<compile_context>
chip_gen: v6e
topology: v6e:2x2x1
jax: 0.10.0
libtpu: 0.0.40
codegen_flags: <defaults>
</compile_context>

<pallas_src>
import functools

import jax
import jax.numpy as jnp
from jax.experimental import pallas as pl
from jax.experimental.pallas import tpu as pltpu


# ---------------------------------------------------------------------------
# Tile-size helpers (respect the (8, 128) block constraints, fall back to the
# full dimension when no legal divisor exists).
# ---------------------------------------------------------------------------
def _row_tile(n, target):
    """Largest multiple-of-8 divisor of n that is <= target, else the full dim."""
    t = min(target, n)
    t -= t % 8
    while t >= 8:
        if n % t == 0:
            return t
        t -= 8
    return n


def _k_tile(n, target):
    """Largest multiple-of-128 divisor of n that is <= target, else the full dim."""
    if n <= target:
        return n
    t = (min(target, n) // 128) * 128
    while t >= 128:
        if n % t == 0:
            return t
        t -= 128
    return n


def _cp(sem):
    # Per-call VMEM footprints are kept well under the default scoped limit
    # (<~8 MiB at the production tile caps), so this is portable to v7x's
    # 64 MiB VMEM; "parallel" on the row axis shards across v7x's 2 TCs.
    return pltpu.CompilerParams(dimension_semantics=sem)


# ---------------------------------------------------------------------------
# Kernels
# ---------------------------------------------------------------------------
def _matmul_bf16_kernel(x_ref, w_ref, o_ref):
    """Hoisted GCN support: o = (x @ w) computed in f32, stored bf16."""
    o_ref[...] = jnp.dot(
        x_ref[...], w_ref[...], preferred_element_type=jnp.float32
    ).astype(o_ref.dtype)


def _support_split_kernel(x_ref, wcat_ref, o_ref):
    """One lane-dense x @ W_cat (width 4*D), split per view into a (4, tm, D) block."""
    s = jnp.dot(x_ref[...], wcat_ref[...], preferred_element_type=jnp.float32)
    n_views, _, d = o_ref.shape
    for v in range(n_views):
        o_ref[v] = s[:, v * d:(v + 1) * d].astype(o_ref.dtype)


def _multiview_gcn_kernel(sup_ref, b_ref, a0_ref, a1_ref, a2_ref, a3_ref,
                          o_ref, acc_ref):
    """Four single-layer GCNs (different adjacencies, shared x) in one pass.

    grid = (row tiles, adj-K tiles); acc_ref is a (4, tm, D) f32 accumulator.
    out[v, rows] = relu(adj_v[rows, :] @ support[v] + b[v]).
    """
    k = pl.program_id(1)

    @pl.when(k == 0)
    def _init():
        acc_ref[...] = jnp.zeros_like(acc_ref)

    adjs = (a0_ref, a1_ref, a2_ref, a3_ref)
    for v in range(4):
        acc_ref[v] += jnp.dot(adjs[v][...], sup_ref[v],
                              preferred_element_type=jnp.float32)

    @pl.when(k == pl.num_programs(1) - 1)
    def _finish():
        o_ref[...] = jnp.maximum(acc_ref[...] + b_ref[...], 0.0)


def _gcn_layer2_kernel(adj_ref, sup_ref, b_ref, o_ref, acc_ref):
    """Second GraphConvolution of MGCN1 (no ReLU): out = adj @ support + b."""
    k = pl.program_id(1)

    @pl.when(k == 0)
    def _init():
        acc_ref[...] = jnp.zeros_like(acc_ref)

    acc_ref[...] += jnp.dot(adj_ref[...], sup_ref[...],
                            preferred_element_type=jnp.float32)

    @pl.when(k == pl.num_programs(1) - 1)
    def _finish():
        o_ref[...] = acc_ref[...] + b_ref[...]


def _item_fused_kernel(special_ref, sup5_ref, b5_ref, f_ref, wm_ref, bm_ref,
                       w1_ref, b1_ref, w2_ref, b2_ref, o_ref, acc_ref):
    """Fused MLP(mixed features) + MGCN5 + FeatureFusionGate over item row tiles.

    grid = (item row tiles, special-K tiles).
    """
    k = pl.program_id(1)

    @pl.when(k == 0)
    def _init():
        acc_ref[...] = jnp.zeros_like(acc_ref)

    # MGCN5 adjacency reduction: special @ (features1 @ W5)
    acc_ref[...] += jnp.dot(special_ref[...], sup5_ref[...],
                            preferred_element_type=jnp.float32)

    @pl.when(k == pl.num_programs(1) - 1)
    def _finish():
        bundle_it = jnp.maximum(acc_ref[...] + b5_ref[...], 0.0)   # relu (GCN_one)

        # MLP on the softmax(concat)-mixed features; alpha is folded into the
        # weights outside:  (a0*f0 + a1*f1) @ W == f0 @ (a0*W) + f1 @ (a1*W).
        item_f = (jnp.dot(f_ref[0], wm_ref[0], preferred_element_type=jnp.float32)
                  + jnp.dot(f_ref[1], wm_ref[1], preferred_element_type=jnp.float32)
                  + bm_ref[...])

        # FeatureFusionGate(bundle_like=item_f, item_like=bundle_it):
        # cat([bundle_like, item_like]) @ W == bundle_like @ W[:d] + item_like @ W[d:]
        d = item_f.shape[1]
        pre1 = (jnp.dot(item_f, w1_ref[:d, :], preferred_element_type=jnp.float32)
                + jnp.dot(bundle_it, w1_ref[d:, :], preferred_element_type=jnp.float32)
                + b1_ref[...])
        pre2 = (jnp.dot(item_f, w2_ref[:d, :], preferred_element_type=jnp.float32)
                + jnp.dot(bundle_it, w2_ref[d:, :], preferred_element_type=jnp.float32)
                + b2_ref[...])
        # ELU(alpha=1), overflow-safe: exp is only evaluated on min(x, 0).
        fusion = jnp.where(pre1 > 0, pre1, jnp.exp(jnp.minimum(pre1, 0.0)) - 1.0)
        gate = pl.reciprocal(1.0 + jnp.exp(-pre2), approx=True)      # sigmoid
        o_ref[...] = gate * fusion + (1.0 - gate) * item_f


def _attention_kernel(e1_ref, ebuf_ref, w1_ref, b1_ref, w2_ref, o_ref):
    """Row-tiled attention over 4 views (view 0 = emb1, views 1..3 in ebuf)."""
    tn = e1_ref.shape[0]
    views = [e1_ref[...], ebuf_ref[1], ebuf_ref[2], ebuf_ref[3]]

    # Batch all 4 views into a single MXU matmul (lane/MXU-dense vs per-view loops).
    z = jnp.concatenate(views, axis=0)                               # (4*tn, D)
    h = jnp.tanh(jnp.dot(z, w1_ref[...], preferred_element_type=jnp.float32)
                 + b1_ref[...])                                      # (4*tn, H)
    s = jnp.dot(h, w2_ref[...], preferred_element_type=jnp.float32)  # (4*tn, 1)

    sc = [s[v * tn:(v + 1) * tn, :] for v in range(4)]
    m = jnp.maximum(jnp.maximum(sc[0], sc[1]), jnp.maximum(sc[2], sc[3]))
    ex = [jnp.exp(sv - m) for sv in sc]
    inv = pl.reciprocal(ex[0] + ex[1] + ex[2] + ex[3], approx=True)
    rep = (ex[0] * views[0] + ex[1] * views[1]
           + ex[2] * views[2] + ex[3] * views[3]) * inv
    o_ref[...] = rep


# ---------------------------------------------------------------------------
# pallas_call wrappers
# ---------------------------------------------------------------------------
def rowwise_matmul_bf16(x, w, *, row_tile=256, view=None):
    """Row-tiled x @ w stored in bf16 (a hoisted GCN "support" matrix).

    If `view` is not None, x is a (V, N, K) array and only x[view] is used
    (reads the slice directly via BlockSpec, no HBM copy of the view).
    """
    if view is None:
        n, kin = x.shape
        tm = _row_tile(n, row_tile)
        x_spec = pl.BlockSpec((tm, kin), lambda i: (i, 0))
    else:
        _, n, kin = x.shape
        tm = _row_tile(n, row_tile)
        x_spec = pl.BlockSpec((None, tm, kin), lambda i: (view, i, 0))
    kout = w.shape[1]
    return pl.pallas_call(
        _matmul_bf16_kernel,
        out_shape=jax.ShapeDtypeStruct((n, kout), jnp.bfloat16),
        grid=(n // tm,),
        in_specs=[x_spec, pl.BlockSpec((kin, kout), lambda i: (0, 0))],
        out_specs=pl.BlockSpec((tm, kout), lambda i: (i, 0)),
        compiler_params=_cp(("parallel",)),
    )(x, w)


def gcn_support_4views(x, w_cat, dim_latent, *, row_tile=256):
    """support[v] = x @ W_v for 4 views, computed as one 4*D-wide matmul."""
    n, kin = x.shape
    tm = _row_tile(n, row_tile)
    return pl.pallas_call(
        _support_split_kernel,
        out_shape=jax.ShapeDtypeStruct((4, n, dim_latent), jnp.bfloat16),
        grid=(n // tm,),
        in_specs=[pl.BlockSpec((tm, kin), lambda i: (i, 0)),
                  pl.BlockSpec((kin, 4 * dim_latent), lambda i: (0, 0))],
        out_specs=pl.BlockSpec((4, tm, dim_latent), lambda i: (0, i, 0)),
        compiler_params=_cp(("parallel",)),
    )(x, w_cat)


def multiview_gcn(sup4, b4, adjs_bf16, *, row_tile=256, k_tile=1024):
    """Writes the shared (4, N, D) embedding buffer: relu(adj_v @ support_v + b_v)."""
    n = adjs_bf16[0].shape[0]
    d = sup4.shape[2]
    tm = _row_tile(n, row_tile)
    tk = _k_tile(n, k_tile)
    adj_spec = pl.BlockSpec((tm, tk), lambda i, k: (i, k))
    return pl.pallas_call(
        _multiview_gcn_kernel,
        out_shape=jax.ShapeDtypeStruct((4, n, d), jnp.float32),
        grid=(n // tm, n // tk),
        in_specs=[pl.BlockSpec((4, tk, d), lambda i, k: (0, k, 0)),   # support
                  pl.BlockSpec((4, 1, d), lambda i, k: (0, 0, 0)),    # biases
                  adj_spec, adj_spec, adj_spec, adj_spec],            # 4 adjacencies
        out_specs=pl.BlockSpec((4, tm, d), lambda i, k: (0, i, 0)),
        scratch_shapes=[pltpu.VMEM((4, tm, d), jnp.float32)],
        compiler_params=_cp(("parallel", "arbitrary")),
    )(sup4, b4, *adjs_bf16)


def gcn_layer2(adj_bf16, sup_bf16, b, *, row_tile=256, k_tile=1024):
    n = adj_bf16.shape[0]
    d = sup_bf16.shape[1]
    tm = _row_tile(n, row_tile)
    tk = _k_tile(n, k_tile)
    return pl.pallas_call(
        _gcn_layer2_kernel,
        out_shape=jax.ShapeDtypeStruct((n, d), jnp.float32),
        grid=(n // tm, n // tk),
        in_specs=[pl.BlockSpec((tm, tk), lambda i, k: (i, k)),
                  pl.BlockSpec((tk, d), lambda i, k: (k, 0)),
                  pl.BlockSpec((1, d), lambda i, k: (0, 0))],
        out_specs=pl.BlockSpec((tm, d), lambda i, k: (i, 0)),
        scratch_shapes=[pltpu.VMEM((tm, d), jnp.float32)],
        compiler_params=_cp(("parallel", "arbitrary")),
    )(adj_bf16, sup_bf16, b)


def item_pipeline(features_t, special_bf16, sup5_bf16, b5, wm_scaled, bm,
                  w1, b1, w2, b2, *, row_tile=256, k_tile=1024):
    m = special_bf16.shape[0]
    d = sup5_bf16.shape[1]
    dim_ori = features_t.shape[2]
    tm = _row_tile(m, row_tile)
    tk = _k_tile(m, k_tile)
    return pl.pallas_call(
        _item_fused_kernel,
        out_shape=jax.ShapeDtypeStruct((m, d), jnp.float32),
        grid=(m // tm, m // tk),
        in_specs=[pl.BlockSpec((tm, tk), lambda i, k: (i, k)),            # special
                  pl.BlockSpec((tk, d), lambda i, k: (k, 0)),             # sup5
                  pl.BlockSpec((1, d), lambda i, k: (0, 0)),              # b5
                  pl.BlockSpec((2, tm, dim_ori), lambda i, k: (0, i, 0)),  # features
                  pl.BlockSpec((2, dim_ori, d), lambda i, k: (0, 0, 0)),   # alpha*W_mlp
                  pl.BlockSpec((1, d), lambda i, k: (0, 0)),              # b_mlp
                  pl.BlockSpec((2 * d, d), lambda i, k: (0, 0)),          # ffg w1
                  pl.BlockSpec((1, d), lambda i, k: (0, 0)),              # ffg b1
                  pl.BlockSpec((2 * d, d), lambda i, k: (0, 0)),          # ffg w2
                  pl.BlockSpec((1, d), lambda i, k: (0, 0))],             # ffg b2
        out_specs=pl.BlockSpec((tm, d), lambda i, k: (i, 0)),
        scratch_shapes=[pltpu.VMEM((tm, d), jnp.float32)],
        compiler_params=_cp(("parallel", "arbitrary")),
    )(special_bf16, sup5_bf16, b5, features_t, wm_scaled, bm, w1, b1, w2, b2)


def attention_fused(emb1, emb_buf, w1, b1, w2_col, *, row_tile=256):
    n, d = emb1.shape
    h = w1.shape[1]
    tn = _row_tile(n, row_tile)
    return pl.pallas_call(
        _attention_kernel,
        out_shape=jax.ShapeDtypeStruct((n, d), jnp.float32),
        grid=(n // tn,),
        in_specs=[pl.BlockSpec((tn, d), lambda i: (i, 0)),
                  pl.BlockSpec((4, tn, d), lambda i: (0, i, 0)),
                  pl.BlockSpec((d, h), lambda i: (0, 0)),
                  pl.BlockSpec((1, h), lambda i: (0, 0)),
                  pl.BlockSpec((h, 1), lambda i: (0, 0))],
        out_specs=pl.BlockSpec((tn, d), lambda i: (i, 0)),
        compiler_params=_cp(("parallel",)),
    )(emb1, emb_buf, w1, b1, w2_col)


# ---------------------------------------------------------------------------
# HGLR forward (glue in plain JAX, heavy compute in Pallas kernels)
# ---------------------------------------------------------------------------
def hglr_forward(params, features, features1, fadj, sadj1, sadj2, sadj3, special,
                 *, row_tile=256, k_tile=1024):
    dim_latent = params["gc1a_w"].shape[1]

    # softmax over the learnable (2,1) "concat" mixing weights; fold into the
    # MLP weight: (a0*f0 + a1*f1) @ W == f0 @ (a0*W) + f1 @ (a1*W)  (exact).
    alpha = jax.nn.softmax(params["concat"][:, 0], axis=0)               # (2,)
    wm_scaled = alpha[:, None, None] * params["mlp_w"][None, :, :]       # (2, dim_ori, dim_feat)
    features_t = jnp.transpose(features, (2, 0, 1))                      # (2, num_item, dim_ori)

    # bf16 copies of the (row-normalized) adjacencies — the dominant HBM stream.
    # For repeated inference these casts would be hoisted out of the forward.
    special_bf = special.astype(jnp.bfloat16)
    adjs_bf = [a.astype(jnp.bfloat16) for a in (fadj, sadj1, sadj2, sadj3)]

    # ---- item branch: MLP + MGCN5 + FeatureFusionGate, fused over item rows ----
    sup5 = rowwise_matmul_bf16(features1, params["gc5_w"], row_tile=row_tile)
    item_final = item_pipeline(
        features_t, special_bf, sup5, params["gc5_b"], wm_scaled, params["mlp_b"],
        params["ffg_w1"], params["ffg_b1"], params["ffg_w2"], params["ffg_b2"],
        row_tile=row_tile, k_tile=k_tile)

    # x = cat(preference, item_final)
    x = jnp.concatenate([params["preference"], item_final], axis=0)      # (N, dim_feat)

    # ---- first GCN layer of all 4 views: one lane-dense x @ W_cat, then one
    # tiled pallas_call streaming all four adjacencies into a shared (4,N,D) buf
    w_cat = jnp.concatenate(
        [params["gc1a_w"], params["gc2_w"], params["gc3_w"], params["gc4_w"]], axis=1)
    b4 = jnp.stack(
        [params["gc1a_b"], params["gc2_b"], params["gc3_b"], params["gc4_b"]], axis=0)
    sup4 = gcn_support_4views(x, w_cat, dim_latent, row_tile=row_tile)
    emb_buf = multiview_gcn(sup4, b4, adjs_bf, row_tile=row_tile, k_tile=k_tile)
    # emb_buf[0] = relu(fadj @ x W1a + b1a) = h1 (MGCN1 hidden); emb_buf[1..3] = emb2..emb4

    # ---- second GraphConvolution of MGCN1: emb1 = fadj @ (h1 @ W1b) + b1b ----
    sup2 = rowwise_matmul_bf16(emb_buf, params["gc1b_w"], row_tile=row_tile, view=0)
    emb1 = gcn_layer2(adjs_bf[0], sup2, params["gc1b_b"],
                      row_tile=row_tile, k_tile=k_tile)

    # ---- attention across the 4 views (row-tiled; no jnp.stack of embeddings) ----
    rep = attention_fused(emb1, emb_buf, params["att_w1"], params["att_b1"],
                          params["att_w2"], row_tile=row_tile)
    return rep


# ---------------------------------------------------------------------------
# Deterministic parameter initialization (shapes from HGLR.__init__)
# ---------------------------------------------------------------------------
def init_params(key, num_user, dim_ori, dim_feat, dim_latent, hidden_size):
    # The model structurally requires dim_feat == dim_latent (FeatureFusionGate
    # residual and x = cat(preference, item_final) feeding dim_feat GCNs).
    assert dim_feat == dim_latent
    ks = iter(jax.random.split(key, 32))

    def linear(fan_in, fan_out):
        bound = 1.0 / jnp.sqrt(jnp.float32(fan_in))
        w = jax.random.uniform(next(ks), (fan_in, fan_out), jnp.float32, -bound, bound)
        b = jax.random.uniform(next(ks), (1, fan_out), jnp.float32, -bound, bound)
        return w, b

    params = {}
    params["concat"] = jnp.ones((2, 1), jnp.float32)
    # xavier_normal_ preference
    std = jnp.sqrt(2.0 / (num_user + dim_feat))
    params["preference"] = std * jax.random.normal(next(ks), (num_user, dim_feat), jnp.float32)

    params["mlp_w"], params["mlp_b"] = linear(dim_ori, dim_feat)

    params["gc1a_w"], params["gc1a_b"] = linear(dim_feat, dim_latent)    # MGCN1.gc1
    params["gc1b_w"], params["gc1b_b"] = linear(dim_latent, dim_latent)  # MGCN1.gc2
    params["gc2_w"], params["gc2_b"] = linear(dim_feat, dim_latent)      # MGCN2
    params["gc3_w"], params["gc3_b"] = linear(dim_feat, dim_latent)      # MGCN3
    params["gc4_w"], params["gc4_b"] = linear(dim_feat, dim_latent)      # MGCN4
    params["gc5_w"], params["gc5_b"] = linear(dim_feat, dim_latent)      # MGCN5

    params["att_w1"], params["att_b1"] = linear(dim_latent, hidden_size)
    # Linear(hidden_size, 1, bias=False): stored column-major as (hidden_size, 1)
    bound = 1.0 / jnp.sqrt(jnp.float32(hidden_size))
    params["att_w2"] = jax.random.uniform(next(ks), (hidden_size, 1), jnp.float32, -bound, bound)

    params["ffg_w1"], params["ffg_b1"] = linear(dim_latent * 2, dim_latent)
    params["ffg_w2"], params["ffg_b2"] = linear(dim_latent * 2, dim_latent)
    return params


# ---------------------------------------------------------------------------
if __name__ == "__main__":
    key = jax.random.PRNGKey(0)

    # Small synthetic shapes (original hard-codes 195283 items; we use num_item).
    num_user, num_item = 64, 192
    n_nodes = num_user + num_item          # 256
    dim_ori, dim_feat, dim_latent, hidden_size = 16, 32, 32, 16

    ks = jax.random.split(key, 8)
    features = jax.random.normal(ks[0], (num_item, dim_ori, 2), jnp.float32)
    features1 = jax.random.normal(ks[1], (num_item, dim_feat), jnp.float32)

    def make_adj(k, n):
        a = jax.random.uniform(k, (n, n), jnp.float32)
        a = 0.5 * (a + a.T)
        return a / jnp.sum(a, axis=1, keepdims=True)

    fadj = make_adj(ks[2], n_nodes)
    sadj1 = make_adj(ks[3], n_nodes)
    sadj2 = make_adj(ks[4], n_nodes)
    sadj3 = make_adj(ks[5], n_nodes)
    special = make_adj(ks[6], num_item)

    params = init_params(ks[7], num_user, dim_ori, dim_feat, dim_latent, hidden_size)

    # Small demo tiles so both the row-tile and K-reduction grid axes are
    # actually exercised at toy N (production defaults: row_tile=256, k_tile=1024).
    fwd = jax.jit(functools.partial(hglr_forward, params, row_tile=128, k_tile=128))
    out = fwd(features, features1, fadj, sadj1, sadj2, sadj3, special)
    jax.block_until_ready(out)
    assert out.shape == (n_nodes, dim_latent)
    print("KERNEL_OK")
</pallas_src>

<mosaic_0001>
module attributes {stable_mosaic.version = 11 : i64} {
  func.func @_matmul_bf16_kernel(%arg0: i32, %arg1: memref<96x32xf32, #tpu.memory_space<vmem>>, %arg2: memref<32x32xf32, #tpu.memory_space<vmem>>, %arg3: memref<96x32xbf16, #tpu.memory_space<vmem>>) attributes {dimension_semantics = [#tpu.dimension_semantics<parallel>], iteration_bounds = array<i64: 2>, scalar_prefetch = 0 : i64, scratch_operands = 0 : i64, tpu.core_type = #tpu.core_type<tc>, window_params = [{transform_indices = @transform_0, window_bounds = array<i64: 96, 32>}, {pipeline_mode = #tpu.pipeline_mode<synchronous>, transform_indices = @transform_1, window_bounds = array<i64: 32, 32>}, {transform_indices = @transform_2, window_bounds = array<i64: 96, 32>}]} {
    %c0 = arith.constant 0 : index
    %c0_0 = arith.constant 0 : index
    %0 = vector.load %arg1[%c0, %c0_0] : memref<96x32xf32, #tpu.memory_space<vmem>>, vector<96x32xf32>
    %c0_1 = arith.constant 0 : index
    %c0_2 = arith.constant 0 : index
    %1 = vector.load %arg2[%c0_1, %c0_2] : memref<32x32xf32, #tpu.memory_space<vmem>>, vector<32x32xf32>
    %cst = arith.constant dense<0.000000e+00> : vector<96x32xf32>
    %2 = tpu.matmul %0, %1, %cst {dimension_numbers = #tpu.dot_dimension_numbers<[1], [0], [0], [1], [0, 0, 1, 1], [], []>} : vector<96x32xf32>, vector<32x32xf32>, vector<96x32xf32> -> vector<96x32xf32>
    %3 = arith.truncf %2 : vector<96x32xf32> to vector<96x32xbf16>
    %c0_3 = arith.constant 0 : index
    %c0_4 = arith.constant 0 : index
    %4 = vector.load %arg3[%c0_3, %c0_4] : memref<96x32xbf16, #tpu.memory_space<vmem>>, vector<96x32xbf16>
    tpu.vector_store %arg3[%c0_3, %c0_4], %3 {strides = array<i32>} : memref<96x32xbf16, #tpu.memory_space<vmem>>, vector<96x32xbf16>,
    return
  }
  func.func @transform_0(%arg0: i32) -> (i32, i32) {
    %c0_i32 = arith.constant 0 : i32
    %c0_i32_0 = arith.constant 0 : i32
    return %arg0, %c0_i32 : i32, i32
  }
  func.func @transform_1(%arg0: i32) -> (i32, i32) {
    %c0_i32 = arith.constant 0 : i32
    %c0_i32_0 = arith.constant 0 : i32
    %c0_i32_1 = arith.constant 0 : i32
    return %c0_i32, %c0_i32_0 : i32, i32
  }
  func.func @transform_2(%arg0: i32) -> (i32, i32) {
    %c0_i32 = arith.constant 0 : i32
    %c0_i32_0 = arith.constant 0 : i32
    return %arg0, %c0_i32 : i32, i32
  }
}

module attributes {stable_mosaic.version = 11 : i64} {
  func.func @_support_split_kernel(%arg0: i32, %arg1: memref<128x32xf32, #tpu.memory_space<vmem>>, %arg2: memref<32x128xf32, #tpu.memory_space<vmem>>, %arg3: memref<4x128x32xbf16, #tpu.memory_space<vmem>>) attributes {dimension_semantics = [#tpu.dimension_semantics<parallel>], iteration_bounds = array<i64: 2>, scalar_prefetch = 0 : i64, scratch_operands = 0 : i64, tpu.core_type = #tpu.core_type<tc>, window_params = [{transform_indices = @transform_0, window_bounds = array<i64: 128, 32>}, {pipeline_mode = #tpu.pipeline_mode<synchronous>, transform_indices = @transform_1, window_bounds = array<i64: 32, 128>}, {transform_indices = @transform_2, window_bounds = array<i64: 4, 128, 32>}]} {
    %c0 = arith.constant 0 : index
    %c0_0 = arith.constant 0 : index
    %0 = vector.load %arg1[%c0, %c0_0] : memref<128x32xf32, #tpu.memory_space<vmem>>, vector<128x32xf32>
    %c0_1 = arith.constant 0 : index
    %c0_2 = arith.constant 0 : index
    %1 = vector.load %arg2[%c0_1, %c0_2] : memref<32x128xf32, #tpu.memory_space<vmem>>, vector<32x128xf32>
    %cst = arith.constant dense<0.000000e+00> : vector<128x128xf32>
    %2 = tpu.matmul %0, %1, %cst {dimension_numbers = #tpu.dot_dimension_numbers<[1], [0], [0], [1], [0, 0, 1, 1], [], []>} : vector<128x32xf32>, vector<32x128xf32>, vector<128x128xf32> -> vector<128x128xf32>
    %3 = vector.extract_strided_slice %2 {offsets = [0, 0], sizes = [128, 32], strides = [1, 1]} : vector<128x128xf32> to vector<128x32xf32>
    %4 = arith.truncf %3 : vector<128x32xf32> to vector<128x32xbf16>
    %c0_3 = arith.constant 0 : index
    %c0_4 = arith.constant 0 : index
    %c0_5 = arith.constant 0 : index
    %5 = vector.load %arg3[%c0_3, %c0_4, %c0_5] : memref<4x128x32xbf16, #tpu.memory_space<vmem>>, vector<1x128x32xbf16>
    %6 = vector.shape_cast %5 : vector<1x128x32xbf16> to vector<128x32xbf16>
    %7 = vector.shape_cast %4 : vector<128x32xbf16> to vector<1x128x32xbf16>
    tpu.vector_store %arg3[%c0_3, %c0_4, %c0_5], %7 {strides = array<i32>} : memref<4x128x32xbf16, #tpu.memory_space<vmem>>, vector<1x128x32xbf16>,
    %8 = vector.extract_strided_slice %2 {offsets = [0, 32], sizes = [128, 32], strides = [1, 1]} : vector<128x128xf32> to vector<128x32xf32>
    %9 = arith.truncf %8 : vector<128x32xf32> to vector<128x32xbf16>
    %c1 = arith.constant 1 : index
    %c0_6 = arith.constant 0 : index
    %c0_7 = arith.constant 0 : index
    %10 = vector.load %arg3[%c1, %c0_6, %c0_7] : memref<4x128x32xbf16, #tpu.memory_space<vmem>>, vector<1x128x32xbf16>
    %11 = vector.shape_cast %10 : vector<1x128x32xbf16> to vector<128x32xbf16>
    %12 = vector.shape_cast %9 : vector<128x32xbf16> to vector<1x128x32xbf16>
    tpu.vector_store %arg3[%c1, %c0_6, %c0_7], %12 {strides = array<i32>} : memref<4x128x32xbf16, #tpu.memory_space<vmem>>, vector<1x128x32xbf16>,
    %13 = vector.extract_strided_slice %2 {offsets = [0, 64], sizes = [128, 32], strides = [1, 1]} : vector<128x128xf32> to vector<128x32xf32>
    %14 = arith.truncf %13 : vector<128x32xf32> to vector<128x32xbf16>
    %c2 = arith.constant 2 : index
    %c0_8 = arith.constant 0 : index
    %c0_9 = arith.constant 0 : index
    %15 = vector.load %arg3[%c2, %c0_8, %c0_9] : memref<4x128x32xbf16, #tpu.memory_space<vmem>>, vector<1x128x32xbf16>
    %16 = vector.shape_cast %15 : vector<1x128x32xbf16> to vector<128x32xbf16>
    %17 = vector.shape_cast %14 : vector<128x32xbf16> to vector<1x128x32xbf16>
    tpu.vector_store %arg3[%c2, %c0_8, %c0_9], %17 {strides = array<i32>} : memref<4x128x32xbf16, #tpu.memory_space<vmem>>, vector<1x128x32xbf16>,
    %18 = vector.extract_strided_slice %2 {offsets = [0, 96], sizes = [128, 32], strides = [1, 1]} : vector<128x128xf32> to vector<128x32xf32>
    %19 = arith.truncf %18 : vector<128x32xf32> to vector<128x32xbf16>
    %c3 = arith.constant 3 : index
    %c0_10 = arith.constant 0 : index
    %c0_11 = arith.constant 0 : index
    %20 = vector.load %arg3[%c3, %c0_10, %c0_11] : memref<4x128x32xbf16, #tpu.memory_space<vmem>>, vector<1x128x32xbf16>
    %21 = vector.shape_cast %20 : vector<1x128x32xbf16> to vector<128x32xbf16>
    %22 = vector.shape_cast %19 : vector<128x32xbf16> to vector<1x128x32xbf16>
    tpu.vector_store %arg3[%c3, %c0_10, %c0_11], %22 {strides = array<i32>} : memref<4x128x32xbf16, #tpu.memory_space<vmem>>, vector<1x128x32xbf16>,
    return
  }
  func.func @transform_0(%arg0: i32) -> (i32, i32) {
    %c0_i32 = arith.constant 0 : i32
    %c0_i32_0 = arith.constant 0 : i32
    return %arg0, %c0_i32 : i32, i32
  }
  func.func @transform_1(%arg0: i32) -> (i32, i32) {
    %c0_i32 = arith.constant 0 : i32
    %c0_i32_0 = arith.constant 0 : i32
    %c0_i32_1 = arith.constant 0 : i32
    return %c0_i32, %c0_i32_0 : i32, i32
  }
  func.func @transform_2(%arg0: i32) -> (i32, i32, i32) {
    %c0_i32 = arith.constant 0 : i32
    %c0_i32_0 = arith.constant 0 : i32
    %c0_i32_1 = arith.constant 0 : i32
    return %c0_i32, %arg0, %c0_i32_0 : i32, i32, i32
  }
}

module attributes {stable_mosaic.version = 11 : i64} {
  func.func @_item_fused_kernel(%arg0: i32, %arg1: i32, %arg2: memref<96x192xbf16, #tpu.memory_space<vmem>>, %arg3: memref<192x32xbf16, #tpu.memory_space<vmem>>, %arg4: memref<1x32xf32, #tpu.memory_space<vmem>>, %arg5: memref<2x96x16xf32, #tpu.memory_space<vmem>>, %arg6: memref<2x16x32xf32, #tpu.memory_space<vmem>>, %arg7: memref<1x32xf32, #tpu.memory_space<vmem>>, %arg8: memref<64x32xf32, #tpu.memory_space<vmem>>, %arg9: memref<1x32xf32, #tpu.memory_space<vmem>>, %arg10: memref<64x32xf32, #tpu.memory_space<vmem>>, %arg11: memref<1x32xf32, #tpu.memory_space<vmem>>, %arg12: memref<96x32xf32, #tpu.memory_space<vmem>>, %arg13: memref<96x32xf32, #tpu.memory_space<vmem>>) attributes {dimension_semantics = [#tpu.dimension_semantics<parallel>, #tpu.dimension_semantics<arbitrary>], iteration_bounds = array<i64: 2, 1>, scalar_prefetch = 0 : i64, scratch_operands = 1 : i64, tpu.core_type = #tpu.core_type<tc>, window_params = [{transform_indices = @transform_0, window_bounds = array<i64: 96, 192>}, {transform_indices = @transform_1, window_bounds = array<i64: 192, 32>}, {pipeline_mode = #tpu.pipeline_mode<synchronous>, transform_indices = @transform_2, window_bounds = array<i64: 1, 32>}, {transform_indices = @transform_3, window_bounds = array<i64: 2, 96, 16>}, {pipeline_mode = #tpu.pipeline_mode<synchronous>, transform_indices = @transform_4, window_bounds = array<i64: 2, 16, 32>}, {pipeline_mode = #tpu.pipeline_mode<synchronous>, transform_indices = @transform_5, window_bounds = array<i64: 1, 32>}, {pipeline_mode = #tpu.pipeline_mode<synchronous>, transform_indices = @transform_6, window_bounds = array<i64: 64, 32>}, {pipeline_mode = #tpu.pipeline_mode<synchronous>, transform_indices = @transform_7, window_bounds = array<i64: 1, 32>}, {pipeline_mode = #tpu.pipeline_mode<synchronous>, transform_indices = @transform_8, window_bounds = array<i64: 64, 32>}, {pipeline_mode = #tpu.pipeline_mode<synchronous>, transform_indices = @transform_9, window_bounds = array<i64: 1, 32>}, {transform_indices = @transform_10, window_bounds = array<i64: 96, 32>}]} {
    %c0_i32 = arith.constant 0 : i32
    %0 = arith.cmpi eq, %arg1, %c0_i32 : i32
    %1 = arith.extui %0 : i1 to i32
    %c0_i32_0 = arith.constant 0 : i32
    %2 = arith.cmpi ne, %1, %c0_i32_0 : i32
    scf.if %2 {
      %cst_10 = arith.constant 0.000000e+00 : f32
      %12 = vector.broadcast %cst_10 : f32 to vector<96x32xf32>
      %c0_11 = arith.constant 0 : index
      %c0_12 = arith.constant 0 : index
      %13 = vector.load %arg13[%c0_11, %c0_12] : memref<96x32xf32, #tpu.memory_space<vmem>>, vector<96x32xf32>
      tpu.vector_store %arg13[%c0_11, %c0_12], %12 {strides = array<i32>} : memref<96x32xf32, #tpu.memory_space<vmem>>, vector<96x32xf32>,
    } else {
    }
    %c0 = arith.constant 0 : index
    %c0_1 = arith.constant 0 : index
    %3 = vector.load %arg13[%c0, %c0_1] : memref<96x32xf32, #tpu.memory_space<vmem>>, vector<96x32xf32>
    %c0_2 = arith.constant 0 : index
    %c0_3 = arith.constant 0 : index
    %4 = vector.load %arg2[%c0_2, %c0_3] : memref<96x192xbf16, #tpu.memory_space<vmem>>, vector<96x192xbf16>
    %c0_4 = arith.constant 0 : index
    %c0_5 = arith.constant 0 : index
    %5 = vector.load %arg3[%c0_4, %c0_5] : memref<192x32xbf16, #tpu.memory_space<vmem>>, vector<192x32xbf16>
    %cst = arith.constant dense<0.000000e+00> : vector<96x32xf32>
    %6 = tpu.matmul %4, %5, %cst {dimension_numbers = #tpu.dot_dimension_numbers<[1], [0], [0], [1], [0, 0, 1, 1], [], []>} : vector<96x192xbf16>, vector<192x32xbf16>, vector<96x32xf32> -> vector<96x32xf32>
    %7 = arith.addf %3, %6 : vector<96x32xf32>
    %c0_6 = arith.constant 0 : index
    %c0_7 = arith.constant 0 : index
    %8 = vector.load %arg13[%c0_6, %c0_7] : memref<96x32xf32, #tpu.memory_space<vmem>>, vector<96x32xf32>
    tpu.vector_store %arg13[%c0_6, %c0_7], %7 {strides = array<i32>} : memref<96x32xf32, #tpu.memory_space<vmem>>, vector<96x32xf32>,
    %c0_i32_8 = arith.constant 0 : i32
    %9 = arith.cmpi eq, %arg1, %c0_i32_8 : i32
    %10 = arith.extui %9 : i1 to i32
    %c0_i32_9 = arith.constant 0 : i32
    %11 = arith.cmpi ne, %10, %c0_i32_9 : i32
    scf.if %11 {
      %c0_10 = arith.constant 0 : index
      %c0_11 = arith.constant 0 : index
      %12 = vector.load %arg13[%c0_10, %c0_11] : memref<96x32xf32, #tpu.memory_space<vmem>>, vector<96x32xf32>
      %c0_12 = arith.constant 0 : index
      %c0_13 = arith.constant 0 : index
      %13 = vector.load %arg4[%c0_12, %c0_13] : memref<1x32xf32, #tpu.memory_space<vmem>>, vector<1x32xf32>
      %14 = vector.broadcast %13 : vector<1x32xf32> to vector<96x32xf32>
      %15 = arith.addf %12, %14 : vector<96x32xf32>
      %cst_14 = arith.constant 0.000000e+00 : f32
      %16 = vector.broadcast %cst_14 : f32 to vector<96x32xf32>
      %17 = arith.maximumf %15, %16 : vector<96x32xf32>
      %c0_15 = arith.constant 0 : index
      %c0_16 = arith.constant 0 : index
      %c0_17 = arith.constant 0 : index
      %18 = vector.load %arg5[%c0_15, %c0_16, %c0_17] : memref<2x96x16xf32, #tpu.memory_space<vmem>>, vector<1x96x16xf32>
      %19 = vector.shape_cast %18 : vector<1x96x16xf32> to vector<96x16xf32>
      %c0_18 = arith.constant 0 : index
      %c0_19 = arith.constant 0 : index
      %c0_20 = arith.constant 0 : index
      %20 = vector.load %arg6[%c0_18, %c0_19, %c0_20] : memref<2x16x32xf32, #tpu.memory_space<vmem>>, vector<1x16x32xf32>
      %21 = vector.shape_cast %20 : vector<1x16x32xf32> to vector<16x32xf32>
      %cst_21 = arith.constant dense<0.000000e+00> : vector<96x32xf32>
      %22 = tpu.matmul %19, %21, %cst_21 {dimension_numbers = #tpu.dot_dimension_numbers<[1], [0], [0], [1], [0, 0, 1, 1], [], []>} : vector<96x16xf32>, vector<16x32xf32>, vector<96x32xf32> -> vector<96x32xf32>
      %c1 = arith.constant 1 : index
      %c0_22 = arith.constant 0 : index
      %c0_23 = arith.constant 0 : index
      %23 = vector.load %arg5[%c1, %c0_22, %c0_23] : memref<2x96x16xf32, #tpu.memory_space<vmem>>, vector<1x96x16xf32>
      %24 = vector.shape_cast %23 : vector<1x96x16xf32> to vector<96x16xf32>
      %c1_24 = arith.constant 1 : index
      %c0_25 = arith.constant 0 : index
      %c0_26 = arith.constant 0 : index
      %25 = vector.load %arg6[%c1_24, %c0_25, %c0_26] : memref<2x16x32xf32, #tpu.memory_space<vmem>>, vector<1x16x32xf32>
      %26 = vector.shape_cast %25 : vector<1x16x32xf32> to vector<16x32xf32>
      %cst_27 = arith.constant dense<0.000000e+00> : vector<96x32xf32>
      %27 = tpu.matmul %24, %26, %cst_27 {dimension_numbers = #tpu.dot_dimension_numbers<[1], [0], [0], [1], [0, 0, 1, 1], [], []>} : vector<96x16xf32>, vector<16x32xf32>, vector<96x32xf32> -> vector<96x32xf32>
      %28 = arith.addf %22, %27 : vector<96x32xf32>
      %c0_28 = arith.constant 0 : index
      %c0_29 = arith.constant 0 : index
      %29 = vector.load %arg7[%c0_28, %c0_29] : memref<1x32xf32, #tpu.memory_space<vmem>>, vector<1x32xf32>
      %30 = vector.broadcast %29 : vector<1x32xf32> to vector<96x32xf32>
      %31 = arith.addf %28, %30 : vector<96x32xf32>
      %c0_30 = arith.constant 0 : index
      %c0_31 = arith.constant 0 : index
      %32 = vector.load %arg8[%c0_30, %c0_31] : memref<64x32xf32, #tpu.memory_space<vmem>>, vector<32x32xf32>
      %cst_32 = arith.constant dense<0.000000e+00> : vector<96x32xf32>
      %33 = tpu.matmul %31, %32, %cst_32 {dimension_numbers = #tpu.dot_dimension_numbers<[1], [0], [0], [1], [0, 0, 1, 1], [], []>} : vector<96x32xf32>, vector<32x32xf32>, vector<96x32xf32> -> vector<96x32xf32>
      %c32 = arith.constant 32 : index
      %c0_33 = arith.constant 0 : index
      %34 = vector.load %arg8[%c32, %c0_33] : memref<64x32xf32, #tpu.memory_space<vmem>>, vector<32x32xf32>
      %cst_34 = arith.constant dense<0.000000e+00> : vector<96x32xf32>
      %35 = tpu.matmul %17, %34, %cst_34 {dimension_numbers = #tpu.dot_dimension_numbers<[1], [0], [0], [1], [0, 0, 1, 1], [], []>} : vector<96x32xf32>, vector<32x32xf32>, vector<96x32xf32> -> vector<96x32xf32>
      %36 = arith.addf %33, %35 : vector<96x32xf32>
      %c0_35 = arith.constant 0 : index
      %c0_36 = arith.constant 0 : index
      %37 = vector.load %arg9[%c0_35, %c0_36] : memref<1x32xf32, #tpu.memory_space<vmem>>, vector<1x32xf32>
      %38 = vector.broadcast %37 : vector<1x32xf32> to vector<96x32xf32>
      %39 = arith.addf %36, %38 : vector<96x32xf32>
      %c0_37 = arith.constant 0 : index
      %c0_38 = arith.constant 0 : index
      %40 = vector.load %arg10[%c0_37, %c0_38] : memref<64x32xf32, #tpu.memory_space<vmem>>, vector<32x32xf32>
      %cst_39 = arith.constant dense<0.000000e+00> : vector<96x32xf32>
      %41 = tpu.matmul %31, %40, %cst_39 {dimension_numbers = #tpu.dot_dimension_numbers<[1], [0], [0], [1], [0, 0, 1, 1], [], []>} : vector<96x32xf32>, vector<32x32xf32>, vector<96x32xf32> -> vector<96x32xf32>
      %c32_40 = arith.constant 32 : index
      %c0_41 = arith.constant 0 : index
      %42 = vector.load %arg10[%c32_40, %c0_41] : memref<64x32xf32, #tpu.memory_space<vmem>>, vector<32x32xf32>
      %cst_42 = arith.constant dense<0.000000e+00> : vector<96x32xf32>
      %43 = tpu.matmul %17, %42, %cst_42 {dimension_numbers = #tpu.dot_dimension_numbers<[1], [0], [0], [1], [0, 0, 1, 1], [], []>} : vector<96x32xf32>, vector<32x32xf32>, vector<96x32xf32> -> vector<96x32xf32>
      %44 = arith.addf %41, %43 : vector<96x32xf32>
      %c0_43 = arith.constant 0 : index
      %c0_44 = arith.constant 0 : index
      %45 = vector.load %arg11[%c0_43, %c0_44] : memref<1x32xf32, #tpu.memory_space<vmem>>, vector<1x32xf32>
      %46 = vector.broadcast %45 : vector<1x32xf32> to vector<96x32xf32>
      %47 = arith.addf %44, %46 : vector<96x32xf32>
      %cst_45 = arith.constant 0.000000e+00 : f32
      %48 = vector.broadcast %cst_45 : f32 to vector<96x32xf32>
      %49 = arith.cmpf ogt, %39, %48 : vector<96x32xf32>
      %cst_46 = arith.constant 0.000000e+00 : f32
      %50 = vector.broadcast %cst_46 : f32 to vector<96x32xf32>
      %51 = arith.minimumf %39, %50 : vector<96x32xf32>
      %52 = math.exp %51 : vector<96x32xf32>
      %cst_47 = arith.constant 1.000000e+00 : f32
      %53 = vector.broadcast %cst_47 : f32 to vector<96x32xf32>
      %54 = arith.subf %52, %53 : vector<96x32xf32>
      %55 = arith.select %49, %39, %54 : vector<96x32xi1>, vector<96x32xf32>
      %cst_48 = arith.constant 0.000000e+00 : f32
      %56 = vector.broadcast %cst_48 : f32 to vector<96x32xf32>
      %57 = arith.subf %56, %47 : vector<96x32xf32>
      %58 = math.exp %57 : vector<96x32xf32>
      %cst_49 = arith.constant 1.000000e+00 : f32
      %59 = vector.broadcast %cst_49 : f32 to vector<96x32xf32>
      %60 = arith.addf %59, %58 : vector<96x32xf32>
      %61 = tpu.reciprocal %60 {approx = true} : vector<96x32xf32> -> vector<96x32xf32>
      %62 = arith.mulf %61, %55 : vector<96x32xf32>
      %cst_50 = arith.constant 1.000000e+00 : f32
      %63 = vector.broadcast %cst_50 : f32 to vector<96x32xf32>
      %64 = arith.subf %63, %61 : vector<96x32xf32>
      %65 = arith.mulf %64, %31 : vector<96x32xf32>
      %66 = arith.addf %62, %65 : vector<96x32xf32>
      %c0_51 = arith.constant 0 : index
      %c0_52 = arith.constant 0 : index
      %67 = vector.load %arg12[%c0_51, %c0_52] : memref<96x32xf32, #tpu.memory_space<vmem>>, vector<96x32xf32>
      tpu.vector_store %arg12[%c0_51, %c0_52], %66 {strides = array<i32>} : memref<96x32xf32, #tpu.memory_space<vmem>>, vector<96x32xf32>,
    } else {
    }
    return
  }
  func.func @transform_0(%arg0: i32, %arg1: i32) -> (i32, i32) {
    %c0_i32 = arith.constant 0 : i32
    return %arg0, %arg1 : i32, i32
  }
  func.func @transform_1(%arg0: i32, %arg1: i32) -> (i32, i32) {
    %c0_i32 = arith.constant 0 : i32
    %c0_i32_0 = arith.constant 0 : i32
    return %arg1, %c0_i32 : i32, i32
  }
  func.func @transform_2(%arg0: i32, %arg1: i32) -> (i32, i32) {
    %c0_i32 = arith.constant 0 : i32
    %c0_i32_0 = arith.constant 0 : i32
    %c0_i32_1 = arith.constant 0 : i32
    return %c0_i32, %c0_i32_0 : i32, i32
  }
  func.func @transform_3(%arg0: i32, %arg1: i32) -> (i32, i32, i32) {
    %c0_i32 = arith.constant 0 : i32
    %c0_i32_0 = arith.constant 0 : i32
    %c0_i32_1 = arith.constant 0 : i32
    return %c0_i32, %arg0, %c0_i32_0 : i32, i32, i32
  }
  func.func @transform_4(%arg0: i32, %arg1: i32) -> (i32, i32, i32) {
    %c0_i32 = arith.constant 0 : i32
    %c0_i32_0 = arith.constant 0 : i32
    %c0_i32_1 = arith.constant 0 : i32
    %c0_i32_2 = arith.constant 0 : i32
    return %c0_i32, %c0_i32_0, %c0_i32_1 : i32, i32, i32
  }
  func.func @transform_5(%arg0: i32, %arg1: i32) -> (i32, i32) {
    %c0_i32 = arith.constant 0 : i32
    %c0_i32_0 = arith.constant 0 : i32
    %c0_i32_1 = arith.constant 0 : i32
    return %c0_i32, %c0_i32_0 : i32, i32
  }
  func.func @transform_6(%arg0: i32, %arg1: i32) -> (i32, i32) {
    %c0_i32 = arith.constant 0 : i32
    %c0_i32_0 = arith.constant 0 : i32
    %c0_i32_1 = arith.constant 0 : i32
    return %c0_i32, %c0_i32_0 : i32, i32
  }
  func.func @transform_7(%arg0: i32, %arg1: i32) -> (i32, i32) {
    %c0_i32 = arith.constant 0 : i32
    %c0_i32_0 = arith.constant 0 : i32
    %c0_i32_1 = arith.constant 0 : i32
    return %c0_i32, %c0_i32_0 : i32, i32
  }
  func.func @transform_8(%arg0: i32, %arg1: i32) -> (i32, i32) {
    %c0_i32 = arith.constant 0 : i32
    %c0_i32_0 = arith.constant 0 : i32
    %c0_i32_1 = arith.constant 0 : i32
    return %c0_i32, %c0_i32_0 : i32, i32
  }
  func.func @transform_9(%arg0: i32, %arg1: i32) -> (i32, i32) {
    %c0_i32 = arith.constant 0 : i32
    %c0_i32_0 = arith.constant 0 : i32
    %c0_i32_1 = arith.constant 0 : i32
    return %c0_i32, %c0_i32_0 : i32, i32
  }
  func.func @transform_10(%arg0: i32, %arg1: i32) -> (i32, i32) {
    %c0_i32 = arith.constant 0 : i32
    %c0_i32_0 = arith.constant 0 : i32
    return %arg0, %c0_i32 : i32, i32
  }
}

module attributes {stable_mosaic.version = 11 : i64} {
  func.func @_multiview_gcn_kernel(%arg0: i32, %arg1: i32, %arg2: memref<4x128x32xbf16, #tpu.memory_space<vmem>>, %arg3: memref<4x1x32xf32, #tpu.memory_space<vmem>>, %arg4: memref<128x128xbf16, #tpu.memory_space<vmem>>, %arg5: memref<128x128xbf16, #tpu.memory_space<vmem>>, %arg6: memref<128x128xbf16, #tpu.memory_space<vmem>>, %arg7: memref<128x128xbf16, #tpu.memory_space<vmem>>, %arg8: memref<4x128x32xf32, #tpu.memory_space<vmem>>, %arg9: memref<4x128x32xf32, #tpu.memory_space<vmem>>) attributes {dimension_semantics = [#tpu.dimension_semantics<parallel>, #tpu.dimension_semantics<arbitrary>], iteration_bounds = array<i64: 2, 2>, scalar_prefetch = 0 : i64, scratch_operands = 1 : i64, tpu.core_type = #tpu.core_type<tc>, window_params = [{transform_indices = @transform_0, window_bounds = array<i64: 4, 128, 32>}, {pipeline_mode = #tpu.pipeline_mode<synchronous>, transform_indices = @transform_1, window_bounds = array<i64: 4, 1, 32>}, {transform_indices = @transform_2, window_bounds = array<i64: 128, 128>}, {transform_indices = @transform_3, window_bounds = array<i64: 128, 128>}, {transform_indices = @transform_4, window_bounds = array<i64: 128, 128>}, {transform_indices = @transform_5, window_bounds = array<i64: 128, 128>}, {transform_indices = @transform_6, window_bounds = array<i64: 4, 128, 32>}]} {
    %c0_i32 = arith.constant 0 : i32
    %0 = arith.cmpi eq, %arg1, %c0_i32 : i32
    %1 = arith.extui %0 : i1 to i32
    %c0_i32_0 = arith.constant 0 : i32
    %2 = arith.cmpi ne, %1, %c0_i32_0 : i32
    scf.if %2 {
      %cst_45 = arith.constant 0.000000e+00 : f32
      %46 = vector.broadcast %cst_45 : f32 to vector<4x128x32xf32>
      %c0_46 = arith.constant 0 : index
      %c0_47 = arith.constant 0 : index
      %c0_48 = arith.constant 0 : index
      %47 = vector.load %arg9[%c0_46, %c0_47, %c0_48] : memref<4x128x32xf32, #tpu.memory_space<vmem>>, vector<4x128x32xf32>
      tpu.vector_store %arg9[%c0_46, %c0_47, %c0_48], %46 {strides = array<i32>} : memref<4x128x32xf32, #tpu.memory_space<vmem>>, vector<4x128x32xf32>,
    } else {
    }
    %c0 = arith.constant 0 : index
    %c0_1 = arith.constant 0 : index
    %c0_2 = arith.constant 0 : index
    %3 = vector.load %arg9[%c0, %c0_1, %c0_2] : memref<4x128x32xf32, #tpu.memory_space<vmem>>, vector<1x128x32xf32>
    %4 = vector.shape_cast %3 : vector<1x128x32xf32> to vector<128x32xf32>
    %c0_3 = arith.constant 0 : index
    %c0_4 = arith.constant 0 : index
    %5 = vector.load %arg4[%c0_3, %c0_4] : memref<128x128xbf16, #tpu.memory_space<vmem>>, vector<128x128xbf16>
    %c0_5 = arith.constant 0 : index
    %c0_6 = arith.constant 0 : index
    %c0_7 = arith.constant 0 : index
    %6 = vector.load %arg2[%c0_5, %c0_6, %c0_7] : memref<4x128x32xbf16, #tpu.memory_space<vmem>>, vector<1x128x32xbf16>
    %7 = vector.shape_cast %6 : vector<1x128x32xbf16> to vector<128x32xbf16>
    %cst = arith.constant dense<0.000000e+00> : vector<128x32xf32>
    %8 = tpu.matmul %5, %7, %cst {dimension_numbers = #tpu.dot_dimension_numbers<[1], [0], [0], [1], [0, 0, 1, 1], [], []>} : vector<128x128xbf16>, vector<128x32xbf16>, vector<128x32xf32> -> vector<128x32xf32>
    %9 = arith.addf %4, %8 : vector<128x32xf32>
    %c0_8 = arith.constant 0 : index
    %c0_9 = arith.constant 0 : index
    %c0_10 = arith.constant 0 : index
    %10 = vector.load %arg9[%c0_8, %c0_9, %c0_10] : memref<4x128x32xf32, #tpu.memory_space<vmem>>, vector<1x128x32xf32>
    %11 = vector.shape_cast %10 : vector<1x128x32xf32> to vector<128x32xf32>
    %12 = vector.shape_cast %9 : vector<128x32xf32> to vector<1x128x32xf32>
    tpu.vector_store %arg9[%c0_8, %c0_9, %c0_10], %12 {strides = array<i32>} : memref<4x128x32xf32, #tpu.memory_space<vmem>>, vector<1x128x32xf32>,
    %c1 = arith.constant 1 : index
    %c0_11 = arith.constant 0 : index
    %c0_12 = arith.constant 0 : index
    %13 = vector.load %arg9[%c1, %c0_11, %c0_12] : memref<4x128x32xf32, #tpu.memory_space<vmem>>, vector<1x128x32xf32>
    %14 = vector.shape_cast %13 : vector<1x128x32xf32> to vector<128x32xf32>
    %c0_13 = arith.constant 0 : index
    %c0_14 = arith.constant 0 : index
    %15 = vector.load %arg5[%c0_13, %c0_14] : memref<128x128xbf16, #tpu.memory_space<vmem>>, vector<128x128xbf16>
    %c1_15 = arith.constant 1 : index
    %c0_16 = arith.constant 0 : index
    %c0_17 = arith.constant 0 : index
    %16 = vector.load %arg2[%c1_15, %c0_16, %c0_17] : memref<4x128x32xbf16, #tpu.memory_space<vmem>>, vector<1x128x32xbf16>
    %17 = vector.shape_cast %16 : vector<1x128x32xbf16> to vector<128x32xbf16>
    %cst_18 = arith.constant dense<0.000000e+00> : vector<128x32xf32>
    %18 = tpu.matmul %15, %17, %cst_18 {dimension_numbers = #tpu.dot_dimension_numbers<[1], [0], [0], [1], [0, 0, 1, 1], [], []>} : vector<128x128xbf16>, vector<128x32xbf16>, vector<128x32xf32> -> vector<128x32xf32>
    %19 = arith.addf %14, %18 : vector<128x32xf32>
    %c1_19 = arith.constant 1 : index
    %c0_20 = arith.constant 0 : index
    %c0_21 = arith.constant 0 : index
    %20 = vector.load %arg9[%c1_19, %c0_20, %c0_21] : memref<4x128x32xf32, #tpu.memory_space<vmem>>, vector<1x128x32xf32>
    %21 = vector.shape_cast %20 : vector<1x128x32xf32> to vector<128x32xf32>
    %22 = vector.shape_cast %19 : vector<128x32xf32> to vector<1x128x32xf32>
    tpu.vector_store %arg9[%c1_19, %c0_20, %c0_21], %22 {strides = array<i32>} : memref<4x128x32xf32, #tpu.memory_space<vmem>>, vector<1x128x32xf32>,
    %c2 = arith.constant 2 : index
    %c0_22 = arith.constant 0 : index
    %c0_23 = arith.constant 0 : index
    %23 = vector.load %arg9[%c2, %c0_22, %c0_23] : memref<4x128x32xf32, #tpu.memory_space<vmem>>, vector<1x128x32xf32>
    %24 = vector.shape_cast %23 : vector<1x128x32xf32> to vector<128x32xf32>
    %c0_24 = arith.constant 0 : index
    %c0_25 = arith.constant 0 : index
    %25 = vector.load %arg6[%c0_24, %c0_25] : memref<128x128xbf16, #tpu.memory_space<vmem>>, vector<128x128xbf16>
    %c2_26 = arith.constant 2 : index
    %c0_27 = arith.constant 0 : index
    %c0_28 = arith.constant 0 : index
    %26 = vector.load %arg2[%c2_26, %c0_27, %c0_28] : memref<4x128x32xbf16, #tpu.memory_space<vmem>>, vector<1x128x32xbf16>
    %27 = vector.shape_cast %26 : vector<1x128x32xbf16> to vector<128x32xbf16>
    %cst_29 = arith.constant dense<0.000000e+00> : vector<128x32xf32>
    %28 = tpu.matmul %25, %27, %cst_29 {dimension_numbers = #tpu.dot_dimension_numbers<[1], [0], [0], [1], [0, 0, 1, 1], [], []>} : vector<128x128xbf16>, vector<128x32xbf16>, vector<128x32xf32> -> vector<128x32xf32>
    %29 = arith.addf %24, %28 : vector<128x32xf32>
    %c2_30 = arith.constant 2 : index
    %c0_31 = arith.constant 0 : index
    %c0_32 = arith.constant 0 : index
    %30 = vector.load %arg9[%c2_30, %c0_31, %c0_32] : memref<4x128x32xf32, #tpu.memory_space<vmem>>, vector<1x128x32xf32>
    %31 = vector.shape_cast %30 : vector<1x128x32xf32> to vector<128x32xf32>
    %32 = vector.shape_cast %29 : vector<128x32xf32> to vector<1x128x32xf32>
    tpu.vector_store %arg9[%c2_30, %c0_31, %c0_32], %32 {strides = array<i32>} : memref<4x128x32xf32, #tpu.memory_space<vmem>>, vector<1x128x32xf32>,
    %c3 = arith.constant 3 : index
    %c0_33 = arith.constant 0 : index
    %c0_34 = arith.constant 0 : index
    %33 = vector.load %arg9[%c3, %c0_33, %c0_34] : memref<4x128x32xf32, #tpu.memory_space<vmem>>, vector<1x128x32xf32>
    %34 = vector.shape_cast %33 : vector<1x128x32xf32> to vector<128x32xf32>
    %c0_35 = arith.constant 0 : index
    %c0_36 = arith.constant 0 : index
    %35 = vector.load %arg7[%c0_35, %c0_36] : memref<128x128xbf16, #tpu.memory_space<vmem>>, vector<128x128xbf16>
    %c3_37 = arith.constant 3 : index
    %c0_38 = arith.constant 0 : index
    %c0_39 = arith.constant 0 : index
    %36 = vector.load %arg2[%c3_37, %c0_38, %c0_39] : memref<4x128x32xbf16, #tpu.memory_space<vmem>>, vector<1x128x32xbf16>
    %37 = vector.shape_cast %36 : vector<1x128x32xbf16> to vector<128x32xbf16>
    %cst_40 = arith.constant dense<0.000000e+00> : vector<128x32xf32>
    %38 = tpu.matmul %35, %37, %cst_40 {dimension_numbers = #tpu.dot_dimension_numbers<[1], [0], [0], [1], [0, 0, 1, 1], [], []>} : vector<128x128xbf16>, vector<128x32xbf16>, vector<128x32xf32> -> vector<128x32xf32>
    %39 = arith.addf %34, %38 : vector<128x32xf32>
    %c3_41 = arith.constant 3 : index
    %c0_42 = arith.constant 0 : index
    %c0_43 = arith.constant 0 : index
    %40 = vector.load %arg9[%c3_41, %c0_42, %c0_43] : memref<4x128x32xf32, #tpu.memory_space<vmem>>, vector<1x128x32xf32>
    %41 = vector.shape_cast %40 : vector<1x128x32xf32> to vector<128x32xf32>
    %42 = vector.shape_cast %39 : vector<128x32xf32> to vector<1x128x32xf32>
    tpu.vector_store %arg9[%c3_41, %c0_42, %c0_43], %42 {strides = array<i32>} : memref<4x128x32xf32, #tpu.memory_space<vmem>>, vector<1x128x32xf32>,
    %c1_i32 = arith.constant 1 : i32
    %43 = arith.cmpi eq, %arg1, %c1_i32 : i32
    %44 = arith.extui %43 : i1 to i32
    %c0_i32_44 = arith.constant 0 : i32
    %45 = arith.cmpi ne, %44, %c0_i32_44 : i32
    scf.if %45 {
      %c0_45 = arith.constant 0 : index
      %c0_46 = arith.constant 0 : index
      %c0_47 = arith.constant 0 : index
      %46 = vector.load %arg9[%c0_45, %c0_46, %c0_47] : memref<4x128x32xf32, #tpu.memory_space<vmem>>, vector<4x128x32xf32>
      %c0_48 = arith.constant 0 : index
      %c0_49 = arith.constant 0 : index
      %c0_50 = arith.constant 0 : index
      %47 = vector.load %arg3[%c0_48, %c0_49, %c0_50] : memref<4x1x32xf32, #tpu.memory_space<vmem>>, vector<4x1x32xf32>
      %48 = vector.broadcast %47 : vector<4x1x32xf32> to vector<4x128x32xf32>
      %49 = arith.addf %46, %48 : vector<4x128x32xf32>
      %cst_51 = arith.constant 0.000000e+00 : f32
      %50 = vector.broadcast %cst_51 : f32 to vector<4x128x32xf32>
      %51 = arith.maximumf %49, %50 : vector<4x128x32xf32>
      %c0_52 = arith.constant 0 : index
      %c0_53 = arith.constant 0 : index
      %c0_54 = arith.constant 0 : index
      %52 = vector.load %arg8[%c0_52, %c0_53, %c0_54] : memref<4x128x32xf32, #tpu.memory_space<vmem>>, vector<4x128x32xf32>
      tpu.vector_store %arg8[%c0_52, %c0_53, %c0_54], %51 {strides = array<i32>} : memref<4x128x32xf32, #tpu.memory_space<vmem>>, vector<4x128x32xf32>,
    } else {
    }
    return
  }
  func.func @transform_0(%arg0: i32, %arg1: i32) -> (i32, i32, i32) {
    %c0_i32 = arith.constant 0 : i32
    %c0_i32_0 = arith.constant 0 : i32
    %c0_i32_1 = arith.constant 0 : i32
    return %c0_i32, %arg1, %c0_i32_0 : i32, i32, i32
  }
  func.func @transform_1(%arg0: i32, %arg1: i32) -> (i32, i32, i32) {
    %c0_i32 = arith.constant 0 : i32
    %c0_i32_0 = arith.constant 0 : i32
    %c0_i32_1 = arith.constant 0 : i32
    %c0_i32_2 = arith.constant 0 : i32
    return %c0_i32, %c0_i32_0, %c0_i32_1 : i32, i32, i32
  }
  func.func @transform_2(%arg0: i32, %arg1: i32) -> (i32, i32) {
    %c0_i32 = arith.constant 0 : i32
    return %arg0, %arg1 : i32, i32
  }
  func.func @transform_3(%arg0: i32, %arg1: i32) -> (i32, i32) {
    %c0_i32 = arith.constant 0 : i32
    return %arg0, %arg1 : i32, i32
  }
  func.func @transform_4(%arg0: i32, %arg1: i32) -> (i32, i32) {
    %c0_i32 = arith.constant 0 : i32
    return %arg0, %arg1 : i32, i32
  }
  func.func @transform_5(%arg0: i32, %arg1: i32) -> (i32, i32) {
    %c0_i32 = arith.constant 0 : i32
    return %arg0, %arg1 : i32, i32
  }
  func.func @transform_6(%arg0: i32, %arg1: i32) -> (i32, i32, i32) {
    %c0_i32 = arith.constant 0 : i32
    %c0_i32_0 = arith.constant 0 : i32
    %c0_i32_1 = arith.constant 0 : i32
    return %c0_i32, %arg0, %c0_i32_0 : i32, i32, i32
  }
}

module attributes {stable_mosaic.version = 11 : i64} {
  func.func @_matmul_bf16_kernel(%arg0: i32, %arg1: memref<1x128x32xf32, #tpu.memory_space<vmem>>, %arg2: memref<32x32xf32, #tpu.memory_space<vmem>>, %arg3: memref<128x32xbf16, #tpu.memory_space<vmem>>) attributes {dimension_semantics = [#tpu.dimension_semantics<parallel>], iteration_bounds = array<i64: 2>, scalar_prefetch = 0 : i64, scratch_operands = 0 : i64, tpu.core_type = #tpu.core_type<tc>, window_params = [{transform_indices = @transform_0, window_bounds = array<i64: 1, 128, 32>}, {pipeline_mode = #tpu.pipeline_mode<synchronous>, transform_indices = @transform_1, window_bounds = array<i64: 32, 32>}, {transform_indices = @transform_2, window_bounds = array<i64: 128, 32>}]} {
    %c0 = arith.constant 0 : index
    %c0_0 = arith.constant 0 : index
    %c0_1 = arith.constant 0 : index
    %0 = vector.load %arg1[%c0, %c0_0, %c0_1] : memref<1x128x32xf32, #tpu.memory_space<vmem>>, vector<1x128x32xf32>
    %1 = vector.shape_cast %0 : vector<1x128x32xf32> to vector<128x32xf32>
    %c0_2 = arith.constant 0 : index
    %c0_3 = arith.constant 0 : index
    %2 = vector.load %arg2[%c0_2, %c0_3] : memref<32x32xf32, #tpu.memory_space<vmem>>, vector<32x32xf32>
    %cst = arith.constant dense<0.000000e+00> : vector<128x32xf32>
    %3 = tpu.matmul %1, %2, %cst {dimension_numbers = #tpu.dot_dimension_numbers<[1], [0], [0], [1], [0, 0, 1, 1], [], []>} : vector<128x32xf32>, vector<32x32xf32>, vector<128x32xf32> -> vector<128x32xf32>
    %4 = arith.truncf %3 : vector<128x32xf32> to vector<128x32xbf16>
    %c0_4 = arith.constant 0 : index
    %c0_5 = arith.constant 0 : index
    %5 = vector.load %arg3[%c0_4, %c0_5] : memref<128x32xbf16, #tpu.memory_space<vmem>>, vector<128x32xbf16>
    tpu.vector_store %arg3[%c0_4, %c0_5], %4 {strides = array<i32>} : memref<128x32xbf16, #tpu.memory_space<vmem>>, vector<128x32xbf16>,
    return
  }
  func.func @transform_0(%arg0: i32) -> (i32, i32, i32) {
    %c0_i32 = arith.constant 0 : i32
    %c0_i32_0 = arith.constant 0 : i32
    %c0_i32_1 = arith.constant 0 : i32
    return %c0_i32, %arg0, %c0_i32_0 : i32, i32, i32
  }
  func.func @transform_1(%arg0: i32) -> (i32, i32) {
    %c0_i32 = arith.constant 0 : i32
    %c0_i32_0 = arith.constant 0 : i32
    %c0_i32_1 = arith.constant 0 : i32
    return %c0_i32, %c0_i32_0 : i32, i32
  }
  func.func @transform_2(%arg0: i32) -> (i32, i32) {
    %c0_i32 = arith.constant 0 : i32
    %c0_i32_0 = arith.constant 0 : i32
    return %arg0, %c0_i32 : i32, i32
  }
}

module attributes {stable_mosaic.version = 11 : i64} {
  func.func @_gcn_layer2_kernel(%arg0: i32, %arg1: i32, %arg2: memref<128x128xbf16, #tpu.memory_space<vmem>>, %arg3: memref<128x32xbf16, #tpu.memory_space<vmem>>, %arg4: memref<1x32xf32, #tpu.memory_space<vmem>>, %arg5: memref<128x32xf32, #tpu.memory_space<vmem>>, %arg6: memref<128x32xf32, #tpu.memory_space<vmem>>) attributes {dimension_semantics = [#tpu.dimension_semantics<parallel>, #tpu.dimension_semantics<arbitrary>], iteration_bounds = array<i64: 2, 2>, scalar_prefetch = 0 : i64, scratch_operands = 1 : i64, tpu.core_type = #tpu.core_type<tc>, window_params = [{transform_indices = @transform_0, window_bounds = array<i64: 128, 128>}, {transform_indices = @transform_1, window_bounds = array<i64: 128, 32>}, {pipeline_mode = #tpu.pipeline_mode<synchronous>, transform_indices = @transform_2, window_bounds = array<i64: 1, 32>}, {transform_indices = @transform_3, window_bounds = array<i64: 128, 32>}]} {
    %c0_i32 = arith.constant 0 : i32
    %0 = arith.cmpi eq, %arg1, %c0_i32 : i32
    %1 = arith.extui %0 : i1 to i32
    %c0_i32_0 = arith.constant 0 : i32
    %2 = arith.cmpi ne, %1, %c0_i32_0 : i32
    scf.if %2 {
      %cst_9 = arith.constant 0.000000e+00 : f32
      %12 = vector.broadcast %cst_9 : f32 to vector<128x32xf32>
      %c0_10 = arith.constant 0 : index
      %c0_11 = arith.constant 0 : index
      %13 = vector.load %arg6[%c0_10, %c0_11] : memref<128x32xf32, #tpu.memory_space<vmem>>, vector<128x32xf32>
      tpu.vector_store %arg6[%c0_10, %c0_11], %12 {strides = array<i32>} : memref<128x32xf32, #tpu.memory_space<vmem>>, vector<128x32xf32>,
    } else {
    }
    %c0 = arith.constant 0 : index
    %c0_1 = arith.constant 0 : index
    %3 = vector.load %arg6[%c0, %c0_1] : memref<128x32xf32, #tpu.memory_space<vmem>>, vector<128x32xf32>
    %c0_2 = arith.constant 0 : index
    %c0_3 = arith.constant 0 : index
    %4 = vector.load %arg2[%c0_2, %c0_3] : memref<128x128xbf16, #tpu.memory_space<vmem>>, vector<128x128xbf16>
    %c0_4 = arith.constant 0 : index
    %c0_5 = arith.constant 0 : index
    %5 = vector.load %arg3[%c0_4, %c0_5] : memref<128x32xbf16, #tpu.memory_space<vmem>>, vector<128x32xbf16>
    %cst = arith.constant dense<0.000000e+00> : vector<128x32xf32>
    %6 = tpu.matmul %4, %5, %cst {dimension_numbers = #tpu.dot_dimension_numbers<[1], [0], [0], [1], [0, 0, 1, 1], [], []>} : vector<128x128xbf16>, vector<128x32xbf16>, vector<128x32xf32> -> vector<128x32xf32>
    %7 = arith.addf %3, %6 : vector<128x32xf32>
    %c0_6 = arith.constant 0 : index
    %c0_7 = arith.constant 0 : index
    %8 = vector.load %arg6[%c0_6, %c0_7] : memref<128x32xf32, #tpu.memory_space<vmem>>, vector<128x32xf32>
    tpu.vector_store %arg6[%c0_6, %c0_7], %7 {strides = array<i32>} : memref<128x32xf32, #tpu.memory_space<vmem>>, vector<128x32xf32>,
    %c1_i32 = arith.constant 1 : i32
    %9 = arith.cmpi eq, %arg1, %c1_i32 : i32
    %10 = arith.extui %9 : i1 to i32
    %c0_i32_8 = arith.constant 0 : i32
    %11 = arith.cmpi ne, %10, %c0_i32_8 : i32
    scf.if %11 {
      %c0_9 = arith.constant 0 : index
      %c0_10 = arith.constant 0 : index
      %12 = vector.load %arg6[%c0_9, %c0_10] : memref<128x32xf32, #tpu.memory_space<vmem>>, vector<128x32xf32>
      %c0_11 = arith.constant 0 : index
      %c0_12 = arith.constant 0 : index
      %13 = vector.load %arg4[%c0_11, %c0_12] : memref<1x32xf32, #tpu.memory_space<vmem>>, vector<1x32xf32>
      %14 = vector.broadcast %13 : vector<1x32xf32> to vector<128x32xf32>
      %15 = arith.addf %12, %14 : vector<128x32xf32>
      %c0_13 = arith.constant 0 : index
      %c0_14 = arith.constant 0 : index
      %16 = vector.load %arg5[%c0_13, %c0_14] : memref<128x32xf32, #tpu.memory_space<vmem>>, vector<128x32xf32>
      tpu.vector_store %arg5[%c0_13, %c0_14], %15 {strides = array<i32>} : memref<128x32xf32, #tpu.memory_space<vmem>>, vector<128x32xf32>,
    } else {
    }
    return
  }
  func.func @transform_0(%arg0: i32, %arg1: i32) -> (i32, i32) {
    %c0_i32 = arith.constant 0 : i32
    return %arg0, %arg1 : i32, i32
  }
  func.func @transform_1(%arg0: i32, %arg1: i32) -> (i32, i32) {
    %c0_i32 = arith.constant 0 : i32
    %c0_i32_0 = arith.constant 0 : i32
    return %arg1, %c0_i32 : i32, i32
  }
  func.func @transform_2(%arg0: i32, %arg1: i32) -> (i32, i32) {
    %c0_i32 = arith.constant 0 : i32
    %c0_i32_0 = arith.constant 0 : i32
    %c0_i32_1 = arith.constant 0 : i32
    return %c0_i32, %c0_i32_0 : i32, i32
  }
  func.func @transform_3(%arg0: i32, %arg1: i32) -> (i32, i32) {
    %c0_i32 = arith.constant 0 : i32
    %c0_i32_0 = arith.constant 0 : i32
    return %arg0, %c0_i32 : i32, i32
  }
}

module attributes {stable_mosaic.version = 11 : i64} {
  func.func @_attention_kernel(%arg0: i32, %arg1: memref<128x32xf32, #tpu.memory_space<vmem>>, %arg2: memref<4x128x32xf32, #tpu.memory_space<vmem>>, %arg3: memref<32x16xf32, #tpu.memory_space<vmem>>, %arg4: memref<1x16xf32, #tpu.memory_space<vmem>>, %arg5: memref<16x1xf32, #tpu.memory_space<vmem>>, %arg6: memref<128x32xf32, #tpu.memory_space<vmem>>) attributes {dimension_semantics = [#tpu.dimension_semantics<parallel>], iteration_bounds = array<i64: 2>, scalar_prefetch = 0 : i64, scratch_operands = 0 : i64, tpu.core_type = #tpu.core_type<tc>, window_params = [{transform_indices = @transform_0, window_bounds = array<i64: 128, 32>}, {transform_indices = @transform_1, window_bounds = array<i64: 4, 128, 32>}, {pipeline_mode = #tpu.pipeline_mode<synchronous>, transform_indices = @transform_2, window_bounds = array<i64: 32, 16>}, {pipeline_mode = #tpu.pipeline_mode<synchronous>, transform_indices = @transform_3, window_bounds = array<i64: 1, 16>}, {pipeline_mode = #tpu.pipeline_mode<synchronous>, transform_indices = @transform_4, window_bounds = array<i64: 16, 1>}, {transform_indices = @transform_5, window_bounds = array<i64: 128, 32>}]} {
    %c0 = arith.constant 0 : index
    %c0_0 = arith.constant 0 : index
    %0 = vector.load %arg1[%c0, %c0_0] : memref<128x32xf32, #tpu.memory_space<vmem>>, vector<128x32xf32>
    %c1 = arith.constant 1 : index
    %c0_1 = arith.constant 0 : index
    %c0_2 = arith.constant 0 : index
    %1 = vector.load %arg2[%c1, %c0_1, %c0_2] : memref<4x128x32xf32, #tpu.memory_space<vmem>>, vector<1x128x32xf32>
    %2 = vector.shape_cast %1 : vector<1x128x32xf32> to vector<128x32xf32>
    %c2 = arith.constant 2 : index
    %c0_3 = arith.constant 0 : index
    %c0_4 = arith.constant 0 : index
    %3 = vector.load %arg2[%c2, %c0_3, %c0_4] : memref<4x128x32xf32, #tpu.memory_space<vmem>>, vector<1x128x32xf32>
    %4 = vector.shape_cast %3 : vector<1x128x32xf32> to vector<128x32xf32>
    %c3 = arith.constant 3 : index
    %c0_5 = arith.constant 0 : index
    %c0_6 = arith.constant 0 : index
    %5 = vector.load %arg2[%c3, %c0_5, %c0_6] : memref<4x128x32xf32, #tpu.memory_space<vmem>>, vector<1x128x32xf32>
    %6 = vector.shape_cast %5 : vector<1x128x32xf32> to vector<128x32xf32>
    %7 = tpu.concatenate %0, %2, %4, %6 in 0 : vector<128x32xf32>, vector<128x32xf32>, vector<128x32xf32>, vector<128x32xf32> -> vector<512x32xf32>
    %c0_7 = arith.constant 0 : index
    %c0_8 = arith.constant 0 : index
    %8 = vector.load %arg3[%c0_7, %c0_8] : memref<32x16xf32, #tpu.memory_space<vmem>>, vector<32x16xf32>
    %cst = arith.constant dense<0.000000e+00> : vector<512x16xf32>
    %9 = tpu.matmul %7, %8, %cst {dimension_numbers = #tpu.dot_dimension_numbers<[1], [0], [0], [1], [0, 0, 1, 1], [], []>} : vector<512x32xf32>, vector<32x16xf32>, vector<512x16xf32> -> vector<512x16xf32>
    %c0_9 = arith.constant 0 : index
    %c0_10 = arith.constant 0 : index
    %10 = vector.load %arg4[%c0_9, %c0_10] : memref<1x16xf32, #tpu.memory_space<vmem>>, vector<1x16xf32>
    %11 = vector.broadcast %10 : vector<1x16xf32> to vector<512x16xf32>
    %12 = arith.addf %9, %11 : vector<512x16xf32>
    %13 = math.tanh %12 : vector<512x16xf32>
    %c0_11 = arith.constant 0 : index
    %c0_12 = arith.constant 0 : index
    %14 = vector.load %arg5[%c0_11, %c0_12] : memref<16x1xf32, #tpu.memory_space<vmem>>, vector<16x1xf32>
    %cst_13 = arith.constant dense<0.000000e+00> : vector<512x1xf32>
    %15 = tpu.matmul %13, %14, %cst_13 {dimension_numbers = #tpu.dot_dimension_numbers<[1], [0], [0], [1], [0, 0, 1, 1], [], []>} : vector<512x16xf32>, vector<16x1xf32>, vector<512x1xf32> -> vector<512x1xf32>
    %16 = vector.extract_strided_slice %15 {offsets = [0, 0], sizes = [128, 1], strides = [1, 1]} : vector<512x1xf32> to vector<128x1xf32>
    %17 = vector.extract_strided_slice %15 {offsets = [128, 0], sizes = [128, 1], strides = [1, 1]} : vector<512x1xf32> to vector<128x1xf32>
    %18 = vector.extract_strided_slice %15 {offsets = [256, 0], sizes = [128, 1], strides = [1, 1]} : vector<512x1xf32> to vector<128x1xf32>
    %19 = vector.extract_strided_slice %15 {offsets = [384, 0], sizes = [128, 1], strides = [1, 1]} : vector<512x1xf32> to vector<128x1xf32>
    %20 = arith.maximumf %16, %17 : vector<128x1xf32>
    %21 = arith.maximumf %18, %19 : vector<128x1xf32>
    %22 = arith.maximumf %20, %21 : vector<128x1xf32>
    %23 = arith.subf %16, %22 : vector<128x1xf32>
    %24 = math.exp %23 : vector<128x1xf32>
    %25 = arith.subf %17, %22 : vector<128x1xf32>
    %26 = math.exp %25 : vector<128x1xf32>
    %27 = arith.subf %18, %22 : vector<128x1xf32>
    %28 = math.exp %27 : vector<128x1xf32>
    %29 = arith.subf %19, %22 : vector<128x1xf32>
    %30 = math.exp %29 : vector<128x1xf32>
    %31 = arith.addf %24, %26 : vector<128x1xf32>
    %32 = arith.addf %31, %28 : vector<128x1xf32>
    %33 = arith.addf %32, %30 : vector<128x1xf32>
    %34 = tpu.reciprocal %33 {approx = true} : vector<128x1xf32> -> vector<128x1xf32>
    %35 = vector.broadcast %24 : vector<128x1xf32> to vector<128x32xf32>
    %36 = arith.mulf %35, %0 : vector<128x32xf32>
    %37 = vector.broadcast %26 : vector<128x1xf32> to vector<128x32xf32>
    %38 = arith.mulf %37, %2 : vector<128x32xf32>
    %39 = arith.addf %36, %38 : vector<128x32xf32>
    %40 = vector.broadcast %28 : vector<128x1xf32> to vector<128x32xf32>
    %41 = arith.mulf %40, %4 : vector<128x32xf32>
    %42 = arith.addf %39, %41 : vector<128x32xf32>
    %43 = vector.broadcast %30 : vector<128x1xf32> to vector<128x32xf32>
    %44 = arith.mulf %43, %6 : vector<128x32xf32>
    %45 = arith.addf %42, %44 : vector<128x32xf32>
    %46 = vector.broadcast %34 : vector<128x1xf32> to vector<128x32xf32>
    %47 = arith.mulf %45, %46 : vector<128x32xf32>
    %c0_14 = arith.constant 0 : index
    %c0_15 = arith.constant 0 : index
    %48 = vector.load %arg6[%c0_14, %c0_15] : memref<128x32xf32, #tpu.memory_space<vmem>>, vector<128x32xf32>
    tpu.vector_store %arg6[%c0_14, %c0_15], %47 {strides = array<i32>} : memref<128x32xf32, #tpu.memory_space<vmem>>, vector<128x32xf32>,
    return
  }
  func.func @transform_0(%arg0: i32) -> (i32, i32) {
    %c0_i32 = arith.constant 0 : i32
    %c0_i32_0 = arith.constant 0 : i32
    return %arg0, %c0_i32 : i32, i32
  }
  func.func @transform_1(%arg0: i32) -> (i32, i32, i32) {
    %c0_i32 = arith.constant 0 : i32
    %c0_i32_0 = arith.constant 0 : i32
    %c0_i32_1 = arith.constant 0 : i32
    return %c0_i32, %arg0, %c0_i32_0 : i32, i32, i32
  }
  func.func @transform_2(%arg0: i32) -> (i32, i32) {
    %c0_i32 = arith.constant 0 : i32
    %c0_i32_0 = arith.constant 0 : i32
    %c0_i32_1 = arith.constant 0 : i32
    return %c0_i32, %c0_i32_0 : i32, i32
  }
  func.func @transform_3(%arg0: i32) -> (i32, i32) {
    %c0_i32 = arith.constant 0 : i32
    %c0_i32_0 = arith.constant 0 : i32
    %c0_i32_1 = arith.constant 0 : i32
    return %c0_i32, %c0_i32_0 : i32, i32
  }
  func.func @transform_4(%arg0: i32) -> (i32, i32) {
    %c0_i32 = arith.constant 0 : i32
    %c0_i32_0 = arith.constant 0 : i32
    %c0_i32_1 = arith.constant 0 : i32
    return %c0_i32, %c0_i32_0 : i32, i32
  }
  func.func @transform_5(%arg0: i32) -> (i32, i32) {
    %c0_i32 = arith.constant 0 : i32
    %c0_i32_0 = arith.constant 0 : i32
    return %arg0, %c0_i32 : i32, i32
  }
}

</mosaic_0001>

<bundles_post_ra>
// kernel: hglr_forward.7
= control target key start
LH: loop header
LB: loop body
LE: loop exit
PB: predicated region body
PF: predicated region fallthrough
CT: control target
= control target key end

     0   :  { %s568_s9 = smov 0   ;;  %s639_s0 = inlined_call_operand.vmem [shape: f32[192,32], index: 0, kind: input, shape index: {}]   ;;  %s640_s1 = inlined_call_operand.vmem [shape: f32[32,32], index: 1, kind: input, shape index: {}]   ;;  %s641_s2 = inlined_call_operand.vmem [shape: bf16[192,32], index: 2, kind: output, shape index: {}]  }
   0x1 LB: > { %s442_s10 = sadd.s32 4294967295, %s551_s9   ;;  %p446_p0 = scmp.ge.s32.totalorder %s551_s9, 1  ;;  %s551_s9 = sphi %s568_s9, %s12_s9  }
   0x2   : > { %p113_p1 = scmp.lt.s32.totalorder %s551_s9, 3 }
   0x4   : > { %p114_p2 = pnand %p446_p0, %p113_p1 }
   0x5   : > { %s135_s15 = smul.u32 (!%p114_p2), 12, %s442_s10 }
   0x6   : > { %117 = sbr.rel (%p114_p2) target bundleno = 227 (0xe3), region = 28 }
   0x7   : > { %p136_p3 = scmp.lt.s32.totalorder (!%p114_p2), %s135_s15, 23 }
   0xb   : > { %v162_v0 = vld [vmem:[%s640_s1 + $0x18] sm:$0xff]  ;;  %v161_v1 = vld [vmem:[%s640_s1 + $0x10] sm:$0xff]  ;;  %v160_v2 = vld [vmem:[%s640_s1 + $0x8] sm:$0xff]  ;;  %s643_s15 = smov (!%p136_p3, %s135_s15), 23  ;;  %vm163_vm0 = vcmask 261120   ;;  %vm373_vm1 = vcmask 257024  }
   0xc   : > { %503 = vmatprep.subr.mxu0 %v162_v0  ;;  %529 = vmatprep.subr.mxu1 %v162_v0  ;;  %v159_v3 = vld [vmem:[%s640_s1] sm:$0xff]  ;;  %s447_s20 = sshll.u32 %s643_s15, 3  ;;  %s448_s24 = sshll.u32 %s643_s15, 2 }
   0xd   : > { %504 = vmatpush3.msra.mxu0 %v162_v0  ;;  %533 = vmatpush3.msra.mxu1 %v162_v0  ;;  %s139_s23 = scalar_lea.vmem %s639_s0, %s447_s20  ;;  %s610_s27 = scalar_lea.vmem %s641_s2, %s448_s24 }
   0xe   : > { %505 = vmatprep.subr.mxu0 %v161_v1  ;;  %530 = vmatprep.subr.mxu1 %v161_v1  ;;  %v147_v4 = vld [vmem:[%s139_s23] sm:$0xff]  ;;  %v153_v5 = vld [vmem:[%s139_s23 + $0x30] sm:$0xff]  ;;  %v148_v6 = vld [vmem:[%s139_s23 + $0x8] sm:$0xff] }
   0xf   : > { %506 = vmatpush3.msra.mxu0 %v161_v1  ;;  %534 = vmatpush3.msra.mxu1 %v161_v1  ;;  %v154_v7 = vld [vmem:[%s139_s23 + $0x38] sm:$0xff]  ;;  %v149_v8 = vld [vmem:[%s139_s23 + $0x10] sm:$0xff]  ;;  %v155_v9 = vld [vmem:[%s139_s23 + $0x40] sm:$0xff] }
  0x10   : > { %507 = vmatprep.subr.mxu0 %v160_v2  ;;  %531 = vmatprep.subr.mxu1 %v160_v2  ;;  %v150_v10 = vld [vmem:[%s139_s23 + $0x18] sm:$0xff]  ;;  %v156_v11 = vld [vmem:[%s139_s23 + $0x48] sm:$0xff]  ;;  %v151_v12 = vld [vmem:[%s139_s23 + $0x20] sm:$0xff] }
  0x11   : > { %508 = vmatpush3.msra.mxu0 %v160_v2  ;;  %535 = vmatpush3.msra.mxu1 %v160_v2  ;;  %v157_v13 = vld [vmem:[%s139_s23 + $0x50] sm:$0xff]  ;;  %v152_v14 = vld [vmem:[%s139_s23 + $0x28] sm:$0xff]  ;;  %v158_v15 = vld [vmem:[%s139_s23 + $0x58] sm:$0xff] }
  0x12   : > { %509 = vmatprep.subr.mxu0 %v159_v3  ;;  %532 = vmatprep.subr.mxu1 %v159_v3 }
  0x13   : > { %510 = vmatpush3.msra.mxu0 %v159_v3  ;;  %536 = vmatpush3.msra.mxu1 %v159_v3 }
  0x14   : > { %511 = vmatprep.mubr.msk.f32.mxu0 %vm163_vm0, %v147_v4  ;;  %520 = vmatprep.mubr.msk.f32.mxu1 %vm163_vm0, %v153_v5 }
  0x15   : > { %512 = vmatmul.mubr.msk.f32.vlgmr.msra.gmra.mxu0 %vm163_vm0, %v148_v6  ;;  %521 = vmatmul.mubr.msk.f32.vlgmr.msra.gmra.mxu1 %vm163_vm0, %v154_v7 }
  0x16   : > { %514 = vmatprep.mubr.msk.f32.mxu0 %vm163_vm0, %v149_v8  ;;  %523 = vmatprep.mubr.msk.f32.mxu1 %vm163_vm0, %v155_v9 }
  0x19   : > { %515 = vmatmul.mubr.msk.f32.gmra.mxu0 %vm163_vm0, %v150_v10  ;;  %524 = vmatmul.mubr.msk.f32.gmra.mxu1 %vm163_vm0, %v156_v11 }
  0x1a   : > { %517 = vmatprep.mubr.msk.f32.mxu0 %vm163_vm0, %v151_v12  ;;  %526 = vmatprep.mubr.msk.f32.mxu1 %vm163_vm0, %v157_v13 }
  0x1d   : > { %518 = vmatmul.mubr.msk.f32.gmra.mxu0 %vm163_vm0, %v152_v14  ;;  %527 = vmatmul.mubr.msk.f32.gmra.mxu1 %vm163_vm0, %v158_v15 }
  0xd5   : > { %v513_v16 = vpop.f32.mrf.mxu0  ;;  %v522_v17 = vpop.f32.mrf.mxu1 }
  0xd6   : > { %v476_v18 = vpack.c.bf16 %v513_v16, %v513_v16  ;;  %v482_v19 = vpack.c.bf16 %v522_v17, %v522_v17 }
  0xd7   : > { %v266_v20 = vpop.f32.mrf.mxu0  ;;  %v296_v21 = vpop.f32.mrf.mxu1 }
  0xd8   : > { %375 = vst.msk [vmem:[%s610_s27 + $0x4] sm:$0xf] %vm373_vm1, %v476_v18  ;;  %381 = vst.msk [vmem:[%s610_s27 + $0x1c] sm:$0xf] %vm373_vm1, %v482_v19  ;;  %v475_v22 = vpack.c.bf16 %v266_v20, %v266_v20  ;;  %v481_v23 = vpack.c.bf16 %v296_v21, %v296_v21 }
  0xd9   : > { %v516_v24 = vpop.f32.mrf.mxu0  ;;  %v525_v25 = vpop.f32.mrf.mxu1 }
  0xda   : > { %374 = vst.msk [vmem:[%s610_s27] sm:$0xf] %vm373_vm1, %v475_v22  ;;  %380 = vst.msk [vmem:[%s610_s27 + $0x18] sm:$0xf] %vm373_vm1, %v481_v23  ;;  %v478_v26 = vpack.c.bf16 %v516_v24, %v516_v24  ;;  %v484_v27 = vpack.c.bf16 %v525_v25, %v525_v25 }
  0xdb   : > { %v276_v28 = vpop.f32.mrf.mxu0  ;;  %v306_v29 = vpop.f32.mrf.mxu1 }
  0xdc   : > { %377 = vst.msk [vmem:[%s610_s27 + $0xc] sm:$0xf] %vm373_vm1, %v478_v26  ;;  %383 = vst.msk [vmem:[%s610_s27 + $0x24] sm:$0xf] %vm373_vm1, %v484_v27  ;;  %v477_v30 = vpack.c.bf16 %v276_v28, %v276_v28  ;;  %v483_v31 = vpack.c.bf16 %v306_v29, %v306_v29 }
  0xdd   : > { %v519_v32 = vpop.f32.mrf.mxu0  ;;  %v528_v33 = vpop.f32.mrf.mxu1 }
  0xde   : > { %376 = vst.msk [vmem:[%s610_s27 + $0x8] sm:$0xf] %vm373_vm1, %v477_v30  ;;  %382 = vst.msk [vmem:[%s610_s27 + $0x20] sm:$0xf] %vm373_vm1, %v483_v31  ;;  %v480_v34 = vpack.c.bf16 %v519_v32, %v519_v32  ;;  %v486_v35 = vpack.c.bf16 %v528_v33, %v528_v33 }
  0xdf   : > { %v286_v36 = vpop.f32.mrf.mxu0  ;;  %v316_v37 = vpop.f32.mrf.mxu1 }
  0xe0   : > { %379 = vst.msk [vmem:[%s610_s27 + $0x14] sm:$0xf] %vm373_vm1, %v480_v34  ;;  %385 = vst.msk [vmem:[%s610_s27 + $0x2c] sm:$0xf] %vm373_vm1, %v486_v35  ;;  %v479_v38 = vpack.c.bf16 %v286_v36, %v286_v36  ;;  %v485_v39 = vpack.c.bf16 %v316_v37, %v316_v37 }
  0xe2   : > { %378 = vst.msk [vmem:[%s610_s27 + $0x10] sm:$0xf] %vm373_vm1, %v479_v38  ;;  %384 = vst.msk [vmem:[%s610_s27 + $0x28] sm:$0xf] %vm373_vm1, %v485_v39 }
  0xe3 PF: > { %s12_s9 = sadd.s32 1, %s551_s9  }
  0xe4   : > { %p9_p4 = scmp.ge.s32.totalorder %s12_s9, 4  }
  0xe6   :  { %11 = sbr.rel (!%p9_p4) target bundleno = 1 (0x1), region = 58 }

// kernel: hglr_forward.9
= control target key start
LH: loop header
LB: loop body
LE: loop exit
PB: predicated region body
PF: predicated region fallthrough
CT: control target
= control target key end

     0   :  { %s1223_s9 = smov 0   ;;  %s1225_s10 = smov 0   ;;  %s1563_s0 = inlined_call_operand.vmem [shape: f32[256,32], index: 0, kind: input, shape index: {}]   ;;  %s1564_s1 = inlined_call_operand.vmem [shape: f32[32,128], index: 1, kind: input, shape index: {}]   ;;  %s1565_s2 = inlined_call_operand.vmem [shape: bf16[4,256,32], index: 2, kind: output, shape index: {}]  }
   0x1   :  { %s1227_s11 = smov 0  }
   0x2 LB: > { %s1236_s12 = sadd.s32 4294967295, %s1203_s11   ;;  %s1238_s13 = sadd.s32 1, %s1203_s11   ;;  %s1203_s11 = sphi %s1227_s11, %s1569_s11   ;;  %s1199_s10 = sphi %s1225_s10, %s1568_s10   ;;  %s1195_s9 = sphi %s1223_s9, %s1567_s9  }
   0x3   : > { %s63_s14 = ssub.s32 %s1203_s11, %s1238_s13  ;;  %s66_s15 = sadd.s32 1, %s1199_s10 }
   0x4   : > { %p64_p0 = scmp.eq.s32.totalorder %s63_s14, 0  ;;  %p76_p1 = scmp.ne.s32.totalorder %s1199_s10, %s1195_s9 }
   0x5   : > { %p77_p2 = scmp.eq.s32.totalorder %s1236_s12, 1  ;;  %p988_p3 = scmp.ge.s32.totalorder %s1203_s11, 1 }
   0x6   : > { %s1246_s16 = scalar_select %p64_p0, %s1199_s10, %s66_s15  }
   0x7   : > { %p1248_p4 = por %p77_p2, %p76_p1  ;;  %p113_p5 = scmp.lt.s32.totalorder %s1203_s11, 3 }
   0x9   : > { %p114_p6 = pnand %p988_p3, %p113_p5 }
   0xa   : > { %s990_s22 = sshll.u32 (!%p114_p6), %s1236_s12, 4  ;;  %s131_s3 = sand.u32 (!%p114_p6), 1, %s1195_s9  }
   0xb   : > { %117 = sbr.rel (%p114_p6) target bundleno = 437 (0x1b5), region = 28  ;;  %p135_p7 = scmp.lt.s32.totalorder (!%p114_p6), %s990_s22, 31 }
   0xc   : > { %s989_s4 = sshll.u32 (!%p114_p6), %s131_s3, 8  ;;  %s1205_s6 = smov (!%p114_p6), 96  }
   0xd   : > { %s1303_s5 = scalar_lea.vmem (!%p114_p6), [#allocation2], %s989_s4  ;;  %s1206_s7 = smov (!%p114_p6), 64  }
   0xe   : > { %s1207_s8 = smov (!%p114_p6), 32  }
  0x10   : > { %v160_v0 = vld [vmem:[%s1564_s1 + $0x18] sm:$0xff]  ;;  %v159_v1 = vld [vmem:[%s1564_s1 + $0x10] sm:$0xff]  ;;  %v158_v2 = vld [vmem:[%s1564_s1 + $0x8] sm:$0xff]  ;;  %s1571_s22 = smov (!%p135_p7, %s990_s22), 31  ;;  %vm161_vm0 = vcmask 261120   ;;  %vm419_vm1 = vcmask 257024  }
  0x11   : > { %1114 = vmatprep.subr.mxu0 %v160_v0  ;;  %1146 = vmatprep.subr.mxu1 %v160_v0  ;;  %v157_v3 = vld [vmem:[%s1564_s1] sm:$0xff]  ;;  %s991_s27 = sshll.u32 %s1571_s22, 3  ;;  %s1093_s9 = sshll.u32 (%p1248_p4), %s1236_s12, 6 }
  0x12   : > { %1115 = vmatpush3.msra.mxu0 %v160_v0  ;;  %1150 = vmatpush3.msra.mxu1 %v160_v0  ;;  %s1268_s30 = scalar_lea.vmem %s1563_s0, %s991_s27  ;;  %s1490_s15 = scalar_lea.vmem (%p1248_p4), %s1565_s2, %s1093_s9 }
  0x13   : > { %1116 = vmatprep.subr.mxu0 %v159_v1  ;;  %1147 = vmatprep.subr.mxu1 %v159_v1  ;;  %v141_v4 = vld [vmem:[%s1268_s30] sm:$0xff]  ;;  %v142_v6 = vld [vmem:[%s1268_s30 + $0x8] sm:$0xff]  ;;  %v143_v8 = vld [vmem:[%s1268_s30 + $0x10] sm:$0xff] }
  0x14   : > { %1117 = vmatpush3.msra.mxu0 %v159_v1  ;;  %1151 = vmatpush3.msra.mxu1 %v159_v1  ;;  %v149_v5 = vld [vmem:[%s1268_s30 + $0x40] sm:$0xff]  ;;  %v150_v7 = vld [vmem:[%s1268_s30 + $0x48] sm:$0xff]  ;;  %v151_v9 = vld [vmem:[%s1268_s30 + $0x50] sm:$0xff] }
  0x15   : > { %1118 = vmatprep.subr.mxu0 %v158_v2  ;;  %1148 = vmatprep.subr.mxu1 %v158_v2  ;;  %v144_v10 = vld [vmem:[%s1268_s30 + $0x18] sm:$0xff]  ;;  %v145_v12 = vld [vmem:[%s1268_s30 + $0x20] sm:$0xff]  ;;  %v146_v14 = vld [vmem:[%s1268_s30 + $0x28] sm:$0xff] }
  0x16   : > { %1119 = vmatpush3.msra.mxu0 %v158_v2  ;;  %1152 = vmatpush3.msra.mxu1 %v158_v2  ;;  %v152_v11 = vld [vmem:[%s1268_s30 + $0x58] sm:$0xff]  ;;  %v153_v13 = vld [vmem:[%s1268_s30 + $0x60] sm:$0xff]  ;;  %v154_v15 = vld [vmem:[%s1268_s30 + $0x68] sm:$0xff] }
  0x17   : > { %1120 = vmatprep.subr.mxu0 %v157_v3  ;;  %1149 = vmatprep.subr.mxu1 %v157_v3  ;;  %v147_v16 = vld [vmem:[%s1268_s30 + $0x30] sm:$0xff]  ;;  %v148_v18 = vld [vmem:[%s1268_s30 + $0x38] sm:$0xff] }
  0x18   : > { %1121 = vmatpush3.msra.mxu0 %v157_v3  ;;  %1153 = vmatpush3.msra.mxu1 %v157_v3  ;;  %v155_v17 = vld [vmem:[%s1268_s30 + $0x70] sm:$0xff]  ;;  %v156_v19 = vld [vmem:[%s1268_s30 + $0x78] sm:$0xff] }
  0x19   : > { %1122 = vmatprep.mubr.msk.f32.mxu0 %vm161_vm0, %v141_v4  ;;  %1134 = vmatprep.mubr.msk.f32.mxu1 %vm161_vm0, %v149_v5 }
  0x1a   : > { %1123 = vmatmul.mubr.msk.f32.vlgmr.msra.gmra.mxu0 %vm161_vm0, %v142_v6  ;;  %1135 = vmatmul.mubr.msk.f32.vlgmr.msra.gmra.mxu1 %vm161_vm0, %v150_v7 }
  0x1b   : > { %1125 = vmatprep.mubr.msk.f32.mxu0 %vm161_vm0, %v143_v8  ;;  %1137 = vmatprep.mubr.msk.f32.mxu1 %vm161_vm0, %v151_v9 }
  0x1e   : > { %1126 = vmatmul.mubr.msk.f32.gmra.mxu0 %vm161_vm0, %v144_v10  ;;  %1138 = vmatmul.mubr.msk.f32.gmra.mxu1 %vm161_vm0, %v152_v11 }
  0x1f   : > { %1128 = vmatprep.mubr.msk.f32.mxu0 %vm161_vm0, %v145_v12  ;;  %1140 = vmatprep.mubr.msk.f32.mxu1 %vm161_vm0, %v153_v13 }
  0x22   : > { %1129 = vmatmul.mubr.msk.f32.gmra.mxu0 %vm161_vm0, %v146_v14  ;;  %1141 = vmatmul.mubr.msk.f32.gmra.mxu1 %vm161_vm0, %v154_v15 }
  0x23   : > { %1131 = vmatprep.mubr.msk.f32.mxu0 %vm161_vm0, %v147_v16  ;;  %1143 = vmatprep.mubr.msk.f32.mxu1 %vm161_vm0, %v155_v17 }
  0x26   : > { %1132 = vmatmul.mubr.msk.f32.gmra.mxu0 %vm161_vm0, %v148_v18  ;;  %1144 = vmatmul.mubr.msk.f32.gmra.mxu1 %vm161_vm0, %v156_v19 }
  0xda   : > { %v1124_v20 = vpop.f32.mrf.mxu0  ;;  %v1136_v21 = vpop.f32.mrf.mxu1 }
  0xdb   : > { %v1078_v22 = vpack.c.bf16 %v1124_v20, %v1124_v20  ;;  %v1086_v23 = vpack.c.bf16 %v1136_v21, %v1136_v21 }
  0xdc   : > { %v276_v24 = vpop.f32.mrf.mxu0  ;;  %v316_v25 = vpop.f32.mrf.mxu1 }
  0xdd   : > { %421 = vst.msk [vmem:[%s1303_s5 + $0x4] sm:$0xf] %vm419_vm1, %v1078_v22  ;;  %429 = vst.msk [vmem:[%s1303_s5 + $0x24] sm:$0xf] %vm419_vm1, %v1086_v23  ;;  %v1077_v26 = vpack.c.bf16 %v276_v24, %v276_v24  ;;  %v1085_v27 = vpack.c.bf16 %v316_v25, %v316_v25  ;;  %454 = vrot.lane.b32.xlu1 %v1086_v23, %s1205_s6  ;;  %438 = vrot.lane.b32.xlu0 %v1078_v22, %s1205_s6 }
  0xde   : > { %v1127_v28 = vpop.f32.mrf.mxu0  ;;  %v1139_v29 = vpop.f32.mrf.mxu1 }
  0xdf   : > { %420 = vst.msk [vmem:[%s1303_s5] sm:$0xf] %vm419_vm1, %v1077_v26  ;;  %428 = vst.msk [vmem:[%s1303_s5 + $0x20] sm:$0xf] %vm419_vm1, %v1085_v27  ;;  %v1080_v30 = vpack.c.bf16 %v1127_v28, %v1127_v28  ;;  %v1088_v31 = vpack.c.bf16 %v1139_v29, %v1139_v29 }
  0xe0   : > { %v286_v32 = vpop.f32.mrf.mxu0  ;;  %v326_v33 = vpop.f32.mrf.mxu1 }
  0xe1   : > { %503 = vrot.lane.b32.xlu1 %v1078_v22, %s1206_s7  ;;  %436 = vrot.lane.b32.xlu0 %v1077_v26, %s1205_s6  ;;  %423 = vst.msk [vmem:[%s1303_s5 + $0xc] sm:$0xf] %vm419_vm1, %v1080_v30  ;;  %v1079_v34 = vpack.c.bf16 %v286_v32, %v286_v32  ;;  %431 = vst.msk [vmem:[%s1303_s5 + $0x2c] sm:$0xf] %vm419_vm1, %v1088_v31  ;;  %v1087_v35 = vpack.c.bf16 %v326_v33, %v326_v33 }
  0xe2   : > { %v1130_v36 = vpop.f32.mrf.mxu0  ;;  %v1142_v37 = vpop.f32.mrf.mxu1 }
  0xe3   : > { %422 = vst.msk [vmem:[%s1303_s5 + $0x8] sm:$0xf] %vm419_vm1, %v1079_v34  ;;  %430 = vst.msk [vmem:[%s1303_s5 + $0x28] sm:$0xf] %vm419_vm1, %v1087_v35  ;;  %v1082_v38 = vpack.c.bf16 %v1130_v36, %v1130_v36  ;;  %v1090_v39 = vpack.c.bf16 %v1142_v37, %v1142_v37 }
  0xe4   : > { %v296_v40 = vpop.f32.mrf.mxu0  ;;  %v336_v41 = vpop.f32.mrf.mxu1 }
  0xe5   : > { %519 = vrot.lane.b32.xlu1 %v1086_v23, %s1206_s7  ;;  %452 = vrot.lane.b32.xlu0 %v1085_v27, %s1205_s6  ;;  %425 = vst.msk [vmem:[%s1303_s5 + $0x14] sm:$0xf] %vm419_vm1, %v1082_v38  ;;  %v1081_v42 = vpack.c.bf16 %v296_v40, %v296_v40  ;;  %433 = vst.msk [vmem:[%s1303_s5 + $0x34] sm:$0xf] %vm419_vm1, %v1090_v39  ;;  %v1089_v43 = vpack.c.bf16 %v336_v41, %v336_v41 }
  0xe6   : > { %v1133_v44 = vpop.f32.mrf.mxu0  ;;  %v1145_v45 = vpop.f32.mrf.mxu1  ;;  %v657_v36 = vld [vmem:[%s1303_s5] sm:$0xff] (%p1248_p4)  }
  0xe7   : > { %424 = vst.msk [vmem:[%s1303_s5 + $0x10] sm:$0xf] %vm419_vm1, %v1081_v42  ;;  %432 = vst.msk [vmem:[%s1303_s5 + $0x30] sm:$0xf] %vm419_vm1, %v1089_v43  ;;  %v1084_v46 = vpack.c.bf16 %v1133_v44, %v1133_v44  ;;  %v1092_v47 = vpack.c.bf16 %v1145_v45, %v1145_v45  ;;  %v673_v40 = vld [vmem:[%s1303_s5 + $0x20] sm:$0xff] (%p1248_p4)  }
  0xe8   : > { %v306_v48 = vpop.f32.mrf.mxu0  ;;  %v346_v49 = vpop.f32.mrf.mxu1  ;;  %658 = vst [vmem:[%s1490_s15] sm:$0xff] (%p1248_p4), %v657_v36   ;;  %674 = vst [vmem:[%s1490_s15 + $0x20] sm:$0xff] (%p1248_p4), %v673_v40  }
  0xe9   : > { %568 = vrot.lane.b32.xlu1 %v1078_v22, %s1207_s8  ;;  %501 = vrot.lane.b32.xlu0 %v1077_v26, %s1206_s7  ;;  %427 = vst.msk [vmem:[%s1303_s5 + $0x1c] sm:$0xf] %vm419_vm1, %v1084_v46  ;;  %v1083_v50 = vpack.c.bf16 %v306_v48, %v306_v48  ;;  %435 = vst.msk [vmem:[%s1303_s5 + $0x3c] sm:$0xf] %vm419_vm1, %v1092_v47  ;;  %v1091_v51 = vpack.c.bf16 %v346_v49, %v346_v49 }
  0xea   : > { %v661_v37 = vld [vmem:[%s1303_s5 + $0x8] sm:$0xff] (%p1248_p4)  }
  0xeb   : > { %426 = vst.msk [vmem:[%s1303_s5 + $0x18] sm:$0xf] %vm419_vm1, %v1083_v50  ;;  %434 = vst.msk [vmem:[%s1303_s5 + $0x38] sm:$0xf] %vm419_vm1, %v1091_v51  ;;  %v677_v41 = vld [vmem:[%s1303_s5 + $0x28] sm:$0xff] (%p1248_p4)  }
  0xec   : > { %662 = vst [vmem:[%s1490_s15 + $0x8] sm:$0xff] (%p1248_p4), %v661_v37   ;;  %678 = vst [vmem:[%s1490_s15 + $0x28] sm:$0xff] (%p1248_p4), %v677_v41  }
  0xed   : > { %584 = vrot.lane.b32.xlu1 %v1086_v23, %s1207_s8  ;;  %517 = vrot.lane.b32.xlu0 %v1085_v27, %s1206_s7 }
  0xf1   : > { %566 = vrot.lane.b32.xlu0 %v1077_v26, %s1207_s8  ;;  %442 = vrot.lane.b32.xlu1 %v1080_v30, %s1205_s6 }
  0xf5   : > { %582 = vrot.lane.b32.xlu0 %v1085_v27, %s1207_s8  ;;  %458 = vrot.lane.b32.xlu1 %v1088_v31, %s1205_s6 }
  0xf9   : > { %456 = vrot.lane.b32.xlu0 %v1087_v35, %s1205_s6  ;;  %507 = vrot.lane.b32.xlu1 %v1080_v30, %s1206_s7 }
  0xfd   : > { %523 = vrot.lane.b32.xlu1 %v1088_v31, %s1206_s7  ;;  %505 = vrot.lane.b32.xlu0 %v1079_v34, %s1206_s7 }
 0x101   : > { %572 = vrot.lane.b32.xlu1 %v1080_v30, %s1207_s8  ;;  %521 = vrot.lane.b32.xlu0 %v1087_v35, %s1206_s7 }
 0x105   : > { %588 = vrot.lane.b32.xlu1 %v1088_v31, %s1207_s8  ;;  %570 = vrot.lane.b32.xlu0 %v1079_v34, %s1207_s8 }
 0x109   : > { %586 = vrot.lane.b32.xlu0 %v1087_v35, %s1207_s8  ;;  %440 = vrot.lane.b32.xlu1 %v1079_v34, %s1205_s6 }
 0x10d   : > { %446 = vrot.lane.b32.xlu1 %v1082_v38, %s1205_s6  ;;  %444 = vrot.lane.b32.xlu0 %v1081_v42, %s1205_s6 }
 0x111   : > { %462 = vrot.lane.b32.xlu1 %v1090_v39, %s1205_s6  ;;  %460 = vrot.lane.b32.xlu0 %v1089_v43, %s1205_s6 }
 0x115   : > { %511 = vrot.lane.b32.xlu1 %v1082_v38, %s1206_s7  ;;  %509 = vrot.lane.b32.xlu0 %v1081_v42, %s1206_s7 }
 0x119   : > { %527 = vrot.lane.b32.xlu1 %v1090_v39, %s1206_s7  ;;  %525 = vrot.lane.b32.xlu0 %v1089_v43, %s1206_s7 }
 0x11d   : > { %576 = vrot.lane.b32.xlu1 %v1082_v38, %s1207_s8  ;;  %574 = vrot.lane.b32.xlu0 %v1081_v42, %s1207_s8  ;;  %v665_v38 = vld [vmem:[%s1303_s5 + $0x10] sm:$0xff] (%p1248_p4)  }
 0x11e   : > { %666 = vst [vmem:[%s1490_s15 + $0x10] sm:$0xff] (%p1248_p4), %v665_v38   ;;  %v681_v42 = vld [vmem:[%s1303_s5 + $0x30] sm:$0xff] (%p1248_p4)  }
 0x11f   : > { %682 = vst [vmem:[%s1490_s15 + $0x30] sm:$0xff] (%p1248_p4), %v681_v42  }
 0x121   : > { %592 = vrot.lane.b32.xlu1 %v1090_v39, %s1207_s8  ;;  %590 = vrot.lane.b32.xlu0 %v1089_v43, %s1207_s8  ;;  %v669_v39 = vld [vmem:[%s1303_s5 + $0x18] sm:$0xff] (%p1248_p4)  }
 0x122   : > { %670 = vst [vmem:[%s1490_s15 + $0x18] sm:$0xff] (%p1248_p4), %v669_v39   ;;  %v685_v43 = vld [vmem:[%s1303_s5 + $0x38] sm:$0xff] (%p1248_p4)  }
 0x123   : > { %686 = vst [vmem:[%s1490_s15 + $0x38] sm:$0xff] (%p1248_p4), %v685_v43  }
 0x125   : > { %450 = vrot.lane.b32.xlu1 %v1084_v46, %s1205_s6  ;;  %448 = vrot.lane.b32.xlu0 %v1083_v50, %s1205_s6 }
 0x129   : > { %466 = vrot.lane.b32.xlu1 %v1092_v47, %s1205_s6  ;;  %464 = vrot.lane.b32.xlu0 %v1091_v51, %s1205_s6 }
 0x12d   : > { %515 = vrot.lane.b32.xlu1 %v1084_v46, %s1206_s7  ;;  %513 = vrot.lane.b32.xlu0 %v1083_v50, %s1206_s7 }
 0x131   : > { %531 = vrot.lane.b32.xlu1 %v1092_v47, %s1206_s7  ;;  %529 = vrot.lane.b32.xlu0 %v1091_v51, %s1206_s7 }
 0x135   : > { %580 = vrot.lane.b32.xlu1 %v1084_v46, %s1207_s8  ;;  %578 = vrot.lane.b32.xlu0 %v1083_v50, %s1207_s8 }
 0x139   : > { %596 = vrot.lane.b32.xlu1 %v1092_v47, %s1207_s8  ;;  %594 = vrot.lane.b32.xlu0 %v1091_v51, %s1207_s8 }
 0x14f   : > { %v455_v52 = vpop.permute.xlu1 %454  ;;  %v439_v53 = vpop.permute.xlu0 %438 }
 0x150   : > { %1033 = vst.msk [vmem:[%s1303_s5 + $0x64] sm:$0xf] %vm419_vm1, %v455_v52  ;;  %1025 = vst.msk [vmem:[%s1303_s5 + $0x44] sm:$0xf] %vm419_vm1, %v439_v53 }
 0x153   : > { %v504_v54 = vpop.permute.xlu1 %503  ;;  %v437_v55 = vpop.permute.xlu0 %436 }
 0x154   : > { %1041 = vst.msk [vmem:[%s1303_s5 + $0x84] sm:$0xf] %vm419_vm1, %v504_v54  ;;  %1024 = vst.msk [vmem:[%s1303_s5 + $0x40] sm:$0xf] %vm419_vm1, %v437_v55 }
 0x157   : > { %v520_v56 = vpop.permute.xlu1 %519  ;;  %v453_v57 = vpop.permute.xlu0 %452 }
 0x158   : > { %1049 = vst.msk [vmem:[%s1303_s5 + $0xa4] sm:$0xf] %vm419_vm1, %v520_v56  ;;  %1032 = vst.msk [vmem:[%s1303_s5 + $0x60] sm:$0xf] %vm419_vm1, %v453_v57 }
 0x15b   : > { %v569_v58 = vpop.permute.xlu1 %568  ;;  %v502_v59 = vpop.permute.xlu0 %501  ;;  %v689_v44 = vld [vmem:[%s1303_s5 + $0x40] sm:$0xff] (%p1248_p4)  }
 0x15c   : > { %1057 = vst.msk [vmem:[%s1303_s5 + $0xc4] sm:$0xf] %vm419_vm1, %v569_v58  ;;  %1040 = vst.msk [vmem:[%s1303_s5 + $0x80] sm:$0xf] %vm419_vm1, %v502_v59 }
 0x15d   : > { %690 = vst [vmem:[%s1490_s15 + $0x80] sm:$0xff] (%p1248_p4), %v689_v44  }
 0x15f   : > { %v585_v60 = vpop.permute.xlu1 %584  ;;  %v518_v61 = vpop.permute.xlu0 %517  ;;  %v705_v48 = vld [vmem:[%s1303_s5 + $0x60] sm:$0xff] (%p1248_p4)  }
 0x160   : > { %1065 = vst.msk [vmem:[%s1303_s5 + $0xe4] sm:$0xf] %vm419_vm1, %v585_v60  ;;  %1048 = vst.msk [vmem:[%s1303_s5 + $0xa0] sm:$0xf] %vm419_vm1, %v518_v61 }
 0x161   : > { %706 = vst [vmem:[%s1490_s15 + $0xa0] sm:$0xff] (%p1248_p4), %v705_v48  }
 0x163   : > { %v567_v62 = vpop.permute.xlu0 %566  ;;  %v443_v63 = vpop.permute.xlu1 %442  ;;  %v721_v52 = vld [vmem:[%s1303_s5 + $0x80] sm:$0xff] (%p1248_p4)  }
 0x164   : > { %1056 = vst.msk [vmem:[%s1303_s5 + $0xc0] sm:$0xf] %vm419_vm1, %v567_v62  ;;  %1027 = vst.msk [vmem:[%s1303_s5 + $0x4c] sm:$0xf] %vm419_vm1, %v443_v63 }
 0x165   : > { %722 = vst [vmem:[%s1490_s15 + $0x100] sm:$0xff] (%p1248_p4), %v721_v52  }
 0x167   : > { %v583_v0 = vpop.permute.xlu0 %582  ;;  %v459_v1 = vpop.permute.xlu1 %458  ;;  %v737_v56 = vld [vmem:[%s1303_s5 + $0xa0] sm:$0xff] (%p1248_p4)  }
 0x168   : > { %1064 = vst.msk [vmem:[%s1303_s5 + $0xe0] sm:$0xf] %vm419_vm1, %v583_v0  ;;  %1035 = vst.msk [vmem:[%s1303_s5 + $0x6c] sm:$0xf] %vm419_vm1, %v459_v1 }
 0x169   : > { %738 = vst [vmem:[%s1490_s15 + $0x120] sm:$0xff] (%p1248_p4), %v737_v56  }
 0x16b   : > { %v457_v2 = vpop.permute.xlu0 %456  ;;  %v508_v3 = vpop.permute.xlu1 %507  ;;  %v753_v60 = vld [vmem:[%s1303_s5 + $0xc0] sm:$0xff] (%p1248_p4)  }
 0x16c   : > { %1034 = vst.msk [vmem:[%s1303_s5 + $0x68] sm:$0xf] %vm419_vm1, %v457_v2  ;;  %1043 = vst.msk [vmem:[%s1303_s5 + $0x8c] sm:$0xf] %vm419_vm1, %v508_v3 }
 0x16d   : > { %754 = vst [vmem:[%s1490_s15 + $0x180] sm:$0xff] (%p1248_p4), %v753_v60  }
 0x16f   : > { %v524_v4 = vpop.permute.xlu1 %523  ;;  %v506_v5 = vpop.permute.xlu0 %505  ;;  %v769_v0 = vld [vmem:[%s1303_s5 + $0xe0] sm:$0xff] (%p1248_p4)  }
 0x170   : > { %1051 = vst.msk [vmem:[%s1303_s5 + $0xac] sm:$0xf] %vm419_vm1, %v524_v4  ;;  %1042 = vst.msk [vmem:[%s1303_s5 + $0x88] sm:$0xf] %vm419_vm1, %v506_v5 }
 0x171   : > { %770 = vst [vmem:[%s1490_s15 + $0x1a0] sm:$0xff] (%p1248_p4), %v769_v0  }
 0x173   : > { %v573_v6 = vpop.permute.xlu1 %572  ;;  %v522_v7 = vpop.permute.xlu0 %521  ;;  %v709_v49 = vld [vmem:[%s1303_s5 + $0x68] sm:$0xff] (%p1248_p4)  }
 0x174   : > { %1059 = vst.msk [vmem:[%s1303_s5 + $0xcc] sm:$0xf] %vm419_vm1, %v573_v6  ;;  %1050 = vst.msk [vmem:[%s1303_s5 + $0xa8] sm:$0xf] %vm419_vm1, %v522_v7 }
 0x175   : > { %710 = vst [vmem:[%s1490_s15 + $0xa8] sm:$0xff] (%p1248_p4), %v709_v49  }
 0x177   : > { %v589_v8 = vpop.permute.xlu1 %588  ;;  %v571_v9 = vpop.permute.xlu0 %570  ;;  %v725_v53 = vld [vmem:[%s1303_s5 + $0x88] sm:$0xff] (%p1248_p4)  }
 0x178   : > { %1067 = vst.msk [vmem:[%s1303_s5 + $0xec] sm:$0xf] %vm419_vm1, %v589_v8  ;;  %1058 = vst.msk [vmem:[%s1303_s5 + $0xc8] sm:$0xf] %vm419_vm1, %v571_v9 }
 0x179   : > { %726 = vst [vmem:[%s1490_s15 + $0x108] sm:$0xff] (%p1248_p4), %v725_v53  }
 0x17b   : > { %v587_v10 = vpop.permute.xlu0 %586  ;;  %v441_v11 = vpop.permute.xlu1 %440  ;;  %v741_v57 = vld [vmem:[%s1303_s5 + $0xa8] sm:$0xff] (%p1248_p4)  }
 0x17c   : > { %1066 = vst.msk [vmem:[%s1303_s5 + $0xe8] sm:$0xf] %vm419_vm1, %v587_v10  ;;  %1026 = vst.msk [vmem:[%s1303_s5 + $0x48] sm:$0xf] %vm419_vm1, %v441_v11 }
 0x17d   : > { %742 = vst [vmem:[%s1490_s15 + $0x128] sm:$0xff] (%p1248_p4), %v741_v57  }
 0x17f   : > { %v447_v12 = vpop.permute.xlu1 %446  ;;  %v445_v13 = vpop.permute.xlu0 %444  ;;  %v757_v61 = vld [vmem:[%s1303_s5 + $0xc8] sm:$0xff] (%p1248_p4)  }
 0x180   : > { %1029 = vst.msk [vmem:[%s1303_s5 + $0x54] sm:$0xf] %vm419_vm1, %v447_v12  ;;  %1028 = vst.msk [vmem:[%s1303_s5 + $0x50] sm:$0xf] %vm419_vm1, %v445_v13 }
 0x181   : > { %758 = vst [vmem:[%s1490_s15 + $0x188] sm:$0xff] (%p1248_p4), %v757_v61  }
 0x183   : > { %v463_v14 = vpop.permute.xlu1 %462  ;;  %v461_v15 = vpop.permute.xlu0 %460  ;;  %v693_v45 = vld [vmem:[%s1303_s5 + $0x48] sm:$0xff] (%p1248_p4)  }
 0x184   : > { %1037 = vst.msk [vmem:[%s1303_s5 + $0x74] sm:$0xf] %vm419_vm1, %v463_v14  ;;  %1036 = vst.msk [vmem:[%s1303_s5 + $0x70] sm:$0xf] %vm419_vm1, %v461_v15  ;;  %v773_v1 = vld [vmem:[%s1303_s5 + $0xe8] sm:$0xff] (%p1248_p4)  }
 0x185   : > { %694 = vst [vmem:[%s1490_s15 + $0x88] sm:$0xff] (%p1248_p4), %v693_v45   ;;  %774 = vst [vmem:[%s1490_s15 + $0x1a8] sm:$0xff] (%p1248_p4), %v773_v1  }
 0x187   : > { %v512_v16 = vpop.permute.xlu1 %511  ;;  %v510_v17 = vpop.permute.xlu0 %509  ;;  %v697_v46 = vld [vmem:[%s1303_s5 + $0x50] sm:$0xff] (%p1248_p4)  }
 0x188   : > { %1045 = vst.msk [vmem:[%s1303_s5 + $0x94] sm:$0xf] %vm419_vm1, %v512_v16  ;;  %1044 = vst.msk [vmem:[%s1303_s5 + $0x90] sm:$0xf] %vm419_vm1, %v510_v17 }
 0x189   : > { %698 = vst [vmem:[%s1490_s15 + $0x90] sm:$0xff] (%p1248_p4), %v697_v46  }
 0x18b   : > { %v528_v18 = vpop.permute.xlu1 %527  ;;  %v526_v19 = vpop.permute.xlu0 %525  ;;  %v713_v50 = vld [vmem:[%s1303_s5 + $0x70] sm:$0xff] (%p1248_p4)  }
 0x18c   : > { %1053 = vst.msk [vmem:[%s1303_s5 + $0xb4] sm:$0xf] %vm419_vm1, %v528_v18  ;;  %1052 = vst.msk [vmem:[%s1303_s5 + $0xb0] sm:$0xf] %vm419_vm1, %v526_v19 }
 0x18d   : > { %714 = vst [vmem:[%s1490_s15 + $0xb0] sm:$0xff] (%p1248_p4), %v713_v50  }
 0x18f   : > { %v577_v20 = vpop.permute.xlu1 %576  ;;  %v575_v21 = vpop.permute.xlu0 %574  ;;  %v729_v54 = vld [vmem:[%s1303_s5 + $0x90] sm:$0xff] (%p1248_p4)  }
 0x190   : > { %1061 = vst.msk [vmem:[%s1303_s5 + $0xd4] sm:$0xf] %vm419_vm1, %v577_v20  ;;  %1060 = vst.msk [vmem:[%s1303_s5 + $0xd0] sm:$0xf] %vm419_vm1, %v575_v21 }
 0x191   : > { %730 = vst [vmem:[%s1490_s15 + $0x110] sm:$0xff] (%p1248_p4), %v729_v54  }
 0x193   : > { %v593_v22 = vpop.permute.xlu1 %592  ;;  %v591_v23 = vpop.permute.xlu0 %590  ;;  %v745_v58 = vld [vmem:[%s1303_s5 + $0xb0] sm:$0xff] (%p1248_p4)  }
 0x194   : > { %1069 = vst.msk [vmem:[%s1303_s5 + $0xf4] sm:$0xf] %vm419_vm1, %v593_v22  ;;  %1068 = vst.msk [vmem:[%s1303_s5 + $0xf0] sm:$0xf] %vm419_vm1, %v591_v23 }
 0x195   : > { %746 = vst [vmem:[%s1490_s15 + $0x130] sm:$0xff] (%p1248_p4), %v745_v58  }
 0x197   : > { %v451_v24 = vpop.permute.xlu1 %450  ;;  %v449_v25 = vpop.permute.xlu0 %448  ;;  %v761_v62 = vld [vmem:[%s1303_s5 + $0xd0] sm:$0xff] (%p1248_p4)  }
 0x198   : > { %1031 = vst.msk [vmem:[%s1303_s5 + $0x5c] sm:$0xf] %vm419_vm1, %v451_v24  ;;  %1030 = vst.msk [vmem:[%s1303_s5 + $0x58] sm:$0xf] %vm419_vm1, %v449_v25 }
 0x199   : > { %762 = vst [vmem:[%s1490_s15 + $0x190] sm:$0xff] (%p1248_p4), %v761_v62  }
 0x19b   : > { %v467_v26 = vpop.permute.xlu1 %466  ;;  %v465_v27 = vpop.permute.xlu0 %464  ;;  %v777_v2 = vld [vmem:[%s1303_s5 + $0xf0] sm:$0xff] (%p1248_p4)  }
 0x19c   : > { %1039 = vst.msk [vmem:[%s1303_s5 + $0x7c] sm:$0xf] %vm419_vm1, %v467_v26  ;;  %1038 = vst.msk [vmem:[%s1303_s5 + $0x78] sm:$0xf] %vm419_vm1, %v465_v27 }
 0x19d   : > { %778 = vst [vmem:[%s1490_s15 + $0x1b0] sm:$0xff] (%p1248_p4), %v777_v2  }
 0x19f   : > { %v516_v28 = vpop.permute.xlu1 %515  ;;  %v514_v29 = vpop.permute.xlu0 %513  ;;  %v701_v47 = vld [vmem:[%s1303_s5 + $0x58] sm:$0xff] (%p1248_p4)  }
 0x1a0   : > { %1047 = vst.msk [vmem:[%s1303_s5 + $0x9c] sm:$0xf] %vm419_vm1, %v516_v28  ;;  %1046 = vst.msk [vmem:[%s1303_s5 + $0x98] sm:$0xf] %vm419_vm1, %v514_v29 }
 0x1a1   : > { %702 = vst [vmem:[%s1490_s15 + $0x98] sm:$0xff] (%p1248_p4), %v701_v47  }
 0x1a3   : > { %v532_v30 = vpop.permute.xlu1 %531  ;;  %v530_v31 = vpop.permute.xlu0 %529  ;;  %v717_v51 = vld [vmem:[%s1303_s5 + $0x78] sm:$0xff] (%p1248_p4)  }
 0x1a4   : > { %1055 = vst.msk [vmem:[%s1303_s5 + $0xbc] sm:$0xf] %vm419_vm1, %v532_v30  ;;  %1054 = vst.msk [vmem:[%s1303_s5 + $0xb8] sm:$0xf] %vm419_vm1, %v530_v31 }
 0x1a5   : > { %718 = vst [vmem:[%s1490_s15 + $0xb8] sm:$0xff] (%p1248_p4), %v717_v51  }
 0x1a7   : > { %v581_v32 = vpop.permute.xlu1 %580  ;;  %v579_v33 = vpop.permute.xlu0 %578  ;;  %v733_v55 = vld [vmem:[%s1303_s5 + $0x98] sm:$0xff] (%p1248_p4)  }
 0x1a8   : > { %1063 = vst.msk [vmem:[%s1303_s5 + $0xdc] sm:$0xf] %vm419_vm1, %v581_v32  ;;  %1062 = vst.msk [vmem:[%s1303_s5 + $0xd8] sm:$0xf] %vm419_vm1, %v579_v33  ;;  %637 = sbr.rel (!%p1248_p4) target bundleno = 437 (0x1b5), region = 32 }
 0x1a9   : > { %734 = vst [vmem:[%s1490_s15 + $0x118] sm:$0xff] (%p1248_p4), %v733_v55  }
 0x1ab   : > { %v597_v34 = vpop.permute.xlu1 %596  ;;  %v595_v35 = vpop.permute.xlu0 %594  ;;  %v749_v59 = vld [vmem:[%s1303_s5 + $0xb8] sm:$0xff] (%p1248_p4)  }
 0x1ac   : > { %1071 = vst.msk [vmem:[%s1303_s5 + $0xfc] sm:$0xf] %vm419_vm1, %v597_v34  ;;  %1070 = vst.msk [vmem:[%s1303_s5 + $0xf8] sm:$0xf] %vm419_vm1, %v595_v35 }
 0x1ad   : > { %750 = vst [vmem:[%s1490_s15 + $0x138] sm:$0xff] %v749_v59  }
 0x1af   : > { %v765_v63 = vld [vmem:[%s1303_s5 + $0xd8] sm:$0xff]  }
 0x1b0   : > { %766 = vst [vmem:[%s1490_s15 + $0x198] sm:$0xff] %v765_v63  }
 0x1b3   : > { %v781_v3 = vld [vmem:[%s1303_s5 + $0xf8] sm:$0xff]  }
 0x1b4   : > { %782 = vst [vmem:[%s1490_s15 + $0x1b8] sm:$0xff] %v781_v3  }
 0x1b5 PF: > { %p9_p8 = scmp.ge.s32.totalorder %s1238_s13, 4   ;;  %s1567_s9 = smov %s1199_s10 }
 0x1b6   : > { %s1568_s10 = smov %s1246_s16  ;;  %s1569_s11 = smov %s1238_s13 }
 0x1b7   :  { %11 = sbr.rel (!%p9_p8) target bundleno = 2 (0x2), region = 102 }

// kernel: hglr_forward.11
= control target key start
LH: loop header
LB: loop body
LE: loop exit
PB: predicated region body
PF: predicated region fallthrough
CT: control target
= control target key end

     0   :  { %s648_s9 = smov 0   ;;  %s749_s0 = inlined_call_operand.vmem [shape: f32[4,256,32], index: 0, kind: input, shape index: {}]   ;;  %s750_s1 = inlined_call_operand.vmem [shape: f32[32,32], index: 1, kind: input, shape index: {}]   ;;  %s751_s2 = inlined_call_operand.vmem [shape: bf16[256,32], index: 2, kind: output, shape index: {}]  }
   0x1 LB: > { %s498_s10 = sadd.s32 4294967295, %s631_s9   ;;  %p502_p0 = scmp.ge.s32.totalorder %s631_s9, 1  ;;  %s631_s9 = sphi %s648_s9, %s12_s9  }
   0x2   : > { %p113_p1 = scmp.lt.s32.totalorder %s631_s9, 3 }
   0x4   : > { %p114_p2 = pnand %p502_p0, %p113_p1 }
   0x5   : > { %s503_s15 = sshll.u32 (!%p114_p2), %s498_s10, 4 }
   0x6   : > { %117 = sbr.rel (%p114_p2) target bundleno = 231 (0xe7), region = 28  ;;  %p136_p3 = scmp.lt.s32.totalorder (!%p114_p2), %s503_s15, 31 }
   0xb   : > { %v166_v0 = vld [vmem:[%s750_s1 + $0x18] sm:$0xff]  ;;  %v165_v1 = vld [vmem:[%s750_s1 + $0x10] sm:$0xff]  ;;  %v164_v2 = vld [vmem:[%s750_s1 + $0x8] sm:$0xff]  ;;  %s753_s15 = smov (!%p136_p3, %s503_s15), 31  ;;  %vm167_vm0 = vcmask 261120   ;;  %vm425_vm1 = vcmask 257024  }
   0xc   : > { %577 = vmatprep.subr.mxu0 %v166_v0  ;;  %609 = vmatprep.subr.mxu1 %v166_v0  ;;  %v163_v3 = vld [vmem:[%s750_s1] sm:$0xff]  ;;  %s504_s20 = sshll.u32 %s753_s15, 3  ;;  %s506_s24 = sshll.u32 %s753_s15, 2 }
   0xd   : > { %578 = vmatpush3.msra.mxu0 %v166_v0  ;;  %613 = vmatpush3.msra.mxu1 %v166_v0  ;;  %s674_s23 = scalar_lea.vmem %s749_s0, %s504_s20  ;;  %s712_s27 = scalar_lea.vmem %s751_s2, %s506_s24 }
   0xe   : > { %579 = vmatprep.subr.mxu0 %v165_v1  ;;  %610 = vmatprep.subr.mxu1 %v165_v1  ;;  %v147_v4 = vld [vmem:[%s674_s23] sm:$0xff]  ;;  %v148_v6 = vld [vmem:[%s674_s23 + $0x8] sm:$0xff]  ;;  %v149_v8 = vld [vmem:[%s674_s23 + $0x10] sm:$0xff] }
   0xf   : > { %580 = vmatpush3.msra.mxu0 %v165_v1  ;;  %614 = vmatpush3.msra.mxu1 %v165_v1  ;;  %v155_v5 = vld [vmem:[%s674_s23 + $0x40] sm:$0xff]  ;;  %v156_v7 = vld [vmem:[%s674_s23 + $0x48] sm:$0xff]  ;;  %v157_v9 = vld [vmem:[%s674_s23 + $0x50] sm:$0xff] }
  0x10   : > { %581 = vmatprep.subr.mxu0 %v164_v2  ;;  %611 = vmatprep.subr.mxu1 %v164_v2  ;;  %v150_v10 = vld [vmem:[%s674_s23 + $0x18] sm:$0xff]  ;;  %v151_v12 = vld [vmem:[%s674_s23 + $0x20] sm:$0xff]  ;;  %v152_v14 = vld [vmem:[%s674_s23 + $0x28] sm:$0xff] }
  0x11   : > { %582 = vmatpush3.msra.mxu0 %v164_v2  ;;  %615 = vmatpush3.msra.mxu1 %v164_v2  ;;  %v158_v11 = vld [vmem:[%s674_s23 + $0x58] sm:$0xff]  ;;  %v159_v13 = vld [vmem:[%s674_s23 + $0x60] sm:$0xff]  ;;  %v160_v15 = vld [vmem:[%s674_s23 + $0x68] sm:$0xff] }
  0x12   : > { %583 = vmatprep.subr.mxu0 %v163_v3  ;;  %612 = vmatprep.subr.mxu1 %v163_v3  ;;  %v153_v16 = vld [vmem:[%s674_s23 + $0x30] sm:$0xff]  ;;  %v154_v18 = vld [vmem:[%s674_s23 + $0x38] sm:$0xff] }
  0x13   : > { %584 = vmatpush3.msra.mxu0 %v163_v3  ;;  %616 = vmatpush3.msra.mxu1 %v163_v3  ;;  %v161_v17 = vld [vmem:[%s674_s23 + $0x70] sm:$0xff]  ;;  %v162_v19 = vld [vmem:[%s674_s23 + $0x78] sm:$0xff] }
  0x14   : > { %585 = vmatprep.mubr.msk.f32.mxu0 %vm167_vm0, %v147_v4  ;;  %597 = vmatprep.mubr.msk.f32.mxu1 %vm167_vm0, %v155_v5 }
  0x15   : > { %586 = vmatmul.mubr.msk.f32.vlgmr.msra.gmra.mxu0 %vm167_vm0, %v148_v6  ;;  %598 = vmatmul.mubr.msk.f32.vlgmr.msra.gmra.mxu1 %vm167_vm0, %v156_v7 }
  0x16   : > { %588 = vmatprep.mubr.msk.f32.mxu0 %vm167_vm0, %v149_v8  ;;  %600 = vmatprep.mubr.msk.f32.mxu1 %vm167_vm0, %v157_v9 }
  0x19   : > { %589 = vmatmul.mubr.msk.f32.gmra.mxu0 %vm167_vm0, %v150_v10  ;;  %601 = vmatmul.mubr.msk.f32.gmra.mxu1 %vm167_vm0, %v158_v11 }
  0x1a   : > { %591 = vmatprep.mubr.msk.f32.mxu0 %vm167_vm0, %v151_v12  ;;  %603 = vmatprep.mubr.msk.f32.mxu1 %vm167_vm0, %v159_v13 }
  0x1d   : > { %592 = vmatmul.mubr.msk.f32.gmra.mxu0 %vm167_vm0, %v152_v14  ;;  %604 = vmatmul.mubr.msk.f32.gmra.mxu1 %vm167_vm0, %v160_v15 }
  0x1e   : > { %594 = vmatprep.mubr.msk.f32.mxu0 %vm167_vm0, %v153_v16  ;;  %606 = vmatprep.mubr.msk.f32.mxu1 %vm167_vm0, %v161_v17 }
  0x21   : > { %595 = vmatmul.mubr.msk.f32.gmra.mxu0 %vm167_vm0, %v154_v18  ;;  %607 = vmatmul.mubr.msk.f32.gmra.mxu1 %vm167_vm0, %v162_v19 }
  0xd5   : > { %v587_v20 = vpop.f32.mrf.mxu0  ;;  %v599_v21 = vpop.f32.mrf.mxu1 }
  0xd6   : > { %v542_v22 = vpack.c.bf16 %v587_v20, %v587_v20  ;;  %v550_v23 = vpack.c.bf16 %v599_v21, %v599_v21 }
  0xd7   : > { %v282_v24 = vpop.f32.mrf.mxu0  ;;  %v322_v25 = vpop.f32.mrf.mxu1 }
  0xd8   : > { %427 = vst.msk [vmem:[%s712_s27 + $0x4] sm:$0xf] %vm425_vm1, %v542_v22  ;;  %435 = vst.msk [vmem:[%s712_s27 + $0x24] sm:$0xf] %vm425_vm1, %v550_v23  ;;  %v541_v26 = vpack.c.bf16 %v282_v24, %v282_v24  ;;  %v549_v27 = vpack.c.bf16 %v322_v25, %v322_v25 }
  0xd9   : > { %v590_v28 = vpop.f32.mrf.mxu0  ;;  %v602_v29 = vpop.f32.mrf.mxu1 }
  0xda   : > { %426 = vst.msk [vmem:[%s712_s27] sm:$0xf] %vm425_vm1, %v541_v26  ;;  %434 = vst.msk [vmem:[%s712_s27 + $0x20] sm:$0xf] %vm425_vm1, %v549_v27  ;;  %v544_v30 = vpack.c.bf16 %v590_v28, %v590_v28  ;;  %v552_v31 = vpack.c.bf16 %v602_v29, %v602_v29 }
  0xdb   : > { %v292_v32 = vpop.f32.mrf.mxu0  ;;  %v332_v33 = vpop.f32.mrf.mxu1 }
  0xdc   : > { %429 = vst.msk [vmem:[%s712_s27 + $0xc] sm:$0xf] %vm425_vm1, %v544_v30  ;;  %437 = vst.msk [vmem:[%s712_s27 + $0x2c] sm:$0xf] %vm425_vm1, %v552_v31  ;;  %v543_v34 = vpack.c.bf16 %v292_v32, %v292_v32  ;;  %v551_v35 = vpack.c.bf16 %v332_v33, %v332_v33 }
  0xdd   : > { %v593_v36 = vpop.f32.mrf.mxu0  ;;  %v605_v37 = vpop.f32.mrf.mxu1 }
  0xde   : > { %428 = vst.msk [vmem:[%s712_s27 + $0x8] sm:$0xf] %vm425_vm1, %v543_v34  ;;  %436 = vst.msk [vmem:[%s712_s27 + $0x28] sm:$0xf] %vm425_vm1, %v551_v35  ;;  %v546_v38 = vpack.c.bf16 %v593_v36, %v593_v36  ;;  %v554_v39 = vpack.c.bf16 %v605_v37, %v605_v37 }
  0xdf   : > { %v302_v40 = vpop.f32.mrf.mxu0  ;;  %v342_v41 = vpop.f32.mrf.mxu1 }
  0xe0   : > { %431 = vst.msk [vmem:[%s712_s27 + $0x14] sm:$0xf] %vm425_vm1, %v546_v38  ;;  %439 = vst.msk [vmem:[%s712_s27 + $0x34] sm:$0xf] %vm425_vm1, %v554_v39  ;;  %v545_v42 = vpack.c.bf16 %v302_v40, %v302_v40  ;;  %v553_v43 = vpack.c.bf16 %v342_v41, %v342_v41 }
  0xe1   : > { %v596_v44 = vpop.f32.mrf.mxu0  ;;  %v608_v45 = vpop.f32.mrf.mxu1 }
  0xe2   : > { %430 = vst.msk [vmem:[%s712_s27 + $0x10] sm:$0xf] %vm425_vm1, %v545_v42  ;;  %438 = vst.msk [vmem:[%s712_s27 + $0x30] sm:$0xf] %vm425_vm1, %v553_v43  ;;  %v548_v46 = vpack.c.bf16 %v596_v44, %v596_v44  ;;  %v556_v47 = vpack.c.bf16 %v608_v45, %v608_v45 }
  0xe3   : > { %v312_v48 = vpop.f32.mrf.mxu0  ;;  %v352_v49 = vpop.f32.mrf.mxu1 }
  0xe4   : > { %433 = vst.msk [vmem:[%s712_s27 + $0x1c] sm:$0xf] %vm425_vm1, %v548_v46  ;;  %441 = vst.msk [vmem:[%s712_s27 + $0x3c] sm:$0xf] %vm425_vm1, %v556_v47  ;;  %v547_v50 = vpack.c.bf16 %v312_v48, %v312_v48  ;;  %v555_v51 = vpack.c.bf16 %v352_v49, %v352_v49 }
  0xe6   : > { %432 = vst.msk [vmem:[%s712_s27 + $0x18] sm:$0xf] %vm425_vm1, %v547_v50  ;;  %440 = vst.msk [vmem:[%s712_s27 + $0x38] sm:$0xf] %vm425_vm1, %v555_v51 }
  0xe7 PF: > { %s12_s9 = sadd.s32 1, %s631_s9  }
  0xe8   : > { %p9_p4 = scmp.ge.s32.totalorder %s12_s9, 4  }
  0xea   :  { %11 = sbr.rel (!%p9_p4) target bundleno = 1 (0x1), region = 58 }

// kernel: hglr_forward.8
= control target key start
LH: loop header
LB: loop body
LE: loop exit
PB: predicated region body
PF: predicated region fallthrough
CT: control target
= control target key end

     0   :  { %s2851_s13 = smov 0   ;;  %s2853_s14 = smov 0   ;;  %s3514_s0 = inlined_call_operand.vmem [shape: bf16[192,192], index: 0, kind: input, shape index: {}]   ;;  %s3515_s1 = inlined_call_operand.vmem [shape: bf16[192,32], index: 1, kind: input, shape index: {}]   ;;  %s3516_s2 = inlined_call_operand.vmem [shape: f32[1,32], index: 2, kind: input, shape index: {}]   ;;  %s3517_s3 = inlined_call_operand.vmem [shape: f32[2,192,16], index: 3, kind: input, shape index: {}]   ;;  %s3518_s4 = inlined_call_operand.vmem [shape: f32[2,16,32], index: 4, kind: input, shape index: {}]   ;;  %s3519_s5 = inlined_call_operand.vmem [shape: f32[1,32], index: 5, kind: input, shape index: {}]   ;;  %s3520_s6 = inlined_call_operand.vmem [shape: f32[64,32], index: 6, kind: input, shape index: {}]   ;;  %s3521_s7 = inlined_call_operand.vmem [shape: f32[1,32], index: 7, kind: input, shape index: {}]   ;;  %s3522_s8 = inlined_call_operand.vmem [shape: f32[64,32], index: 8, kind: input, shape index: {}]   ;;  %s3523_s9 = inlined_call_operand.vmem [shape: f32[1,32], index: 9, kind: input, shape index: {}]   ;;  %s3524_s10 = inlined_call_operand.vmem [shape: f32[192,32], index: 10, kind: output, shape index: {}]  }
   0x1   :  { %s2855_s15 = smov 0   ;;  %s2857_s16 = smov 0  }
   0x2   :  { %s2859_s17 = smov 0  }
   0x3 LB: > { %s32_s18 = sadd.s32 1, %s2788_s16  ;;  %p121_p1 = scmp.ne.s32.totalorder %s2780_s14, %s2776_s13  ;;  %s2792_s17 = sphi %s2859_s17, %s20_s17   ;;  %s2788_s16 = sphi %s2857_s16, %s3528_s16   ;;  %s2784_s15 = sphi %s2855_s15, %s3527_s15   ;;  %s2780_s14 = sphi %s2853_s14, %s3526_s14   ;;  %s2776_s13 = sphi %s2851_s13, %s3525_s13  }
   0x4   : > { %p34_p0 = scmp.ge.s32.totalorder %s32_s18, 2  ;;  %p122_p2 = scmp.eq.s32.totalorder %s2792_s17, 0 }
   0x5   : > { %s114_s20 = sadd.s32 1, %s2780_s14  ;;  %p2226_p5 = scmp.ge.s32.totalorder %s2792_s17, 2 }
   0x6   : > { %s3530_s18 = smov (%p34_p0, %s32_s18), 0  ;;  %p123_p3 = por %p122_p2, %p121_p1 }
   0x7   : > { %s111_s19 = ssub.s32 %s2788_s16, %s3530_s18  ;;  %329 = sbr.rel (%p2226_p5) target bundleno = 29 (0x1d), region = 48 }
   0x8   : > { %p112_p4 = scmp.eq.s32.totalorder %s111_s19, 0 }
   0xa   : > { %s2886_s21 = scalar_select %p112_p4, %s2780_s14, %s114_s20  }
   0xc   : > { %347 = sbr.rel (!%p123_p3) target bundleno = 29 (0x1d), region = 56  ;;  %s349_s22 = sand.u32 (%p123_p3), 1, %s2780_s14  }
   0xd   : > { %s2366_s23 = smul.u32 (%p123_p3), 96, %s2788_s16 }
   0xe   : > { %s2608_s24 = smul.u32 (%p123_p3), 192, %s349_s22 }
   0xf   : > { %s2894_s27 = scalar_lea.vmem (%p123_p3), %s3517_s3, %s2366_s23 }
  0x10   : > { %v429_v0 = vld [vmem:[%s2894_s27] sm:$0xff] (%p123_p3)  ;;  %v431_v1 = vld [vmem:[%s2894_s27 + $0x8] sm:$0xff] (%p123_p3)  ;;  %v433_v2 = vld [vmem:[%s2894_s27 + $0x10] sm:$0xff] (%p123_p3)  ;;  %s2899_s28 = scalar_lea.vmem (%p123_p3), [#allocation3], %s2608_s24 }
  0x11   : > { %430 = vst [vmem:[%s2899_s28] sm:$0xff] %v429_v0  ;;  %432 = vst [vmem:[%s2899_s28 + $0x8] sm:$0xff] %v431_v1  ;;  %v435_v3 = vld [vmem:[%s2894_s27 + $0x18] sm:$0xff]  ;;  %v437_v4 = vld [vmem:[%s2894_s27 + $0x20] sm:$0xff] }
  0x12   : > { %434 = vst [vmem:[%s2899_s28 + $0x10] sm:$0xff] %v433_v2  ;;  %v439_v5 = vld [vmem:[%s2894_s27 + $0x28] sm:$0xff]  ;;  %436 = vst [vmem:[%s2899_s28 + $0x18] sm:$0xff] %v435_v3  ;;  %v441_v6 = vld [vmem:[%s2894_s27 + $0x30] sm:$0xff] }
  0x13   : > { %438 = vst [vmem:[%s2899_s28 + $0x20] sm:$0xff] %v437_v4  ;;  %440 = vst [vmem:[%s2899_s28 + $0x28] sm:$0xff] %v439_v5  ;;  %v443_v7 = vld [vmem:[%s2894_s27 + $0x38] sm:$0xff]  ;;  %v445_v8 = vld [vmem:[%s2894_s27 + $0x40] sm:$0xff] }
  0x14   : > { %442 = vst [vmem:[%s2899_s28 + $0x30] sm:$0xff] %v441_v6  ;;  %444 = vst [vmem:[%s2899_s28 + $0x38] sm:$0xff] %v443_v7  ;;  %v447_v9 = vld [vmem:[%s2894_s27 + $0x48] sm:$0xff]  ;;  %v449_v10 = vld [vmem:[%s2894_s27 + $0x50] sm:$0xff] }
  0x15   : > { %446 = vst [vmem:[%s2899_s28 + $0x40] sm:$0xff] %v445_v8  ;;  %v451_v11 = vld [vmem:[%s2894_s27 + $0x58] sm:$0xff]  ;;  %448 = vst [vmem:[%s2899_s28 + $0x48] sm:$0xff] %v447_v9  ;;  %v453_v12 = vld [vmem:[%s2894_s27 + $0xc0] sm:$0xff] }
  0x16   : > { %450 = vst [vmem:[%s2899_s28 + $0x50] sm:$0xff] %v449_v10  ;;  %452 = vst [vmem:[%s2899_s28 + $0x58] sm:$0xff] %v451_v11  ;;  %v455_v13 = vld [vmem:[%s2894_s27 + $0xc8] sm:$0xff]  ;;  %v457_v14 = vld [vmem:[%s2894_s27 + $0xd0] sm:$0xff] }
  0x17   : > { %454 = vst [vmem:[%s2899_s28 + $0x60] sm:$0xff] %v453_v12  ;;  %456 = vst [vmem:[%s2899_s28 + $0x68] sm:$0xff] %v455_v13  ;;  %v459_v15 = vld [vmem:[%s2894_s27 + $0xd8] sm:$0xff]  ;;  %v461_v16 = vld [vmem:[%s2894_s27 + $0xe0] sm:$0xff] }
  0x18   : > { %458 = vst [vmem:[%s2899_s28 + $0x70] sm:$0xff] %v457_v14  ;;  %v463_v17 = vld [vmem:[%s2894_s27 + $0xe8] sm:$0xff]  ;;  %460 = vst [vmem:[%s2899_s28 + $0x78] sm:$0xff] %v459_v15  ;;  %v465_v18 = vld [vmem:[%s2894_s27 + $0xf0] sm:$0xff] }
  0x19   : > { %462 = vst [vmem:[%s2899_s28 + $0x80] sm:$0xff] %v461_v16  ;;  %464 = vst [vmem:[%s2899_s28 + $0x88] sm:$0xff] %v463_v17  ;;  %v467_v19 = vld [vmem:[%s2894_s27 + $0xf8] sm:$0xff]  ;;  %v469_v20 = vld [vmem:[%s2894_s27 + $0x100] sm:$0xff] }
  0x1a   : > { %466 = vst [vmem:[%s2899_s28 + $0x90] sm:$0xff] %v465_v18  ;;  %468 = vst [vmem:[%s2899_s28 + $0x98] sm:$0xff] %v467_v19  ;;  %v471_v21 = vld [vmem:[%s2894_s27 + $0x108] sm:$0xff]  ;;  %v473_v22 = vld [vmem:[%s2894_s27 + $0x110] sm:$0xff] }
  0x1b   : > { %470 = vst [vmem:[%s2899_s28 + $0xa0] sm:$0xff] %v469_v20  ;;  %v475_v23 = vld [vmem:[%s2894_s27 + $0x118] sm:$0xff]  ;;  %472 = vst [vmem:[%s2899_s28 + $0xa8] sm:$0xff] %v471_v21 }
  0x1c   : > { %474 = vst [vmem:[%s2899_s28 + $0xb0] sm:$0xff] %v473_v22  ;;  %476 = vst [vmem:[%s2899_s28 + $0xb8] sm:$0xff] %v475_v23 }
  0x1d PF: > { %p2228_p6 = scmp.ge.s32.totalorder %s2792_s17, 1  ;;  %p481_p7 = scmp.lt.s32.totalorder %s2792_s17, 3 }
  0x1f   : > { %p482_p8 = pnand %p2228_p6, %p481_p7 }
  0x20   : > { %s540_s11 = smul.u32 (!%p482_p8), 12, %s2784_s15  ;;  %s488_s20 = sand.u32 (!%p482_p8), 1, %s2776_s13  }
  0x21   : > { %485 = sbr.rel (%p482_p8) target bundleno = 626 (0x272), region = 94 }
  0x22   : > { %p542_p9 = scmp.lt.s32.totalorder (!%p482_p8), %s540_s11, 23  ;;  %s2609_s24 = smul.u32 (!%p482_p8), 192, %s488_s20 }
  0x24   : > { %s2998_s23 = scalar_lea.vmem (!%p482_p8), [#allocation3], %s2609_s24 }
  0x26   : > { %v2652_v24 = vld [vmem:[%s3515_s1 + $0x38] sm:$0xff]   ;;  %v2794_v25 = vmov 0   ;;  %v2653_v26 = vld [vmem:[%s3515_s1 + $0x30] sm:$0xff]   ;;  %s3532_s11 = smov (!%p542_p9, %s540_s11), 23  ;;  %v2654_v27 = vld [vmem:[%s3515_s1 + $0x28] sm:$0xff]   ;;  %vm570_vm0 = vcmask 261120  }
  0x27   : > { %776 = vmatprep.subr.bf16.mxu0 %v2794_v25  ;;  %s2367_s15 = sshll.u32 %s3532_s11, 3  ;;  %v2655_v28 = vld [vmem:[%s3515_s1 + $0x20] sm:$0xff]   ;;  %vm757_vm1 = vcmask 523264   ;;  %v2795_v29 = vmov 0.0   ;;  %v2656_v30 = vld [vmem:[%s3515_s1 + $0x18] sm:$0xff]   ;;  %vm958_vm2 = vcmask 130048  }
  0x28   : > { %777 = vmatpush1.bf16.msra.mxu0 %v2652_v24  ;;  %s2973_s28 = scalar_lea.vmem %s3514_s0, %s2367_s15  ;;  %571 = vst.msk [vmem:[#allocation2] sm:$0xff] %vm570_vm0, %v2795_v29  ;;  %572 = vst.msk [vmem:[#allocation2 + $0x8] sm:$0xff] %vm570_vm0, %v2795_v29  ;;  %v2276_v32 = vld [vmem:[%s3518_s4 + $0x18] sm:$0xff]  ;;  %v2275_v33 = vld [vmem:[%s3518_s4 + $0x10] sm:$0xff]  ;;  %s3439_s20 = scalar_lea.vmem %s3524_s10, %s2367_s15 }
  0x29   : > { %778 = vmatprep.subr.bf16.mxu0 %v2794_v25  ;;  %573 = vst.msk [vmem:[#allocation2 + $0x10] sm:$0xff] %vm570_vm0, %v2795_v29  ;;  %574 = vst.msk [vmem:[#allocation2 + $0x18] sm:$0xff] %vm570_vm0, %v2795_v29  ;;  %v2666_v31 = vld [vmem:[%s2973_s28 + $0x4] ss:$8 sps:$4 sm:$0xff]   ;;  %2460 = vmatprep.subr.mxu1 %v2276_v32  ;;  %v2265_v36 = vld [vmem:[%s2998_s23 + $0x70] sm:$0xff] }
  0x2a   : > { %575 = vst.msk [vmem:[#allocation2 + $0x20] sm:$0xff] %vm570_vm0, %v2795_v29  ;;  %576 = vst.msk [vmem:[#allocation2 + $0x28] sm:$0xff] %vm570_vm0, %v2795_v29  ;;  %v2263_v34 = vld [vmem:[%s2998_s23 + $0x60] sm:$0xff]  ;;  %2256 = vmatprep.mubr.msk.bf16.mxu0 %vm757_vm1, %v2666_v31  ;;  %2461 = vmatpush3.msra.mxu1 %v2276_v32  ;;  %v2264_v35 = vld [vmem:[%s2998_s23 + $0x68] sm:$0xff] }
  0x2b   : > { %577 = vst.msk [vmem:[#allocation2 + $0x30] sm:$0xff] %vm570_vm0, %v2795_v29  ;;  %578 = vst.msk [vmem:[#allocation2 + $0x38] sm:$0xff] %vm570_vm0, %v2795_v29  ;;  %2464 = vmatprep.mubr.msk.f32.mxu1 %vm958_vm2, %v2263_v34  ;;  %2462 = vmatprep.subr.mxu1 %v2275_v33  ;;  %v2657_v37 = vld [vmem:[%s3515_s1 + $0x10] sm:$0xff]   ;;  %v2266_v38 = vld [vmem:[%s2998_s23 + $0x78] sm:$0xff] }
  0x2c   : > { %779 = vmatpush1.bf16.msra.mxu0 %v2653_v26  ;;  %579 = vst.msk [vmem:[#allocation2 + $0x40] sm:$0xff] %vm570_vm0, %v2795_v29  ;;  %580 = vst.msk [vmem:[#allocation2 + $0x48] sm:$0xff] %vm570_vm0, %v2795_v29  ;;  %2463 = vmatpush3.msra.mxu1 %v2275_v33  ;;  %v2267_v39 = vld [vmem:[%s2998_s23 + $0x80] sm:$0xff]  ;;  %v2658_v40 = vld [vmem:[%s3515_s1 + $0x8] sm:$0xff]  }
  0x2d   : > { %780 = vmatprep.subr.bf16.mxu0 %v2794_v25  ;;  %581 = vst.msk [vmem:[#allocation2 + $0x50] sm:$0xff] %vm570_vm0, %v2795_v29  ;;  %582 = vst.msk [vmem:[#allocation2 + $0x58] sm:$0xff] %vm570_vm0, %v2795_v29  ;;  %2465 = vmatmul.mubr.msk.f32.vlgmr.msra.gmra.mxu1 %vm958_vm2, %v2264_v35  ;;  %v941_v41 = vld [vmem:[%s3518_s4 + $0x8] sm:$0xff]  ;;  %v940_v42 = vld [vmem:[%s3518_s4] sm:$0xff] }
  0x2e   : > { %2467 = vmatprep.mubr.msk.f32.mxu1 %vm958_vm2, %v2265_v36  ;;  %v2268_v43 = vld [vmem:[%s2998_s23 + $0x88] sm:$0xff]  ;;  %2482 = vmatprep.subr.mxu1 %v941_v41  ;;  %v2269_v44 = vld [vmem:[%s2998_s23 + $0x90] sm:$0xff]  ;;  %v2659_v45 = vld [vmem:[%s3515_s1] sm:$0xff]  }
  0x2f   : > { %2483 = vmatpush3.msra.mxu1 %v941_v41  ;;  %v2270_v46 = vld [vmem:[%s2998_s23 + $0x98] sm:$0xff]  ;;  %v2271_v47 = vld [vmem:[%s2998_s23 + $0xa0] sm:$0xff]  ;;  %v2272_v49 = vld [vmem:[%s2998_s23 + $0xa8] sm:$0xff] }
  0x30   : > { %781 = vmatpush1.bf16.msra.mxu0 %v2654_v27  ;;  %2484 = vmatprep.subr.mxu1 %v940_v42  ;;  %v2660_v48 = vld [vmem:[%s3515_s1 + $0x58] sm:$0xff]   ;;  %v2273_v50 = vld [vmem:[%s2998_s23 + $0xb0] sm:$0xff]  ;;  %v928_v53 = vld [vmem:[%s2998_s23] sm:$0xff] }
  0x31   : > { %782 = vmatprep.subr.bf16.mxu0 %v2794_v25  ;;  %2468 = vmatmul.mubr.msk.f32.gmra.mxu1 %vm958_vm2, %v2266_v38  ;;  %v2661_v51 = vld [vmem:[%s3515_s1 + $0x50] sm:$0xff]   ;;  %v2274_v52 = vld [vmem:[%s2998_s23 + $0xb8] sm:$0xff]  ;;  %v2662_v54 = vld [vmem:[%s3515_s1 + $0x48] sm:$0xff]  }
  0x32   : > { %2470 = vmatprep.mubr.msk.f32.mxu1 %vm958_vm2, %v2267_v39  ;;  %2485 = vmatpush3.msra.mxu1 %v940_v42  ;;  %v929_v55 = vld [vmem:[%s2998_s23 + $0x8] sm:$0xff]  ;;  %v930_v56 = vld [vmem:[%s2998_s23 + $0x10] sm:$0xff]  ;;  %v2663_v57 = vld [vmem:[%s3515_s1 + $0x40] sm:$0xff]  }
  0x33   : > { %v931_v58 = vld [vmem:[%s2998_s23 + $0x18] sm:$0xff]  ;;  %v2664_v59 = vld [vmem:[%s2973_s28] ss:$8 sps:$4 sm:$0xff]   ;;  %v934_v63 = vld [vmem:[%s2998_s23 + $0x30] sm:$0xff] }
  0x34   : > { %783 = vmatpush1.bf16.msra.mxu0 %v2655_v28  ;;  %v932_v60 = vld [vmem:[%s2998_s23 + $0x20] sm:$0xff]  ;;  %v2667_v61 = vld [vmem:[%s2973_s28 + $0x14] ss:$8 sps:$4 sm:$0xff]   ;;  %v933_v62 = vld [vmem:[%s2998_s23 + $0x28] sm:$0xff] }
  0x35   : > { %784 = vmatprep.subr.bf16.mxu0 %v2794_v25  ;;  %2471 = vmatmul.mubr.msk.f32.gmra.mxu1 %vm958_vm2, %v2268_v43  ;;  %v935_v0 = vld [vmem:[%s2998_s23 + $0x38] sm:$0xff]  ;;  %v936_v2 = vld [vmem:[%s2998_s23 + $0x40] sm:$0xff]  ;;  %v937_v4 = vld [vmem:[%s2998_s23 + $0x48] sm:$0xff] }
  0x36   : > { %2473 = vmatprep.mubr.msk.f32.mxu1 %vm958_vm2, %v2269_v44  ;;  %v2669_v1 = vld [vmem:[%s2973_s28 + $0x10] ss:$8 sps:$4 sm:$0xff]   ;;  %v2670_v3 = vld [vmem:[%s2973_s28 + $0x24] ss:$8 sps:$4 sm:$0xff]   ;;  %v2672_v7 = vld [vmem:[%s2973_s28 + $0x20] ss:$8 sps:$4 sm:$0xff]  }
  0x37   : > { %v938_v5 = vld [vmem:[%s2998_s23 + $0x50] sm:$0xff]  ;;  %v939_v6 = vld [vmem:[%s2998_s23 + $0x58] sm:$0xff]  ;;  %v2676_v10 = vld [vmem:[%s2973_s28 + $0x44] ss:$8 sps:$4 sm:$0xff]  }
  0x38   : > { %785 = vmatpush1.bf16.msra.mxu0 %v2656_v30  ;;  %v2673_v8 = vld [vmem:[%s2973_s28 + $0x34] ss:$8 sps:$4 sm:$0xff]   ;;  %v2675_v9 = vld [vmem:[%s2973_s28 + $0x30] ss:$8 sps:$4 sm:$0xff]   ;;  %v2678_v11 = vld [vmem:[%s2973_s28 + $0x40] ss:$8 sps:$4 sm:$0xff]  }
  0x39   : > { %786 = vmatprep.subr.bf16.mxu0 %v2794_v25  ;;  %2474 = vmatmul.mubr.msk.f32.gmra.mxu1 %vm958_vm2, %v2270_v46  ;;  %v2679_v12 = vld [vmem:[%s2973_s28 + $0x54] ss:$8 sps:$4 sm:$0xff]   ;;  %v2681_v13 = vld [vmem:[%s2973_s28 + $0x50] ss:$8 sps:$4 sm:$0xff]   ;;  %v1305_v18 = vld [vmem:[%s3520_s6 + $0x28] sm:$0xff] }
  0x3a   : > { %2476 = vmatprep.mubr.msk.f32.mxu1 %vm958_vm2, %v2271_v47  ;;  %v1307_v14 = vld [vmem:[%s3520_s6 + $0x38] sm:$0xff]  ;;  %v1306_v16 = vld [vmem:[%s3520_s6 + $0x30] sm:$0xff]  ;;  %v1654_v19 = vld [vmem:[%s3522_s8 + $0x28] sm:$0xff] }
  0x3b   : > { %v1656_v15 = vld [vmem:[%s3522_s8 + $0x38] sm:$0xff]  ;;  %2504 = vmatprep.subr.mxu1 %v1307_v14  ;;  %v1655_v17 = vld [vmem:[%s3522_s8 + $0x30] sm:$0xff]  ;;  %v1304_v20 = vld [vmem:[%s3520_s6 + $0x20] sm:$0xff] }
  0x3c   : > { %787 = vmatpush1.bf16.msra.mxu0 %v2657_v37  ;;  %v1653_v21 = vld [vmem:[%s3522_s8 + $0x20] sm:$0xff]  ;;  %v1303_v22 = vld [vmem:[%s3520_s6 + $0x18] sm:$0xff]  ;;  %v584_v33 = vld [vmem:[#allocation2 + $0x8] sm:$0xff] }
  0x3d   : > { %788 = vmatprep.subr.bf16.mxu0 %v2794_v25  ;;  %2477 = vmatmul.mubr.msk.f32.gmra.mxu1 %vm958_vm2, %v2272_v49  ;;  %v583_v28 = vld [vmem:[#allocation2] sm:$0xff]  ;;  %v585_v38 = vld [vmem:[#allocation2 + $0x10] sm:$0xff]  ;;  %v586_v44 = vld [vmem:[#allocation2 + $0x18] sm:$0xff] }
  0x3e   : > { %2479 = vmatprep.mubr.msk.f32.mxu1 %vm958_vm2, %v2273_v50  ;;  %v3148_v41 = vld [vmem:[%s3516_s2] ss:$0 sm:$0xff] }
  0x40   : > { %789 = vmatpush1.bf16.msra.mxu0 %v2658_v40 }
  0x41   : > { %790 = vmatprep.subr.bf16.mxu0 %v2794_v25  ;;  %2480 = vmatmul.mubr.msk.f32.gmra.mxu1 %vm958_vm2, %v2274_v52  ;;  %v587_v52 = vld [vmem:[#allocation2 + $0x20] sm:$0xff] }
  0x42   : > { %2486 = vmatprep.mubr.msk.f32.mxu1 %vm958_vm2, %v928_v53 }
  0x44   : > { %791 = vmatpush1.bf16.msra.mxu0 %v2659_v45 }
  0x45   : > { %800 = vmatprep.subr.bf16.mxu0 %v2794_v25  ;;  %2487 = vmatmul.mubr.msk.f32.vlgmr.msra.gmra.mxu1 %vm958_vm2, %v929_v55 }
  0x46   : > { %2489 = vmatprep.mubr.msk.f32.mxu1 %vm958_vm2, %v930_v56  ;;  %2505 = vmatpush3.msra.mxu1 %v1307_v14 }
  0x47   : > { %2506 = vmatprep.subr.mxu1 %v1306_v16 }
  0x48   : > { %801 = vmatpush2.bf16.msra.mxu0 %v2660_v48  ;;  %2507 = vmatpush3.msra.mxu1 %v1306_v16 }
  0x49   : > { %802 = vmatprep.subr.bf16.mxu0 %v2794_v25  ;;  %2490 = vmatmul.mubr.msk.f32.gmra.mxu1 %vm958_vm2, %v931_v58 }
  0x4a   : > { %2492 = vmatprep.mubr.msk.f32.mxu1 %vm958_vm2, %v932_v60  ;;  %2508 = vmatprep.subr.mxu1 %v1305_v18  ;;  %v588_v60 = vld [vmem:[#allocation2 + $0x28] sm:$0xff] }
  0x4b   : > { %2509 = vmatpush3.msra.mxu1 %v1305_v18 }
  0x4c   : > { %803 = vmatpush2.bf16.msra.mxu0 %v2661_v51  ;;  %2510 = vmatprep.subr.mxu1 %v1304_v20 }
  0x4d   : > { %804 = vmatprep.subr.bf16.mxu0 %v2794_v25  ;;  %2493 = vmatmul.mubr.msk.f32.gmra.mxu1 %vm958_vm2, %v933_v62  ;;  %v1302_v62 = vld [vmem:[%s3520_s6 + $0x10] sm:$0xff] }
  0x4e   : > { %2495 = vmatprep.mubr.msk.f32.mxu1 %vm958_vm2, %v934_v63  ;;  %2511 = vmatpush3.msra.mxu1 %v1304_v20 }
  0x4f   : > { %2530 = vmatprep.subr.mxu1 %v1303_v22 }
  0x50   : > { %805 = vmatpush2.bf16.msra.mxu0 %v2662_v54 }
  0x51   : > { %806 = vmatprep.subr.bf16.mxu0 %v2794_v25  ;;  %2496 = vmatmul.mubr.msk.f32.gmra.mxu1 %vm958_vm2, %v935_v0 }
  0x52   : > { %2498 = vmatprep.mubr.msk.f32.mxu1 %vm958_vm2, %v936_v2 }
  0x54   : > { %807 = vmatpush2.bf16.msra.mxu0 %v2663_v57 }
  0x55   : > { %2499 = vmatmul.mubr.msk.f32.gmra.mxu1 %vm958_vm2, %v937_v4  ;;  %2556 = vmatprep.subr.mxu0 %v1656_v15  ;;  %v1301_v4 = vld [vmem:[%s3520_s6 + $0x8] sm:$0xff] }
  0x56   : > { %2501 = vmatprep.mubr.msk.f32.mxu1 %vm958_vm2, %v938_v5 }
  0x57   : > { %809 = vmatmul.mubr.bf16.vlgmr.msra.gmra.mxu0 %v2664_v59 }
  0x58   : > { %2257 = vmatprep.mubr.msk.bf16.mxu0 %vm757_vm1, %v2667_v61  ;;  %2557 = vmatpush3.msra.mxu0 %v1656_v15  ;;  %v590_v15 = vld [vmem:[#allocation2 + $0x38] sm:$0xff] }
  0x59   : > { %2502 = vmatmul.mubr.msk.f32.gmra.mxu1 %vm958_vm2, %v939_v6  ;;  %2558 = vmatprep.subr.mxu0 %v1655_v17  ;;  %v589_v6 = vld [vmem:[#allocation2 + $0x30] sm:$0xff] }
  0x5a   : > { %2559 = vmatpush3.msra.mxu0 %v1655_v17  ;;  %v3184_v17 = vld [vmem:[%s3522_s8 + $0x18] sm:$0xff] }
  0x5b   : > { %2560 = vmatprep.subr.mxu0 %v1654_v19 }
  0x5c   : > { %2561 = vmatpush3.msra.mxu0 %v1654_v19 }
  0x5d   : > { %2562 = vmatprep.subr.mxu0 %v1653_v21 }
  0x5e   : > { %2563 = vmatpush3.msra.mxu0 %v1653_v21 }
  0x5f   : > { %817 = vmatmul.mubr.bf16.gmra.mxu0 %v2669_v1 }
  0x60   : > { %2258 = vmatprep.mubr.msk.bf16.mxu0 %vm757_vm1, %v2670_v3 }
  0x67   : > { %825 = vmatmul.mubr.bf16.gmra.mxu0 %v2672_v7 }
  0x68   : > { %2259 = vmatprep.mubr.msk.bf16.mxu0 %vm757_vm1, %v2673_v8 }
  0x6f   : > { %833 = vmatmul.mubr.bf16.gmra.mxu0 %v2675_v9 }
  0x70   : > { %2260 = vmatprep.mubr.msk.bf16.mxu0 %vm757_vm1, %v2676_v10  ;;  %v1300_v10 = vld [vmem:[%s3520_s6] sm:$0xff] }
  0x77   : > { %841 = vmatmul.mubr.bf16.gmra.mxu0 %v2678_v11 }
  0x78   : > { %2261 = vmatprep.mubr.msk.bf16.mxu0 %vm757_vm1, %v2679_v12 }
  0x7f   : > { %849 = vmatmul.mubr.bf16.gmra.mxu0 %v2681_v13 }
  0xed   : > { %v3127_v23 = vpop.f32.mrf.mxu1 }
  0xef   : > { %v3129_v24 = vpop.f32.mrf.mxu1 }
  0xf1   : > { %v3131_v25 = vpop.f32.mrf.mxu1 }
  0xf3   : > { %v3133_v26 = vpop.f32.mrf.mxu1 }
  0xf5   : > { %v3135_v27 = vpop.f32.mrf.mxu1 }
  0xf7   : > { %v3137_v29 = vpop.f32.mrf.mxu1 }
  0xf9   : > { %v3140_v34 = vpop.f32.mrf.mxu1 }
  0xfb   : > { %v3143_v39 = vpop.f32.mrf.mxu1 }
  0xfd   : > { %v3152_v47 = vpop.f32.mrf.mxu1 }
  0xff   : > { %v3158_v55 = vpop.f32.mrf.mxu1 }
 0x101   : > { %v3167_v0 = vpop.f32.mrf.mxu1 }
 0x103   : > { %v3175_v8 = vpop.f32.mrf.mxu1 }
 0x105   : > { %v3189_v18 = vpop.f32.mrf.mxu1 }
 0x117   : > { %v810_v30 = vpop.f32.mrf.mxu0 }
 0x118   : > { %v857_v31 = vadd.f32 %v810_v30, %v583_v28  ;;  %v591_v30 = vld [vmem:[#allocation2 + $0x40] sm:$0xff] }
 0x119   : > { %v812_v32 = vpop.f32.mrf.mxu0 }
 0x11a   : > { %870 = vst.msk [vmem:[#allocation2] sm:$0xff] %vm570_vm0, %v857_v31  ;;  %v1222_v32 = vpop.f32.mrf.mxu1 }
 0x11b   : > { %v813_v35 = vpop.f32.mrf.mxu0 }
 0x11c   : > { %v858_v36 = vadd.f32 %v813_v35, %v584_v33 }
 0x11d   : > { %v815_v37 = vpop.f32.mrf.mxu0 }
 0x11e   : > { %871 = vst.msk [vmem:[#allocation2 + $0x8] sm:$0xff] %vm570_vm0, %v858_v36 }
 0x11f   : > { %v818_v40 = vpop.f32.mrf.mxu0 }
 0x120   : > { %v859_v42 = vadd.f32 %v818_v40, %v585_v38  ;;  %v592_v40 = vld [vmem:[#allocation2 + $0x48] sm:$0xff] }
 0x121   : > { %v820_v43 = vpop.f32.mrf.mxu0  ;;  %v885_v45 = vld [vmem:[#allocation2] sm:$0xff] }
 0x122   : > { %872 = vst.msk [vmem:[#allocation2 + $0x10] sm:$0xff] %vm570_vm0, %v859_v42  ;;  %v904_v46 = vadd.f32 %v3148_v41, %v885_v45  ;;  %v2491_v43 = vpop.f32.mrf.mxu1 }
 0x123   : > { %v821_v48 = vpop.f32.mrf.mxu0 }
 0x124   : > { %v860_v49 = vadd.f32 %v821_v48, %v586_v44  ;;  %v916_v50 = vmax.f32 %v904_v46, 0.0 }
 0x125   : > { %v823_v51 = vpop.f32.mrf.mxu0  ;;  %v886_v53 = vld [vmem:[#allocation2 + $0x8] sm:$0xff] }
 0x126   : > { %873 = vst.msk [vmem:[#allocation2 + $0x18] sm:$0xff] %vm570_vm0, %v860_v49  ;;  %2512 = vmatprep.mubr.msk.f32.mxu1 %vm570_vm0, %v916_v50  ;;  %2564 = vmatprep.mubr.msk.f32.mxu0 %vm570_vm0, %v916_v50  ;;  %v905_v54 = vadd.f32 %v3148_v41, %v886_v53  ;;  %v593_v50 = vld [vmem:[#allocation2 + $0x50] sm:$0xff] }
 0x127   : > { %v826_v56 = vpop.f32.mrf.mxu0 }
 0x128   : > { %v861_v57 = vadd.f32 %v826_v56, %v587_v52  ;;  %v917_v58 = vmax.f32 %v905_v54, 0.0  ;;  %v1232_v52 = vpop.f32.mrf.mxu1 }
 0x129   : > { %v828_v59 = vpop.f32.mrf.mxu0  ;;  %v887_v61 = vld [vmem:[#allocation2 + $0x10] sm:$0xff] }
 0x12a   : > { %874 = vst.msk [vmem:[#allocation2 + $0x20] sm:$0xff] %vm570_vm0, %v861_v57  ;;  %2513 = vmatmul.mubr.msk.f32.vlgmr.msra.gmra.mxu1 %vm570_vm0, %v917_v58  ;;  %2565 = vmatmul.mubr.msk.f32.vlgmr.msra.gmra.mxu0 %vm570_vm0, %v917_v58  ;;  %v906_v63 = vadd.f32 %v3148_v41, %v887_v61  ;;  %v594_v59 = vld [vmem:[#allocation2 + $0x58] sm:$0xff]  ;;  %v2494_v61 = vpop.f32.mrf.mxu1 }
 0x12b   : > { %v829_v1 = vpop.f32.mrf.mxu0  ;;  %2531 = vmatpush3.msra.mxu1 %v1303_v22 }
 0x12c   : > { %v862_v2 = vadd.f32 %v829_v1, %v588_v60  ;;  %v918_v3 = vmax.f32 %v906_v63, 0.0  ;;  %2532 = vmatprep.subr.mxu1 %v1302_v62 }
 0x12d   : > { %v831_v5 = vpop.f32.mrf.mxu0  ;;  %v888_v7 = vld [vmem:[#allocation2 + $0x18] sm:$0xff]  ;;  %2533 = vmatpush3.msra.mxu1 %v1302_v62 }
 0x12e   : > { %875 = vst.msk [vmem:[#allocation2 + $0x28] sm:$0xff] %vm570_vm0, %v862_v2  ;;  %2515 = vmatprep.mubr.msk.f32.mxu1 %vm570_vm0, %v918_v3  ;;  %2567 = vmatprep.mubr.msk.f32.mxu0 %vm570_vm0, %v918_v3  ;;  %v907_v9 = vadd.f32 %v3148_v41, %v888_v7  ;;  %v1242_v5 = vpop.f32.mrf.mxu1 }
 0x12f   : > { %v834_v11 = vpop.f32.mrf.mxu0  ;;  %2534 = vmatprep.subr.mxu1 %v1301_v4 }
 0x130   : > { %v863_v12 = vadd.f32 %v834_v11, %v589_v6  ;;  %v919_v13 = vmax.f32 %v907_v9, 0.0  ;;  %2535 = vmatpush3.msra.mxu1 %v1301_v4 }
 0x131   : > { %v836_v14 = vpop.f32.mrf.mxu0  ;;  %v889_v16 = vld [vmem:[#allocation2 + $0x20] sm:$0xff]  ;;  %2536 = vmatprep.subr.mxu1 %v1300_v10 }
 0x132   : > { %876 = vst.msk [vmem:[#allocation2 + $0x30] sm:$0xff] %vm570_vm0, %v863_v12  ;;  %2516 = vmatmul.mubr.msk.f32.gmra.mxu1 %vm570_vm0, %v919_v13  ;;  %2568 = vmatmul.mubr.msk.f32.gmra.mxu0 %vm570_vm0, %v919_v13  ;;  %v908_v19 = vadd.f32 %v3148_v41, %v889_v16  ;;  %v1223_v13 = vadd.f32 %v1222_v32, %v3129_v24 }
 0x133   : > { %v837_v20 = vpop.f32.mrf.mxu0  ;;  %2537 = vmatpush3.msra.mxu1 %v1300_v10  ;;  %v2497_v10 = vpop.f32.mrf.mxu1  ;;  %v1233_v24 = vadd.f32 %v1232_v52, %v3133_v26  ;;  %v1651_v26 = vld [vmem:[%s3522_s8 + $0x10] sm:$0xff] }
 0x134   : > { %v864_v21 = vadd.f32 %v837_v20, %v590_v15  ;;  %v920_v22 = vmax.f32 %v908_v19, 0.0  ;;  %2582 = vmatprep.subr.mxu1 %v3184_v17  ;;  %v2301_v15 = vld [vmem:[%s3519_s5] ss:$0 sm:$0xff]  ;;  %v1228_v20 = vadd.f32 %v3189_v18, %v3127_v23  ;;  %v1243_v23 = vadd.f32 %v1242_v5, %v3137_v29 }
 0x135   : > { %v839_v28 = vpop.f32.mrf.mxu0  ;;  %v890_v31 = vld [vmem:[#allocation2 + $0x28] sm:$0xff]  ;;  %v1252_v16 = vpop.f32.mrf.mxu1  ;;  %v1248_v29 = vadd.f32 %v2494_v61, %v3135_v27  ;;  %v3332_v5 = vld [vmem:[%s3521_s7] ss:$0 sm:$0xff] }
 0x136   : > { %877 = vst.msk [vmem:[#allocation2 + $0x38] sm:$0xff] %vm570_vm0, %v864_v21  ;;  %2518 = vmatprep.mubr.msk.f32.mxu1 %vm570_vm0, %v920_v22  ;;  %2570 = vmatprep.mubr.msk.f32.mxu0 %vm570_vm0, %v920_v22  ;;  %v909_v33 = vadd.f32 %v3148_v41, %v890_v31  ;;  %v3225_v22 = vadd.f32 %v2301_v15, %v1223_v13 }
 0x137   : > { %v842_v35 = vpop.f32.mrf.mxu0  ;;  %v2500_v28 = vpop.f32.mrf.mxu1  ;;  %v3235_v31 = vadd.f32 %v2301_v15, %v1233_v24  ;;  %v3262_v27 = vadd.f32 %v2301_v15, %v1248_v29 }
 0x138   : > { %v865_v36 = vadd.f32 %v842_v35, %v591_v30  ;;  %v921_v37 = vmax.f32 %v909_v33, 0.0  ;;  %v3232_v30 = vadd.f32 %v2301_v15, %v1228_v20  ;;  %v3252_v33 = vadd.f32 %v2301_v15, %v1243_v23 }
 0x139   : > { %v844_v38 = vpop.f32.mrf.mxu0  ;;  %v891_v42 = vld [vmem:[#allocation2 + $0x30] sm:$0xff]  ;;  %v1262_v18 = vpop.f32.mrf.mxu1  ;;  %v1253_v35 = vadd.f32 %v1252_v16, %v3143_v39 }
 0x13a   : > { %878 = vst.msk [vmem:[#allocation2 + $0x40] sm:$0xff] %vm570_vm0, %v865_v36  ;;  %2519 = vmatmul.mubr.msk.f32.gmra.mxu1 %vm570_vm0, %v921_v37  ;;  %2571 = vmatmul.mubr.msk.f32.gmra.mxu0 %vm570_vm0, %v921_v37  ;;  %v910_v44 = vadd.f32 %v3148_v41, %v891_v42  ;;  %v1258_v37 = vadd.f32 %v2497_v10, %v3140_v34 }
 0x13b   : > { %v845_v45 = vpop.f32.mrf.mxu0  ;;  %v2503_v36 = vpop.f32.mrf.mxu1  ;;  %v3265_v39 = vadd.f32 %v2301_v15, %v1253_v35  ;;  %v1263_v38 = vadd.f32 %v1262_v18, %v3158_v55  ;;  %v3357_v35 = vld [vmem:[%s3523_s9] ss:$0 sm:$0xff] }
 0x13c   : > { %v866_v46 = vadd.f32 %v845_v45, %v592_v40  ;;  %v922_v48 = vmax.f32 %v910_v44, 0.0  ;;  %v3272_v42 = vadd.f32 %v2301_v15, %v1258_v37  ;;  %v1278_v45 = vadd.f32 %v2503_v36, %v3167_v0 }
 0x13d   : > { %v847_v49 = vpop.f32.mrf.mxu0  ;;  %v892_v51 = vld [vmem:[#allocation2 + $0x38] sm:$0xff]  ;;  %v1272_v40 = vpop.f32.mrf.mxu1  ;;  %v3275_v44 = vadd.f32 %v2301_v15, %v1263_v38 }
 0x13e   : > { %879 = vst.msk [vmem:[#allocation2 + $0x48] sm:$0xff] %vm570_vm0, %v866_v46  ;;  %2521 = vmatprep.mubr.msk.f32.mxu1 %vm570_vm0, %v922_v48  ;;  %2573 = vmatprep.mubr.msk.f32.mxu0 %vm570_vm0, %v922_v48  ;;  %v911_v53 = vadd.f32 %v3148_v41, %v892_v51  ;;  %v1273_v34 = vadd.f32 %v1272_v40, %v3175_v8 }
 0x13f   : > { %v850_v54 = vpop.f32.mrf.mxu0 }
 0x140   : > { %v867_v56 = vadd.f32 %v850_v54, %v593_v50  ;;  %v923_v57 = vmax.f32 %v911_v53, 0.0  ;;  %v3285_v46 = vadd.f32 %v2301_v15, %v1273_v34 }
 0x141   : > { %v852_v58 = vpop.f32.mrf.mxu0  ;;  %v893_v60 = vld [vmem:[#allocation2 + $0x40] sm:$0xff] }
 0x142   : > { %880 = vst.msk [vmem:[#allocation2 + $0x50] sm:$0xff] %vm570_vm0, %v867_v56  ;;  %2522 = vmatmul.mubr.msk.f32.gmra.mxu1 %vm570_vm0, %v923_v57  ;;  %2574 = vmatmul.mubr.msk.f32.gmra.mxu0 %vm570_vm0, %v923_v57  ;;  %v912_v62 = vadd.f32 %v3148_v41, %v893_v60 }
 0x143   : > { %v853_v63 = vpop.f32.mrf.mxu0 }
 0x144   : > { %v868_v1 = vadd.f32 %v853_v63, %v594_v59  ;;  %v924_v2 = vmax.f32 %v912_v62, 0.0 }
 0x145   : > { %v855_v3 = vpop.f32.mrf.mxu0  ;;  %v894_v4 = vld [vmem:[#allocation2 + $0x48] sm:$0xff] }
 0x146   : > { %881 = vst.msk [vmem:[#allocation2 + $0x58] sm:$0xff] %vm570_vm0, %v868_v1  ;;  %2524 = vmatprep.mubr.msk.f32.mxu1 %vm570_vm0, %v924_v2  ;;  %2576 = vmatprep.mubr.msk.f32.mxu0 %vm570_vm0, %v924_v2  ;;  %v913_v6 = vadd.f32 %v3148_v41, %v894_v4 }
 0x148   : > { %v925_v7 = vmax.f32 %v913_v6, 0.0 }
 0x149   : > { %v895_v9 = vld [vmem:[#allocation2 + $0x50] sm:$0xff] }
 0x14a   : > { %2525 = vmatmul.mubr.msk.f32.gmra.mxu1 %vm570_vm0, %v925_v7  ;;  %2577 = vmatmul.mubr.msk.f32.gmra.mxu0 %vm570_vm0, %v925_v7  ;;  %v914_v11 = vadd.f32 %v3148_v41, %v895_v9 }
 0x14c   : > { %v926_v12 = vmax.f32 %v914_v11, 0.0 }
 0x14d   : > { %v896_v14 = vld [vmem:[#allocation2 + $0x58] sm:$0xff] }
 0x14e   : > { %2527 = vmatprep.mubr.msk.f32.mxu1 %vm570_vm0, %v926_v12  ;;  %2579 = vmatprep.mubr.msk.f32.mxu0 %vm570_vm0, %v926_v12  ;;  %v915_v19 = vadd.f32 %v3148_v41, %v896_v14  ;;  %v1238_v41 = vadd.f32 %v2491_v43, %v3131_v25  ;;  %v1650_v25 = vld [vmem:[%s3522_s8 + $0x8] sm:$0xff]  ;;  %v1268_v43 = vadd.f32 %v2500_v28, %v3152_v47 }
 0x14f   : > { %v3291_v47 = vadd.f32 %v2301_v15, %v1278_v45 }
 0x150   : > { %v927_v21 = vmax.f32 %v915_v19, 0.0  ;;  %v3249_v32 = vadd.f32 %v2301_v15, %v1238_v41  ;;  %v3282_v55 = vadd.f32 %v2301_v15, %v1268_v43 }
 0x152   : > { %2528 = vmatmul.mubr.msk.f32.gmra.mxu1 %vm570_vm0, %v927_v21  ;;  %2580 = vmatmul.mubr.msk.f32.gmra.mxu0 %vm570_vm0, %v927_v21 }
 0x153   : > { %2538 = vmatprep.mubr.msk.f32.mxu1 %vm570_vm0, %v3225_v22 }
 0x156   : > { %2539 = vmatmul.mubr.msk.f32.vlgmr.msra.gmra.mxu1 %vm570_vm0, %v3232_v30 }
 0x157   : > { %2583 = vmatpush3.msra.mxu1 %v3184_v17  ;;  %2541 = vmatprep.mubr.msk.f32.mxu1 %vm570_vm0, %v3235_v31  ;;  %v1649_v17 = vld [vmem:[%s3522_s8] sm:$0xff] }
 0x158   : > { %2584 = vmatprep.subr.mxu1 %v1651_v26 }
 0x159   : > { %2585 = vmatpush3.msra.mxu1 %v1651_v26 }
 0x15a   : > { %2542 = vmatmul.mubr.msk.f32.gmra.mxu1 %vm570_vm0, %v3249_v32  ;;  %2586 = vmatprep.subr.mxu1 %v1650_v25 }
 0x15b   : > { %2544 = vmatprep.mubr.msk.f32.mxu1 %vm570_vm0, %v3252_v33  ;;  %2587 = vmatpush3.msra.mxu1 %v1650_v25 }
 0x15c   : > { %2588 = vmatprep.subr.mxu1 %v1649_v17 }
 0x15d   : > { %2589 = vmatpush3.msra.mxu1 %v1649_v17 }
 0x15e   : > { %2545 = vmatmul.mubr.msk.f32.gmra.mxu1 %vm570_vm0, %v3262_v27 }
 0x15f   : > { %2547 = vmatprep.mubr.msk.f32.mxu1 %vm570_vm0, %v3265_v39 }
 0x162   : > { %2548 = vmatmul.mubr.msk.f32.gmra.mxu1 %vm570_vm0, %v3272_v42 }
 0x163   : > { %2550 = vmatprep.mubr.msk.f32.mxu1 %vm570_vm0, %v3275_v44 }
 0x166   : > { %2551 = vmatmul.mubr.msk.f32.gmra.mxu1 %vm570_vm0, %v3282_v55 }
 0x167   : > { %2553 = vmatprep.mubr.msk.f32.mxu1 %vm570_vm0, %v3285_v46 }
 0x16a   : > { %2554 = vmatmul.mubr.msk.f32.gmra.mxu1 %vm570_vm0, %v3291_v47 }
 0x16b   : > { %2590 = vmatprep.mubr.msk.f32.mxu1 %vm570_vm0, %v3225_v22 }
 0x16e   : > { %2591 = vmatmul.mubr.msk.f32.vlgmr.msra.gmra.mxu1 %vm570_vm0, %v3232_v30 }
 0x16f   : > { %2593 = vmatprep.mubr.msk.f32.mxu1 %vm570_vm0, %v3235_v31 }
 0x172   : > { %2594 = vmatmul.mubr.msk.f32.gmra.mxu1 %vm570_vm0, %v3249_v32 }
 0x173   : > { %2596 = vmatprep.mubr.msk.f32.mxu1 %vm570_vm0, %v3252_v33 }
 0x176   : > { %2597 = vmatmul.mubr.msk.f32.gmra.mxu1 %vm570_vm0, %v3262_v27 }
 0x177   : > { %2599 = vmatprep.mubr.msk.f32.mxu1 %vm570_vm0, %v3265_v39 }
 0x17a   : > { %2600 = vmatmul.mubr.msk.f32.gmra.mxu1 %vm570_vm0, %v3272_v42 }
 0x17b   : > { %2602 = vmatprep.mubr.msk.f32.mxu1 %vm570_vm0, %v3275_v44 }
 0x17e   : > { %2603 = vmatmul.mubr.msk.f32.gmra.mxu1 %vm570_vm0, %v3282_v55 }
 0x17f   : > { %2605 = vmatprep.mubr.msk.f32.mxu1 %vm570_vm0, %v3285_v46 }
 0x182   : > { %2606 = vmatmul.mubr.msk.f32.gmra.mxu1 %vm570_vm0, %v3291_v47 }
 0x1ea   : > { %v2514_v0 = vpop.f32.mrf.mxu1  ;;  %v2566_v2 = vpop.f32.mrf.mxu0 }
 0x1ec   : > { %v1410_v8 = vpop.f32.mrf.mxu1  ;;  %v1723_v9 = vpop.f32.mrf.mxu0 }
 0x1f2   : > { %v2517_v48 = vpop.f32.mrf.mxu1  ;;  %v2569_v13 = vpop.f32.mrf.mxu0 }
 0x1f4   : > { %v1420_v49 = vpop.f32.mrf.mxu1  ;;  %v1733_v21 = vpop.f32.mrf.mxu0 }
 0x1fa   : > { %v2520_v50 = vpop.f32.mrf.mxu1  ;;  %v2572_v23 = vpop.f32.mrf.mxu0 }
 0x1fc   : > { %v1430_v51 = vpop.f32.mrf.mxu1  ;;  %v1743_v34 = vpop.f32.mrf.mxu0 }
 0x202   : > { %v2523_v52 = vpop.f32.mrf.mxu1 }
 0x204   : > { %v3319_v53 = vpop.f32.mrf.mxu1 }
 0x20a   : > { %v3321_v54 = vpop.f32.mrf.mxu1 }
 0x20c   : > { %v3323_v56 = vpop.f32.mrf.mxu1 }
 0x212   : > { %v3325_v57 = vpop.f32.mrf.mxu1 }
 0x214   : > { %v3327_v58 = vpop.f32.mrf.mxu1 }
 0x216   : > { %v2540_v59 = vpop.f32.mrf.mxu1 }
 0x217   : > { %v1577_v4 = vadd.f32 %v2540_v59, %v2514_v0  ;;  %v2575_v59 = vpop.f32.mrf.mxu0 }
 0x218   : > { %v1571_v60 = vpop.f32.mrf.mxu1 }
 0x219   : > { %v1572_v6 = vadd.f32 %v1571_v60, %v1410_v8  ;;  %v3337_v12 = vadd.f32 %v3332_v5, %v1577_v4 }
 0x21a   : > { %v2543_v61 = vpop.f32.mrf.mxu1 }
 0x21b   : > { %v1587_v10 = vadd.f32 %v2543_v61, %v2517_v48  ;;  %v3340_v14 = vadd.f32 %v3332_v5, %v1572_v6  ;;  %v1939_v20 = vmin.f32 %v3337_v12, 0.0  ;;  %vm1927_vm3 = vcmp.gt.f32.partialorder %v3337_v12, 0.0 }
 0x21c   : > { %v1581_v62 = vpop.f32.mrf.mxu1 }
 0x21d   : > { %v3345_v16 = vadd.f32 %v3332_v5, %v1587_v10  ;;  %v1938_v24 = vmin.f32 %v3340_v14, 0.0  ;;  %v1582_v28 = vadd.f32 %v1581_v62, %v1420_v49  ;;  %v1952_v25 = vmul.f32 1.442695, %v1939_v20 }
 0x21e   : > { %v2546_v63 = vpop.f32.mrf.mxu1  ;;  %vm1926_vm4 = vcmp.gt.f32.partialorder %v3340_v14, 0.0 }
 0x21f   : > { %v1941_v26 = vmin.f32 %v3345_v16, 0.0  ;;  %v1597_v29 = vadd.f32 %v2546_v63, %v2520_v50  ;;  %v1950_v17 = vmul.f32 1.442695, %v1938_v24  ;;  %v3360_v36 = vadd.f32 %v3332_v5, %v1582_v28  ;;  %v1753_v28 = vpop.f32.mrf.mxu0 }
 0x220   : > { %v1591_v1 = vpop.f32.mrf.mxu1  ;;  %2682 = vpow2.f32 %v1952_v25  ;;  %vm1929_vm5 = vcmp.gt.f32.partialorder %v3345_v16, 0.0 }
 0x221   : > { %v1592_v40 = vadd.f32 %v1591_v1, %v1430_v51  ;;  %v1956_v45 = vmul.f32 1.442695, %v1941_v26  ;;  %v3364_v48 = vadd.f32 %v3332_v5, %v1597_v29  ;;  %2684 = vpow2.f32 %v1950_v17  ;;  %v2578_v29 = vpop.f32.mrf.mxu0 }
 0x222   : > { %v2549_v3 = vpop.f32.mrf.mxu1  ;;  %v1940_v60 = vmin.f32 %v3360_v36, 0.0  ;;  %vm1928_vm6 = vcmp.gt.f32.partialorder %v3360_v36, 0.0 }
 0x223   : > { %v1607_v61 = vadd.f32 %v2549_v3, %v2523_v52  ;;  %v3369_v63 = vadd.f32 %v3332_v5, %v1592_v40  ;;  %2686 = vpow2.f32 %v1956_v45  ;;  %v1943_v10 = vmin.f32 %v3364_v48, 0.0 }
 0x224   : > { %v1601_v7 = vpop.f32.mrf.mxu1  ;;  %vm1931_vm7 = vcmp.gt.f32.partialorder %v3364_v48, 0.0 }
 0x225   : > { %v3375_v52 = vadd.f32 %v3332_v5, %v1607_v61  ;;  %v1942_v25 = vmin.f32 %v3369_v63, 0.0  ;;  %v1602_v17 = vadd.f32 %v1601_v7, %v3319_v53  ;;  %v1960_v45 = vmul.f32 1.442695, %v1943_v10  ;;  %v1763_v7 = vpop.f32.mrf.mxu0 }
 0x226   : > { %v3334_v11 = vpop.f32.mrf.mxu1  ;;  %vm1930_vm8 = vcmp.gt.f32.partialorder %v3369_v63, 0.0 }
 0x227   : > { %v1958_v61 = vmul.f32 1.442695, %v1942_v25  ;;  %v2581_v10 = vpop.f32.mrf.mxu0  ;;  %vm1933_vm9 = vcmp.gt.f32.partialorder %v3375_v52, 0.0 }
 0x228   : > { %v3342_v15 = vpop.f32.mrf.mxu1 }
 0x22a   : > { %v3347_v19 = vpop.f32.mrf.mxu1 }
 0x22c   : > { %v3351_v41 = vpop.f32.mrf.mxu1 }
 0x22e   : > { %v2592_v18 = vpop.f32.mrf.mxu1 }
 0x22f   : > { %v1854_v37 = vadd.f32 %v2592_v18, %v2566_v2  ;;  %v1954_v18 = vmul.f32 1.442695, %v1940_v60 }
 0x230   : > { %v1848_v38 = vpop.f32.mrf.mxu1 }
 0x231   : > { %v1849_v43 = vadd.f32 %v1848_v38, %v1723_v9  ;;  %v1915_v0 = vadd.f32 %v3357_v35, %v1854_v37 }
 0x232   : > { %v2595_v8 = vpop.f32.mrf.mxu1 }
 0x233   : > { %v1914_v49 = vadd.f32 %v3357_v35, %v1849_v43  ;;  %v1864_v50 = vadd.f32 %v2595_v8, %v2569_v13  ;;  %v1999_v62 = vsub.f32 0.0, %v1915_v0  ;;  %v1945_v8 = vmin.f32 %v3375_v52, 0.0 }
 0x234   : > { %v1858_v51 = vpop.f32.mrf.mxu1 }
 0x235   : > { %v1998_v1 = vsub.f32 0.0, %v1914_v49  ;;  %v1917_v2 = vadd.f32 %v3357_v35, %v1864_v50  ;;  %v1859_v4 = vadd.f32 %v1858_v51, %v1733_v21  ;;  %v2012_v6 = vmul.f32 1.442695, %v1999_v62 }
 0x236   : > { %v2598_v9 = vpop.f32.mrf.mxu1  ;;  %v3384_v51 = vadd.f32 %v3332_v5, %v1602_v17 }
 0x237   : > { %v2010_v13 = vmul.f32 1.442695, %v1998_v1  ;;  %v2001_v20 = vsub.f32 0.0, %v1917_v2  ;;  %v1916_v24 = vadd.f32 %v3357_v35, %v1859_v4  ;;  %2688 = vpow2.f32 %v2012_v6 }
 0x238   : > { %v1874_v3 = vadd.f32 %v2598_v9, %v2572_v23  ;;  %v1868_v26 = vpop.f32.mrf.mxu1  ;;  %v3387_v9 = vpop.eup %2682  ;;  %vm1932_vm10 = vcmp.gt.f32.partialorder %v3384_v51, 0.0 }
 0x239   : > { %2690 = vpow2.f32 %v2010_v13  ;;  %v2016_v21 = vmul.f32 1.442695, %v2001_v20  ;;  %v2000_v37 = vsub.f32 0.0, %v1916_v24  ;;  %v1869_v40 = vadd.f32 %v1868_v26, %v1743_v34 }
 0x23a   : > { %v1919_v38 = vadd.f32 %v3357_v35, %v1874_v3  ;;  %v2601_v43 = vpop.f32.mrf.mxu1  ;;  %v1964_v13 = vmul.f32 1.442695, %v1945_v8  ;;  %v1617_v20 = vadd.f32 %v3334_v11, %v3321_v54  ;;  %v3391_v3 = vpop.eup %2684 }
 0x23b   : > { %2692 = vpow2.f32 %v2016_v21  ;;  %v1884_v0 = vadd.f32 %v2601_v43, %v2575_v59  ;;  %v2014_v23 = vmul.f32 1.442695, %v2000_v37  ;;  %v1918_v50 = vadd.f32 %v3357_v35, %v1869_v40  ;;  %v3394_v17 = vpop.eup %2686 }
 0x23c   : > { %v2003_v49 = vsub.f32 0.0, %v1919_v38  ;;  %v1878_v60 = vpop.f32.mrf.mxu1  ;;  %2694 = vpow2.f32 %v1954_v18  ;;  %v1612_v37 = vadd.f32 %v3342_v15, %v3323_v56  ;;  %v1773_v38 = vpop.f32.mrf.mxu0  ;;  %v1944_v40 = vmin.f32 %v3384_v51, 0.0 }
 0x23d   : > { %v1921_v62 = vadd.f32 %v3357_v35, %v1884_v0  ;;  %v1879_v53 = vadd.f32 %v1878_v60, %v1753_v28  ;;  %2696 = vpow2.f32 %v2014_v23  ;;  %v2002_v1 = vsub.f32 0.0, %v1918_v50 }
 0x23e   : > { %v2020_v34 = vmul.f32 1.442695, %v2003_v49  ;;  %v2604_v59 = vpop.f32.mrf.mxu1  ;;  %2698 = vpow2.f32 %v1960_v45  ;;  %v3401_v23 = vadd.f32 %v3332_v5, %v1617_v20  ;;  %v1627_v56 = vadd.f32 %v3347_v19, %v3325_v57 }
 0x23f   : > { %v2005_v2 = vsub.f32 0.0, %v1921_v62  ;;  %v1920_v4 = vadd.f32 %v3357_v35, %v1879_v53  ;;  %v1894_v6 = vadd.f32 %v2604_v59, %v2578_v29  ;;  %v2018_v24 = vmul.f32 1.442695, %v2002_v1 }
 0x240   : > { %2700 = vpow2.f32 %v2020_v34  ;;  %v1888_v28 = vpop.f32.mrf.mxu1  ;;  %v3407_v53 = vadd.f32 %v3332_v5, %v1612_v37  ;;  %v1622_v59 = vadd.f32 %v3351_v41, %v3327_v58  ;;  %v1947_v57 = vmin.f32 %v3401_v23, 0.0 }
 0x241   : > { %2702 = vpow2.f32 %v1958_v61  ;;  %v2024_v26 = vmul.f32 1.442695, %v2005_v2  ;;  %v2004_v18 = vsub.f32 0.0, %v1920_v4  ;;  %v1923_v25 = vadd.f32 %v3357_v35, %v1894_v6 }
 0x242   : > { %2704 = vpow2.f32 %v2018_v24  ;;  %v1889_v21 = vadd.f32 %v1888_v28, %v1763_v7  ;;  %v2607_v29 = vpop.f32.mrf.mxu1  ;;  %v1946_v58 = vmin.f32 %v3407_v53, 0.0  ;;  %v3418_v41 = vadd.f32 %v3332_v5, %v1622_v59 }
 0x243   : > { %2706 = vpow2.f32 %v2024_v26  ;;  %v2022_v54 = vmul.f32 1.442695, %v2004_v18  ;;  %v2007_v11 = vsub.f32 0.0, %v1923_v25  ;;  %v1904_v45 = vadd.f32 %v2607_v29, %v2581_v10 }
 0x244   : > { %2708 = vpow2.f32 %v1964_v13  ;;  %v1922_v43 = vadd.f32 %v3357_v35, %v1889_v21  ;;  %v1898_v0 = vpop.f32.mrf.mxu1  ;;  %v2689_v8 = vpop.eup %2688  ;;  %v3414_v13 = vadd.f32 %v3332_v5, %v1627_v56  ;;  %v1968_v21 = vmul.f32 1.442695, %v1947_v57 }
 0x245   : > { %2710 = vpow2.f32 %v2022_v54  ;;  %v2028_v49 = vmul.f32 1.442695, %v2007_v11  ;;  %v1899_v50 = vadd.f32 %v1898_v0, %v1773_v38  ;;  %v2035_v15 = vadd.f32 1.0, %v2689_v8 }
 0x246   : > { %v2691_v60 = vpop.eup %2690  ;;  %v2006_v61 = vsub.f32 0.0, %v1922_v43  ;;  %v1925_v62 = vadd.f32 %v3357_v35, %v1904_v45  ;;  %v1949_v37 = vmin.f32 %v3414_v13, 0.0  ;;  %v1948_v43 = vmin.f32 %v3418_v41, 0.0 }
 0x247   : > { %v2034_v7 = vadd.f32 1.0, %v2691_v60  ;;  %2712 = vpow2.f32 %v2028_v49  ;;  %v1924_v34 = vadd.f32 %v3357_v35, %v1899_v50  ;;  %v1962_v35 = vmul.f32 1.442695, %v1944_v40 }
 0x248   : > { %v2693_v1 = vpop.eup %2692  ;;  %2714 = vrcp.f32 %v2035_v15  ;;  %v2026_v2 = vmul.f32 1.442695, %v2006_v61  ;;  %v2009_v4 = vsub.f32 0.0, %v1925_v62  ;;  %v1966_v40 = vmul.f32 1.442695, %v1946_v58 }
 0x249   : > { %2716 = vrcp.f32 %v2034_v7  ;;  %v2037_v19 = vadd.f32 1.0, %v2693_v1  ;;  %v2008_v6 = vsub.f32 0.0, %v1924_v34  ;;  %v2695_v10 = vpop.eup %2694  ;;  %v2353_v49 = vadd.f32 -1.0, %v3387_v9 }
 0x24a   : > { %2718 = vpow2.f32 %v2026_v2  ;;  %v2032_v20 = vmul.f32 1.442695, %v2009_v4  ;;  %v2697_v24 = vpop.eup %2696  ;;  %v1972_v50 = vmul.f32 1.442695, %v1949_v37  ;;  %v2352_v60 = vadd.f32 -1.0, %v3391_v3 }
 0x24b   : > { %2720 = vrcp.f32 %v2037_v19  ;;  %v2030_v28 = vmul.f32 1.442695, %v2008_v6  ;;  %v2699_v26 = vpop.eup %2698  ;;  %v2036_v18 = vadd.f32 1.0, %v2697_v24  ;;  %v1970_v61 = vmul.f32 1.442695, %v1948_v43 }
 0x24c   : > { %2722 = vpow2.f32 %v2032_v20  ;;  %v2355_v7 = vadd.f32 -1.0, %v3394_v17  ;;  %v1987_v3 = vsel %vm1927_vm3, %v3337_v12, %v2353_v49  ;;  %v1986_v2 = vsel %vm1926_vm4, %v3340_v14, %v2352_v60 }
 0x24d   : > { %v2701_v25 = vpop.eup %2700  ;;  %2724 = vpow2.f32 %v2030_v28  ;;  %v2354_v4 = vadd.f32 -1.0, %v2695_v10  ;;  %v2357_v58 = vadd.f32 -1.0, %v2699_v26  ;;  %vm1935_vm11 = vcmp.gt.f32.partialorder %v3401_v23, 0.0 }
 0x24e   : > { %v3420_v29 = vpop.eup %2702  ;;  %2726 = vrcp.f32 %v2036_v18  ;;  %v2039_v54 = vadd.f32 1.0, %v2701_v25  ;;  %v1989_v12 = vsel %vm1929_vm5, %v3345_v16, %v2355_v7  ;;  %vm1934_vm12 = vcmp.gt.f32.partialorder %v3407_v53, 0.0 }
 0x24f   : > { %v2705_v11 = vpop.eup %2704  ;;  %2728 = vpow2.f32 %v1962_v35  ;;  %v1988_v16 = vsel %vm1928_vm6, %v3360_v36, %v2354_v4  ;;  %vm1937_vm13 = vcmp.gt.f32.partialorder %v3414_v13, 0.0  ;;  %vm1936_vm14 = vcmp.gt.f32.partialorder %v3418_v41, 0.0 }
 0x250   : > { %v2707_v38 = vpop.eup %2706  ;;  %2730 = vrcp.f32 %v2039_v54  ;;  %v2038_v5 = vadd.f32 1.0, %v2705_v11 }
 0x251   : > { %v2709_v45 = vpop.eup %2708  ;;  %2732 = vpow2.f32 %v1968_v21  ;;  %v2041_v0 = vadd.f32 1.0, %v2707_v38 }
 0x252   : > { %v2711_v8 = vpop.eup %2710  ;;  %2734 = vrcp.f32 %v2038_v5  ;;  %v2359_v43 = vadd.f32 -1.0, %v2709_v45 }
 0x253   : > { %2736 = vrcp.f32 %v2041_v0  ;;  %v2040_v56 = vadd.f32 1.0, %v2711_v8 }
 0x254   : > { %v2713_v15 = vpop.eup %2712  ;;  %2738 = vpow2.f32 %v1966_v40  ;;  %v2356_v40 = vadd.f32 -1.0, %v3420_v29  ;;  %v1993_v7 = vsel %vm1933_vm9, %v3375_v52, %v2359_v43 }
 0x255   : > { %v2715_v62 = vpop.eup %2714  ;;  %2740 = vrcp.f32 %v2040_v56  ;;  %v2043_v9 = vadd.f32 1.0, %v2713_v15 }
 0x256   : > { %v2717_v34 = vpop.eup %2716  ;;  %2742 = vpow2.f32 %v1972_v50  ;;  %v2071_v1 = vsub.f32 1.0, %v2715_v62  ;;  %v2059_v6 = vmul.f32 %v2715_v62, %v1987_v3  ;;  %v1991_v50 = vsel %vm1931_vm7, %v3364_v48, %v2357_v58 }
 0x257   : > { %v2719_v59 = vpop.eup %2718  ;;  %v2070_v57 = vsub.f32 1.0, %v2717_v34  ;;  %2744 = vrcp.f32 %v2043_v9  ;;  %v2058_v14 = vmul.f32 %v2717_v34, %v1986_v2 }
 0x258   : > { %v2721_v19 = vpop.eup %2720  ;;  %2746 = vpow2.f32 %v1970_v61  ;;  %v2083_v17 = vmul.f32 %v2071_v1, %v3232_v30  ;;  %v2042_v20 = vadd.f32 1.0, %v2719_v59 }
 0x259   : > { %v2723_v24 = vpop.eup %2722  ;;  %v2082_v10 = vmul.f32 %v2070_v57, %v3225_v22  ;;  %v2073_v35 = vsub.f32 1.0, %v2721_v19  ;;  %v2061_v37 = vmul.f32 %v2721_v19, %v1989_v12 }
 0x25a   : > { %v2725_v28 = vpop.eup %2724  ;;  %v2095_v30 = vadd.f32 %v2083_v17, %v2059_v6  ;;  %2748 = vrcp.f32 %v2042_v20  ;;  %v2045_v18 = vadd.f32 1.0, %v2723_v24 }
 0x25b   : > { %v2727_v25 = vpop.eup %2726  ;;  %v2094_v21 = vadd.f32 %v2082_v10, %v2058_v14  ;;  %v2085_v54 = vmul.f32 %v2073_v35, %v3249_v32  ;;  %v2044_v11 = vadd.f32 1.0, %v2725_v28 }
 0x25c   : > { %v2729_v38 = vpop.eup %2728  ;;  %2107 = vst.msk [vmem:[%s3439_s20 + $0x8] sm:$0xff] %vm570_vm0, %v2095_v30  ;;  %v2072_v22 = vsub.f32 1.0, %v2727_v25  ;;  %2750 = vrcp.f32 %v2045_v18  ;;  %v2060_v0 = vmul.f32 %v2727_v25, %v1988_v16 }
 0x25d   : > { %v2731_v26 = vpop.eup %2730  ;;  %2106 = vst.msk [vmem:[%s3439_s20] sm:$0xff] %vm570_vm0, %v2094_v21  ;;  %v2097_v5 = vadd.f32 %v2085_v54, %v2061_v37  ;;  %2752 = vrcp.f32 %v2044_v11  ;;  %v2358_v29 = vadd.f32 -1.0, %v2729_v38 }
 0x25e   : > { %v2733_v32 = vpop.eup %2732  ;;  %v2084_v8 = vmul.f32 %v2072_v22, %v3235_v31  ;;  %v2075_v36 = vsub.f32 1.0, %v2731_v26  ;;  %v2063_v56 = vmul.f32 %v2731_v26, %v1991_v50  ;;  %v1990_v31 = vsel %vm1930_vm8, %v3369_v63, %v2356_v40 }
 0x25f   : > { %v2735_v49 = vpop.eup %2734  ;;  %2109 = vst.msk [vmem:[%s3439_s20 + $0x18] sm:$0xff] %vm570_vm0, %v2097_v5  ;;  %v2361_v34 = vadd.f32 -1.0, %v2733_v32  ;;  %v1992_v57 = vsel %vm1932_vm10, %v3384_v51, %v2358_v29 }
 0x260   : > { %v2737_v45 = vpop.eup %2736  ;;  %v2096_v60 = vadd.f32 %v2084_v8, %v2060_v0  ;;  %v2087_v15 = vmul.f32 %v2075_v36, %v3262_v27  ;;  %v2074_v61 = vsub.f32 1.0, %v2735_v49  ;;  %v2062_v1 = vmul.f32 %v2735_v49, %v1990_v31 }
 0x261   : > { %v2739_v62 = vpop.eup %2738  ;;  %v2077_v48 = vsub.f32 1.0, %v2737_v45  ;;  %v2065_v27 = vmul.f32 %v2737_v45, %v1993_v7 }
 0x262   : > { %v2741_v9 = vpop.eup %2740  ;;  %2108 = vst.msk [vmem:[%s3439_s20 + $0x10] sm:$0xff] %vm570_vm0, %v2096_v60  ;;  %v2099_v3 = vadd.f32 %v2087_v15, %v2063_v56  ;;  %v2086_v59 = vmul.f32 %v2074_v61, %v3252_v33  ;;  %v2360_v19 = vadd.f32 -1.0, %v2739_v62 }
 0x263   : > { %v2743_v2 = vpop.eup %2742  ;;  %v2089_v4 = vmul.f32 %v2077_v48, %v3272_v42  ;;  %v2076_v63 = vsub.f32 1.0, %v2741_v9  ;;  %v2064_v20 = vmul.f32 %v2741_v9, %v1992_v57  ;;  %v1995_v42 = vsel %vm1935_vm11, %v3401_v23, %v2361_v34 }
 0x264   : > { %v2745_v52 = vpop.eup %2744  ;;  %2111 = vst.msk [vmem:[%s3439_s20 + $0x28] sm:$0xff] %vm570_vm0, %v2099_v3  ;;  %v2098_v6 = vadd.f32 %v2086_v59, %v2062_v1  ;;  %v2363_v10 = vadd.f32 -1.0, %v2743_v2 }
 0x265   : > { %v2747_v17 = vpop.eup %2746  ;;  %v2101_v33 = vadd.f32 %v2089_v4, %v2065_v27  ;;  %v2088_v24 = vmul.f32 %v2076_v63, %v3265_v39  ;;  %v2079_v12 = vsub.f32 1.0, %v2745_v52  ;;  %v2067_v35 = vmul.f32 %v2745_v52, %v1995_v42 }
 0x266   : > { %2110 = vst.msk [vmem:[%s3439_s20 + $0x20] sm:$0xff] %vm570_vm0, %v2098_v6  ;;  %v2362_v58 = vadd.f32 -1.0, %v2747_v17  ;;  %v1994_v39 = vsel %vm1934_vm12, %v3407_v53, %v2360_v19  ;;  %v1997_v54 = vsel %vm1937_vm13, %v3414_v13, %v2363_v10 }
 0x267   : > { %v2749_v14 = vpop.eup %2748  ;;  %2113 = vst.msk [vmem:[%s3439_s20 + $0x38] sm:$0xff] %vm570_vm0, %v2101_v33  ;;  %v2100_v51 = vadd.f32 %v2088_v24, %v2064_v20  ;;  %v2091_v28 = vmul.f32 %v2079_v12, %v3282_v55 }
 0x268   : > { %v2078_v30 = vsub.f32 1.0, %v2749_v14  ;;  %v2066_v21 = vmul.f32 %v2749_v14, %v1994_v39  ;;  %v1996_v11 = vsel %vm1936_vm14, %v3418_v41, %v2362_v58 }
 0x269   : > { %v2751_v18 = vpop.eup %2750  ;;  %2112 = vst.msk [vmem:[%s3439_s20 + $0x30] sm:$0xff] %vm570_vm0, %v2100_v51  ;;  %v2103_v23 = vadd.f32 %v2091_v28, %v2067_v35 }
 0x26a   : > { %v2753_v25 = vpop.eup %2752  ;;  %v2090_v37 = vmul.f32 %v2078_v30, %v3275_v44  ;;  %v2081_v55 = vsub.f32 1.0, %v2751_v18  ;;  %v2069_v16 = vmul.f32 %v2751_v18, %v1997_v54 }
 0x26b   : > { %2115 = vst.msk [vmem:[%s3439_s20 + $0x48] sm:$0xff] %vm570_vm0, %v2103_v23  ;;  %v2080_v53 = vsub.f32 1.0, %v2753_v25  ;;  %v2068_v26 = vmul.f32 %v2753_v25, %v1996_v11 }
 0x26c   : > { %v2102_v38 = vadd.f32 %v2090_v37, %v2066_v21  ;;  %v2093_v22 = vmul.f32 %v2081_v55, %v3291_v47 }
 0x26d   : > { %v2092_v40 = vmul.f32 %v2080_v53, %v3285_v46 }
 0x26e   : > { %2114 = vst.msk [vmem:[%s3439_s20 + $0x40] sm:$0xff] %vm570_vm0, %v2102_v38  ;;  %v2105_v44 = vadd.f32 %v2093_v22, %v2069_v16 }
 0x26f   : > { %v2104_v43 = vadd.f32 %v2092_v40, %v2068_v26 }
 0x270   : > { %2117 = vst.msk [vmem:[%s3439_s20 + $0x58] sm:$0xff] %vm570_vm0, %v2105_v44 }
 0x271   : > { %2116 = vst.msk [vmem:[%s3439_s20 + $0x50] sm:$0xff] %vm570_vm0, %v2104_v43 }
 0x272 PF: > { %s20_s17 = sadd.s32 1, %s2792_s17   ;;  %s3525_s13 = smov %s2780_s14 }
 0x273   : > { %p17_p10 = scmp.ge.s32.totalorder %s20_s17, 4   ;;  %s3526_s14 = smov %s2886_s21 }
 0x274   : > { %s3527_s15 = smov %s2788_s16  ;;  %s3528_s16 = smov %s3530_s18 }
 0x275   :  { %19 = sbr.rel (!%p17_p10) target bundleno = 3 (0x3), region = 149 }

// kernel: hglr_forward.12
= control target key start
LH: loop header
LB: loop body
LE: loop exit
PB: predicated region body
PF: predicated region fallthrough
CT: control target
= control target key end

     0   :  { %s1008_s12 = smov 0   ;;  %s1010_s13 = smov 0   ;;  %s1209_s0 = inlined_call_operand.vmem [shape: bf16[256,256], index: 0, kind: input, shape index: {}]   ;;  %s1210_s1 = inlined_call_operand.vmem [shape: bf16[256,32], index: 1, kind: input, shape index: {}]   ;;  %s1211_s2 = inlined_call_operand.vmem [shape: f32[1,32], index: 2, kind: input, shape index: {}]   ;;  %s1212_s3 = inlined_call_operand.vmem [shape: f32[256,32], index: 3, kind: output, shape index: {}]  }
   0x1   :  { %s1012_s14 = smov 0   ;;  %s1014_s15 = smov 0  }
   0x2   :  { %s1016_s16 = smov 0   ;;  %s1018_s17 = smov 0  }
   0x3   :  { %s1020_s18 = smov 0  }
   0x4 LB: > { %s22_s19 = sadd.s32 1, %s977_s16  ;;  %s25_s20 = sadd.s32 1, %s981_s17  ;;  %s985_s18 = sphi %s1020_s18, %s13_s18   ;;  %s981_s17 = sphi %s1018_s17, %s1218_s17   ;;  %s977_s16 = sphi %s1016_s16, %s1217_s16   ;;  %s973_s15 = sphi %s1014_s15, %s1216_s15   ;;  %s969_s14 = sphi %s1012_s14, %s1215_s14   ;;  %s965_s13 = sphi %s1010_s13, %s1214_s13   ;;  %s961_s12 = sphi %s1008_s12, %s1213_s12  }
   0x5   : > { %p23_p0 = scmp.ge.s32.totalorder %s22_s19, 2  ;;  %p41_p1 = scmp.ne.s32.totalorder %s965_s13, %s961_s12 }
   0x6   : > { %p42_p2 = scmp.eq.s32.totalorder %s985_s18, 0  ;;  %s34_s24 = sadd.s32 1, %s965_s13 }
   0x7   : > { %s1220_s19 = smov (%p23_p0, %s22_s19), 0  ;;  %s1222_s20 = smov (!%p23_p0, %s25_s20), %s981_s17 }
   0x8   : > { %p43_p3 = por %p42_p2, %p41_p1  ;;  %p27_p4 = scmp.ge.s32.totalorder %s1222_s20, 2 }
   0x9   : > { %s30_s21 = ssub.s32 %s977_s16, %s1220_s19  ;;  %p761_p6 = scmp.ge.s32.totalorder %s985_s18, 4 }
   0xa   : > { %s1224_s20 = smov (%p27_p4, %s1222_s20), 0 }
   0xb   : > { %s29_s22 = ssub.s32 %s981_s17, %s1224_s20  ;;  %143 = sbr.rel (%p761_p6) target bundleno = 32 (0x20), region = 20 }
   0xc   : > { %s31_s23 = sor.u32 %s30_s21, %s29_s22 }
   0xd   : > { %p32_p5 = scmp.eq.s32.totalorder %s31_s23, 0 }
   0xf   : > { %s1059_s25 = scalar_select %p32_p5, %s965_s13, %s34_s24  }
  0x10   : > { %146 = sbr.rel (!%p43_p3) target bundleno = 32 (0x20), region = 24  ;;  %s148_s26 = sand.u32 (%p43_p3), 1, %s965_s13  }
  0x11   : > { %s793_s27 = sshll.u32 (%p43_p3), %s981_s17, 5  ;;  %s762_s28 = sshll.u32 (%p43_p3), %s148_s26, 6 }
  0x12   : > { %s153_s29 = sadd.s32 (%p43_p3), %s977_s16, %s793_s27  ;;  %s150_s7 = scalar_lea.vmem (%p43_p3), [#allocation3], %s762_s28 }
  0x13   : > { %s765_s30 = sshll.u32 (%p43_p3), %s153_s29, 2 }
  0x14   : > { %s1068_s6 = scalar_lea.vmem (%p43_p3), %s1209_s0, %s765_s30 }
  0x15   : > { %v172_v0 = vld [vmem:[%s1068_s6] sm:$0xf]  ;;  %v174_v1 = vld [vmem:[%s1068_s6 + $0x8] sm:$0xf]  ;;  %v176_v2 = vld [vmem:[%s1068_s6 + $0x10] sm:$0xf] }
  0x16   : > { %173 = vst [vmem:[%s150_s7] sm:$0xf] %v172_v0  ;;  %175 = vst [vmem:[%s150_s7 + $0x4] sm:$0xf] %v174_v1  ;;  %v178_v3 = vld [vmem:[%s1068_s6 + $0x18] sm:$0xf] }
  0x17   : > { %177 = vst [vmem:[%s150_s7 + $0x8] sm:$0xf] %v176_v2  ;;  %v180_v4 = vld [vmem:[%s1068_s6 + $0x20] sm:$0xf]  ;;  %v182_v5 = vld [vmem:[%s1068_s6 + $0x28] sm:$0xf] }
  0x18   : > { %179 = vst [vmem:[%s150_s7 + $0xc] sm:$0xf] %v178_v3  ;;  %181 = vst [vmem:[%s150_s7 + $0x10] sm:$0xf] %v180_v4  ;;  %v184_v6 = vld [vmem:[%s1068_s6 + $0x30] sm:$0xf] }
  0x19   : > { %183 = vst [vmem:[%s150_s7 + $0x14] sm:$0xf] %v182_v5  ;;  %v186_v7 = vld [vmem:[%s1068_s6 + $0x38] sm:$0xf]  ;;  %v188_v8 = vld [vmem:[%s1068_s6 + $0x40] sm:$0xf] }
  0x1a   : > { %185 = vst [vmem:[%s150_s7 + $0x18] sm:$0xf] %v184_v6  ;;  %187 = vst [vmem:[%s150_s7 + $0x1c] sm:$0xf] %v186_v7  ;;  %v190_v9 = vld [vmem:[%s1068_s6 + $0x48] sm:$0xf] }
  0x1b   : > { %189 = vst [vmem:[%s150_s7 + $0x20] sm:$0xf] %v188_v8  ;;  %v192_v10 = vld [vmem:[%s1068_s6 + $0x50] sm:$0xf]  ;;  %v194_v11 = vld [vmem:[%s1068_s6 + $0x58] sm:$0xf] }
  0x1c   : > { %191 = vst [vmem:[%s150_s7 + $0x24] sm:$0xf] %v190_v9  ;;  %193 = vst [vmem:[%s150_s7 + $0x28] sm:$0xf] %v192_v10  ;;  %v196_v12 = vld [vmem:[%s1068_s6 + $0x60] sm:$0xf] }
  0x1d   : > { %195 = vst [vmem:[%s150_s7 + $0x2c] sm:$0xf] %v194_v11  ;;  %v198_v13 = vld [vmem:[%s1068_s6 + $0x68] sm:$0xf]  ;;  %v200_v14 = vld [vmem:[%s1068_s6 + $0x70] sm:$0xf] }
  0x1e   : > { %197 = vst [vmem:[%s150_s7 + $0x30] sm:$0xf] %v196_v12  ;;  %199 = vst [vmem:[%s150_s7 + $0x34] sm:$0xf] %v198_v13  ;;  %v202_v15 = vld [vmem:[%s1068_s6 + $0x78] sm:$0xf] }
  0x1f   : > { %201 = vst [vmem:[%s150_s7 + $0x38] sm:$0xf] %v200_v14  ;;  %203 = vst [vmem:[%s150_s7 + $0x3c] sm:$0xf] %v202_v15 }
  0x20 PF: > { %p766_p7 = scmp.ge.s32.totalorder %s985_s18, 1  ;;  %p267_p8 = scmp.lt.s32.totalorder %s985_s18, 5 }
  0x22   : > { %p268_p9 = pnand %p766_p7, %p267_p8 }
  0x23   : > { %s274_s8 = sand.u32 (!%p268_p9), 1, %s961_s12   ;;  %s768_s9 = sshll.u32 (!%p268_p9), %s969_s14, 4 }
  0x24   : > { %271 = sbr.rel (%p268_p9) target bundleno = 313 (0x139), region = 69  ;;  %s767_s10 = sshll.u32 (!%p268_p9), %s274_s8, 6 }
  0x25   : > { %p304_p10 = scmp.lt.s32.totalorder (!%p268_p9), %s768_s9, 31  ;;  %s770_s11 = sshll.u32 (!%p268_p9), %s973_s15, 4 }
  0x26   : > { %p310_p11 = scmp.lt.s32.totalorder (!%p268_p9), %s770_s11, 31  ;;  %s1101_s12 = scalar_lea.vmem (!%p268_p9), [#allocation3], %s767_s10 }
  0x27   : > { %p772_p12 = scmp.ne.s32.totalorder (!%p268_p9), %s969_s14, 0 }
  0x29   : > { %s1226_s9 = smov (!%p304_p10, %s768_s9), 31  ;;  %s1228_s11 = smov (!%p310_p11, %s770_s11), 31 }
  0x2a   : > { %s769_s21 = sshll.u32 %s1226_s9, 2  ;;  %s771_s26 = sshll.u32 %s1228_s11, 3 }
  0x2b   : > { %s1094_s24 = scalar_lea.vmem %s1210_s1, %s769_s21  ;;  %s1099_s29 = scalar_lea.vmem %s1212_s3, %s771_s26 }
  0x2c   : > { %319 = sbr.rel (%p772_p12) target bundleno = 58 (0x3a), region = 77 }
  0x31   : > { %vm320_vm0 = vcmask 261120   ;;  %v987_v16 = vmov 0.0  }
  0x32   : > { %321 = vst.msk [vmem:[#allocation2] sm:$0xff] %vm320_vm0, %v987_v16  ;;  %322 = vst.msk [vmem:[#allocation2 + $0x8] sm:$0xff] %vm320_vm0, %v987_v16 }
  0x33   : > { %323 = vst.msk [vmem:[#allocation2 + $0x10] sm:$0xff] %vm320_vm0, %v987_v16  ;;  %324 = vst.msk [vmem:[#allocation2 + $0x18] sm:$0xff] %vm320_vm0, %v987_v16 }
  0x34   : > { %325 = vst.msk [vmem:[#allocation2 + $0x20] sm:$0xff] %vm320_vm0, %v987_v16  ;;  %326 = vst.msk [vmem:[#allocation2 + $0x28] sm:$0xff] %vm320_vm0, %v987_v16 }
  0x35   : > { %327 = vst.msk [vmem:[#allocation2 + $0x30] sm:$0xff] %vm320_vm0, %v987_v16  ;;  %328 = vst.msk [vmem:[#allocation2 + $0x38] sm:$0xff] %vm320_vm0, %v987_v16 }
  0x36   : > { %329 = vst.msk [vmem:[#allocation2 + $0x40] sm:$0xff] %vm320_vm0, %v987_v16  ;;  %330 = vst.msk [vmem:[#allocation2 + $0x48] sm:$0xff] %vm320_vm0, %v987_v16 }
  0x37   : > { %331 = vst.msk [vmem:[#allocation2 + $0x50] sm:$0xff] %vm320_vm0, %v987_v16  ;;  %332 = vst.msk [vmem:[#allocation2 + $0x58] sm:$0xff] %vm320_vm0, %v987_v16 }
  0x38   : > { %333 = vst.msk [vmem:[#allocation2 + $0x60] sm:$0xff] %vm320_vm0, %v987_v16  ;;  %334 = vst.msk [vmem:[#allocation2 + $0x68] sm:$0xff] %vm320_vm0, %v987_v16 }
  0x39   : > { %335 = vst.msk [vmem:[#allocation2 + $0x70] sm:$0xff] %vm320_vm0, %v987_v16  ;;  %336 = vst.msk [vmem:[#allocation2 + $0x78] sm:$0xff] %vm320_vm0, %v987_v16 }
  0x3a PF: > { %v915_v17 = vld [vmem:[%s1094_s24 + $0x38] sm:$0xff]   ;;  %v916_v18 = vld [vmem:[%s1094_s24 + $0x30] sm:$0xff]   ;;  %v917_v19 = vld [vmem:[%s1094_s24 + $0x28] sm:$0xff]   ;;  %vm594_vm1 = vcmask 261120   ;;  %p789_p13 = scmp.ne.s32.totalorder %s969_s14, 1 }
  0x3b   : > { %810 = vmatprep.subr.bf16.mxu0 %v915_v17  ;;  %842 = vmatprep.subr.bf16.mxu1 %v915_v17  ;;  %v918_v20 = vld [vmem:[%s1094_s24 + $0x20] sm:$0xff]   ;;  %v919_v23 = vld [vmem:[%s1094_s24 + $0x18] sm:$0xff]   ;;  %v920_v24 = vld [vmem:[%s1094_s24 + $0x10] sm:$0xff]  }
  0x3c   : > { %811 = vmatpush3.bf16.msra.mxu0 %v915_v17  ;;  %850 = vmatpush3.bf16.msra.mxu1 %v915_v17  ;;  %v923_v21 = vld [vmem:[%s1101_s12] sm:$0xff]   ;;  %v921_v25 = vld [vmem:[%s1094_s24 + $0x8] sm:$0xff]   ;;  %v927_v29 = vld [vmem:[%s1101_s12 + $0x10] sm:$0xff]  }
  0x3d   : > { %812 = vmatprep.subr.bf16.mxu0 %v916_v18  ;;  %843 = vmatprep.subr.bf16.mxu1 %v916_v18  ;;  %v924_v22 = vld [vmem:[%s1101_s12 + $0x20] sm:$0xff]   ;;  %v925_v27 = vld [vmem:[%s1101_s12 + $0x8] sm:$0xff]   ;;  %v928_v30 = vld [vmem:[%s1101_s12 + $0x30] sm:$0xff]  }
  0x3e   : > { %826 = vmatprep.mubr.bf16.mxu0 %v923_v21  ;;  %834 = vmatprep.mubr.bf16.mxu1 %v924_v22  ;;  %v922_v26 = vld [vmem:[%s1094_s24] sm:$0xff]   ;;  %v926_v28 = vld [vmem:[%s1101_s12 + $0x28] sm:$0xff]   ;;  %v929_v31 = vld [vmem:[%s1101_s12 + $0x18] sm:$0xff]  }
  0x3f   : > { %v930_v32 = vld [vmem:[%s1101_s12 + $0x38] sm:$0xff]   ;;  %v339_v33 = vld [vmem:[#allocation2 + $0x10] sm:$0xff]  ;;  %v337_v37 = vld [vmem:[#allocation2] sm:$0xff] }
  0x40   : > { %813 = vmatpush3.bf16.msra.mxu0 %v916_v18  ;;  %851 = vmatpush3.bf16.msra.mxu1 %v916_v18  ;;  %v347_v34 = vld [vmem:[#allocation2 + $0x50] sm:$0xff]  ;;  %v345_v38 = vld [vmem:[#allocation2 + $0x40] sm:$0xff]  ;;  %v340_v43 = vld [vmem:[#allocation2 + $0x18] sm:$0xff] }
  0x41   : > { %814 = vmatprep.subr.bf16.mxu0 %v917_v19  ;;  %844 = vmatprep.subr.bf16.mxu1 %v917_v19  ;;  %v348_v44 = vld [vmem:[#allocation2 + $0x58] sm:$0xff]  ;;  %v338_v49 = vld [vmem:[#allocation2 + $0x8] sm:$0xff]  ;;  %v343_v55 = vld [vmem:[#allocation2 + $0x30] sm:$0xff] }
  0x42   : > { %v346_v50 = vld [vmem:[#allocation2 + $0x48] sm:$0xff]  ;;  %v351_v56 = vld [vmem:[#allocation2 + $0x70] sm:$0xff]  ;;  %v341_v61 = vld [vmem:[#allocation2 + $0x20] sm:$0xff] }
  0x43   : > { %v349_v62 = vld [vmem:[#allocation2 + $0x60] sm:$0xff]  ;;  %v344_v3 = vld [vmem:[#allocation2 + $0x38] sm:$0xff]  ;;  %v342_v9 = vld [vmem:[#allocation2 + $0x28] sm:$0xff] }
  0x44   : > { %815 = vmatpush3.bf16.msra.mxu0 %v917_v19  ;;  %852 = vmatpush3.bf16.msra.mxu1 %v917_v19  ;;  %v352_v4 = vld [vmem:[#allocation2 + $0x78] sm:$0xff]  ;;  %v350_v10 = vld [vmem:[#allocation2 + $0x68] sm:$0xff] }
  0x45   : > { %816 = vmatprep.subr.bf16.mxu0 %v918_v20  ;;  %845 = vmatprep.subr.bf16.mxu1 %v918_v20 }
  0x48   : > { %817 = vmatpush3.bf16.msra.mxu0 %v918_v20  ;;  %853 = vmatpush3.bf16.msra.mxu1 %v918_v20 }
  0x49   : > { %818 = vmatprep.subr.bf16.mxu0 %v919_v23  ;;  %846 = vmatprep.subr.bf16.mxu1 %v919_v23 }
  0x4c   : > { %819 = vmatpush3.bf16.msra.mxu0 %v919_v23  ;;  %854 = vmatpush3.bf16.msra.mxu1 %v919_v23 }
  0x4d   : > { %820 = vmatprep.subr.bf16.mxu0 %v920_v24  ;;  %847 = vmatprep.subr.bf16.mxu1 %v920_v24 }
  0x50   : > { %821 = vmatpush3.bf16.msra.mxu0 %v920_v24  ;;  %855 = vmatpush3.bf16.msra.mxu1 %v920_v24 }
  0x51   : > { %822 = vmatprep.subr.bf16.mxu0 %v921_v25  ;;  %848 = vmatprep.subr.bf16.mxu1 %v921_v25 }
  0x54   : > { %823 = vmatpush3.bf16.msra.mxu0 %v921_v25  ;;  %856 = vmatpush3.bf16.msra.mxu1 %v921_v25 }
  0x55   : > { %824 = vmatprep.subr.bf16.mxu0 %v922_v26  ;;  %849 = vmatprep.subr.bf16.mxu1 %v922_v26 }
  0x58   : > { %825 = vmatpush3.bf16.msra.mxu0 %v922_v26  ;;  %857 = vmatpush3.bf16.msra.mxu1 %v922_v26 }
  0x5b   : > { %827 = vmatmul.mubr.bf16.vlgmr.msra.gmra.mxu0 %v925_v27  ;;  %835 = vmatmul.mubr.bf16.vlgmr.msra.gmra.mxu1 %v926_v28 }
  0x5c   : > { %830 = vmatprep.mubr.bf16.mxu0 %v927_v29  ;;  %838 = vmatprep.mubr.bf16.mxu1 %v928_v30 }
  0x63   : > { %831 = vmatmul.mubr.bf16.gmra.mxu0 %v929_v31  ;;  %839 = vmatmul.mubr.bf16.gmra.mxu1 %v930_v32 }
 0x11b   : > { %v828_v35 = vpop.f32.mrf.mxu0  ;;  %v836_v36 = vpop.f32.mrf.mxu1 }
 0x11c   : > { %v580_v39 = vadd.f32 %v828_v35, %v339_v33  ;;  %v588_v40 = vadd.f32 %v836_v36, %v347_v34 }
 0x11d   : > { %v515_v41 = vpop.f32.mrf.mxu0  ;;  %v547_v42 = vpop.f32.mrf.mxu1 }
 0x11e   : > { %597 = vst.msk [vmem:[#allocation2 + $0x10] sm:$0xff] %vm594_vm1, %v580_v39  ;;  %605 = vst.msk [vmem:[#allocation2 + $0x50] sm:$0xff] %vm594_vm1, %v588_v40  ;;  %v578_v45 = vadd.f32 %v515_v41, %v337_v37  ;;  %v586_v46 = vadd.f32 %v547_v42, %v345_v38 }
 0x11f   : > { %v829_v47 = vpop.f32.mrf.mxu0  ;;  %v837_v48 = vpop.f32.mrf.mxu1 }
 0x120   : > { %595 = vst.msk [vmem:[#allocation2] sm:$0xff] %vm594_vm1, %v578_v45  ;;  %603 = vst.msk [vmem:[#allocation2 + $0x40] sm:$0xff] %vm594_vm1, %v586_v46  ;;  %v581_v51 = vadd.f32 %v829_v47, %v340_v43  ;;  %v589_v52 = vadd.f32 %v837_v48, %v348_v44 }
 0x121   : > { %v518_v53 = vpop.f32.mrf.mxu0  ;;  %v550_v54 = vpop.f32.mrf.mxu1 }
 0x122   : > { %598 = vst.msk [vmem:[#allocation2 + $0x18] sm:$0xff] %vm594_vm1, %v581_v51  ;;  %606 = vst.msk [vmem:[#allocation2 + $0x58] sm:$0xff] %vm594_vm1, %v589_v52  ;;  %v579_v57 = vadd.f32 %v518_v53, %v338_v49  ;;  %v587_v58 = vadd.f32 %v550_v54, %v346_v50 }
 0x123   : > { %v832_v59 = vpop.f32.mrf.mxu0  ;;  %v840_v60 = vpop.f32.mrf.mxu1 }
 0x124   : > { %596 = vst.msk [vmem:[#allocation2 + $0x8] sm:$0xff] %vm594_vm1, %v579_v57  ;;  %604 = vst.msk [vmem:[#allocation2 + $0x48] sm:$0xff] %vm594_vm1, %v587_v58  ;;  %v584_v63 = vadd.f32 %v832_v59, %v343_v55  ;;  %v592_v0 = vadd.f32 %v840_v60, %v351_v56 }
 0x125   : > { %v531_v1 = vpop.f32.mrf.mxu0  ;;  %v563_v2 = vpop.f32.mrf.mxu1 }
 0x126   : > { %601 = vst.msk [vmem:[#allocation2 + $0x30] sm:$0xff] %vm594_vm1, %v584_v63  ;;  %609 = vst.msk [vmem:[#allocation2 + $0x70] sm:$0xff] %vm594_vm1, %v592_v0  ;;  %v582_v5 = vadd.f32 %v531_v1, %v341_v61  ;;  %v590_v6 = vadd.f32 %v563_v2, %v349_v62 }
 0x127   : > { %v833_v7 = vpop.f32.mrf.mxu0  ;;  %v841_v8 = vpop.f32.mrf.mxu1 }
 0x128   : > { %599 = vst.msk [vmem:[#allocation2 + $0x20] sm:$0xff] %vm594_vm1, %v582_v5  ;;  %607 = vst.msk [vmem:[#allocation2 + $0x60] sm:$0xff] %vm594_vm1, %v590_v6  ;;  %v585_v11 = vadd.f32 %v833_v7, %v344_v3  ;;  %v593_v12 = vadd.f32 %v841_v8, %v352_v4  ;;  %614 = sbr.rel (%p789_p13) target bundleno = 313 (0x139), region = 81 }
 0x129   : > { %v534_v13 = vpop.f32.mrf.mxu0  ;;  %v566_v14 = vpop.f32.mrf.mxu1 }
 0x12a   : > { %602 = vst.msk [vmem:[#allocation2 + $0x38] sm:$0xff] %vm594_vm1, %v585_v11  ;;  %610 = vst.msk [vmem:[#allocation2 + $0x78] sm:$0xff] %vm594_vm1, %v593_v12  ;;  %v583_v15 = vadd.f32 %v534_v13, %v342_v9  ;;  %v591_v16 = vadd.f32 %v566_v14, %v350_v10 }
 0x12c   : > { %600 = vst.msk [vmem:[#allocation2 + $0x28] sm:$0xff] %vm594_vm1, %v583_v15  ;;  %608 = vst.msk [vmem:[#allocation2 + $0x68] sm:$0xff] %vm594_vm1, %v591_v16 }
 0x12d   : > { %v615_v17 = vld [vmem:[#allocation2] sm:$0xff]  ;;  %v616_v19 = vld [vmem:[#allocation2 + $0x8] sm:$0xff]  ;;  %v617_v22 = vld [vmem:[#allocation2 + $0x10] sm:$0xff] }
 0x12e   : > { %v790_v18 = vld [vmem:[%s1211_s2] ss:$0 sm:$0xff]  ;;  %v618_v23 = vld [vmem:[#allocation2 + $0x18] sm:$0xff]  ;;  %v621_v29 = vld [vmem:[#allocation2 + $0x30] sm:$0xff] }
 0x12f   : > { %v638_v20 = vadd.f32 %v790_v18, %v615_v17  ;;  %v639_v21 = vadd.f32 %v790_v18, %v616_v19  ;;  %v619_v24 = vld [vmem:[#allocation2 + $0x20] sm:$0xff]  ;;  %v640_v25 = vadd.f32 %v790_v18, %v617_v22  ;;  %v641_v26 = vadd.f32 %v790_v18, %v618_v23  ;;  %v624_v35 = vld [vmem:[#allocation2 + $0x48] sm:$0xff]  ;;  %v625_v36 = vld [vmem:[#allocation2 + $0x50] sm:$0xff] }
 0x130   : > { %v642_v27 = vadd.f32 %v790_v18, %v619_v24  ;;  %v644_v32 = vadd.f32 %v790_v18, %v621_v29  ;;  %v623_v34 = vld [vmem:[#allocation2 + $0x40] sm:$0xff]  ;;  %v647_v38 = vadd.f32 %v790_v18, %v624_v35  ;;  %v648_v39 = vadd.f32 %v790_v18, %v625_v36  ;;  %v626_v40 = vld [vmem:[#allocation2 + $0x58] sm:$0xff]  ;;  %v629_v46 = vld [vmem:[#allocation2 + $0x70] sm:$0xff] }
 0x131   : > { %v622_v30 = vld [vmem:[#allocation2 + $0x38] sm:$0xff]  ;;  %654 = vst.msk [vmem:[%s1099_s29] sm:$0xff] %vm594_vm1, %v638_v20  ;;  %655 = vst.msk [vmem:[%s1099_s29 + $0x8] sm:$0xff] %vm594_vm1, %v639_v21  ;;  %v646_v37 = vadd.f32 %v790_v18, %v623_v34  ;;  %v627_v41 = vld [vmem:[#allocation2 + $0x60] sm:$0xff]  ;;  %v649_v43 = vadd.f32 %v790_v18, %v626_v40  ;;  %v652_v48 = vadd.f32 %v790_v18, %v629_v46 }
 0x132   : > { %v645_v33 = vadd.f32 %v790_v18, %v622_v30  ;;  %656 = vst.msk [vmem:[%s1099_s29 + $0x10] sm:$0xff] %vm594_vm1, %v640_v25  ;;  %657 = vst.msk [vmem:[%s1099_s29 + $0x18] sm:$0xff] %vm594_vm1, %v641_v26  ;;  %v650_v44 = vadd.f32 %v790_v18, %v627_v41  ;;  %v630_v47 = vld [vmem:[#allocation2 + $0x78] sm:$0xff] }
 0x133   : > { %v620_v28 = vld [vmem:[#allocation2 + $0x28] sm:$0xff]  ;;  %658 = vst.msk [vmem:[%s1099_s29 + $0x20] sm:$0xff] %vm594_vm1, %v642_v27  ;;  %660 = vst.msk [vmem:[%s1099_s29 + $0x30] sm:$0xff] %vm594_vm1, %v644_v32  ;;  %v653_v49 = vadd.f32 %v790_v18, %v630_v47 }
 0x134   : > { %v643_v31 = vadd.f32 %v790_v18, %v620_v28  ;;  %v628_v42 = vld [vmem:[#allocation2 + $0x68] sm:$0xff]  ;;  %661 = vst.msk [vmem:[%s1099_s29 + $0x38] sm:$0xff] %vm594_vm1, %v645_v33  ;;  %662 = vst.msk [vmem:[%s1099_s29 + $0x40] sm:$0xff] %vm594_vm1, %v646_v37 }
 0x135   : > { %v651_v45 = vadd.f32 %v790_v18, %v628_v42  ;;  %663 = vst.msk [vmem:[%s1099_s29 + $0x48] sm:$0xff] %vm594_vm1, %v647_v38  ;;  %664 = vst.msk [vmem:[%s1099_s29 + $0x50] sm:$0xff] %vm594_vm1, %v648_v39 }
 0x136   : > { %659 = vst.msk [vmem:[%s1099_s29 + $0x28] sm:$0xff] %vm594_vm1, %v643_v31  ;;  %665 = vst.msk [vmem:[%s1099_s29 + $0x58] sm:$0xff] %vm594_vm1, %v649_v43 }
 0x137   : > { %666 = vst.msk [vmem:[%s1099_s29 + $0x60] sm:$0xff] %vm594_vm1, %v650_v44  ;;  %667 = vst.msk [vmem:[%s1099_s29 + $0x68] sm:$0xff] %vm594_vm1, %v651_v45 }
 0x138   : > { %668 = vst.msk [vmem:[%s1099_s29 + $0x70] sm:$0xff] %vm594_vm1, %v652_v48  ;;  %669 = vst.msk [vmem:[%s1099_s29 + $0x78] sm:$0xff] %vm594_vm1, %v653_v49 }
 0x139 PF: > { %s13_s18 = sadd.s32 1, %s985_s18   ;;  %s1213_s12 = smov %s965_s13 }
 0x13a   : > { %p10_p0 = scmp.ge.s32.totalorder %s13_s18, 6   ;;  %s1214_s13 = smov %s1059_s25 }
 0x13b   : > { %s1215_s14 = smov %s977_s16  ;;  %s1216_s15 = smov %s981_s17 }
 0x13c   : > { %s1217_s16 = smov %s1220_s19  ;;  %s1218_s17 = smov %s1224_s20 }
 0x13d   :  { %12 = sbr.rel (!%p10_p0) target bundleno = 4 (0x4), region = 119 }

// kernel: hglr_forward.10
= control target key start
LH: loop header
LB: loop body
LE: loop exit
PB: predicated region body
PF: predicated region fallthrough
CT: control target
= control target key end

     0   :  { %s4516_s0 = inlined_call_operand.vmem [shape: bf16[4,256,32], index: 0, kind: input, shape index: {}]   ;;  %s4517_s1 = inlined_call_operand.vmem [shape: f32[4,1,32], index: 1, kind: input, shape index: {}]   ;;  %s4518_s2 = inlined_call_operand.vmem [shape: bf16[256,256], index: 2, kind: input, shape index: {}]   ;;  %s4519_s3 = inlined_call_operand.vmem [shape: bf16[256,256], index: 3, kind: input, shape index: {}]   ;;  %s4520_s4 = inlined_call_operand.vmem [shape: bf16[256,256], index: 4, kind: input, shape index: {}]   ;;  %s4521_s5 = inlined_call_operand.vmem [shape: bf16[256,256], index: 5, kind: input, shape index: {}]   ;;  %s4522_s6 = inlined_call_operand.vmem [shape: f32[4,256,32], index: 6, kind: output, shape index: {}]  }
   0x1   :  { %4525 = sst [smem:[#allocation11_spill]] %s4516_s0 }
   0x2   :  { %4526 = sst [smem:[#allocation12_spill]] %s4518_s2 }
   0x3   :  { %4527 = sst [smem:[#allocation13_spill]] %s4522_s6 }
   0x4   :  { %s3600_s21 = smov 0   ;;  %s3602_s22 = smov 0  }
   0x5   :  { %s3604_s23 = smov 0   ;;  %s3606_s24 = smov 0  }
   0x6   :  { %s3608_s25 = smov 0   ;;  %s3610_s26 = smov 0  }
   0x7   :  { %s3612_s27 = smov 0   ;;  %s3614_s28 = smov 0  }
   0x8   :  { %s3616_s29 = smov 0   ;;  %s3618_s30 = smov 0  }
   0x9   :  { %s3620_s7 = smov 0  }
   0xa LB: > { %s2972_s8 = sadd.s32 4294967295, %s3562_s7   ;;  %s25_s9 = sadd.s32 1, %s3554_s29  ;;  %s3562_s7 = sphi %s3620_s7, %s16_s7   ;;  %s3558_s30 = sphi %s3618_s30, %s4547_s30   ;;  %s3554_s29 = sphi %s3616_s29, %s4546_s29   ;;  %s3550_s28 = sphi %s3614_s28, %s4545_s28   ;;  %s3546_s27 = sphi %s3612_s27, %s4544_s27   ;;  %s3542_s26 = sphi %s3610_s26, %s4543_s26   ;;  %s3538_s25 = sphi %s3608_s25, %s4542_s25   ;;  %s3534_s24 = sphi %s3606_s24, %s4541_s24   ;;  %s3530_s23 = sphi %s3604_s23, %s4540_s23   ;;  %s3526_s22 = sphi %s3602_s22, %s4539_s22   ;;  %s3522_s21 = sphi %s3600_s21, %s4538_s21  }
   0xb   : > { %p26_p0 = scmp.ge.s32.totalorder %s25_s9, 2  ;;  %s28_s10 = sadd.s32 1, %s3558_s30 }
   0xc   : > { %s35_s11 = sadd.s32 1, %s3542_s26  ;;  %p42_p1 = scmp.ne.s32.totalorder %s3542_s26, %s3538_s25 }
   0xd   : > { %s4549_s9 = smov (%p26_p0, %s25_s9), 0  ;;  %s4551_s10 = smov (!%p26_p0, %s28_s10), %s3558_s30 }
   0xe   : > { %4528 = sst [smem:[#allocation9_spill]] %s4549_s9  ;;  %s32_s12 = ssub.s32 %s3554_s29, %s4549_s9 }
   0xf   : > { %p43_p2 = scmp.eq.s32.totalorder %s3562_s7, 0  ;;  %p30_p3 = scmp.ge.s32.totalorder %s4551_s10, 2 }
  0x10   : > { %p33_p4 = scmp.eq.s32.totalorder %s32_s12, 0  ;;  %s84_s14 = sadd.s32 1, %s3534_s24 }
  0x11   : > { %p3667_p5 = por %p43_p2, %p42_p1  ;;  %s4553_s10 = smov (%p30_p3, %s4551_s10), 0 }
  0x12   : > { %4530 = sst [smem:[#allocation10_spill]] %s4553_s10  ;;  %s79_s16 = ssub.s32 %s3558_s30, %s4553_s10 }
  0x13   : > { %s3675_s15 = scalar_select %p33_p4, %s3542_s26, %s35_s11  }
  0x14   : > { %p91_p6 = scmp.ne.s32.totalorder %s3534_s24, %s3530_s23  ;;  %s81_s17 = sor.u32 %s79_s16, %s32_s12 }
  0x15   : > { %p192_p7 = scmp.eq.s32.totalorder %s79_s16, 0  ;;  %p82_p8 = scmp.eq.s32.totalorder %s81_s17, 0 }
  0x16   : > { %p3681_p9 = por %p91_p6, %p43_p2  ;;  %s194_s19 = sadd.s32 1, %s3526_s22 }
  0x17   : > { %p204_p10 = scmp.ne.s32.totalorder %s3526_s22, %s3522_s21  ;;  %p205_p11 = scmp.eq.s32.totalorder %s2972_s8, 3 }
  0x18   : > { %s3689_s20 = scalar_select %p82_p8, %s3534_s24, %s84_s14  }
  0x19   : > { %s3692_s9 = scalar_select %p192_p7, %s3526_s22, %s194_s19  }
  0x1a   : > { %p3694_p12 = por %p205_p11, %p204_p10  ;;  %p2975_p13 = scmp.ge.s32.totalorder %s3562_s7, 4 }
  0x1c   : > { %230 = sbr.rel (%p2975_p13) target bundleno = 127 (0x7f), region = 20 }
  0x21   : > { %233 = sbr.rel (!%p3667_p5) target bundleno = 59 (0x3b), region = 24  ;;  %s235_s11 = sand.u32 (%p3667_p5), 1, %s3542_s26  }
  0x22   : > { %s3125_s12 = sshll.u32 (%p3667_p5), %s3554_s29, 6  ;;  %s2976_s16 = sshll.u32 (%p3667_p5), %s235_s11, 8 }
  0x23   : > { %s4533_s0 = sld [smem:[#allocation11_spill]] (%p3667_p5)  ;;  %s3711_s8 = scalar_lea.vmem (%p3667_p5), [#allocation3], %s2976_s16 }
  0x29   : > { %s3706_s19 = scalar_lea.vmem %s4533_s0, %s3125_s12 }
  0x2a   : > { %v257_v0 = vld [vmem:[%s3706_s19] sm:$0xff]   ;;  %v261_v1 = vld [vmem:[%s3706_s19 + $0x8] sm:$0xff]   ;;  %v265_v2 = vld [vmem:[%s3706_s19 + $0x10] sm:$0xff]  }
  0x2b   : > { %258 = vst [vmem:[%s3711_s8] sm:$0xff] %v257_v0   ;;  %262 = vst [vmem:[%s3711_s8 + $0x8] sm:$0xff] %v261_v1   ;;  %v269_v3 = vld [vmem:[%s3706_s19 + $0x18] sm:$0xff]   ;;  %v273_v4 = vld [vmem:[%s3706_s19 + $0x20] sm:$0xff]  }
  0x2c   : > { %266 = vst [vmem:[%s3711_s8 + $0x10] sm:$0xff] %v265_v2   ;;  %v277_v5 = vld [vmem:[%s3706_s19 + $0x28] sm:$0xff]   ;;  %270 = vst [vmem:[%s3711_s8 + $0x18] sm:$0xff] %v269_v3   ;;  %v281_v6 = vld [vmem:[%s3706_s19 + $0x30] sm:$0xff]  }
  0x2d   : > { %274 = vst [vmem:[%s3711_s8 + $0x20] sm:$0xff] %v273_v4   ;;  %278 = vst [vmem:[%s3711_s8 + $0x28] sm:$0xff] %v277_v5   ;;  %v285_v7 = vld [vmem:[%s3706_s19 + $0x38] sm:$0xff]   ;;  %v289_v8 = vld [vmem:[%s3706_s19 + $0x80] sm:$0xff]  }
  0x2e   : > { %282 = vst [vmem:[%s3711_s8 + $0x30] sm:$0xff] %v281_v6   ;;  %286 = vst [vmem:[%s3711_s8 + $0x38] sm:$0xff] %v285_v7   ;;  %v293_v9 = vld [vmem:[%s3706_s19 + $0x88] sm:$0xff]   ;;  %v297_v10 = vld [vmem:[%s3706_s19 + $0x90] sm:$0xff]  }
  0x2f   : > { %290 = vst [vmem:[%s3711_s8 + $0x40] sm:$0xff] %v289_v8   ;;  %v301_v11 = vld [vmem:[%s3706_s19 + $0x98] sm:$0xff]   ;;  %294 = vst [vmem:[%s3711_s8 + $0x48] sm:$0xff] %v293_v9   ;;  %v305_v12 = vld [vmem:[%s3706_s19 + $0xa0] sm:$0xff]  }
  0x30   : > { %298 = vst [vmem:[%s3711_s8 + $0x50] sm:$0xff] %v297_v10   ;;  %302 = vst [vmem:[%s3711_s8 + $0x58] sm:$0xff] %v301_v11   ;;  %v309_v13 = vld [vmem:[%s3706_s19 + $0xa8] sm:$0xff]   ;;  %v313_v14 = vld [vmem:[%s3706_s19 + $0xb0] sm:$0xff]  }
  0x31   : > { %306 = vst [vmem:[%s3711_s8 + $0x60] sm:$0xff] %v305_v12   ;;  %310 = vst [vmem:[%s3711_s8 + $0x68] sm:$0xff] %v309_v13   ;;  %v317_v15 = vld [vmem:[%s3706_s19 + $0xb8] sm:$0xff]   ;;  %v321_v16 = vld [vmem:[%s3706_s19 + $0x100] sm:$0xff]  }
  0x32   : > { %314 = vst [vmem:[%s3711_s8 + $0x70] sm:$0xff] %v313_v14   ;;  %v325_v17 = vld [vmem:[%s3706_s19 + $0x108] sm:$0xff]   ;;  %318 = vst [vmem:[%s3711_s8 + $0x78] sm:$0xff] %v317_v15   ;;  %v329_v18 = vld [vmem:[%s3706_s19 + $0x110] sm:$0xff]  }
  0x33   : > { %322 = vst [vmem:[%s3711_s8 + $0x80] sm:$0xff] %v321_v16   ;;  %326 = vst [vmem:[%s3711_s8 + $0x88] sm:$0xff] %v325_v17   ;;  %v333_v19 = vld [vmem:[%s3706_s19 + $0x118] sm:$0xff]   ;;  %v337_v20 = vld [vmem:[%s3706_s19 + $0x120] sm:$0xff]  }
  0x34   : > { %330 = vst [vmem:[%s3711_s8 + $0x90] sm:$0xff] %v329_v18   ;;  %334 = vst [vmem:[%s3711_s8 + $0x98] sm:$0xff] %v333_v19   ;;  %v341_v21 = vld [vmem:[%s3706_s19 + $0x128] sm:$0xff]   ;;  %v345_v22 = vld [vmem:[%s3706_s19 + $0x130] sm:$0xff]  }
  0x35   : > { %338 = vst [vmem:[%s3711_s8 + $0xa0] sm:$0xff] %v337_v20   ;;  %v349_v23 = vld [vmem:[%s3706_s19 + $0x138] sm:$0xff]   ;;  %342 = vst [vmem:[%s3711_s8 + $0xa8] sm:$0xff] %v341_v21   ;;  %v353_v24 = vld [vmem:[%s3706_s19 + $0x180] sm:$0xff]  }
  0x36   : > { %346 = vst [vmem:[%s3711_s8 + $0xb0] sm:$0xff] %v345_v22   ;;  %350 = vst [vmem:[%s3711_s8 + $0xb8] sm:$0xff] %v349_v23   ;;  %v357_v25 = vld [vmem:[%s3706_s19 + $0x188] sm:$0xff]   ;;  %v361_v26 = vld [vmem:[%s3706_s19 + $0x190] sm:$0xff]  }
  0x37   : > { %354 = vst [vmem:[%s3711_s8 + $0xc0] sm:$0xff] %v353_v24   ;;  %358 = vst [vmem:[%s3711_s8 + $0xc8] sm:$0xff] %v357_v25   ;;  %v365_v27 = vld [vmem:[%s3706_s19 + $0x198] sm:$0xff]   ;;  %v369_v28 = vld [vmem:[%s3706_s19 + $0x1a0] sm:$0xff]  }
  0x38   : > { %362 = vst [vmem:[%s3711_s8 + $0xd0] sm:$0xff] %v361_v26   ;;  %v373_v29 = vld [vmem:[%s3706_s19 + $0x1a8] sm:$0xff]   ;;  %366 = vst [vmem:[%s3711_s8 + $0xd8] sm:$0xff] %v365_v27   ;;  %v377_v30 = vld [vmem:[%s3706_s19 + $0x1b0] sm:$0xff]  }
  0x39   : > { %370 = vst [vmem:[%s3711_s8 + $0xe0] sm:$0xff] %v369_v28   ;;  %374 = vst [vmem:[%s3711_s8 + $0xe8] sm:$0xff] %v373_v29   ;;  %v381_v31 = vld [vmem:[%s3706_s19 + $0x1b8] sm:$0xff]  }
  0x3a   : > { %378 = vst [vmem:[%s3711_s8 + $0xf0] sm:$0xff] %v377_v30   ;;  %382 = vst [vmem:[%s3711_s8 + $0xf8] sm:$0xff] %v381_v31  }
  0x3b PF: > { %536 = sbr.rel (!%p3681_p9) target bundleno = 79 (0x4f), region = 65  ;;  %s538_s13 = sand.u32 (%p3681_p9), 1, %s3534_s24  }
  0x3c   : > { %s3126_s11 = sshll.u32 (%p3681_p9), %s3558_s30, 5  ;;  %s2979_s12 = sshll.u32 (%p3681_p9), %s538_s13, 6 }
  0x3d   : > { %s543_s16 = sadd.s32 (%p3681_p9), %s3554_s29, %s3126_s11  ;;  %s4534_s2 = sld [smem:[#allocation12_spill]] (%p3681_p9) }
  0x3e   : > { %s2982_s14 = sshll.u32 (%p3681_p9), %s543_s16, 2  ;;  %s540_s19 = scalar_lea.vmem (%p3681_p9), [#allocation4], %s2979_s12 }
  0x43   : > { %s3782_s10 = scalar_lea.vmem %s4534_s2, %s2982_s14 }
  0x44   : > { %v562_v32 = vld [vmem:[%s3782_s10] sm:$0xf]  ;;  %v564_v33 = vld [vmem:[%s3782_s10 + $0x8] sm:$0xf]  ;;  %v566_v34 = vld [vmem:[%s3782_s10 + $0x10] sm:$0xf] }
  0x45   : > { %563 = vst [vmem:[%s540_s19] sm:$0xf] %v562_v32  ;;  %565 = vst [vmem:[%s540_s19 + $0x4] sm:$0xf] %v564_v33  ;;  %v568_v35 = vld [vmem:[%s3782_s10 + $0x18] sm:$0xf] }
  0x46   : > { %567 = vst [vmem:[%s540_s19 + $0x8] sm:$0xf] %v566_v34  ;;  %v570_v36 = vld [vmem:[%s3782_s10 + $0x20] sm:$0xf]  ;;  %v572_v37 = vld [vmem:[%s3782_s10 + $0x28] sm:$0xf] }
  0x47   : > { %569 = vst [vmem:[%s540_s19 + $0xc] sm:$0xf] %v568_v35  ;;  %571 = vst [vmem:[%s540_s19 + $0x10] sm:$0xf] %v570_v36  ;;  %v574_v38 = vld [vmem:[%s3782_s10 + $0x30] sm:$0xf] }
  0x48   : > { %573 = vst [vmem:[%s540_s19 + $0x14] sm:$0xf] %v572_v37  ;;  %v576_v39 = vld [vmem:[%s3782_s10 + $0x38] sm:$0xf]  ;;  %v578_v40 = vld [vmem:[%s3782_s10 + $0x40] sm:$0xf] }
  0x49   : > { %575 = vst [vmem:[%s540_s19 + $0x18] sm:$0xf] %v574_v38  ;;  %577 = vst [vmem:[%s540_s19 + $0x1c] sm:$0xf] %v576_v39  ;;  %v580_v41 = vld [vmem:[%s3782_s10 + $0x48] sm:$0xf] }
  0x4a   : > { %579 = vst [vmem:[%s540_s19 + $0x20] sm:$0xf] %v578_v40  ;;  %v582_v42 = vld [vmem:[%s3782_s10 + $0x50] sm:$0xf]  ;;  %v584_v43 = vld [vmem:[%s3782_s10 + $0x58] sm:$0xf] }
  0x4b   : > { %581 = vst [vmem:[%s540_s19 + $0x24] sm:$0xf] %v580_v41  ;;  %583 = vst [vmem:[%s540_s19 + $0x28] sm:$0xf] %v582_v42  ;;  %v586_v44 = vld [vmem:[%s3782_s10 + $0x60] sm:$0xf] }
  0x4c   : > { %585 = vst [vmem:[%s540_s19 + $0x2c] sm:$0xf] %v584_v43  ;;  %v588_v45 = vld [vmem:[%s3782_s10 + $0x68] sm:$0xf]  ;;  %v590_v46 = vld [vmem:[%s3782_s10 + $0x70] sm:$0xf] }
  0x4d   : > { %587 = vst [vmem:[%s540_s19 + $0x30] sm:$0xf] %v586_v44  ;;  %589 = vst [vmem:[%s540_s19 + $0x34] sm:$0xf] %v588_v45  ;;  %v592_v47 = vld [vmem:[%s3782_s10 + $0x78] sm:$0xf] }
  0x4e   : > { %591 = vst [vmem:[%s540_s19 + $0x38] sm:$0xf] %v590_v46  ;;  %593 = vst [vmem:[%s540_s19 + $0x3c] sm:$0xf] %v592_v47 }
  0x4f PF: > { %649 = sbr.rel (!%p3681_p9) target bundleno = 95 (0x5f), region = 106  ;;  %s651_s0 = sand.u32 (%p3681_p9), 1, %s3534_s24  }
  0x50   : > { %s3127_s8 = sshll.u32 (%p3681_p9), %s3558_s30, 5  ;;  %s2983_s13 = sshll.u32 (%p3681_p9), %s651_s0, 6 }
  0x51   : > { %s656_s11 = sadd.s32 (%p3681_p9), %s3554_s29, %s3127_s8  ;;  %s653_s10 = scalar_lea.vmem (%p3681_p9), [#allocation5], %s2983_s13 }
  0x52   : > { %s2986_s12 = sshll.u32 (%p3681_p9), %s656_s11, 2 }
  0x53   : > { %s3808_s17 = scalar_lea.vmem (%p3681_p9), %s4519_s3, %s2986_s12 }
  0x54   : > { %v675_v48 = vld [vmem:[%s3808_s17] sm:$0xf]  ;;  %v677_v49 = vld [vmem:[%s3808_s17 + $0x8] sm:$0xf]  ;;  %v679_v50 = vld [vmem:[%s3808_s17 + $0x10] sm:$0xf] }
  0x55   : > { %676 = vst [vmem:[%s653_s10] sm:$0xf] %v675_v48  ;;  %678 = vst [vmem:[%s653_s10 + $0x4] sm:$0xf] %v677_v49  ;;  %v681_v51 = vld [vmem:[%s3808_s17 + $0x18] sm:$0xf] }
  0x56   : > { %680 = vst [vmem:[%s653_s10 + $0x8] sm:$0xf] %v679_v50  ;;  %v683_v52 = vld [vmem:[%s3808_s17 + $0x20] sm:$0xf]  ;;  %v685_v53 = vld [vmem:[%s3808_s17 + $0x28] sm:$0xf] }
  0x57   : > { %682 = vst [vmem:[%s653_s10 + $0xc] sm:$0xf] %v681_v51  ;;  %684 = vst [vmem:[%s653_s10 + $0x10] sm:$0xf] %v683_v52  ;;  %v687_v54 = vld [vmem:[%s3808_s17 + $0x30] sm:$0xf] }
  0x58   : > { %686 = vst [vmem:[%s653_s10 + $0x14] sm:$0xf] %v685_v53  ;;  %v689_v55 = vld [vmem:[%s3808_s17 + $0x38] sm:$0xf]  ;;  %v691_v56 = vld [vmem:[%s3808_s17 + $0x40] sm:$0xf] }
  0x59   : > { %688 = vst [vmem:[%s653_s10 + $0x18] sm:$0xf] %v687_v54  ;;  %690 = vst [vmem:[%s653_s10 + $0x1c] sm:$0xf] %v689_v55  ;;  %v693_v57 = vld [vmem:[%s3808_s17 + $0x48] sm:$0xf] }
  0x5a   : > { %692 = vst [vmem:[%s653_s10 + $0x20] sm:$0xf] %v691_v56  ;;  %v695_v58 = vld [vmem:[%s3808_s17 + $0x50] sm:$0xf]  ;;  %v697_v59 = vld [vmem:[%s3808_s17 + $0x58] sm:$0xf] }
  0x5b   : > { %694 = vst [vmem:[%s653_s10 + $0x24] sm:$0xf] %v693_v57  ;;  %696 = vst [vmem:[%s653_s10 + $0x28] sm:$0xf] %v695_v58  ;;  %v699_v60 = vld [vmem:[%s3808_s17 + $0x60] sm:$0xf] }
  0x5c   : > { %698 = vst [vmem:[%s653_s10 + $0x2c] sm:$0xf] %v697_v59  ;;  %v701_v61 = vld [vmem:[%s3808_s17 + $0x68] sm:$0xf]  ;;  %v703_v62 = vld [vmem:[%s3808_s17 + $0x70] sm:$0xf] }
  0x5d   : > { %700 = vst [vmem:[%s653_s10 + $0x30] sm:$0xf] %v699_v60  ;;  %702 = vst [vmem:[%s653_s10 + $0x34] sm:$0xf] %v701_v61  ;;  %v705_v63 = vld [vmem:[%s3808_s17 + $0x78] sm:$0xf] }
  0x5e   : > { %704 = vst [vmem:[%s653_s10 + $0x38] sm:$0xf] %v703_v62  ;;  %706 = vst [vmem:[%s653_s10 + $0x3c] sm:$0xf] %v705_v63 }
  0x5f PF: > { %762 = sbr.rel (!%p3681_p9) target bundleno = 111 (0x6f), region = 147  ;;  %s764_s19 = sand.u32 (%p3681_p9), 1, %s3534_s24  }
  0x60   : > { %s3128_s0 = sshll.u32 (%p3681_p9), %s3558_s30, 5  ;;  %s2987_s8 = sshll.u32 (%p3681_p9), %s764_s19, 6 }
  0x61   : > { %s769_s13 = sadd.s32 (%p3681_p9), %s3554_s29, %s3128_s0  ;;  %s766_s17 = scalar_lea.vmem (%p3681_p9), [#allocation6], %s2987_s8 }
  0x62   : > { %s2990_s11 = sshll.u32 (%p3681_p9), %s769_s13, 2 }
  0x63   : > { %s3834_s14 = scalar_lea.vmem (%p3681_p9), %s4520_s4, %s2990_s11 }
  0x64   : > { %v788_v0 = vld [vmem:[%s3834_s14] sm:$0xf]  ;;  %v790_v1 = vld [vmem:[%s3834_s14 + $0x8] sm:$0xf]  ;;  %v792_v2 = vld [vmem:[%s3834_s14 + $0x10] sm:$0xf] }
  0x65   : > { %789 = vst [vmem:[%s766_s17] sm:$0xf] %v788_v0  ;;  %791 = vst [vmem:[%s766_s17 + $0x4] sm:$0xf] %v790_v1  ;;  %v794_v3 = vld [vmem:[%s3834_s14 + $0x18] sm:$0xf] }
  0x66   : > { %793 = vst [vmem:[%s766_s17 + $0x8] sm:$0xf] %v792_v2  ;;  %v796_v4 = vld [vmem:[%s3834_s14 + $0x20] sm:$0xf]  ;;  %v798_v5 = vld [vmem:[%s3834_s14 + $0x28] sm:$0xf] }
  0x67   : > { %795 = vst [vmem:[%s766_s17 + $0xc] sm:$0xf] %v794_v3  ;;  %797 = vst [vmem:[%s766_s17 + $0x10] sm:$0xf] %v796_v4  ;;  %v800_v6 = vld [vmem:[%s3834_s14 + $0x30] sm:$0xf] }
  0x68   : > { %799 = vst [vmem:[%s766_s17 + $0x14] sm:$0xf] %v798_v5  ;;  %v802_v7 = vld [vmem:[%s3834_s14 + $0x38] sm:$0xf]  ;;  %v804_v8 = vld [vmem:[%s3834_s14 + $0x40] sm:$0xf] }
  0x69   : > { %801 = vst [vmem:[%s766_s17 + $0x18] sm:$0xf] %v800_v6  ;;  %803 = vst [vmem:[%s766_s17 + $0x1c] sm:$0xf] %v802_v7  ;;  %v806_v9 = vld [vmem:[%s3834_s14 + $0x48] sm:$0xf] }
  0x6a   : > { %805 = vst [vmem:[%s766_s17 + $0x20] sm:$0xf] %v804_v8  ;;  %v808_v10 = vld [vmem:[%s3834_s14 + $0x50] sm:$0xf]  ;;  %v810_v11 = vld [vmem:[%s3834_s14 + $0x58] sm:$0xf] }
  0x6b   : > { %807 = vst [vmem:[%s766_s17 + $0x24] sm:$0xf] %v806_v9  ;;  %809 = vst [vmem:[%s766_s17 + $0x28] sm:$0xf] %v808_v10  ;;  %v812_v12 = vld [vmem:[%s3834_s14 + $0x60] sm:$0xf] }
  0x6c   : > { %811 = vst [vmem:[%s766_s17 + $0x2c] sm:$0xf] %v810_v11  ;;  %v814_v13 = vld [vmem:[%s3834_s14 + $0x68] sm:$0xf]  ;;  %v816_v14 = vld [vmem:[%s3834_s14 + $0x70] sm:$0xf] }
  0x6d   : > { %813 = vst [vmem:[%s766_s17 + $0x30] sm:$0xf] %v812_v12  ;;  %815 = vst [vmem:[%s766_s17 + $0x34] sm:$0xf] %v814_v13  ;;  %v818_v15 = vld [vmem:[%s3834_s14 + $0x78] sm:$0xf] }
  0x6e   : > { %817 = vst [vmem:[%s766_s17 + $0x38] sm:$0xf] %v816_v14  ;;  %819 = vst [vmem:[%s766_s17 + $0x3c] sm:$0xf] %v818_v15 }
  0x6f PF: > { %875 = sbr.rel (!%p3681_p9) target bundleno = 127 (0x7f), region = 188  ;;  %s877_s10 = sand.u32 (%p3681_p9), 1, %s3534_s24  }
  0x70   : > { %s3129_s19 = sshll.u32 (%p3681_p9), %s3558_s30, 5  ;;  %s2991_s0 = sshll.u32 (%p3681_p9), %s877_s10, 6 }
  0x71   : > { %s882_s8 = sadd.s32 (%p3681_p9), %s3554_s29, %s3129_s19  ;;  %s879_s18 = scalar_lea.vmem (%p3681_p9), [#allocation7], %s2991_s0 }
  0x72   : > { %s2994_s13 = sshll.u32 (%p3681_p9), %s882_s8, 2 }
  0x73   : > { %s3860_s16 = scalar_lea.vmem (%p3681_p9), %s4521_s5, %s2994_s13 }
  0x74   : > { %v901_v16 = vld [vmem:[%s3860_s16] sm:$0xf]  ;;  %v903_v17 = vld [vmem:[%s3860_s16 + $0x8] sm:$0xf]  ;;  %v905_v18 = vld [vmem:[%s3860_s16 + $0x10] sm:$0xf] }
  0x75   : > { %902 = vst [vmem:[%s879_s18] sm:$0xf] %v901_v16  ;;  %904 = vst [vmem:[%s879_s18 + $0x4] sm:$0xf] %v903_v17  ;;  %v907_v19 = vld [vmem:[%s3860_s16 + $0x18] sm:$0xf] }
  0x76   : > { %906 = vst [vmem:[%s879_s18 + $0x8] sm:$0xf] %v905_v18  ;;  %v909_v20 = vld [vmem:[%s3860_s16 + $0x20] sm:$0xf]  ;;  %v911_v21 = vld [vmem:[%s3860_s16 + $0x28] sm:$0xf] }
  0x77   : > { %908 = vst [vmem:[%s879_s18 + $0xc] sm:$0xf] %v907_v19  ;;  %910 = vst [vmem:[%s879_s18 + $0x10] sm:$0xf] %v909_v20  ;;  %v913_v22 = vld [vmem:[%s3860_s16 + $0x30] sm:$0xf] }
  0x78   : > { %912 = vst [vmem:[%s879_s18 + $0x14] sm:$0xf] %v911_v21  ;;  %v915_v23 = vld [vmem:[%s3860_s16 + $0x38] sm:$0xf]  ;;  %v917_v24 = vld [vmem:[%s3860_s16 + $0x40] sm:$0xf] }
  0x79   : > { %914 = vst [vmem:[%s879_s18 + $0x18] sm:$0xf] %v913_v22  ;;  %916 = vst [vmem:[%s879_s18 + $0x1c] sm:$0xf] %v915_v23  ;;  %v919_v25 = vld [vmem:[%s3860_s16 + $0x48] sm:$0xf] }
  0x7a   : > { %918 = vst [vmem:[%s879_s18 + $0x20] sm:$0xf] %v917_v24  ;;  %v921_v26 = vld [vmem:[%s3860_s16 + $0x50] sm:$0xf]  ;;  %v923_v27 = vld [vmem:[%s3860_s16 + $0x58] sm:$0xf] }
  0x7b   : > { %920 = vst [vmem:[%s879_s18 + $0x24] sm:$0xf] %v919_v25  ;;  %922 = vst [vmem:[%s879_s18 + $0x28] sm:$0xf] %v921_v26  ;;  %v925_v28 = vld [vmem:[%s3860_s16 + $0x60] sm:$0xf] }
  0x7c   : > { %924 = vst [vmem:[%s879_s18 + $0x2c] sm:$0xf] %v923_v27  ;;  %v927_v29 = vld [vmem:[%s3860_s16 + $0x68] sm:$0xf]  ;;  %v929_v30 = vld [vmem:[%s3860_s16 + $0x70] sm:$0xf] }
  0x7d   : > { %926 = vst [vmem:[%s879_s18 + $0x30] sm:$0xf] %v925_v28  ;;  %928 = vst [vmem:[%s879_s18 + $0x34] sm:$0xf] %v927_v29  ;;  %v931_v31 = vld [vmem:[%s3860_s16 + $0x78] sm:$0xf] }
  0x7e   : > { %930 = vst [vmem:[%s879_s18 + $0x38] sm:$0xf] %v929_v30  ;;  %932 = vst [vmem:[%s879_s18 + $0x3c] sm:$0xf] %v931_v31 }
  0x7f PF: > { %p2995_p0 = scmp.ge.s32.totalorder %s3562_s7, 1  ;;  %p987_p1 = scmp.lt.s32.totalorder %s3562_s7, 5 }
  0x81   : > { %p988_p2 = pnand %p2995_p0, %p987_p1 }
  0x82   : > { %s994_s14 = sand.u32 (!%p988_p2), 1, %s3538_s25   ;;  %s1001_s17 = sand.u32 (!%p988_p2), 1, %s3530_s23  }
  0x83   : > { %991 = sbr.rel (%p988_p2) target bundleno = 547 (0x223), region = 229  ;;  %s2996_s10 = sshll.u32 (!%p988_p2), %s994_s14, 8 }
  0x84   : > { %s2997_s19 = sshll.u32 (!%p988_p2), %s1001_s17, 6  ;;  %s1063_s0 = sand.u32 (!%p988_p2), 1, %s3522_s21  }
  0x85   : > { %s3001_s8 = sshll.u32 (!%p988_p2), %s1063_s0, 9  ;;  %s3883_s13 = scalar_lea.vmem (!%p988_p2), [#allocation3], %s2996_s10 }
  0x86   : > { %s3885_s11 = scalar_lea.vmem (!%p988_p2), [#allocation4], %s2997_s19  ;;  %s3887_s12 = scalar_lea.vmem (!%p988_p2), [#allocation5], %s2997_s19 }
  0x87   : > { %s3889_s16 = scalar_lea.vmem (!%p988_p2), [#allocation6], %s2997_s19  ;;  %s3891_s18 = scalar_lea.vmem (!%p988_p2), [#allocation7], %s2997_s19 }
  0x88   : > { %s3893_s2 = scalar_lea.vmem [#allocation8], %s3001_s8  ;;  %p3002_p3 = scmp.ne.s32.totalorder %s3546_s27, 0 }
  0x8a   : > { %1076 = sbr.rel (%p3002_p3) target bundleno = 176 (0xb0), region = 253 }
  0x8f   : > { %vm1077_vm0 = vcmask 261120   ;;  %v3564_v32 = vmov 0.0  }
  0x90   : > { %1078 = vst.msk [vmem:[#allocation2] sm:$0xff] %vm1077_vm0, %v3564_v32  ;;  %1079 = vst.msk [vmem:[#allocation2 + $0x8] sm:$0xff] %vm1077_vm0, %v3564_v32 }
  0x91   : > { %1080 = vst.msk [vmem:[#allocation2 + $0x10] sm:$0xff] %vm1077_vm0, %v3564_v32  ;;  %1081 = vst.msk [vmem:[#allocation2 + $0x18] sm:$0xff] %vm1077_vm0, %v3564_v32 }
  0x92   : > { %1082 = vst.msk [vmem:[#allocation2 + $0x20] sm:$0xff] %vm1077_vm0, %v3564_v32  ;;  %1083 = vst.msk [vmem:[#allocation2 + $0x28] sm:$0xff] %vm1077_vm0, %v3564_v32 }
  0x93   : > { %1084 = vst.msk [vmem:[#allocation2 + $0x30] sm:$0xff] %vm1077_vm0, %v3564_v32  ;;  %1085 = vst.msk [vmem:[#allocation2 + $0x38] sm:$0xff] %vm1077_vm0, %v3564_v32 }
  0x94   : > { %1086 = vst.msk [vmem:[#allocation2 + $0x40] sm:$0xff] %vm1077_vm0, %v3564_v32  ;;  %1087 = vst.msk [vmem:[#allocation2 + $0x48] sm:$0xff] %vm1077_vm0, %v3564_v32 }
  0x95   : > { %1088 = vst.msk [vmem:[#allocation2 + $0x50] sm:$0xff] %vm1077_vm0, %v3564_v32  ;;  %1089 = vst.msk [vmem:[#allocation2 + $0x58] sm:$0xff] %vm1077_vm0, %v3564_v32 }
  0x96   : > { %1090 = vst.msk [vmem:[#allocation2 + $0x60] sm:$0xff] %vm1077_vm0, %v3564_v32  ;;  %1091 = vst.msk [vmem:[#allocation2 + $0x68] sm:$0xff] %vm1077_vm0, %v3564_v32 }
  0x97   : > { %1092 = vst.msk [vmem:[#allocation2 + $0x70] sm:$0xff] %vm1077_vm0, %v3564_v32  ;;  %1093 = vst.msk [vmem:[#allocation2 + $0x78] sm:$0xff] %vm1077_vm0, %v3564_v32 }
  0x98   : > { %1094 = vst.msk [vmem:[#allocation2 + $0x80] sm:$0xff] %vm1077_vm0, %v3564_v32  ;;  %1095 = vst.msk [vmem:[#allocation2 + $0x88] sm:$0xff] %vm1077_vm0, %v3564_v32 }
  0x99   : > { %1096 = vst.msk [vmem:[#allocation2 + $0x90] sm:$0xff] %vm1077_vm0, %v3564_v32  ;;  %1097 = vst.msk [vmem:[#allocation2 + $0x98] sm:$0xff] %vm1077_vm0, %v3564_v32 }
  0x9a   : > { %1098 = vst.msk [vmem:[#allocation2 + $0xa0] sm:$0xff] %vm1077_vm0, %v3564_v32  ;;  %1099 = vst.msk [vmem:[#allocation2 + $0xa8] sm:$0xff] %vm1077_vm0, %v3564_v32 }
  0x9b   : > { %1100 = vst.msk [vmem:[#allocation2 + $0xb0] sm:$0xff] %vm1077_vm0, %v3564_v32  ;;  %1101 = vst.msk [vmem:[#allocation2 + $0xb8] sm:$0xff] %vm1077_vm0, %v3564_v32 }
  0x9c   : > { %1102 = vst.msk [vmem:[#allocation2 + $0xc0] sm:$0xff] %vm1077_vm0, %v3564_v32  ;;  %1103 = vst.msk [vmem:[#allocation2 + $0xc8] sm:$0xff] %vm1077_vm0, %v3564_v32 }
  0x9d   : > { %1104 = vst.msk [vmem:[#allocation2 + $0xd0] sm:$0xff] %vm1077_vm0, %v3564_v32  ;;  %1105 = vst.msk [vmem:[#allocation2 + $0xd8] sm:$0xff] %vm1077_vm0, %v3564_v32 }
  0x9e   : > { %1106 = vst.msk [vmem:[#allocation2 + $0xe0] sm:$0xff] %vm1077_vm0, %v3564_v32  ;;  %1107 = vst.msk [vmem:[#allocation2 + $0xe8] sm:$0xff] %vm1077_vm0, %v3564_v32 }
  0x9f   : > { %1108 = vst.msk [vmem:[#allocation2 + $0xf0] sm:$0xff] %vm1077_vm0, %v3564_v32  ;;  %1109 = vst.msk [vmem:[#allocation2 + $0xf8] sm:$0xff] %vm1077_vm0, %v3564_v32 }
  0xa0   : > { %1110 = vst.msk [vmem:[#allocation2 + $0x100] sm:$0xff] %vm1077_vm0, %v3564_v32  ;;  %1111 = vst.msk [vmem:[#allocation2 + $0x108] sm:$0xff] %vm1077_vm0, %v3564_v32 }
  0xa1   : > { %1112 = vst.msk [vmem:[#allocation2 + $0x110] sm:$0xff] %vm1077_vm0, %v3564_v32  ;;  %1113 = vst.msk [vmem:[#allocation2 + $0x118] sm:$0xff] %vm1077_vm0, %v3564_v32 }
  0xa2   : > { %1114 = vst.msk [vmem:[#allocation2 + $0x120] sm:$0xff] %vm1077_vm0, %v3564_v32  ;;  %1115 = vst.msk [vmem:[#allocation2 + $0x128] sm:$0xff] %vm1077_vm0, %v3564_v32 }
  0xa3   : > { %1116 = vst.msk [vmem:[#allocation2 + $0x130] sm:$0xff] %vm1077_vm0, %v3564_v32  ;;  %1117 = vst.msk [vmem:[#allocation2 + $0x138] sm:$0xff] %vm1077_vm0, %v3564_v32 }
  0xa4   : > { %1118 = vst.msk [vmem:[#allocation2 + $0x140] sm:$0xff] %vm1077_vm0, %v3564_v32  ;;  %1119 = vst.msk [vmem:[#allocation2 + $0x148] sm:$0xff] %vm1077_vm0, %v3564_v32 }
  0xa5   : > { %1120 = vst.msk [vmem:[#allocation2 + $0x150] sm:$0xff] %vm1077_vm0, %v3564_v32  ;;  %1121 = vst.msk [vmem:[#allocation2 + $0x158] sm:$0xff] %vm1077_vm0, %v3564_v32 }
  0xa6   : > { %1122 = vst.msk [vmem:[#allocation2 + $0x160] sm:$0xff] %vm1077_vm0, %v3564_v32  ;;  %1123 = vst.msk [vmem:[#allocation2 + $0x168] sm:$0xff] %vm1077_vm0, %v3564_v32 }
  0xa7   : > { %1124 = vst.msk [vmem:[#allocation2 + $0x170] sm:$0xff] %vm1077_vm0, %v3564_v32  ;;  %1125 = vst.msk [vmem:[#allocation2 + $0x178] sm:$0xff] %vm1077_vm0, %v3564_v32 }
  0xa8   : > { %1126 = vst.msk [vmem:[#allocation2 + $0x180] sm:$0xff] %vm1077_vm0, %v3564_v32  ;;  %1127 = vst.msk [vmem:[#allocation2 + $0x188] sm:$0xff] %vm1077_vm0, %v3564_v32 }
  0xa9   : > { %1128 = vst.msk [vmem:[#allocation2 + $0x190] sm:$0xff] %vm1077_vm0, %v3564_v32  ;;  %1129 = vst.msk [vmem:[#allocation2 + $0x198] sm:$0xff] %vm1077_vm0, %v3564_v32 }
  0xaa   : > { %1130 = vst.msk [vmem:[#allocation2 + $0x1a0] sm:$0xff] %vm1077_vm0, %v3564_v32  ;;  %1131 = vst.msk [vmem:[#allocation2 + $0x1a8] sm:$0xff] %vm1077_vm0, %v3564_v32 }
  0xab   : > { %1132 = vst.msk [vmem:[#allocation2 + $0x1b0] sm:$0xff] %vm1077_vm0, %v3564_v32  ;;  %1133 = vst.msk [vmem:[#allocation2 + $0x1b8] sm:$0xff] %vm1077_vm0, %v3564_v32 }
  0xac   : > { %1134 = vst.msk [vmem:[#allocation2 + $0x1c0] sm:$0xff] %vm1077_vm0, %v3564_v32  ;;  %1135 = vst.msk [vmem:[#allocation2 + $0x1c8] sm:$0xff] %vm1077_vm0, %v3564_v32 }
  0xad   : > { %1136 = vst.msk [vmem:[#allocation2 + $0x1d0] sm:$0xff] %vm1077_vm0, %v3564_v32  ;;  %1137 = vst.msk [vmem:[#allocation2 + $0x1d8] sm:$0xff] %vm1077_vm0, %v3564_v32 }
  0xae   : > { %1138 = vst.msk [vmem:[#allocation2 + $0x1e0] sm:$0xff] %vm1077_vm0, %v3564_v32  ;;  %1139 = vst.msk [vmem:[#allocation2 + $0x1e8] sm:$0xff] %vm1077_vm0, %v3564_v32 }
  0xaf   : > { %1140 = vst.msk [vmem:[#allocation2 + $0x1f0] sm:$0xff] %vm1077_vm0, %v3564_v32  ;;  %1141 = vst.msk [vmem:[#allocation2 + $0x1f8] sm:$0xff] %vm1077_vm0, %v3564_v32 }
  0xb0 PF: > { %v3412_v33 = vld [vmem:[%s3883_s13 + $0x38] sm:$0xff]   ;;  %v3414_v35 = vld [vmem:[%s3883_s13 + $0x30] sm:$0xff]   ;;  %v3416_v37 = vld [vmem:[%s3883_s13 + $0x28] sm:$0xff]   ;;  %vm1399_vm1 = vcmask 261120   ;;  %p3115_p4 = scmp.ne.s32.totalorder %s3546_s27, 1 }
  0xb1   : > { %v3413_v34 = vld [vmem:[%s3883_s13 + $0x78] sm:$0xff]   ;;  %3195 = vmatprep.subr.bf16.mxu0 %v3412_v33  ;;  %v3415_v36 = vld [vmem:[%s3883_s13 + $0x70] sm:$0xff]   ;;  %v3417_v38 = vld [vmem:[%s3883_s13 + $0x68] sm:$0xff]  }
  0xb2   : > { %3227 = vmatprep.subr.bf16.mxu1 %v3413_v34  ;;  %3196 = vmatpush3.bf16.msra.mxu0 %v3412_v33  ;;  %v3418_v39 = vld [vmem:[%s3883_s13 + $0x20] sm:$0xff]   ;;  %v3420_v41 = vld [vmem:[%s3883_s13 + $0x18] sm:$0xff]   ;;  %v3422_v43 = vld [vmem:[%s3883_s13 + $0x10] sm:$0xff]  }
  0xb3   : > { %3228 = vmatpush3.bf16.msra.mxu1 %v3413_v34  ;;  %3197 = vmatprep.subr.bf16.mxu0 %v3414_v35  ;;  %v3419_v40 = vld [vmem:[%s3883_s13 + $0x60] sm:$0xff]   ;;  %v3421_v42 = vld [vmem:[%s3883_s13 + $0x58] sm:$0xff]   ;;  %v3423_v44 = vld [vmem:[%s3883_s13 + $0x50] sm:$0xff]  }
  0xb4   : > { %3229 = vmatprep.subr.bf16.mxu1 %v3415_v36  ;;  %v3428_v45 = vld [vmem:[%s3885_s11] sm:$0xff]   ;;  %v3424_v47 = vld [vmem:[%s3883_s13 + $0x8] sm:$0xff]   ;;  %v3432_v52 = vld [vmem:[%s3883_s13 + $0xb8] sm:$0xff]  }
  0xb5   : > { %v3429_v46 = vld [vmem:[%s3887_s12] sm:$0xff]   ;;  %3211 = vmatprep.mubr.bf16.mxu0 %v3428_v45  ;;  %v3425_v48 = vld [vmem:[%s3883_s13 + $0x48] sm:$0xff]   ;;  %v3433_v53 = vld [vmem:[%s3883_s13 + $0xf8] sm:$0xff]  }
  0xb6   : > { %3198 = vmatpush3.bf16.msra.mxu0 %v3414_v35  ;;  %3243 = vmatprep.mubr.bf16.mxu1 %v3429_v46  ;;  %v3426_v49 = vld [vmem:[%s3883_s13] sm:$0xff]   ;;  %v3430_v51 = vld [vmem:[%s3885_s11 + $0x8] sm:$0xff]   ;;  %v3434_v55 = vld [vmem:[%s3883_s13 + $0xb0] sm:$0xff]  }
  0xb7   : > { %3230 = vmatpush3.bf16.msra.mxu1 %v3415_v36  ;;  %3199 = vmatprep.subr.bf16.mxu0 %v3416_v37  ;;  %v3427_v50 = vld [vmem:[%s3883_s13 + $0x40] sm:$0xff]   ;;  %v3431_v54 = vld [vmem:[%s3887_s12 + $0x8] sm:$0xff]   ;;  %v3435_v56 = vld [vmem:[%s3883_s13 + $0xf0] sm:$0xff]  }
  0xb8   : > { %3231 = vmatprep.subr.bf16.mxu1 %v3417_v38  ;;  %v3436_v57 = vld [vmem:[%s3885_s11 + $0x10] sm:$0xff]   ;;  %v3438_v59 = vld [vmem:[%s3885_s11 + $0x18] sm:$0xff]   ;;  %v3440_v60 = vld [vmem:[%s3883_s13 + $0xa8] sm:$0xff]  }
  0xb9   : > { %v3437_v58 = vld [vmem:[%s3887_s12 + $0x10] sm:$0xff]   ;;  %v3441_v61 = vld [vmem:[%s3883_s13 + $0xe8] sm:$0xff]   ;;  %v3439_v62 = vld [vmem:[%s3887_s12 + $0x18] sm:$0xff]  }
  0xba   : > { %3200 = vmatpush3.bf16.msra.mxu0 %v3416_v37  ;;  %v3442_v63 = vld [vmem:[%s3883_s13 + $0xa0] sm:$0xff]   ;;  %v3446_v3 = vld [vmem:[%s3885_s11 + $0x28] sm:$0xff]   ;;  %v3448_v4 = vld [vmem:[%s3883_s13 + $0x98] sm:$0xff]  }
  0xbb   : > { %3232 = vmatpush3.bf16.msra.mxu1 %v3417_v38  ;;  %3201 = vmatprep.subr.bf16.mxu0 %v3418_v39  ;;  %v3443_v0 = vld [vmem:[%s3883_s13 + $0xe0] sm:$0xff]   ;;  %v3449_v5 = vld [vmem:[%s3883_s13 + $0xd8] sm:$0xff]   ;;  %v3447_v6 = vld [vmem:[%s3887_s12 + $0x28] sm:$0xff]  }
  0xbc   : > { %3233 = vmatprep.subr.bf16.mxu1 %v3419_v40  ;;  %v3444_v1 = vld [vmem:[%s3885_s11 + $0x20] sm:$0xff]   ;;  %v3450_v7 = vld [vmem:[%s3883_s13 + $0x90] sm:$0xff]   ;;  %v3454_v11 = vld [vmem:[%s3885_s11 + $0x38] sm:$0xff]  }
  0xbd   : > { %v3445_v2 = vld [vmem:[%s3887_s12 + $0x20] sm:$0xff]   ;;  %v3451_v8 = vld [vmem:[%s3883_s13 + $0xd0] sm:$0xff]   ;;  %v3456_v12 = vld [vmem:[%s3883_s13 + $0x88] sm:$0xff]  }
  0xbe   : > { %3202 = vmatpush3.bf16.msra.mxu0 %v3418_v39  ;;  %v3452_v9 = vld [vmem:[%s3885_s11 + $0x30] sm:$0xff]   ;;  %v3457_v13 = vld [vmem:[%s3883_s13 + $0xc8] sm:$0xff]   ;;  %v3455_v14 = vld [vmem:[%s3887_s12 + $0x38] sm:$0xff]  }
  0xbf   : > { %3234 = vmatpush3.bf16.msra.mxu1 %v3419_v40  ;;  %3203 = vmatprep.subr.bf16.mxu0 %v3420_v41  ;;  %v3453_v10 = vld [vmem:[%s3887_s12 + $0x30] sm:$0xff]   ;;  %v3458_v15 = vld [vmem:[%s3883_s13 + $0x80] sm:$0xff]   ;;  %v3462_v19 = vld [vmem:[%s3889_s16 + $0x8] sm:$0xff]  }
  0xc0   : > { %3235 = vmatprep.subr.bf16.mxu1 %v3421_v42  ;;  %v3459_v16 = vld [vmem:[%s3883_s13 + $0xc0] sm:$0xff]   ;;  %v3463_v20 = vld [vmem:[%s3891_s18 + $0x8] sm:$0xff]   ;;  %v3464_v21 = vld [vmem:[%s3889_s16 + $0x10] sm:$0xff]  }
  0xc1   : > { %v3460_v17 = vld [vmem:[%s3889_s16] sm:$0xff]   ;;  %v3465_v22 = vld [vmem:[%s3891_s18 + $0x10] sm:$0xff]   ;;  %v3466_v23 = vld [vmem:[%s3889_s16 + $0x18] sm:$0xff]  }
  0xc2   : > { %3204 = vmatpush3.bf16.msra.mxu0 %v3420_v41  ;;  %v3461_v18 = vld [vmem:[%s3891_s18] sm:$0xff]   ;;  %v3467_v24 = vld [vmem:[%s3891_s18 + $0x18] sm:$0xff]   ;;  %v3470_v27 = vld [vmem:[%s3889_s16 + $0x28] sm:$0xff]  }
  0xc3   : > { %3236 = vmatpush3.bf16.msra.mxu1 %v3421_v42  ;;  %3205 = vmatprep.subr.bf16.mxu0 %v3422_v43  ;;  %v3468_v25 = vld [vmem:[%s3889_s16 + $0x20] sm:$0xff]   ;;  %v3471_v28 = vld [vmem:[%s3891_s18 + $0x28] sm:$0xff]   ;;  %v3472_v29 = vld [vmem:[%s3889_s16 + $0x30] sm:$0xff]  }
  0xc4   : > { %3237 = vmatprep.subr.bf16.mxu1 %v3423_v44  ;;  %v3469_v26 = vld [vmem:[%s3891_s18 + $0x20] sm:$0xff]   ;;  %v3473_v30 = vld [vmem:[%s3891_s18 + $0x30] sm:$0xff]   ;;  %v3474_v31 = vld [vmem:[%s3889_s16 + $0x38] sm:$0xff]  }
  0xc5   : > { %v3475_v32 = vld [vmem:[%s3891_s18 + $0x38] sm:$0xff]   ;;  %v1144_v33 = vld [vmem:[#allocation2 + $0x10] sm:$0xff]  ;;  %v1142_v36 = vld [vmem:[#allocation2] sm:$0xff] }
  0xc6   : > { %3206 = vmatpush3.bf16.msra.mxu0 %v3422_v43  ;;  %v1419_v34 = vld [vmem:[#allocation2 + $0x90] sm:$0xff]  ;;  %v1417_v39 = vld [vmem:[#allocation2 + $0x80] sm:$0xff]  ;;  %v1145_v42 = vld [vmem:[#allocation2 + $0x18] sm:$0xff] }
  0xc7   : > { %3238 = vmatpush3.bf16.msra.mxu1 %v3423_v44  ;;  %3207 = vmatprep.subr.bf16.mxu0 %v3424_v47  ;;  %v1420_v45 = vld [vmem:[#allocation2 + $0x98] sm:$0xff] }
  0xc8   : > { %3239 = vmatprep.subr.bf16.mxu1 %v3425_v48 }
  0xca   : > { %3208 = vmatpush3.bf16.msra.mxu0 %v3424_v47 }
  0xcb   : > { %3240 = vmatpush3.bf16.msra.mxu1 %v3425_v48  ;;  %3209 = vmatprep.subr.bf16.mxu0 %v3426_v49  ;;  %v1143_v48 = vld [vmem:[#allocation2 + $0x8] sm:$0xff] }
  0xcc   : > { %3241 = vmatprep.subr.bf16.mxu1 %v3427_v50 }
  0xce   : > { %3210 = vmatpush3.bf16.msra.mxu0 %v3426_v49 }
  0xcf   : > { %3242 = vmatpush3.bf16.msra.mxu1 %v3427_v50  ;;  %3259 = vmatprep.subr.bf16.mxu0 %v3432_v52 }
  0xd0   : > { %3291 = vmatprep.subr.bf16.mxu1 %v3433_v53 }
  0xd1   : > { %3212 = vmatmul.mubr.bf16.vlgmr.msra.gmra.mxu0 %v3430_v51  ;;  %v1418_v51 = vld [vmem:[#allocation2 + $0x88] sm:$0xff] }
  0xd2   : > { %3244 = vmatmul.mubr.bf16.vlgmr.msra.gmra.mxu1 %v3431_v54  ;;  %3260 = vmatpush3.bf16.msra.mxu0 %v3432_v52  ;;  %v1148_v54 = vld [vmem:[#allocation2 + $0x30] sm:$0xff] }
  0xd3   : > { %3292 = vmatpush3.bf16.msra.mxu1 %v3433_v53  ;;  %3261 = vmatprep.subr.bf16.mxu0 %v3434_v55 }
  0xd4   : > { %3293 = vmatprep.subr.bf16.mxu1 %v3435_v56  ;;  %3215 = vmatprep.mubr.bf16.mxu0 %v3436_v57  ;;  %v1423_v57 = vld [vmem:[#allocation2 + $0xb0] sm:$0xff] }
  0xd5   : > { %3247 = vmatprep.mubr.bf16.mxu1 %v3437_v58 }
  0xd6   : > { %3262 = vmatpush3.bf16.msra.mxu0 %v3434_v55 }
  0xd7   : > { %3294 = vmatpush3.bf16.msra.mxu1 %v3435_v56  ;;  %3263 = vmatprep.subr.bf16.mxu0 %v3440_v60 }
  0xd8   : > { %3295 = vmatprep.subr.bf16.mxu1 %v3441_v61 }
  0xd9   : > { %3216 = vmatmul.mubr.bf16.gmra.mxu0 %v3438_v59 }
  0xda   : > { %3248 = vmatmul.mubr.bf16.gmra.mxu1 %v3439_v62  ;;  %3264 = vmatpush3.bf16.msra.mxu0 %v3440_v60  ;;  %v1146_v60 = vld [vmem:[#allocation2 + $0x20] sm:$0xff] }
  0xdb   : > { %3296 = vmatpush3.bf16.msra.mxu1 %v3441_v61  ;;  %3265 = vmatprep.subr.bf16.mxu0 %v3442_v63 }
  0xdc   : > { %3297 = vmatprep.subr.bf16.mxu1 %v3443_v0  ;;  %3219 = vmatprep.mubr.bf16.mxu0 %v3444_v1 }
  0xdd   : > { %3251 = vmatprep.mubr.bf16.mxu1 %v3445_v2  ;;  %v1149_v2 = vld [vmem:[#allocation2 + $0x38] sm:$0xff] }
  0xde   : > { %3266 = vmatpush3.bf16.msra.mxu0 %v3442_v63  ;;  %v1421_v63 = vld [vmem:[#allocation2 + $0xa0] sm:$0xff] }
  0xdf   : > { %3298 = vmatpush3.bf16.msra.mxu1 %v3443_v0  ;;  %3267 = vmatprep.subr.bf16.mxu0 %v3448_v4 }
  0xe0   : > { %3299 = vmatprep.subr.bf16.mxu1 %v3449_v5 }
  0xe1   : > { %3220 = vmatmul.mubr.bf16.gmra.mxu0 %v3446_v3 }
  0xe2   : > { %3252 = vmatmul.mubr.bf16.gmra.mxu1 %v3447_v6  ;;  %3268 = vmatpush3.bf16.msra.mxu0 %v3448_v4 }
  0xe3   : > { %3300 = vmatpush3.bf16.msra.mxu1 %v3449_v5  ;;  %3269 = vmatprep.subr.bf16.mxu0 %v3450_v7  ;;  %v1424_v5 = vld [vmem:[#allocation2 + $0xb8] sm:$0xff] }
  0xe4   : > { %3301 = vmatprep.subr.bf16.mxu1 %v3451_v8  ;;  %3223 = vmatprep.mubr.bf16.mxu0 %v3452_v9 }
  0xe5   : > { %3255 = vmatprep.mubr.bf16.mxu1 %v3453_v10 }
  0xe6   : > { %3270 = vmatpush3.bf16.msra.mxu0 %v3450_v7 }
  0xe7   : > { %3302 = vmatpush3.bf16.msra.mxu1 %v3451_v8  ;;  %3271 = vmatprep.subr.bf16.mxu0 %v3456_v12  ;;  %v1147_v8 = vld [vmem:[#allocation2 + $0x28] sm:$0xff] }
  0xe8   : > { %3303 = vmatprep.subr.bf16.mxu1 %v3457_v13 }
  0xe9   : > { %3224 = vmatmul.mubr.bf16.gmra.mxu0 %v3454_v11  ;;  %v1422_v11 = vld [vmem:[#allocation2 + $0xa8] sm:$0xff] }
  0xea   : > { %3256 = vmatmul.mubr.bf16.gmra.mxu1 %v3455_v14  ;;  %3272 = vmatpush3.bf16.msra.mxu0 %v3456_v12  ;;  %v1152_v14 = vld [vmem:[#allocation2 + $0x50] sm:$0xff] }
  0xeb   : > { %3304 = vmatpush3.bf16.msra.mxu1 %v3457_v13  ;;  %3273 = vmatprep.subr.bf16.mxu0 %v3458_v15 }
  0xec   : > { %3305 = vmatprep.subr.bf16.mxu1 %v3459_v16  ;;  %3275 = vmatprep.mubr.bf16.mxu0 %v3460_v17  ;;  %v1427_v17 = vld [vmem:[#allocation2 + $0xd0] sm:$0xff] }
  0xed   : > { %3307 = vmatprep.mubr.bf16.mxu1 %v3461_v18 }
  0xee   : > { %3274 = vmatpush3.bf16.msra.mxu0 %v3458_v15 }
  0xef   : > { %3306 = vmatpush3.bf16.msra.mxu1 %v3459_v16 }
  0xf1   : > { %3276 = vmatmul.mubr.bf16.vlgmr.msra.gmra.mxu0 %v3462_v19 }
  0xf2   : > { %3308 = vmatmul.mubr.bf16.vlgmr.msra.gmra.mxu1 %v3463_v20  ;;  %3279 = vmatprep.mubr.bf16.mxu0 %v3464_v21  ;;  %v1150_v20 = vld [vmem:[#allocation2 + $0x40] sm:$0xff] }
  0xf3   : > { %3311 = vmatprep.mubr.bf16.mxu1 %v3465_v22 }
  0xf9   : > { %3280 = vmatmul.mubr.bf16.gmra.mxu0 %v3466_v23  ;;  %v1425_v23 = vld [vmem:[#allocation2 + $0xc0] sm:$0xff] }
  0xfa   : > { %3312 = vmatmul.mubr.bf16.gmra.mxu1 %v3467_v24  ;;  %3283 = vmatprep.mubr.bf16.mxu0 %v3468_v25 }
  0xfb   : > { %3315 = vmatprep.mubr.bf16.mxu1 %v3469_v26  ;;  %v1153_v26 = vld [vmem:[#allocation2 + $0x58] sm:$0xff] }
 0x101   : > { %3284 = vmatmul.mubr.bf16.gmra.mxu0 %v3470_v27 }
 0x102   : > { %3316 = vmatmul.mubr.bf16.gmra.mxu1 %v3471_v28  ;;  %3287 = vmatprep.mubr.bf16.mxu0 %v3472_v29  ;;  %v1428_v29 = vld [vmem:[#allocation2 + $0xd8] sm:$0xff] }
 0x103   : > { %3319 = vmatprep.mubr.bf16.mxu1 %v3473_v30 }
 0x109   : > { %3288 = vmatmul.mubr.bf16.gmra.mxu0 %v3474_v31 }
 0x10a   : > { %3320 = vmatmul.mubr.bf16.gmra.mxu1 %v3475_v32  ;;  %v1151_v32 = vld [vmem:[#allocation2 + $0x48] sm:$0xff] }
 0x191   : > { %v3213_v35 = vpop.f32.mrf.mxu0 }
 0x192   : > { %v1385_v37 = vadd.f32 %v3213_v35, %v1144_v33  ;;  %v3245_v38 = vpop.f32.mrf.mxu1  ;;  %v1426_v35 = vld [vmem:[#allocation2 + $0xc8] sm:$0xff] }
 0x193   : > { %v1661_v40 = vadd.f32 %v3245_v38, %v1419_v34  ;;  %v1320_v41 = vpop.f32.mrf.mxu0  ;;  %v1156_v38 = vld [vmem:[#allocation2 + $0x70] sm:$0xff] }
 0x194   : > { %1402 = vst.msk [vmem:[#allocation2 + $0x10] sm:$0xff] %vm1399_vm1, %v1385_v37  ;;  %v1383_v43 = vadd.f32 %v1320_v41, %v1142_v36  ;;  %v1596_v44 = vpop.f32.mrf.mxu1  ;;  %v1431_v41 = vld [vmem:[#allocation2 + $0xf0] sm:$0xff] }
 0x195   : > { %1677 = vst.msk [vmem:[#allocation2 + $0x90] sm:$0xff] %vm1399_vm1, %v1661_v40  ;;  %v1659_v46 = vadd.f32 %v1596_v44, %v1417_v39  ;;  %v3214_v47 = vpop.f32.mrf.mxu0  ;;  %v1154_v44 = vld [vmem:[#allocation2 + $0x60] sm:$0xff] }
 0x196   : > { %1400 = vst.msk [vmem:[#allocation2] sm:$0xff] %vm1399_vm1, %v1383_v43  ;;  %v1386_v49 = vadd.f32 %v3214_v47, %v1145_v42  ;;  %v3246_v50 = vpop.f32.mrf.mxu1  ;;  %v1429_v47 = vld [vmem:[#allocation2 + $0xe0] sm:$0xff] }
 0x197   : > { %1675 = vst.msk [vmem:[#allocation2 + $0x80] sm:$0xff] %vm1399_vm1, %v1659_v46  ;;  %v1662_v52 = vadd.f32 %v3246_v50, %v1420_v45  ;;  %v1323_v53 = vpop.f32.mrf.mxu0  ;;  %v1157_v50 = vld [vmem:[#allocation2 + $0x78] sm:$0xff] }
 0x198   : > { %1403 = vst.msk [vmem:[#allocation2 + $0x18] sm:$0xff] %vm1399_vm1, %v1386_v49  ;;  %v1384_v55 = vadd.f32 %v1323_v53, %v1143_v48  ;;  %v1599_v56 = vpop.f32.mrf.mxu1  ;;  %v1432_v53 = vld [vmem:[#allocation2 + $0xf8] sm:$0xff] }
 0x199   : > { %1678 = vst.msk [vmem:[#allocation2 + $0x98] sm:$0xff] %vm1399_vm1, %v1662_v52  ;;  %v1660_v58 = vadd.f32 %v1599_v56, %v1418_v51  ;;  %v3217_v59 = vpop.f32.mrf.mxu0  ;;  %v1155_v56 = vld [vmem:[#allocation2 + $0x68] sm:$0xff] }
 0x19a   : > { %1401 = vst.msk [vmem:[#allocation2 + $0x8] sm:$0xff] %vm1399_vm1, %v1384_v55  ;;  %v1389_v61 = vadd.f32 %v3217_v59, %v1148_v54  ;;  %v3249_v62 = vpop.f32.mrf.mxu1  ;;  %v1430_v59 = vld [vmem:[#allocation2 + $0xe8] sm:$0xff] }
 0x19b   : > { %1676 = vst.msk [vmem:[#allocation2 + $0x88] sm:$0xff] %vm1399_vm1, %v1660_v58  ;;  %v1665_v0 = vadd.f32 %v3249_v62, %v1423_v57  ;;  %v1336_v1 = vpop.f32.mrf.mxu0  ;;  %v1694_v62 = vld [vmem:[#allocation2 + $0x110] sm:$0xff] }
 0x19c   : > { %1406 = vst.msk [vmem:[#allocation2 + $0x30] sm:$0xff] %vm1399_vm1, %v1389_v61  ;;  %v1387_v3 = vadd.f32 %v1336_v1, %v1146_v60  ;;  %v1612_v4 = vpop.f32.mrf.mxu1  ;;  %v1969_v1 = vld [vmem:[#allocation2 + $0x190] sm:$0xff] }
 0x19d   : > { %1681 = vst.msk [vmem:[#allocation2 + $0xb0] sm:$0xff] %vm1399_vm1, %v1665_v0  ;;  %v1663_v6 = vadd.f32 %v1612_v4, %v1421_v63  ;;  %v3218_v7 = vpop.f32.mrf.mxu0  ;;  %v1692_v4 = vld [vmem:[#allocation2 + $0x100] sm:$0xff] }
 0x19e   : > { %1404 = vst.msk [vmem:[#allocation2 + $0x20] sm:$0xff] %vm1399_vm1, %v1387_v3  ;;  %v1390_v9 = vadd.f32 %v3218_v7, %v1149_v2  ;;  %v3250_v10 = vpop.f32.mrf.mxu1  ;;  %v1967_v7 = vld [vmem:[#allocation2 + $0x180] sm:$0xff] }
 0x19f   : > { %1679 = vst.msk [vmem:[#allocation2 + $0xa0] sm:$0xff] %vm1399_vm1, %v1663_v6  ;;  %v1666_v12 = vadd.f32 %v3250_v10, %v1424_v5  ;;  %v1339_v13 = vpop.f32.mrf.mxu0  ;;  %v1695_v10 = vld [vmem:[#allocation2 + $0x118] sm:$0xff] }
 0x1a0   : > { %1407 = vst.msk [vmem:[#allocation2 + $0x38] sm:$0xff] %vm1399_vm1, %v1390_v9  ;;  %v1388_v15 = vadd.f32 %v1339_v13, %v1147_v8  ;;  %v1615_v16 = vpop.f32.mrf.mxu1  ;;  %v1970_v13 = vld [vmem:[#allocation2 + $0x198] sm:$0xff] }
 0x1a1   : > { %1682 = vst.msk [vmem:[#allocation2 + $0xb8] sm:$0xff] %vm1399_vm1, %v1666_v12  ;;  %v1664_v18 = vadd.f32 %v1615_v16, %v1422_v11  ;;  %v3221_v19 = vpop.f32.mrf.mxu0  ;;  %v1693_v16 = vld [vmem:[#allocation2 + $0x108] sm:$0xff] }
 0x1a2   : > { %1405 = vst.msk [vmem:[#allocation2 + $0x28] sm:$0xff] %vm1399_vm1, %v1388_v15  ;;  %v1393_v21 = vadd.f32 %v3221_v19, %v1152_v14  ;;  %v3253_v22 = vpop.f32.mrf.mxu1  ;;  %v1968_v19 = vld [vmem:[#allocation2 + $0x188] sm:$0xff] }
 0x1a3   : > { %1680 = vst.msk [vmem:[#allocation2 + $0xa8] sm:$0xff] %vm1399_vm1, %v1664_v18  ;;  %v1669_v24 = vadd.f32 %v3253_v22, %v1427_v17  ;;  %v1352_v25 = vpop.f32.mrf.mxu0  ;;  %v1698_v22 = vld [vmem:[#allocation2 + $0x130] sm:$0xff] }
 0x1a4   : > { %1410 = vst.msk [vmem:[#allocation2 + $0x50] sm:$0xff] %vm1399_vm1, %v1393_v21  ;;  %v1391_v27 = vadd.f32 %v1352_v25, %v1150_v20  ;;  %v1628_v28 = vpop.f32.mrf.mxu1  ;;  %v1973_v25 = vld [vmem:[#allocation2 + $0x1b0] sm:$0xff] }
 0x1a5   : > { %1685 = vst.msk [vmem:[#allocation2 + $0xd0] sm:$0xff] %vm1399_vm1, %v1669_v24  ;;  %v1667_v30 = vadd.f32 %v1628_v28, %v1425_v23  ;;  %v3222_v31 = vpop.f32.mrf.mxu0  ;;  %v1696_v28 = vld [vmem:[#allocation2 + $0x120] sm:$0xff] }
 0x1a6   : > { %1408 = vst.msk [vmem:[#allocation2 + $0x40] sm:$0xff] %vm1399_vm1, %v1391_v27  ;;  %v1394_v33 = vadd.f32 %v3222_v31, %v1153_v26  ;;  %v3254_v34 = vpop.f32.mrf.mxu1  ;;  %v1971_v31 = vld [vmem:[#allocation2 + $0x1a0] sm:$0xff] }
 0x1a7   : > { %1683 = vst.msk [vmem:[#allocation2 + $0xc0] sm:$0xff] %vm1399_vm1, %v1667_v30  ;;  %v1670_v36 = vadd.f32 %v3254_v34, %v1428_v29  ;;  %v1355_v37 = vpop.f32.mrf.mxu0  ;;  %v1699_v34 = vld [vmem:[#allocation2 + $0x138] sm:$0xff] }
 0x1a8   : > { %1411 = vst.msk [vmem:[#allocation2 + $0x58] sm:$0xff] %vm1399_vm1, %v1394_v33  ;;  %v1392_v39 = vadd.f32 %v1355_v37, %v1151_v32  ;;  %v1631_v40 = vpop.f32.mrf.mxu1  ;;  %v1974_v37 = vld [vmem:[#allocation2 + $0x1b8] sm:$0xff] }
 0x1a9   : > { %1686 = vst.msk [vmem:[#allocation2 + $0xd8] sm:$0xff] %vm1399_vm1, %v1670_v36  ;;  %v1668_v42 = vadd.f32 %v1631_v40, %v1426_v35  ;;  %v3225_v43 = vpop.f32.mrf.mxu0  ;;  %v1697_v40 = vld [vmem:[#allocation2 + $0x128] sm:$0xff] }
 0x1aa   : > { %1409 = vst.msk [vmem:[#allocation2 + $0x48] sm:$0xff] %vm1399_vm1, %v1392_v39  ;;  %v1397_v45 = vadd.f32 %v3225_v43, %v1156_v38  ;;  %v3257_v46 = vpop.f32.mrf.mxu1  ;;  %v1972_v43 = vld [vmem:[#allocation2 + $0x1a8] sm:$0xff] }
 0x1ab   : > { %1684 = vst.msk [vmem:[#allocation2 + $0xc8] sm:$0xff] %vm1399_vm1, %v1668_v42  ;;  %v1673_v48 = vadd.f32 %v3257_v46, %v1431_v41  ;;  %v1368_v49 = vpop.f32.mrf.mxu0  ;;  %v1702_v46 = vld [vmem:[#allocation2 + $0x150] sm:$0xff] }
 0x1ac   : > { %1414 = vst.msk [vmem:[#allocation2 + $0x70] sm:$0xff] %vm1399_vm1, %v1397_v45  ;;  %v1395_v51 = vadd.f32 %v1368_v49, %v1154_v44  ;;  %v1644_v52 = vpop.f32.mrf.mxu1  ;;  %v1977_v49 = vld [vmem:[#allocation2 + $0x1d0] sm:$0xff] }
 0x1ad   : > { %1689 = vst.msk [vmem:[#allocation2 + $0xf0] sm:$0xff] %vm1399_vm1, %v1673_v48  ;;  %v1671_v54 = vadd.f32 %v1644_v52, %v1429_v47  ;;  %v3226_v55 = vpop.f32.mrf.mxu0  ;;  %v1700_v52 = vld [vmem:[#allocation2 + $0x140] sm:$0xff] }
 0x1ae   : > { %1412 = vst.msk [vmem:[#allocation2 + $0x60] sm:$0xff] %vm1399_vm1, %v1395_v51  ;;  %v1398_v57 = vadd.f32 %v3226_v55, %v1157_v50  ;;  %v3258_v58 = vpop.f32.mrf.mxu1  ;;  %v1975_v55 = vld [vmem:[#allocation2 + $0x1c0] sm:$0xff] }
 0x1af   : > { %1687 = vst.msk [vmem:[#allocation2 + $0xe0] sm:$0xff] %vm1399_vm1, %v1671_v54  ;;  %v1674_v60 = vadd.f32 %v3258_v58, %v1432_v53  ;;  %v1371_v61 = vpop.f32.mrf.mxu0  ;;  %v1703_v58 = vld [vmem:[#allocation2 + $0x158] sm:$0xff] }
 0x1b0   : > { %1415 = vst.msk [vmem:[#allocation2 + $0x78] sm:$0xff] %vm1399_vm1, %v1398_v57  ;;  %v1396_v63 = vadd.f32 %v1371_v61, %v1155_v56  ;;  %v1647_v0 = vpop.f32.mrf.mxu1  ;;  %v1978_v61 = vld [vmem:[#allocation2 + $0x1d8] sm:$0xff] }
 0x1b1   : > { %1690 = vst.msk [vmem:[#allocation2 + $0xf8] sm:$0xff] %vm1399_vm1, %v1674_v60  ;;  %v1672_v2 = vadd.f32 %v1647_v0, %v1430_v59  ;;  %v3277_v3 = vpop.f32.mrf.mxu0  ;;  %v1701_v0 = vld [vmem:[#allocation2 + $0x148] sm:$0xff] }
 0x1b2   : > { %1413 = vst.msk [vmem:[#allocation2 + $0x68] sm:$0xff] %vm1399_vm1, %v1396_v63  ;;  %v1936_v5 = vadd.f32 %v3277_v3, %v1694_v62  ;;  %v3309_v6 = vpop.f32.mrf.mxu1  ;;  %v1976_v3 = vld [vmem:[#allocation2 + $0x1c8] sm:$0xff] }
 0x1b3   : > { %1688 = vst.msk [vmem:[#allocation2 + $0xe8] sm:$0xff] %vm1399_vm1, %v1672_v2  ;;  %v2211_v8 = vadd.f32 %v3309_v6, %v1969_v1  ;;  %v1871_v9 = vpop.f32.mrf.mxu0  ;;  %v1706_v6 = vld [vmem:[#allocation2 + $0x170] sm:$0xff] }
 0x1b4   : > { %1952 = vst.msk [vmem:[#allocation2 + $0x110] sm:$0xff] %vm1399_vm1, %v1936_v5  ;;  %v1934_v11 = vadd.f32 %v1871_v9, %v1692_v4  ;;  %v2146_v12 = vpop.f32.mrf.mxu1  ;;  %v1981_v9 = vld [vmem:[#allocation2 + $0x1f0] sm:$0xff] }
 0x1b5   : > { %2227 = vst.msk [vmem:[#allocation2 + $0x190] sm:$0xff] %vm1399_vm1, %v2211_v8  ;;  %v2209_v14 = vadd.f32 %v2146_v12, %v1967_v7  ;;  %v3278_v15 = vpop.f32.mrf.mxu0  ;;  %v1704_v12 = vld [vmem:[#allocation2 + $0x160] sm:$0xff] }
 0x1b6   : > { %1950 = vst.msk [vmem:[#allocation2 + $0x100] sm:$0xff] %vm1399_vm1, %v1934_v11  ;;  %v1937_v17 = vadd.f32 %v3278_v15, %v1695_v10  ;;  %v3310_v18 = vpop.f32.mrf.mxu1  ;;  %v1979_v15 = vld [vmem:[#allocation2 + $0x1e0] sm:$0xff] }
 0x1b7   : > { %2225 = vst.msk [vmem:[#allocation2 + $0x180] sm:$0xff] %vm1399_vm1, %v2209_v14  ;;  %v2212_v20 = vadd.f32 %v3310_v18, %v1970_v13  ;;  %v1874_v21 = vpop.f32.mrf.mxu0  ;;  %v1707_v18 = vld [vmem:[#allocation2 + $0x178] sm:$0xff] }
 0x1b8   : > { %1953 = vst.msk [vmem:[#allocation2 + $0x118] sm:$0xff] %vm1399_vm1, %v1937_v17  ;;  %v1935_v23 = vadd.f32 %v1874_v21, %v1693_v16  ;;  %v2149_v24 = vpop.f32.mrf.mxu1  ;;  %v1982_v21 = vld [vmem:[#allocation2 + $0x1f8] sm:$0xff] }
 0x1b9   : > { %2228 = vst.msk [vmem:[#allocation2 + $0x198] sm:$0xff] %vm1399_vm1, %v2212_v20  ;;  %v2210_v26 = vadd.f32 %v2149_v24, %v1968_v19  ;;  %v3281_v27 = vpop.f32.mrf.mxu0  ;;  %v1705_v24 = vld [vmem:[#allocation2 + $0x168] sm:$0xff] }
 0x1ba   : > { %1951 = vst.msk [vmem:[#allocation2 + $0x108] sm:$0xff] %vm1399_vm1, %v1935_v23  ;;  %v1940_v29 = vadd.f32 %v3281_v27, %v1698_v22  ;;  %v3313_v30 = vpop.f32.mrf.mxu1  ;;  %v1980_v27 = vld [vmem:[#allocation2 + $0x1e8] sm:$0xff] }
 0x1bb   : > { %2226 = vst.msk [vmem:[#allocation2 + $0x188] sm:$0xff] %vm1399_vm1, %v2210_v26  ;;  %v2215_v32 = vadd.f32 %v3313_v30, %v1973_v25  ;;  %v1887_v33 = vpop.f32.mrf.mxu0 }
 0x1bc   : > { %1956 = vst.msk [vmem:[#allocation2 + $0x130] sm:$0xff] %vm1399_vm1, %v1940_v29  ;;  %v1938_v35 = vadd.f32 %v1887_v33, %v1696_v28  ;;  %v2162_v36 = vpop.f32.mrf.mxu1 }
 0x1bd   : > { %2231 = vst.msk [vmem:[#allocation2 + $0x1b0] sm:$0xff] %vm1399_vm1, %v2215_v32  ;;  %v2213_v38 = vadd.f32 %v2162_v36, %v1971_v31  ;;  %v3282_v39 = vpop.f32.mrf.mxu0 }
 0x1be   : > { %1954 = vst.msk [vmem:[#allocation2 + $0x120] sm:$0xff] %vm1399_vm1, %v1938_v35  ;;  %v1941_v41 = vadd.f32 %v3282_v39, %v1699_v34  ;;  %v3314_v42 = vpop.f32.mrf.mxu1 }
 0x1bf   : > { %2229 = vst.msk [vmem:[#allocation2 + $0x1a0] sm:$0xff] %vm1399_vm1, %v2213_v38  ;;  %v2216_v44 = vadd.f32 %v3314_v42, %v1974_v37  ;;  %v1890_v45 = vpop.f32.mrf.mxu0 }
 0x1c0   : > { %1957 = vst.msk [vmem:[#allocation2 + $0x138] sm:$0xff] %vm1399_vm1, %v1941_v41  ;;  %v1939_v47 = vadd.f32 %v1890_v45, %v1697_v40  ;;  %v2165_v48 = vpop.f32.mrf.mxu1 }
 0x1c1   : > { %2232 = vst.msk [vmem:[#allocation2 + $0x1b8] sm:$0xff] %vm1399_vm1, %v2216_v44  ;;  %v2214_v50 = vadd.f32 %v2165_v48, %v1972_v43  ;;  %v3285_v51 = vpop.f32.mrf.mxu0 }
 0x1c2   : > { %1955 = vst.msk [vmem:[#allocation2 + $0x128] sm:$0xff] %vm1399_vm1, %v1939_v47  ;;  %v1944_v53 = vadd.f32 %v3285_v51, %v1702_v46  ;;  %v3317_v54 = vpop.f32.mrf.mxu1 }
 0x1c3   : > { %2230 = vst.msk [vmem:[#allocation2 + $0x1a8] sm:$0xff] %vm1399_vm1, %v2214_v50  ;;  %v2219_v56 = vadd.f32 %v3317_v54, %v1977_v49  ;;  %v1903_v57 = vpop.f32.mrf.mxu0 }
 0x1c4   : > { %1960 = vst.msk [vmem:[#allocation2 + $0x150] sm:$0xff] %vm1399_vm1, %v1944_v53  ;;  %v1942_v59 = vadd.f32 %v1903_v57, %v1700_v52  ;;  %v2178_v60 = vpop.f32.mrf.mxu1 }
 0x1c5   : > { %2235 = vst.msk [vmem:[#allocation2 + $0x1d0] sm:$0xff] %vm1399_vm1, %v2219_v56  ;;  %v2217_v62 = vadd.f32 %v2178_v60, %v1975_v55  ;;  %v3286_v63 = vpop.f32.mrf.mxu0 }
 0x1c6   : > { %1958 = vst.msk [vmem:[#allocation2 + $0x140] sm:$0xff] %vm1399_vm1, %v1942_v59  ;;  %v1945_v1 = vadd.f32 %v3286_v63, %v1703_v58  ;;  %v3318_v2 = vpop.f32.mrf.mxu1 }
 0x1c7   : > { %2233 = vst.msk [vmem:[#allocation2 + $0x1c0] sm:$0xff] %vm1399_vm1, %v2217_v62  ;;  %v2220_v4 = vadd.f32 %v3318_v2, %v1978_v61  ;;  %v1906_v5 = vpop.f32.mrf.mxu0 }
 0x1c8   : > { %1961 = vst.msk [vmem:[#allocation2 + $0x158] sm:$0xff] %vm1399_vm1, %v1945_v1  ;;  %v1943_v7 = vadd.f32 %v1906_v5, %v1701_v0  ;;  %v2181_v8 = vpop.f32.mrf.mxu1 }
 0x1c9   : > { %2236 = vst.msk [vmem:[#allocation2 + $0x1d8] sm:$0xff] %vm1399_vm1, %v2220_v4  ;;  %v2218_v10 = vadd.f32 %v2181_v8, %v1976_v3  ;;  %v3289_v11 = vpop.f32.mrf.mxu0 }
 0x1ca   : > { %1959 = vst.msk [vmem:[#allocation2 + $0x148] sm:$0xff] %vm1399_vm1, %v1943_v7  ;;  %v1948_v13 = vadd.f32 %v3289_v11, %v1706_v6  ;;  %v3321_v14 = vpop.f32.mrf.mxu1 }
 0x1cb   : > { %2234 = vst.msk [vmem:[#allocation2 + $0x1c8] sm:$0xff] %vm1399_vm1, %v2218_v10  ;;  %v2223_v16 = vadd.f32 %v3321_v14, %v1981_v9  ;;  %v1919_v17 = vpop.f32.mrf.mxu0 }
 0x1cc   : > { %1964 = vst.msk [vmem:[#allocation2 + $0x170] sm:$0xff] %vm1399_vm1, %v1948_v13  ;;  %v1946_v19 = vadd.f32 %v1919_v17, %v1704_v12  ;;  %v2194_v20 = vpop.f32.mrf.mxu1 }
 0x1cd   : > { %2239 = vst.msk [vmem:[#allocation2 + $0x1f0] sm:$0xff] %vm1399_vm1, %v2223_v16  ;;  %v2221_v22 = vadd.f32 %v2194_v20, %v1979_v15  ;;  %v3290_v23 = vpop.f32.mrf.mxu0 }
 0x1ce   : > { %1962 = vst.msk [vmem:[#allocation2 + $0x160] sm:$0xff] %vm1399_vm1, %v1946_v19  ;;  %v1949_v25 = vadd.f32 %v3290_v23, %v1707_v18  ;;  %v3322_v26 = vpop.f32.mrf.mxu1 }
 0x1cf   : > { %2237 = vst.msk [vmem:[#allocation2 + $0x1e0] sm:$0xff] %vm1399_vm1, %v2221_v22  ;;  %v2224_v28 = vadd.f32 %v3322_v26, %v1982_v21  ;;  %v1922_v29 = vpop.f32.mrf.mxu0  ;;  %2244 = sbr.rel (%p3115_p4) target bundleno = 507 (0x1fb), region = 257 }
 0x1d0   : > { %1965 = vst.msk [vmem:[#allocation2 + $0x178] sm:$0xff] %vm1399_vm1, %v1949_v25  ;;  %v1947_v30 = vadd.f32 %v1922_v29, %v1705_v24  ;;  %v2197_v31 = vpop.f32.mrf.mxu1 }
 0x1d1   : > { %2240 = vst.msk [vmem:[#allocation2 + $0x1f8] sm:$0xff] %vm1399_vm1, %v2224_v28  ;;  %v2222_v32 = vadd.f32 %v2197_v31, %v1980_v27 }
 0x1d2   : > { %1963 = vst.msk [vmem:[#allocation2 + $0x168] sm:$0xff] %vm1399_vm1, %v1947_v30 }
 0x1d3   : > { %2238 = vst.msk [vmem:[#allocation2 + $0x1e8] sm:$0xff] %vm1399_vm1, %v2222_v32 }
 0x1d4   : > { %v2245_v33 = vld [vmem:[#allocation2] sm:$0xff]  ;;  %v2246_v35 = vld [vmem:[#allocation2 + $0x8] sm:$0xff]  ;;  %v2247_v38 = vld [vmem:[#allocation2 + $0x10] sm:$0xff] }
 0x1d5   : > { %v3116_v34 = vld [vmem:[%s4517_s1] ss:$0 sm:$0xff]  ;;  %v2248_v39 = vld [vmem:[#allocation2 + $0x18] sm:$0xff]  ;;  %v2250_v44 = vld [vmem:[#allocation2 + $0x28] sm:$0xff] }
 0x1d6   : > { %v2337_v36 = vadd.f32 %v3116_v34, %v2245_v33  ;;  %v2338_v37 = vadd.f32 %v3116_v34, %v2246_v35  ;;  %v2249_v40 = vld [vmem:[#allocation2 + $0x20] sm:$0xff]  ;;  %v2339_v41 = vadd.f32 %v3116_v34, %v2247_v38  ;;  %v2340_v42 = vadd.f32 %v3116_v34, %v2248_v39  ;;  %v2251_v45 = vld [vmem:[#allocation2 + $0x30] sm:$0xff]  ;;  %v2252_v46 = vld [vmem:[#allocation2 + $0x38] sm:$0xff] }
 0x1d7   : > { %v2341_v43 = vadd.f32 %v3116_v34, %v2249_v40  ;;  %v2342_v49 = vadd.f32 %v3116_v34, %v2250_v44  ;;  %v2343_v50 = vadd.f32 %v3116_v34, %v2251_v45  ;;  %v2253_v51 = vld [vmem:[#allocation2 + $0x40] sm:$0xff]  ;;  %v2254_v52 = vld [vmem:[#allocation2 + $0x48] sm:$0xff]  ;;  %v2255_v53 = vld [vmem:[#allocation2 + $0x50] sm:$0xff]  ;;  %v2344_v57 = vadd.f32 %v3116_v34, %v2252_v46 }
 0x1d8   : > { %v2401_v47 = vmax.f32 %v2337_v36, 0.0  ;;  %v2402_v48 = vmax.f32 %v2338_v37, 0.0  ;;  %v2403_v54 = vmax.f32 %v2339_v41, 0.0  ;;  %v2404_v55 = vmax.f32 %v2340_v42, 0.0  ;;  %v2256_v58 = vld [vmem:[#allocation2 + $0x58] sm:$0xff]  ;;  %v2257_v59 = vld [vmem:[#allocation2 + $0x60] sm:$0xff] }
 0x1d9   : > { %v2405_v56 = vmax.f32 %v2341_v43, 0.0  ;;  %v2258_v60 = vld [vmem:[#allocation2 + $0x68] sm:$0xff]  ;;  %v2406_v61 = vmax.f32 %v2342_v49, 0.0  ;;  %v2407_v62 = vmax.f32 %v2343_v50, 0.0  ;;  %v2345_v63 = vadd.f32 %v3116_v34, %v2253_v51  ;;  %v2259_v1 = vld [vmem:[#allocation2 + $0x70] sm:$0xff]  ;;  %v2260_v2 = vld [vmem:[#allocation2 + $0x78] sm:$0xff] }
 0x1da   : > { %2465 = vst.msk [vmem:[%s3893_s2] sm:$0xff] %vm1399_vm1, %v2401_v47  ;;  %2466 = vst.msk [vmem:[%s3893_s2 + $0x8] sm:$0xff] %vm1399_vm1, %v2402_v48  ;;  %v2346_v0 = vadd.f32 %v3116_v34, %v2254_v52  ;;  %v2408_v3 = vmax.f32 %v2344_v57, 0.0  ;;  %v2347_v4 = vadd.f32 %v3116_v34, %v2255_v53  ;;  %v2348_v5 = vadd.f32 %v3116_v34, %v2256_v58  ;;  %v2261_v7 = vld [vmem:[#allocation2 + $0x80] sm:$0xff]  ;;  %v2262_v9 = vld [vmem:[#allocation2 + $0x88] sm:$0xff] }
 0x1db   : > { %2467 = vst.msk [vmem:[%s3893_s2 + $0x10] sm:$0xff] %vm1399_vm1, %v2403_v54  ;;  %2468 = vst.msk [vmem:[%s3893_s2 + $0x18] sm:$0xff] %vm1399_vm1, %v2404_v55  ;;  %v2349_v6 = vadd.f32 %v3116_v34, %v2257_v59  ;;  %v4169_v8 = vld [vmem:[%s4517_s1 + $0x1] ss:$0 sm:$0xff]  ;;  %v2409_v10 = vmax.f32 %v2345_v63, 0.0  ;;  %v2350_v12 = vadd.f32 %v3116_v34, %v2258_v60  ;;  %v2351_v13 = vadd.f32 %v3116_v34, %v2259_v1  ;;  %v2263_v14 = vld [vmem:[#allocation2 + $0x90] sm:$0xff] }
 0x1dc   : > { %2469 = vst.msk [vmem:[%s3893_s2 + $0x20] sm:$0xff] %vm1399_vm1, %v2405_v56  ;;  %2470 = vst.msk [vmem:[%s3893_s2 + $0x28] sm:$0xff] %vm1399_vm1, %v2406_v61  ;;  %v2410_v11 = vmax.f32 %v2346_v0, 0.0  ;;  %v2264_v15 = vld [vmem:[#allocation2 + $0x98] sm:$0xff]  ;;  %v2265_v16 = vld [vmem:[#allocation2 + $0xa0] sm:$0xff]  ;;  %v2411_v17 = vmax.f32 %v2347_v4, 0.0  ;;  %v2352_v20 = vadd.f32 %v3116_v34, %v2260_v2  ;;  %v2353_v25 = vadd.f32 %v4169_v8, %v2261_v7 }
 0x1dd   : > { %2471 = vst.msk [vmem:[%s3893_s2 + $0x30] sm:$0xff] %vm1399_vm1, %v2407_v62  ;;  %2472 = vst.msk [vmem:[%s3893_s2 + $0x38] sm:$0xff] %vm1399_vm1, %v2408_v3  ;;  %v2412_v18 = vmax.f32 %v2348_v5, 0.0  ;;  %v2413_v19 = vmax.f32 %v2349_v6, 0.0  ;;  %v2266_v21 = vld [vmem:[#allocation2 + $0xa8] sm:$0xff]  ;;  %v2267_v22 = vld [vmem:[#allocation2 + $0xb0] sm:$0xff]  ;;  %v2354_v26 = vadd.f32 %v4169_v8, %v2262_v9  ;;  %v2355_v29 = vadd.f32 %v4169_v8, %v2263_v14 }
 0x1de   : > { %2473 = vst.msk [vmem:[%s3893_s2 + $0x40] sm:$0xff] %vm1399_vm1, %v2409_v10  ;;  %2474 = vst.msk [vmem:[%s3893_s2 + $0x48] sm:$0xff] %vm1399_vm1, %v2410_v11  ;;  %v2414_v23 = vmax.f32 %v2350_v12, 0.0  ;;  %v2415_v24 = vmax.f32 %v2351_v13, 0.0  ;;  %v2268_v27 = vld [vmem:[#allocation2 + $0xb8] sm:$0xff]  ;;  %v2416_v28 = vmax.f32 %v2352_v20, 0.0  ;;  %v2356_v30 = vadd.f32 %v4169_v8, %v2264_v15 }
 0x1df   : > { %2475 = vst.msk [vmem:[%s3893_s2 + $0x50] sm:$0xff] %vm1399_vm1, %v2411_v17  ;;  %2476 = vst.msk [vmem:[%s3893_s2 + $0x58] sm:$0xff] %vm1399_vm1, %v2412_v18  ;;  %v2357_v31 = vadd.f32 %v4169_v8, %v2265_v16  ;;  %v2269_v32 = vld [vmem:[#allocation2 + $0xc0] sm:$0xff]  ;;  %v2270_v33 = vld [vmem:[#allocation2 + $0xc8] sm:$0xff]  ;;  %v2417_v34 = vmax.f32 %v2353_v25, 0.0  ;;  %v2418_v35 = vmax.f32 %v2354_v26, 0.0  ;;  %v2358_v36 = vadd.f32 %v4169_v8, %v2266_v21 }
 0x1e0   : > { %2477 = vst.msk [vmem:[%s3893_s2 + $0x60] sm:$0xff] %vm1399_vm1, %v2413_v19  ;;  %2478 = vst.msk [vmem:[%s3893_s2 + $0x68] sm:$0xff] %vm1399_vm1, %v2414_v23  ;;  %v2359_v37 = vadd.f32 %v4169_v8, %v2267_v22  ;;  %v2271_v38 = vld [vmem:[#allocation2 + $0xd0] sm:$0xff]  ;;  %v2272_v39 = vld [vmem:[#allocation2 + $0xd8] sm:$0xff]  ;;  %v2419_v41 = vmax.f32 %v2355_v29, 0.0  ;;  %v2420_v42 = vmax.f32 %v2356_v30, 0.0  ;;  %v2360_v44 = vadd.f32 %v4169_v8, %v2268_v27 }
 0x1e1   : > { %2479 = vst.msk [vmem:[%s3893_s2 + $0x70] sm:$0xff] %vm1399_vm1, %v2415_v24  ;;  %v2273_v40 = vld [vmem:[#allocation2 + $0xe0] sm:$0xff]  ;;  %2480 = vst.msk [vmem:[%s3893_s2 + $0x78] sm:$0xff] %vm1399_vm1, %v2416_v28  ;;  %v2421_v43 = vmax.f32 %v2357_v31, 0.0  ;;  %v2274_v45 = vld [vmem:[#allocation2 + $0xe8] sm:$0xff]  ;;  %v2422_v47 = vmax.f32 %v2358_v36, 0.0  ;;  %v2361_v49 = vadd.f32 %v4169_v8, %v2269_v32  ;;  %v2362_v50 = vadd.f32 %v4169_v8, %v2270_v33 }
 0x1e2   : > { %v2275_v46 = vld [vmem:[#allocation2 + $0xf0] sm:$0xff]  ;;  %2481 = vst.msk [vmem:[%s3893_s2 + $0x80] sm:$0xff] %vm1399_vm1, %v2417_v34  ;;  %2482 = vst.msk [vmem:[%s3893_s2 + $0x88] sm:$0xff] %vm1399_vm1, %v2418_v35  ;;  %v2423_v48 = vmax.f32 %v2359_v37, 0.0  ;;  %v2276_v51 = vld [vmem:[#allocation2 + $0xf8] sm:$0xff]  ;;  %v2424_v52 = vmax.f32 %v2360_v44, 0.0  ;;  %v2363_v53 = vadd.f32 %v4169_v8, %v2271_v38  ;;  %v2364_v54 = vadd.f32 %v4169_v8, %v2272_v39 }
 0x1e3   : > { %2483 = vst.msk [vmem:[%s3893_s2 + $0x90] sm:$0xff] %vm1399_vm1, %v2419_v41  ;;  %2484 = vst.msk [vmem:[%s3893_s2 + $0x98] sm:$0xff] %vm1399_vm1, %v2420_v42  ;;  %v2365_v55 = vadd.f32 %v4169_v8, %v2273_v40  ;;  %v2277_v56 = vld [vmem:[#allocation2 + $0x100] sm:$0xff]  ;;  %v2278_v58 = vld [vmem:[#allocation2 + $0x108] sm:$0xff]  ;;  %v2425_v59 = vmax.f32 %v2361_v49, 0.0  ;;  %v2426_v60 = vmax.f32 %v2362_v50, 0.0  ;;  %v2366_v61 = vadd.f32 %v4169_v8, %v2274_v45 }
 0x1e4   : > { %2485 = vst.msk [vmem:[%s3893_s2 + $0xa0] sm:$0xff] %vm1399_vm1, %v2421_v43  ;;  %v4219_v57 = vld [vmem:[%s4517_s1 + $0x2] ss:$0 sm:$0xff]  ;;  %2486 = vst.msk [vmem:[%s3893_s2 + $0xa8] sm:$0xff] %vm1399_vm1, %v2422_v47  ;;  %v2367_v62 = vadd.f32 %v4169_v8, %v2275_v46  ;;  %v2279_v63 = vld [vmem:[#allocation2 + $0x110] sm:$0xff]  ;;  %v2427_v2 = vmax.f32 %v2363_v53, 0.0  ;;  %v2368_v5 = vadd.f32 %v4169_v8, %v2276_v51 }
 0x1e5   : > { %2487 = vst.msk [vmem:[%s3893_s2 + $0xb0] sm:$0xff] %vm1399_vm1, %v2423_v48  ;;  %v2280_v0 = vld [vmem:[#allocation2 + $0x118] sm:$0xff]  ;;  %v2281_v1 = vld [vmem:[#allocation2 + $0x120] sm:$0xff]  ;;  %2488 = vst.msk [vmem:[%s3893_s2 + $0xb8] sm:$0xff] %vm1399_vm1, %v2424_v52  ;;  %v2428_v3 = vmax.f32 %v2364_v54, 0.0  ;;  %v2429_v4 = vmax.f32 %v2365_v55, 0.0  ;;  %v2369_v11 = vadd.f32 %v4219_v57, %v2277_v56  ;;  %v2370_v12 = vadd.f32 %v4219_v57, %v2278_v58 }
 0x1e6   : > { %v2282_v6 = vld [vmem:[#allocation2 + $0x128] sm:$0xff]  ;;  %v2283_v7 = vld [vmem:[#allocation2 + $0x130] sm:$0xff]  ;;  %2489 = vst.msk [vmem:[%s3893_s2 + $0xc0] sm:$0xff] %vm1399_vm1, %v2425_v59  ;;  %2490 = vst.msk [vmem:[%s3893_s2 + $0xc8] sm:$0xff] %vm1399_vm1, %v2426_v60  ;;  %v2430_v9 = vmax.f32 %v2366_v61, 0.0  ;;  %v2431_v10 = vmax.f32 %v2367_v62, 0.0  ;;  %v2371_v14 = vadd.f32 %v4219_v57, %v2279_v63  ;;  %v2372_v15 = vadd.f32 %v4219_v57, %v2280_v0 }
 0x1e7   : > { %v2284_v13 = vld [vmem:[#allocation2 + $0x138] sm:$0xff]  ;;  %2491 = vst.msk [vmem:[%s3893_s2 + $0xd0] sm:$0xff] %vm1399_vm1, %v2427_v2  ;;  %2492 = vst.msk [vmem:[%s3893_s2 + $0xd8] sm:$0xff] %vm1399_vm1, %v2428_v3  ;;  %v2432_v8 = vmax.f32 %v2368_v5, 0.0  ;;  %v2373_v16 = vadd.f32 %v4219_v57, %v2281_v1  ;;  %v2285_v17 = vld [vmem:[#allocation2 + $0x140] sm:$0xff]  ;;  %v2433_v19 = vmax.f32 %v2369_v11, 0.0  ;;  %v2374_v21 = vadd.f32 %v4219_v57, %v2282_v6 }
 0x1e8   : > { %2493 = vst.msk [vmem:[%s3893_s2 + $0xe0] sm:$0xff] %vm1399_vm1, %v2429_v4  ;;  %v2286_v18 = vld [vmem:[#allocation2 + $0x148] sm:$0xff]  ;;  %2494 = vst.msk [vmem:[%s3893_s2 + $0xe8] sm:$0xff] %vm1399_vm1, %v2430_v9  ;;  %v2434_v20 = vmax.f32 %v2370_v12, 0.0  ;;  %v2375_v22 = vadd.f32 %v4219_v57, %v2283_v7  ;;  %v2287_v23 = vld [vmem:[#allocation2 + $0x150] sm:$0xff]  ;;  %v2435_v26 = vmax.f32 %v2371_v14, 0.0  ;;  %v2376_v29 = vadd.f32 %v4219_v57, %v2284_v13 }
 0x1e9   : > { %2495 = vst.msk [vmem:[%s3893_s2 + $0xf0] sm:$0xff] %vm1399_vm1, %v2431_v10  ;;  %v2288_v24 = vld [vmem:[#allocation2 + $0x158] sm:$0xff]  ;;  %v2289_v25 = vld [vmem:[#allocation2 + $0x160] sm:$0xff]  ;;  %2496 = vst.msk [vmem:[%s3893_s2 + $0xf8] sm:$0xff] %vm1399_vm1, %v2432_v8  ;;  %v2436_v27 = vmax.f32 %v2372_v15, 0.0  ;;  %v2437_v28 = vmax.f32 %v2373_v16, 0.0  ;;  %v2377_v34 = vadd.f32 %v4219_v57, %v2285_v17  ;;  %v2378_v35 = vadd.f32 %v4219_v57, %v2286_v18 }
 0x1ea   : > { %v2290_v30 = vld [vmem:[#allocation2 + $0x168] sm:$0xff]  ;;  %v2291_v31 = vld [vmem:[#allocation2 + $0x170] sm:$0xff]  ;;  %2497 = vst.msk [vmem:[%s3893_s2 + $0x100] sm:$0xff] %vm1399_vm1, %v2433_v19  ;;  %2498 = vst.msk [vmem:[%s3893_s2 + $0x108] sm:$0xff] %vm1399_vm1, %v2434_v20  ;;  %v2438_v32 = vmax.f32 %v2374_v21, 0.0  ;;  %v2439_v33 = vmax.f32 %v2375_v22, 0.0  ;;  %v2379_v38 = vadd.f32 %v4219_v57, %v2287_v23  ;;  %v2380_v39 = vadd.f32 %v4219_v57, %v2288_v24 }
 0x1eb   : > { %v2292_v36 = vld [vmem:[#allocation2 + $0x178] sm:$0xff]  ;;  %2499 = vst.msk [vmem:[%s3893_s2 + $0x110] sm:$0xff] %vm1399_vm1, %v2435_v26  ;;  %2500 = vst.msk [vmem:[%s3893_s2 + $0x118] sm:$0xff] %vm1399_vm1, %v2436_v27  ;;  %v2440_v37 = vmax.f32 %v2376_v29, 0.0  ;;  %v2381_v40 = vadd.f32 %v4219_v57, %v2289_v25  ;;  %v2293_v41 = vld [vmem:[#allocation2 + $0x180] sm:$0xff]  ;;  %v2441_v44 = vmax.f32 %v2377_v34, 0.0  ;;  %v2382_v46 = vadd.f32 %v4219_v57, %v2290_v30 }
 0x1ec   : > { %2501 = vst.msk [vmem:[%s3893_s2 + $0x120] sm:$0xff] %vm1399_vm1, %v2437_v28  ;;  %v4272_v42 = vld [vmem:[%s4517_s1 + $0x3] ss:$0 sm:$0xff]  ;;  %v2294_v43 = vld [vmem:[#allocation2 + $0x188] sm:$0xff]  ;;  %2502 = vst.msk [vmem:[%s3893_s2 + $0x128] sm:$0xff] %vm1399_vm1, %v2438_v32  ;;  %v2442_v45 = vmax.f32 %v2378_v35, 0.0  ;;  %v2383_v47 = vadd.f32 %v4219_v57, %v2291_v31  ;;  %v2384_v54 = vadd.f32 %v4219_v57, %v2292_v36 }
 0x1ed   : > { %2503 = vst.msk [vmem:[%s3893_s2 + $0x130] sm:$0xff] %vm1399_vm1, %v2439_v33  ;;  %v2295_v48 = vld [vmem:[#allocation2 + $0x190] sm:$0xff]  ;;  %v2296_v49 = vld [vmem:[#allocation2 + $0x198] sm:$0xff]  ;;  %v2297_v50 = vld [vmem:[#allocation2 + $0x1a0] sm:$0xff]  ;;  %v2443_v51 = vmax.f32 %v2379_v38, 0.0  ;;  %v2444_v52 = vmax.f32 %v2380_v39, 0.0  ;;  %v2385_v60 = vadd.f32 %v4272_v42, %v2293_v41  ;;  %v2386_v61 = vadd.f32 %v4272_v42, %v2294_v43 }
 0x1ee   : > { %2504 = vst.msk [vmem:[%s3893_s2 + $0x138] sm:$0xff] %vm1399_vm1, %v2440_v37  ;;  %v2445_v53 = vmax.f32 %v2381_v40, 0.0  ;;  %v2298_v55 = vld [vmem:[#allocation2 + $0x1a8] sm:$0xff]  ;;  %v2299_v56 = vld [vmem:[#allocation2 + $0x1b0] sm:$0xff]  ;;  %2505 = vst.msk [vmem:[%s3893_s2 + $0x140] sm:$0xff] %vm1399_vm1, %v2441_v44  ;;  %v2446_v58 = vmax.f32 %v2382_v46, 0.0  ;;  %v2387_v63 = vadd.f32 %v4272_v42, %v2295_v48  ;;  %v2388_v0 = vadd.f32 %v4272_v42, %v2296_v49 }
 0x1ef   : > { %2506 = vst.msk [vmem:[%s3893_s2 + $0x148] sm:$0xff] %vm1399_vm1, %v2442_v45  ;;  %v2447_v59 = vmax.f32 %v2383_v47, 0.0  ;;  %v2300_v62 = vld [vmem:[#allocation2 + $0x1b8] sm:$0xff]  ;;  %2507 = vst.msk [vmem:[%s3893_s2 + $0x150] sm:$0xff] %vm1399_vm1, %v2443_v51  ;;  %v2448_v57 = vmax.f32 %v2384_v54, 0.0  ;;  %v2389_v1 = vadd.f32 %v4272_v42, %v2297_v50  ;;  %v2301_v2 = vld [vmem:[#allocation2 + $0x1c0] sm:$0xff]  ;;  %v2390_v6 = vadd.f32 %v4272_v42, %v2298_v55 }
 0x1f0   : > { %2508 = vst.msk [vmem:[%s3893_s2 + $0x158] sm:$0xff] %vm1399_vm1, %v2444_v52  ;;  %2509 = vst.msk [vmem:[%s3893_s2 + $0x160] sm:$0xff] %vm1399_vm1, %v2445_v53  ;;  %v2302_v3 = vld [vmem:[#allocation2 + $0x1c8] sm:$0xff]  ;;  %v2449_v4 = vmax.f32 %v2385_v60, 0.0  ;;  %v2450_v5 = vmax.f32 %v2386_v61, 0.0  ;;  %v2391_v7 = vadd.f32 %v4272_v42, %v2299_v56  ;;  %v2303_v9 = vld [vmem:[#allocation2 + $0x1d0] sm:$0xff]  ;;  %v2392_v14 = vadd.f32 %v4272_v42, %v2300_v62 }
 0x1f1   : > { %2510 = vst.msk [vmem:[%s3893_s2 + $0x168] sm:$0xff] %vm1399_vm1, %v2446_v58  ;;  %2511 = vst.msk [vmem:[%s3893_s2 + $0x170] sm:$0xff] %vm1399_vm1, %v2447_v59  ;;  %v2304_v10 = vld [vmem:[#allocation2 + $0x1d8] sm:$0xff]  ;;  %v2305_v11 = vld [vmem:[#allocation2 + $0x1e0] sm:$0xff]  ;;  %v2451_v12 = vmax.f32 %v2387_v63, 0.0  ;;  %v2452_v13 = vmax.f32 %v2388_v0, 0.0  ;;  %v2393_v19 = vadd.f32 %v4272_v42, %v2301_v2  ;;  %v2394_v20 = vadd.f32 %v4272_v42, %v2302_v3 }
 0x1f2   : > { %2512 = vst.msk [vmem:[%s3893_s2 + $0x178] sm:$0xff] %vm1399_vm1, %v2448_v57  ;;  %v2453_v8 = vmax.f32 %v2389_v1, 0.0  ;;  %v2306_v15 = vld [vmem:[#allocation2 + $0x1e8] sm:$0xff]  ;;  %v2307_v16 = vld [vmem:[#allocation2 + $0x1f0] sm:$0xff]  ;;  %2513 = vst.msk [vmem:[%s3893_s2 + $0x180] sm:$0xff] %vm1399_vm1, %v2449_v4  ;;  %v2454_v17 = vmax.f32 %v2390_v6, 0.0  ;;  %v2395_v23 = vadd.f32 %v4272_v42, %v2303_v9  ;;  %v2396_v24 = vadd.f32 %v4272_v42, %v2304_v10 }
 0x1f3   : > { %2514 = vst.msk [vmem:[%s3893_s2 + $0x188] sm:$0xff] %vm1399_vm1, %v2450_v5  ;;  %v2455_v18 = vmax.f32 %v2391_v7, 0.0  ;;  %v2308_v21 = vld [vmem:[#allocation2 + $0x1f8] sm:$0xff]  ;;  %2515 = vst.msk [vmem:[%s3893_s2 + $0x190] sm:$0xff] %vm1399_vm1, %v2451_v12  ;;  %v2456_v22 = vmax.f32 %v2392_v14, 0.0  ;;  %v2397_v25 = vadd.f32 %v4272_v42, %v2305_v11  ;;  %v2457_v26 = vmax.f32 %v2393_v19, 0.0 }
 0x1f4   : > { %2516 = vst.msk [vmem:[%s3893_s2 + $0x198] sm:$0xff] %vm1399_vm1, %v2452_v13  ;;  %2517 = vst.msk [vmem:[%s3893_s2 + $0x1a0] sm:$0xff] %vm1399_vm1, %v2453_v8  ;;  %v2458_v27 = vmax.f32 %v2394_v20, 0.0  ;;  %v2398_v28 = vadd.f32 %v4272_v42, %v2306_v15  ;;  %v2399_v29 = vadd.f32 %v4272_v42, %v2307_v16  ;;  %v2459_v30 = vmax.f32 %v2395_v23, 0.0 }
 0x1f5   : > { %2518 = vst.msk [vmem:[%s3893_s2 + $0x1a8] sm:$0xff] %vm1399_vm1, %v2454_v17  ;;  %2519 = vst.msk [vmem:[%s3893_s2 + $0x1b0] sm:$0xff] %vm1399_vm1, %v2455_v18  ;;  %v2460_v31 = vmax.f32 %v2396_v24, 0.0  ;;  %v2461_v32 = vmax.f32 %v2397_v25, 0.0  ;;  %v2400_v33 = vadd.f32 %v4272_v42, %v2308_v21 }
 0x1f6   : > { %2520 = vst.msk [vmem:[%s3893_s2 + $0x1b8] sm:$0xff] %vm1399_vm1, %v2456_v22  ;;  %2521 = vst.msk [vmem:[%s3893_s2 + $0x1c0] sm:$0xff] %vm1399_vm1, %v2457_v26  ;;  %v2462_v34 = vmax.f32 %v2398_v28, 0.0  ;;  %v2463_v35 = vmax.f32 %v2399_v29, 0.0 }
 0x1f7   : > { %2522 = vst.msk [vmem:[%s3893_s2 + $0x1c8] sm:$0xff] %vm1399_vm1, %v2458_v27  ;;  %2523 = vst.msk [vmem:[%s3893_s2 + $0x1d0] sm:$0xff] %vm1399_vm1, %v2459_v30  ;;  %v2464_v36 = vmax.f32 %v2400_v33, 0.0 }
 0x1f8   : > { %2524 = vst.msk [vmem:[%s3893_s2 + $0x1d8] sm:$0xff] %vm1399_vm1, %v2460_v31  ;;  %2525 = vst.msk [vmem:[%s3893_s2 + $0x1e0] sm:$0xff] %vm1399_vm1, %v2461_v32 }
 0x1f9   : > { %2526 = vst.msk [vmem:[%s3893_s2 + $0x1e8] sm:$0xff] %vm1399_vm1, %v2462_v34  ;;  %2527 = vst.msk [vmem:[%s3893_s2 + $0x1f0] sm:$0xff] %vm1399_vm1, %v2463_v35 }
 0x1fa   : > { %2528 = vst.msk [vmem:[%s3893_s2 + $0x1f8] sm:$0xff] %vm1399_vm1, %v2464_v36 }
 0x1fb PF: > { %2535 = sbr.rel (!%p3694_p12) target bundleno = 547 (0x223), region = 261  ;;  %s3130_s0 = sshll.u32 (%p3694_p12), %s3550_s28, 7  ;;  %v2693_v37 = vld [vmem:[%s3893_s2] sm:$0xff] (%p3694_p12)  ;;  %v2695_v38 = vld [vmem:[%s3893_s2 + $0x8] sm:$0xff] (%p3694_p12)  ;;  %v2697_v39 = vld [vmem:[%s3893_s2 + $0x10] sm:$0xff] (%p3694_p12) }
 0x1fc   : > { %s4535_s11 = sld [smem:[#allocation13_spill]] (%p3694_p12)  ;;  %v2699_v40 = vld [vmem:[%s3893_s2 + $0x18] sm:$0xff] (%p3694_p12)  ;;  %v2701_v41 = vld [vmem:[%s3893_s2 + $0x20] sm:$0xff] (%p3694_p12)  ;;  %v2703_v42 = vld [vmem:[%s3893_s2 + $0x28] sm:$0xff] (%p3694_p12) }
 0x1fd   : > { %v2705_v43 = vld [vmem:[%s3893_s2 + $0x30] sm:$0xff] (%p3694_p12)  ;;  %v2707_v44 = vld [vmem:[%s3893_s2 + $0x38] sm:$0xff] (%p3694_p12)  ;;  %v2709_v45 = vld [vmem:[%s3893_s2 + $0x40] sm:$0xff] (%p3694_p12) }
 0x1fe   : > { %v2711_v46 = vld [vmem:[%s3893_s2 + $0x48] sm:$0xff] (%p3694_p12)  ;;  %v2713_v47 = vld [vmem:[%s3893_s2 + $0x50] sm:$0xff] (%p3694_p12)  ;;  %v2715_v48 = vld [vmem:[%s3893_s2 + $0x58] sm:$0xff] (%p3694_p12) }
 0x1ff   : > { %v2717_v49 = vld [vmem:[%s3893_s2 + $0x60] sm:$0xff] (%p3694_p12)  ;;  %v2719_v50 = vld [vmem:[%s3893_s2 + $0x68] sm:$0xff] (%p3694_p12)  ;;  %v2721_v51 = vld [vmem:[%s3893_s2 + $0x70] sm:$0xff] (%p3694_p12) }
 0x200   : > { %v2723_v52 = vld [vmem:[%s3893_s2 + $0x78] sm:$0xff]  ;;  %v2725_v53 = vld [vmem:[%s3893_s2 + $0x80] sm:$0xff]  ;;  %v2727_v54 = vld [vmem:[%s3893_s2 + $0x88] sm:$0xff] }
 0x201   : > { %v2729_v55 = vld [vmem:[%s3893_s2 + $0x90] sm:$0xff]  ;;  %v2731_v56 = vld [vmem:[%s3893_s2 + $0x98] sm:$0xff]  ;;  %v2733_v58 = vld [vmem:[%s3893_s2 + $0xa0] sm:$0xff] }
 0x202   : > { %s4356_s12 = scalar_lea.vmem %s4535_s11, %s3130_s0  ;;  %v2735_v59 = vld [vmem:[%s3893_s2 + $0xa8] sm:$0xff]  ;;  %v2737_v60 = vld [vmem:[%s3893_s2 + $0xb0] sm:$0xff]  ;;  %v2739_v61 = vld [vmem:[%s3893_s2 + $0xb8] sm:$0xff] }
 0x203   : > { %2694 = vst [vmem:[%s4356_s12] sm:$0xff] %v2693_v37  ;;  %2696 = vst [vmem:[%s4356_s12 + $0x8] sm:$0xff] %v2695_v38  ;;  %v2741_v62 = vld [vmem:[%s3893_s2 + $0xc0] sm:$0xff]  ;;  %v2743_v57 = vld [vmem:[%s3893_s2 + $0xc8] sm:$0xff] }
 0x204   : > { %2698 = vst [vmem:[%s4356_s12 + $0x10] sm:$0xff] %v2697_v39  ;;  %2700 = vst [vmem:[%s4356_s12 + $0x18] sm:$0xff] %v2699_v40  ;;  %v2745_v63 = vld [vmem:[%s3893_s2 + $0xd0] sm:$0xff]  ;;  %v2747_v0 = vld [vmem:[%s3893_s2 + $0xd8] sm:$0xff] }
 0x205   : > { %2702 = vst [vmem:[%s4356_s12 + $0x20] sm:$0xff] %v2701_v41  ;;  %2704 = vst [vmem:[%s4356_s12 + $0x28] sm:$0xff] %v2703_v42  ;;  %v2749_v1 = vld [vmem:[%s3893_s2 + $0xe0] sm:$0xff]  ;;  %v2751_v2 = vld [vmem:[%s3893_s2 + $0xe8] sm:$0xff] }
 0x206   : > { %2706 = vst [vmem:[%s4356_s12 + $0x30] sm:$0xff] %v2705_v43  ;;  %2708 = vst [vmem:[%s4356_s12 + $0x38] sm:$0xff] %v2707_v44  ;;  %v2753_v3 = vld [vmem:[%s3893_s2 + $0xf0] sm:$0xff]  ;;  %v2755_v4 = vld [vmem:[%s3893_s2 + $0xf8] sm:$0xff] }
 0x207   : > { %2710 = vst [vmem:[%s4356_s12 + $0x40] sm:$0xff] %v2709_v45  ;;  %2712 = vst [vmem:[%s4356_s12 + $0x48] sm:$0xff] %v2711_v46  ;;  %v2757_v5 = vld [vmem:[%s3893_s2 + $0x100] sm:$0xff]  ;;  %v2759_v6 = vld [vmem:[%s3893_s2 + $0x108] sm:$0xff] }
 0x208   : > { %2714 = vst [vmem:[%s4356_s12 + $0x50] sm:$0xff] %v2713_v47  ;;  %2716 = vst [vmem:[%s4356_s12 + $0x58] sm:$0xff] %v2715_v48  ;;  %v2761_v7 = vld [vmem:[%s3893_s2 + $0x110] sm:$0xff]  ;;  %v2763_v9 = vld [vmem:[%s3893_s2 + $0x118] sm:$0xff] }
 0x209   : > { %2718 = vst [vmem:[%s4356_s12 + $0x60] sm:$0xff] %v2717_v49  ;;  %2720 = vst [vmem:[%s4356_s12 + $0x68] sm:$0xff] %v2719_v50  ;;  %v2765_v10 = vld [vmem:[%s3893_s2 + $0x120] sm:$0xff]  ;;  %v2767_v11 = vld [vmem:[%s3893_s2 + $0x128] sm:$0xff] }
 0x20a   : > { %2722 = vst [vmem:[%s4356_s12 + $0x70] sm:$0xff] %v2721_v51  ;;  %2724 = vst [vmem:[%s4356_s12 + $0x78] sm:$0xff] %v2723_v52  ;;  %v2769_v12 = vld [vmem:[%s3893_s2 + $0x130] sm:$0xff]  ;;  %v2771_v13 = vld [vmem:[%s3893_s2 + $0x138] sm:$0xff] }
 0x20b   : > { %2726 = vst [vmem:[%s4356_s12 + $0x100] sm:$0xff] %v2725_v53  ;;  %2728 = vst [vmem:[%s4356_s12 + $0x108] sm:$0xff] %v2727_v54  ;;  %v2773_v8 = vld [vmem:[%s3893_s2 + $0x140] sm:$0xff]  ;;  %v2775_v14 = vld [vmem:[%s3893_s2 + $0x148] sm:$0xff] }
 0x20c   : > { %2730 = vst [vmem:[%s4356_s12 + $0x110] sm:$0xff] %v2729_v55  ;;  %2732 = vst [vmem:[%s4356_s12 + $0x118] sm:$0xff] %v2731_v56  ;;  %v2777_v15 = vld [vmem:[%s3893_s2 + $0x150] sm:$0xff]  ;;  %v2779_v16 = vld [vmem:[%s3893_s2 + $0x158] sm:$0xff] }
 0x20d   : > { %2734 = vst [vmem:[%s4356_s12 + $0x120] sm:$0xff] %v2733_v58  ;;  %2736 = vst [vmem:[%s4356_s12 + $0x128] sm:$0xff] %v2735_v59  ;;  %v2781_v17 = vld [vmem:[%s3893_s2 + $0x160] sm:$0xff]  ;;  %v2783_v18 = vld [vmem:[%s3893_s2 + $0x168] sm:$0xff] }
 0x20e   : > { %2738 = vst [vmem:[%s4356_s12 + $0x130] sm:$0xff] %v2737_v60  ;;  %2740 = vst [vmem:[%s4356_s12 + $0x138] sm:$0xff] %v2739_v61  ;;  %v2785_v19 = vld [vmem:[%s3893_s2 + $0x170] sm:$0xff]  ;;  %v2787_v20 = vld [vmem:[%s3893_s2 + $0x178] sm:$0xff] }
 0x20f   : > { %2742 = vst [vmem:[%s4356_s12 + $0x140] sm:$0xff] %v2741_v62  ;;  %2744 = vst [vmem:[%s4356_s12 + $0x148] sm:$0xff] %v2743_v57  ;;  %v2789_v21 = vld [vmem:[%s3893_s2 + $0x180] sm:$0xff]  ;;  %v2791_v22 = vld [vmem:[%s3893_s2 + $0x188] sm:$0xff] }
 0x210   : > { %2746 = vst [vmem:[%s4356_s12 + $0x150] sm:$0xff] %v2745_v63  ;;  %2748 = vst [vmem:[%s4356_s12 + $0x158] sm:$0xff] %v2747_v0  ;;  %v2793_v23 = vld [vmem:[%s3893_s2 + $0x190] sm:$0xff]  ;;  %v2795_v24 = vld [vmem:[%s3893_s2 + $0x198] sm:$0xff] }
 0x211   : > { %2750 = vst [vmem:[%s4356_s12 + $0x160] sm:$0xff] %v2749_v1  ;;  %2752 = vst [vmem:[%s4356_s12 + $0x168] sm:$0xff] %v2751_v2  ;;  %v2797_v25 = vld [vmem:[%s3893_s2 + $0x1a0] sm:$0xff]  ;;  %v2799_v26 = vld [vmem:[%s3893_s2 + $0x1a8] sm:$0xff] }
 0x212   : > { %2754 = vst [vmem:[%s4356_s12 + $0x170] sm:$0xff] %v2753_v3  ;;  %2756 = vst [vmem:[%s4356_s12 + $0x178] sm:$0xff] %v2755_v4  ;;  %v2801_v27 = vld [vmem:[%s3893_s2 + $0x1b0] sm:$0xff]  ;;  %v2803_v28 = vld [vmem:[%s3893_s2 + $0x1b8] sm:$0xff] }
 0x213   : > { %2758 = vst [vmem:[%s4356_s12 + $0x200] sm:$0xff] %v2757_v5  ;;  %2760 = vst [vmem:[%s4356_s12 + $0x208] sm:$0xff] %v2759_v6  ;;  %v2805_v29 = vld [vmem:[%s3893_s2 + $0x1c0] sm:$0xff]  ;;  %v2807_v30 = vld [vmem:[%s3893_s2 + $0x1c8] sm:$0xff] }
 0x214   : > { %2762 = vst [vmem:[%s4356_s12 + $0x210] sm:$0xff] %v2761_v7  ;;  %2764 = vst [vmem:[%s4356_s12 + $0x218] sm:$0xff] %v2763_v9  ;;  %v2809_v31 = vld [vmem:[%s3893_s2 + $0x1d0] sm:$0xff]  ;;  %v2811_v32 = vld [vmem:[%s3893_s2 + $0x1d8] sm:$0xff] }
 0x215   : > { %2766 = vst [vmem:[%s4356_s12 + $0x220] sm:$0xff] %v2765_v10  ;;  %2768 = vst [vmem:[%s4356_s12 + $0x228] sm:$0xff] %v2767_v11  ;;  %v2813_v33 = vld [vmem:[%s3893_s2 + $0x1e0] sm:$0xff]  ;;  %v2815_v34 = vld [vmem:[%s3893_s2 + $0x1e8] sm:$0xff] }
 0x216   : > { %2770 = vst [vmem:[%s4356_s12 + $0x230] sm:$0xff] %v2769_v12  ;;  %2772 = vst [vmem:[%s4356_s12 + $0x238] sm:$0xff] %v2771_v13  ;;  %v2817_v35 = vld [vmem:[%s3893_s2 + $0x1f0] sm:$0xff]  ;;  %v2819_v36 = vld [vmem:[%s3893_s2 + $0x1f8] sm:$0xff] }
 0x217   : > { %2774 = vst [vmem:[%s4356_s12 + $0x240] sm:$0xff] %v2773_v8  ;;  %2776 = vst [vmem:[%s4356_s12 + $0x248] sm:$0xff] %v2775_v14 }
 0x218   : > { %2778 = vst [vmem:[%s4356_s12 + $0x250] sm:$0xff] %v2777_v15  ;;  %2780 = vst [vmem:[%s4356_s12 + $0x258] sm:$0xff] %v2779_v16 }
 0x219   : > { %2782 = vst [vmem:[%s4356_s12 + $0x260] sm:$0xff] %v2781_v17  ;;  %2784 = vst [vmem:[%s4356_s12 + $0x268] sm:$0xff] %v2783_v18 }
 0x21a   : > { %2786 = vst [vmem:[%s4356_s12 + $0x270] sm:$0xff] %v2785_v19  ;;  %2788 = vst [vmem:[%s4356_s12 + $0x278] sm:$0xff] %v2787_v20 }
 0x21b   : > { %2790 = vst [vmem:[%s4356_s12 + $0x300] sm:$0xff] %v2789_v21  ;;  %2792 = vst [vmem:[%s4356_s12 + $0x308] sm:$0xff] %v2791_v22 }
 0x21c   : > { %2794 = vst [vmem:[%s4356_s12 + $0x310] sm:$0xff] %v2793_v23  ;;  %2796 = vst [vmem:[%s4356_s12 + $0x318] sm:$0xff] %v2795_v24 }
 0x21d   : > { %2798 = vst [vmem:[%s4356_s12 + $0x320] sm:$0xff] %v2797_v25  ;;  %2800 = vst [vmem:[%s4356_s12 + $0x328] sm:$0xff] %v2799_v26 }
 0x21e   : > { %2802 = vst [vmem:[%s4356_s12 + $0x330] sm:$0xff] %v2801_v27  ;;  %2804 = vst [vmem:[%s4356_s12 + $0x338] sm:$0xff] %v2803_v28 }
 0x21f   : > { %2806 = vst [vmem:[%s4356_s12 + $0x340] sm:$0xff] %v2805_v29  ;;  %2808 = vst [vmem:[%s4356_s12 + $0x348] sm:$0xff] %v2807_v30 }
 0x220   : > { %2810 = vst [vmem:[%s4356_s12 + $0x350] sm:$0xff] %v2809_v31  ;;  %2812 = vst [vmem:[%s4356_s12 + $0x358] sm:$0xff] %v2811_v32 }
 0x221   : > { %2814 = vst [vmem:[%s4356_s12 + $0x360] sm:$0xff] %v2813_v33  ;;  %2816 = vst [vmem:[%s4356_s12 + $0x368] sm:$0xff] %v2815_v34 }
 0x222   : > { %2818 = vst [vmem:[%s4356_s12 + $0x370] sm:$0xff] %v2817_v35  ;;  %2820 = vst [vmem:[%s4356_s12 + $0x378] sm:$0xff] %v2819_v36 }
 0x223 PF: > { %s16_s7 = sadd.s32 1, %s3562_s7   ;;  %s4536_s6 = sld [smem:[#allocation9_spill]] }
 0x224   : > { %p13_p5 = scmp.ge.s32.totalorder %s16_s7, 6   ;;  %s4537_s16 = sld [smem:[#allocation10_spill]] }
 0x225   : > { %s4538_s21 = smov %s3526_s22  ;;  %s4539_s22 = smov %s3692_s9 }
 0x226   : > { %s4540_s23 = smov %s3534_s24  ;;  %s4541_s24 = smov %s3689_s20 }
 0x227   : > { %s4542_s25 = smov %s3542_s26  ;;  %s4543_s26 = smov %s3675_s15 }
 0x228   : > { %s4544_s27 = smov %s3554_s29  ;;  %s4545_s28 = smov %s3558_s30 }
 0x229   : > { %s4546_s29 = smov %s4536_s6  ;;  %15 = sbr.rel (!%p13_p5) target bundleno = 10 (0xa), region = 368 }
 0x22a   : > { %s4547_s30 = smov %s4537_s16 }

// kernel: hglr_forward.13
= control target key start
LH: loop header
LB: loop body
LE: loop exit
PB: predicated region body
PF: predicated region fallthrough
CT: control target
= control target key end

     0   :  { %s3724_s18 = smov 0   ;;  %s3726_s19 = smov 0   ;;  %s4708_s0 = inlined_call_operand.vmem [shape: f32[256,32], index: 0, kind: input, shape index: {}]   ;;  %s4709_s1 = inlined_call_operand.vmem [shape: f32[4,256,32], index: 1, kind: input, shape index: {}]   ;;  %s4710_s2 = inlined_call_operand.vmem [shape: f32[32,16], index: 2, kind: input, shape index: {}]   ;;  %s4711_s3 = inlined_call_operand.vmem [shape: f32[1,16], index: 3, kind: input, shape index: {}]   ;;  %s4712_s4 = inlined_call_operand.vmem [shape: f32[16,1], index: 4, kind: input, shape index: {}]   ;;  %s4713_s5 = inlined_call_operand.vmem [shape: f32[256,32], index: 5, kind: output, shape index: {}]  }
   0x1   :  { %s3728_s20 = smov 0  }
   0x2 LB: > { %s2759_s21 = sadd.s32 4294967295, %s3691_s20   ;;  %s3741_s22 = sadd.s32 1, %s3691_s20   ;;  %s3691_s20 = sphi %s3728_s20, %s4734_s20   ;;  %s3687_s19 = sphi %s3726_s19, %s4733_s19   ;;  %s3683_s18 = sphi %s3724_s18, %s4732_s18  }
   0x3   : > { %s45_s23 = ssub.s32 %s3691_s20, %s3741_s22  ;;  %s48_s24 = sadd.s32 1, %s3687_s19 }
   0x4   : > { %p46_p0 = scmp.eq.s32.totalorder %s45_s23, 0  ;;  %p55_p1 = scmp.ne.s32.totalorder %s3687_s19, %s3683_s18 }
   0x5   : > { %p56_p2 = scmp.eq.s32.totalorder %s3691_s20, 0  ;;  %p2762_p4 = scmp.ge.s32.totalorder %s3691_s20, 2 }
   0x6   : > { %s3750_s25 = scalar_select %p46_p0, %s3687_s19, %s48_s24  }
   0x7   : > { %p57_p3 = por %p56_p2, %p55_p1  ;;  %179 = sbr.rel (%p2762_p4) target bundleno = 48 (0x30), region = 28 }
   0xc   : > { %191 = sbr.rel (!%p57_p3) target bundleno = 48 (0x30), region = 36  ;;  %s193_s26 = sand.u32 (%p57_p3), 1, %s3687_s19  }
   0xd   : > { %s2951_s27 = sshll.u32 (%p57_p3), %s3691_s20, 7  ;;  %s2763_s28 = sshll.u32 (%p57_p3), %s193_s26, 9 }
   0xe   : > { %s3758_s6 = scalar_lea.vmem (%p57_p3), %s4709_s1, %s2951_s27  ;;  %s3763_s7 = scalar_lea.vmem (%p57_p3), [#allocation2], %s2763_s28 }
   0xf   : > { %v353_v0 = vld [vmem:[%s3758_s6] sm:$0xff] (%p57_p3)  ;;  %v355_v1 = vld [vmem:[%s3758_s6 + $0x8] sm:$0xff] (%p57_p3)  ;;  %v357_v2 = vld [vmem:[%s3758_s6 + $0x10] sm:$0xff] (%p57_p3) }
  0x10   : > { %354 = vst [vmem:[%s3763_s7] sm:$0xff] (%p57_p3), %v353_v0  ;;  %356 = vst [vmem:[%s3763_s7 + $0x8] sm:$0xff] (%p57_p3), %v355_v1  ;;  %v359_v3 = vld [vmem:[%s3758_s6 + $0x18] sm:$0xff] (%p57_p3)  ;;  %v361_v4 = vld [vmem:[%s3758_s6 + $0x20] sm:$0xff] (%p57_p3) }
  0x11   : > { %358 = vst [vmem:[%s3763_s7 + $0x10] sm:$0xff] %v357_v2  ;;  %v363_v5 = vld [vmem:[%s3758_s6 + $0x28] sm:$0xff]  ;;  %360 = vst [vmem:[%s3763_s7 + $0x18] sm:$0xff] %v359_v3  ;;  %v365_v6 = vld [vmem:[%s3758_s6 + $0x30] sm:$0xff] }
  0x12   : > { %362 = vst [vmem:[%s3763_s7 + $0x20] sm:$0xff] %v361_v4  ;;  %364 = vst [vmem:[%s3763_s7 + $0x28] sm:$0xff] %v363_v5  ;;  %v367_v7 = vld [vmem:[%s3758_s6 + $0x38] sm:$0xff]  ;;  %v369_v8 = vld [vmem:[%s3758_s6 + $0x40] sm:$0xff] }
  0x13   : > { %366 = vst [vmem:[%s3763_s7 + $0x30] sm:$0xff] %v365_v6  ;;  %368 = vst [vmem:[%s3763_s7 + $0x38] sm:$0xff] %v367_v7  ;;  %v371_v9 = vld [vmem:[%s3758_s6 + $0x48] sm:$0xff]  ;;  %v373_v10 = vld [vmem:[%s3758_s6 + $0x50] sm:$0xff] }
  0x14   : > { %370 = vst [vmem:[%s3763_s7 + $0x40] sm:$0xff] %v369_v8  ;;  %v375_v11 = vld [vmem:[%s3758_s6 + $0x58] sm:$0xff]  ;;  %372 = vst [vmem:[%s3763_s7 + $0x48] sm:$0xff] %v371_v9  ;;  %v377_v12 = vld [vmem:[%s3758_s6 + $0x60] sm:$0xff] }
  0x15   : > { %374 = vst [vmem:[%s3763_s7 + $0x50] sm:$0xff] %v373_v10  ;;  %376 = vst [vmem:[%s3763_s7 + $0x58] sm:$0xff] %v375_v11  ;;  %v379_v13 = vld [vmem:[%s3758_s6 + $0x68] sm:$0xff]  ;;  %v381_v14 = vld [vmem:[%s3758_s6 + $0x70] sm:$0xff] }
  0x16   : > { %378 = vst [vmem:[%s3763_s7 + $0x60] sm:$0xff] %v377_v12  ;;  %380 = vst [vmem:[%s3763_s7 + $0x68] sm:$0xff] %v379_v13  ;;  %v383_v15 = vld [vmem:[%s3758_s6 + $0x78] sm:$0xff]  ;;  %v385_v16 = vld [vmem:[%s3758_s6 + $0x100] sm:$0xff] }
  0x17   : > { %382 = vst [vmem:[%s3763_s7 + $0x70] sm:$0xff] %v381_v14  ;;  %v387_v17 = vld [vmem:[%s3758_s6 + $0x108] sm:$0xff]  ;;  %384 = vst [vmem:[%s3763_s7 + $0x78] sm:$0xff] %v383_v15  ;;  %v389_v18 = vld [vmem:[%s3758_s6 + $0x110] sm:$0xff] }
  0x18   : > { %386 = vst [vmem:[%s3763_s7 + $0x80] sm:$0xff] %v385_v16  ;;  %388 = vst [vmem:[%s3763_s7 + $0x88] sm:$0xff] %v387_v17  ;;  %v391_v19 = vld [vmem:[%s3758_s6 + $0x118] sm:$0xff]  ;;  %v393_v20 = vld [vmem:[%s3758_s6 + $0x120] sm:$0xff] }
  0x19   : > { %390 = vst [vmem:[%s3763_s7 + $0x90] sm:$0xff] %v389_v18  ;;  %392 = vst [vmem:[%s3763_s7 + $0x98] sm:$0xff] %v391_v19  ;;  %v395_v21 = vld [vmem:[%s3758_s6 + $0x128] sm:$0xff]  ;;  %v397_v22 = vld [vmem:[%s3758_s6 + $0x130] sm:$0xff] }
  0x1a   : > { %394 = vst [vmem:[%s3763_s7 + $0xa0] sm:$0xff] %v393_v20  ;;  %v399_v23 = vld [vmem:[%s3758_s6 + $0x138] sm:$0xff]  ;;  %396 = vst [vmem:[%s3763_s7 + $0xa8] sm:$0xff] %v395_v21  ;;  %v401_v24 = vld [vmem:[%s3758_s6 + $0x140] sm:$0xff] }
  0x1b   : > { %398 = vst [vmem:[%s3763_s7 + $0xb0] sm:$0xff] %v397_v22  ;;  %400 = vst [vmem:[%s3763_s7 + $0xb8] sm:$0xff] %v399_v23  ;;  %v403_v25 = vld [vmem:[%s3758_s6 + $0x148] sm:$0xff]  ;;  %v405_v26 = vld [vmem:[%s3758_s6 + $0x150] sm:$0xff] }
  0x1c   : > { %402 = vst [vmem:[%s3763_s7 + $0xc0] sm:$0xff] %v401_v24  ;;  %404 = vst [vmem:[%s3763_s7 + $0xc8] sm:$0xff] %v403_v25  ;;  %v407_v27 = vld [vmem:[%s3758_s6 + $0x158] sm:$0xff]  ;;  %v409_v28 = vld [vmem:[%s3758_s6 + $0x160] sm:$0xff] }
  0x1d   : > { %406 = vst [vmem:[%s3763_s7 + $0xd0] sm:$0xff] %v405_v26  ;;  %v411_v29 = vld [vmem:[%s3758_s6 + $0x168] sm:$0xff]  ;;  %408 = vst [vmem:[%s3763_s7 + $0xd8] sm:$0xff] %v407_v27  ;;  %v413_v30 = vld [vmem:[%s3758_s6 + $0x170] sm:$0xff] }
  0x1e   : > { %410 = vst [vmem:[%s3763_s7 + $0xe0] sm:$0xff] %v409_v28  ;;  %412 = vst [vmem:[%s3763_s7 + $0xe8] sm:$0xff] %v411_v29  ;;  %v415_v31 = vld [vmem:[%s3758_s6 + $0x178] sm:$0xff]  ;;  %v417_v32 = vld [vmem:[%s3758_s6 + $0x200] sm:$0xff] }
  0x1f   : > { %414 = vst [vmem:[%s3763_s7 + $0xf0] sm:$0xff] %v413_v30  ;;  %416 = vst [vmem:[%s3763_s7 + $0xf8] sm:$0xff] %v415_v31  ;;  %v419_v33 = vld [vmem:[%s3758_s6 + $0x208] sm:$0xff]  ;;  %v421_v34 = vld [vmem:[%s3758_s6 + $0x210] sm:$0xff] }
  0x20   : > { %418 = vst [vmem:[%s3763_s7 + $0x100] sm:$0xff] %v417_v32  ;;  %v423_v35 = vld [vmem:[%s3758_s6 + $0x218] sm:$0xff]  ;;  %420 = vst [vmem:[%s3763_s7 + $0x108] sm:$0xff] %v419_v33  ;;  %v425_v36 = vld [vmem:[%s3758_s6 + $0x220] sm:$0xff] }
  0x21   : > { %422 = vst [vmem:[%s3763_s7 + $0x110] sm:$0xff] %v421_v34  ;;  %424 = vst [vmem:[%s3763_s7 + $0x118] sm:$0xff] %v423_v35  ;;  %v427_v37 = vld [vmem:[%s3758_s6 + $0x228] sm:$0xff]  ;;  %v429_v38 = vld [vmem:[%s3758_s6 + $0x230] sm:$0xff] }
  0x22   : > { %426 = vst [vmem:[%s3763_s7 + $0x120] sm:$0xff] %v425_v36  ;;  %428 = vst [vmem:[%s3763_s7 + $0x128] sm:$0xff] %v427_v37  ;;  %v431_v39 = vld [vmem:[%s3758_s6 + $0x238] sm:$0xff]  ;;  %v433_v40 = vld [vmem:[%s3758_s6 + $0x240] sm:$0xff] }
  0x23   : > { %430 = vst [vmem:[%s3763_s7 + $0x130] sm:$0xff] %v429_v38  ;;  %v435_v41 = vld [vmem:[%s3758_s6 + $0x248] sm:$0xff]  ;;  %432 = vst [vmem:[%s3763_s7 + $0x138] sm:$0xff] %v431_v39  ;;  %v437_v42 = vld [vmem:[%s3758_s6 + $0x250] sm:$0xff] }
  0x24   : > { %434 = vst [vmem:[%s3763_s7 + $0x140] sm:$0xff] %v433_v40  ;;  %436 = vst [vmem:[%s3763_s7 + $0x148] sm:$0xff] %v435_v41  ;;  %v439_v43 = vld [vmem:[%s3758_s6 + $0x258] sm:$0xff]  ;;  %v441_v44 = vld [vmem:[%s3758_s6 + $0x260] sm:$0xff] }
  0x25   : > { %438 = vst [vmem:[%s3763_s7 + $0x150] sm:$0xff] %v437_v42  ;;  %440 = vst [vmem:[%s3763_s7 + $0x158] sm:$0xff] %v439_v43  ;;  %v443_v45 = vld [vmem:[%s3758_s6 + $0x268] sm:$0xff]  ;;  %v445_v46 = vld [vmem:[%s3758_s6 + $0x270] sm:$0xff] }
  0x26   : > { %442 = vst [vmem:[%s3763_s7 + $0x160] sm:$0xff] %v441_v44  ;;  %v447_v47 = vld [vmem:[%s3758_s6 + $0x278] sm:$0xff]  ;;  %444 = vst [vmem:[%s3763_s7 + $0x168] sm:$0xff] %v443_v45  ;;  %v449_v48 = vld [vmem:[%s3758_s6 + $0x300] sm:$0xff] }
  0x27   : > { %446 = vst [vmem:[%s3763_s7 + $0x170] sm:$0xff] %v445_v46  ;;  %448 = vst [vmem:[%s3763_s7 + $0x178] sm:$0xff] %v447_v47  ;;  %v451_v49 = vld [vmem:[%s3758_s6 + $0x308] sm:$0xff]  ;;  %v453_v50 = vld [vmem:[%s3758_s6 + $0x310] sm:$0xff] }
  0x28   : > { %450 = vst [vmem:[%s3763_s7 + $0x180] sm:$0xff] %v449_v48  ;;  %452 = vst [vmem:[%s3763_s7 + $0x188] sm:$0xff] %v451_v49  ;;  %v455_v51 = vld [vmem:[%s3758_s6 + $0x318] sm:$0xff]  ;;  %v457_v52 = vld [vmem:[%s3758_s6 + $0x320] sm:$0xff] }
  0x29   : > { %454 = vst [vmem:[%s3763_s7 + $0x190] sm:$0xff] %v453_v50  ;;  %v459_v53 = vld [vmem:[%s3758_s6 + $0x328] sm:$0xff]  ;;  %456 = vst [vmem:[%s3763_s7 + $0x198] sm:$0xff] %v455_v51  ;;  %v461_v54 = vld [vmem:[%s3758_s6 + $0x330] sm:$0xff] }
  0x2a   : > { %458 = vst [vmem:[%s3763_s7 + $0x1a0] sm:$0xff] %v457_v52  ;;  %460 = vst [vmem:[%s3763_s7 + $0x1a8] sm:$0xff] %v459_v53  ;;  %v463_v55 = vld [vmem:[%s3758_s6 + $0x338] sm:$0xff]  ;;  %v465_v56 = vld [vmem:[%s3758_s6 + $0x340] sm:$0xff] }
  0x2b   : > { %462 = vst [vmem:[%s3763_s7 + $0x1b0] sm:$0xff] %v461_v54  ;;  %464 = vst [vmem:[%s3763_s7 + $0x1b8] sm:$0xff] %v463_v55  ;;  %v467_v57 = vld [vmem:[%s3758_s6 + $0x348] sm:$0xff]  ;;  %v469_v58 = vld [vmem:[%s3758_s6 + $0x350] sm:$0xff] }
  0x2c   : > { %466 = vst [vmem:[%s3763_s7 + $0x1c0] sm:$0xff] %v465_v56  ;;  %v471_v59 = vld [vmem:[%s3758_s6 + $0x358] sm:$0xff]  ;;  %468 = vst [vmem:[%s3763_s7 + $0x1c8] sm:$0xff] %v467_v57  ;;  %v473_v60 = vld [vmem:[%s3758_s6 + $0x360] sm:$0xff] }
  0x2d   : > { %470 = vst [vmem:[%s3763_s7 + $0x1d0] sm:$0xff] %v469_v58  ;;  %472 = vst [vmem:[%s3763_s7 + $0x1d8] sm:$0xff] %v471_v59  ;;  %v475_v61 = vld [vmem:[%s3758_s6 + $0x368] sm:$0xff]  ;;  %v477_v62 = vld [vmem:[%s3758_s6 + $0x370] sm:$0xff] }
  0x2e   : > { %474 = vst [vmem:[%s3763_s7 + $0x1e0] sm:$0xff] %v473_v60  ;;  %476 = vst [vmem:[%s3763_s7 + $0x1e8] sm:$0xff] %v475_v61  ;;  %v479_v63 = vld [vmem:[%s3758_s6 + $0x378] sm:$0xff] }
  0x2f   : > { %478 = vst [vmem:[%s3763_s7 + $0x1f0] sm:$0xff] %v477_v62  ;;  %480 = vst [vmem:[%s3763_s7 + $0x1f8] sm:$0xff] %v479_v63 }
  0x30 PF: > { %p2766_p5 = scmp.ge.s32.totalorder %s3691_s20, 1  ;;  %p485_p6 = scmp.lt.s32.totalorder %s3691_s20, 3 }
  0x32   : > { %p486_p7 = pnand %p2766_p5, %p485_p6 }
  0x34   : > { %489 = sbr.rel (%p486_p7) target bundleno = 873 (0x369), region = 74 }
  0x39   : > { %v607_v0 = vld [vmem:[%s4710_s2 + $0x18] sm:$0xff]  ;;  %v606_v1 = vld [vmem:[%s4710_s2 + $0x10] sm:$0xff]  ;;  %s2768_s12 = sshll.u32 %s2759_s21, 4  ;;  %v605_v2 = vld [vmem:[%s4710_s2 + $0x8] sm:$0xff]  ;;  %vm615_vm0 = vcmask 261120   ;;  %s492_s24 = sand.u32 1, %s3683_s18  }
  0x3a   : > { %3086 = vmatprep.subr.mxu0 %v607_v0  ;;  %p525_p8 = scmp.lt.s32.totalorder %s2768_s12, 31  ;;  %v604_v3 = vld [vmem:[%s4710_s2] sm:$0xff]  ;;  %s2767_s26 = sshll.u32 %s492_s24, 9  ;;  %v1258_v47 = vld [vmem:[%s4712_s4 + $0x8] sm:$0xff]  ;;  %vm1259_vm1 = vcmask 130048  }
  0x3b   : > { %3087 = vmatpush3.msra.mxu0 %v607_v0  ;;  %s3948_s27 = scalar_lea.vmem [#allocation2], %s2767_s26  ;;  %3190 = vmatprep.subr.mxu1 %v1258_v47  ;;  %v1257_v49 = vld [vmem:[%s4712_s4] sm:$0xff] }
  0x3c   : > { %3088 = vmatprep.subr.mxu0 %v606_v1  ;;  %s4736_s12 = smov (!%p525_p8, %s2768_s12), 31  ;;  %v2772_v20 = vld [vmem:[%s3948_s27 + $0x80] sm:$0xff]  ;;  %v2773_v21 = vld [vmem:[%s3948_s27 + $0x88] sm:$0xff]  ;;  %v2774_v22 = vld [vmem:[%s3948_s27 + $0x90] sm:$0xff]  ;;  %3191 = vmatpush3.msra.mxu1 %v1258_v47 }
  0x3d   : > { %3089 = vmatpush3.msra.mxu0 %v606_v1  ;;  %s2769_s17 = sshll.u32 %s4736_s12, 3  ;;  %v2775_v23 = vld [vmem:[%s3948_s27 + $0x98] sm:$0xff]  ;;  %v2776_v24 = vld [vmem:[%s3948_s27 + $0xa0] sm:$0xff]  ;;  %v2777_v25 = vld [vmem:[%s3948_s27 + $0xa8] sm:$0xff]  ;;  %3192 = vmatprep.subr.mxu1 %v1257_v49 }
  0x3e   : > { %3090 = vmatprep.subr.mxu0 %v605_v2  ;;  %s3914_s23 = scalar_lea.vmem %s4708_s0, %s2769_s17  ;;  %v2778_v26 = vld [vmem:[%s3948_s27 + $0xb0] sm:$0xff]  ;;  %v2779_v27 = vld [vmem:[%s3948_s27 + $0xb8] sm:$0xff]  ;;  %v2780_v28 = vld [vmem:[%s3948_s27 + $0xc0] sm:$0xff]  ;;  %3193 = vmatpush3.msra.mxu1 %v1257_v49  ;;  %s4597_s10 = scalar_lea.vmem %s4713_s5, %s2769_s17 }
  0x3f   : > { %3091 = vmatpush3.msra.mxu0 %v605_v2  ;;  %v537_v4 = vld [vmem:[%s3914_s23] sm:$0xff]  ;;  %v538_v5 = vld [vmem:[%s3914_s23 + $0x8] sm:$0xff]  ;;  %v539_v6 = vld [vmem:[%s3914_s23 + $0x10] sm:$0xff] }
  0x40   : > { %3092 = vmatprep.subr.mxu0 %v604_v3  ;;  %3094 = vmatprep.mubr.msk.f32.mxu0 %vm615_vm0, %v537_v4  ;;  %v540_v7 = vld [vmem:[%s3914_s23 + $0x18] sm:$0xff]  ;;  %v541_v8 = vld [vmem:[%s3914_s23 + $0x20] sm:$0xff]  ;;  %v542_v9 = vld [vmem:[%s3914_s23 + $0x28] sm:$0xff] }
  0x41   : > { %3093 = vmatpush3.msra.mxu0 %v604_v3  ;;  %v543_v10 = vld [vmem:[%s3914_s23 + $0x30] sm:$0xff]  ;;  %v544_v11 = vld [vmem:[%s3914_s23 + $0x38] sm:$0xff]  ;;  %v545_v12 = vld [vmem:[%s3914_s23 + $0x40] sm:$0xff] }
  0x42   : > { %3095 = vmatmul.mubr.msk.f32.vlgmr.msra.gmra.mxu0 %vm615_vm0, %v538_v5  ;;  %v546_v13 = vld [vmem:[%s3914_s23 + $0x48] sm:$0xff]  ;;  %v547_v14 = vld [vmem:[%s3914_s23 + $0x50] sm:$0xff]  ;;  %v548_v15 = vld [vmem:[%s3914_s23 + $0x58] sm:$0xff] }
  0x43   : > { %3097 = vmatprep.mubr.msk.f32.mxu0 %vm615_vm0, %v539_v6  ;;  %v549_v16 = vld [vmem:[%s3914_s23 + $0x60] sm:$0xff]  ;;  %v550_v17 = vld [vmem:[%s3914_s23 + $0x68] sm:$0xff]  ;;  %v551_v18 = vld [vmem:[%s3914_s23 + $0x70] sm:$0xff] }
  0x44   : > { %v552_v19 = vld [vmem:[%s3914_s23 + $0x78] sm:$0xff]  ;;  %v2781_v29 = vld [vmem:[%s3948_s27 + $0xc8] sm:$0xff]  ;;  %v2782_v30 = vld [vmem:[%s3948_s27 + $0xd0] sm:$0xff] }
  0x45   : > { %v2783_v31 = vld [vmem:[%s3948_s27 + $0xd8] sm:$0xff]  ;;  %v2784_v32 = vld [vmem:[%s3948_s27 + $0xe0] sm:$0xff]  ;;  %v2785_v33 = vld [vmem:[%s3948_s27 + $0xe8] sm:$0xff] }
  0x46   : > { %3098 = vmatmul.mubr.msk.f32.gmra.mxu0 %vm615_vm0, %v540_v7  ;;  %v2786_v34 = vld [vmem:[%s3948_s27 + $0xf0] sm:$0xff]  ;;  %v2787_v35 = vld [vmem:[%s3948_s27 + $0xf8] sm:$0xff]  ;;  %v2788_v36 = vld [vmem:[%s3948_s27 + $0x100] sm:$0xff] }
  0x47   : > { %3100 = vmatprep.mubr.msk.f32.mxu0 %vm615_vm0, %v541_v8  ;;  %v2789_v37 = vld [vmem:[%s3948_s27 + $0x108] sm:$0xff]  ;;  %v2790_v38 = vld [vmem:[%s3948_s27 + $0x110] sm:$0xff]  ;;  %v2791_v39 = vld [vmem:[%s3948_s27 + $0x118] sm:$0xff] }
  0x48   : > { %v2792_v40 = vld [vmem:[%s3948_s27 + $0x120] sm:$0xff]  ;;  %v2793_v41 = vld [vmem:[%s3948_s27 + $0x128] sm:$0xff]  ;;  %v2794_v42 = vld [vmem:[%s3948_s27 + $0x130] sm:$0xff] }
  0x49   : > { %v2795_v43 = vld [vmem:[%s3948_s27 + $0x138] sm:$0xff]  ;;  %v2796_v44 = vld [vmem:[%s3948_s27 + $0x140] sm:$0xff]  ;;  %v2797_v45 = vld [vmem:[%s3948_s27 + $0x148] sm:$0xff] }
  0x4a   : > { %3101 = vmatmul.mubr.msk.f32.gmra.mxu0 %vm615_vm0, %v542_v9  ;;  %v2798_v46 = vld [vmem:[%s3948_s27 + $0x150] sm:$0xff]  ;;  %v2799_v48 = vld [vmem:[%s3948_s27 + $0x158] sm:$0xff]  ;;  %v2800_v50 = vld [vmem:[%s3948_s27 + $0x160] sm:$0xff] }
  0x4b   : > { %3103 = vmatprep.mubr.msk.f32.mxu0 %vm615_vm0, %v543_v10  ;;  %v2801_v51 = vld [vmem:[%s3948_s27 + $0x168] sm:$0xff]  ;;  %v2802_v52 = vld [vmem:[%s3948_s27 + $0x170] sm:$0xff]  ;;  %v2803_v53 = vld [vmem:[%s3948_s27 + $0x178] sm:$0xff] }
  0x4c   : > { %v2804_v54 = vld [vmem:[%s3948_s27 + $0x180] sm:$0xff]  ;;  %v2805_v55 = vld [vmem:[%s3948_s27 + $0x188] sm:$0xff]  ;;  %v2806_v56 = vld [vmem:[%s3948_s27 + $0x190] sm:$0xff] }
  0x4d   : > { %v2807_v57 = vld [vmem:[%s3948_s27 + $0x198] sm:$0xff]  ;;  %v2808_v58 = vld [vmem:[%s3948_s27 + $0x1a0] sm:$0xff]  ;;  %v2809_v59 = vld [vmem:[%s3948_s27 + $0x1a8] sm:$0xff] }
  0x4e   : > { %3104 = vmatmul.mubr.msk.f32.gmra.mxu0 %vm615_vm0, %v544_v11  ;;  %v2810_v60 = vld [vmem:[%s3948_s27 + $0x1b0] sm:$0xff]  ;;  %v2811_v61 = vld [vmem:[%s3948_s27 + $0x1b8] sm:$0xff]  ;;  %v2812_v62 = vld [vmem:[%s3948_s27 + $0x1c0] sm:$0xff] }
  0x4f   : > { %3106 = vmatprep.mubr.msk.f32.mxu0 %vm615_vm0, %v545_v12  ;;  %v2813_v63 = vld [vmem:[%s3948_s27 + $0x1c8] sm:$0xff]  ;;  %v2814_v0 = vld [vmem:[%s3948_s27 + $0x1d0] sm:$0xff]  ;;  %v2815_v1 = vld [vmem:[%s3948_s27 + $0x1d8] sm:$0xff] }
  0x50   : > { %v2816_v2 = vld [vmem:[%s3948_s27 + $0x1e0] sm:$0xff]  ;;  %v2817_v3 = vld [vmem:[%s3948_s27 + $0x1e8] sm:$0xff]  ;;  %v2818_v4 = vld [vmem:[%s3948_s27 + $0x1f0] sm:$0xff] }
  0x51   : > { %v2819_v5 = vld [vmem:[%s3948_s27 + $0x1f8] sm:$0xff]  ;;  %v4056_v6 = vld [vmem:[%s4711_s3] ss:$0 sm:$0xff] }
  0x52   : > { %3107 = vmatmul.mubr.msk.f32.gmra.mxu0 %vm615_vm0, %v546_v13 }
  0x53   : > { %3109 = vmatprep.mubr.msk.f32.mxu0 %vm615_vm0, %v547_v14 }
  0x56   : > { %3110 = vmatmul.mubr.msk.f32.gmra.mxu0 %vm615_vm0, %v548_v15 }
  0x57   : > { %3112 = vmatprep.mubr.msk.f32.mxu0 %vm615_vm0, %v549_v16 }
  0x5a   : > { %3113 = vmatmul.mubr.msk.f32.gmra.mxu0 %vm615_vm0, %v550_v17 }
  0x5b   : > { %3115 = vmatprep.mubr.msk.f32.mxu0 %vm615_vm0, %v551_v18 }
  0x5e   : > { %3116 = vmatmul.mubr.msk.f32.gmra.mxu0 %vm615_vm0, %v552_v19 }
  0x5f   : > { %3118 = vmatprep.mubr.msk.f32.mxu0 %vm615_vm0, %v2772_v20 }
  0x62   : > { %3119 = vmatmul.mubr.msk.f32.gmra.mxu0 %vm615_vm0, %v2773_v21 }
  0x63   : > { %3121 = vmatprep.mubr.msk.f32.mxu0 %vm615_vm0, %v2774_v22 }
  0x66   : > { %3122 = vmatmul.mubr.msk.f32.gmra.mxu0 %vm615_vm0, %v2775_v23 }
  0x67   : > { %3124 = vmatprep.mubr.msk.f32.mxu0 %vm615_vm0, %v2776_v24 }
  0x6a   : > { %3125 = vmatmul.mubr.msk.f32.gmra.mxu0 %vm615_vm0, %v2777_v25 }
  0x6b   : > { %3127 = vmatprep.mubr.msk.f32.mxu0 %vm615_vm0, %v2778_v26 }
  0x6e   : > { %3128 = vmatmul.mubr.msk.f32.gmra.mxu0 %vm615_vm0, %v2779_v27 }
  0x6f   : > { %3130 = vmatprep.mubr.msk.f32.mxu0 %vm615_vm0, %v2780_v28 }
  0x72   : > { %3131 = vmatmul.mubr.msk.f32.gmra.mxu0 %vm615_vm0, %v2781_v29 }
  0x73   : > { %3133 = vmatprep.mubr.msk.f32.mxu0 %vm615_vm0, %v2782_v30 }
  0x76   : > { %3134 = vmatmul.mubr.msk.f32.gmra.mxu0 %vm615_vm0, %v2783_v31 }
  0x77   : > { %3136 = vmatprep.mubr.msk.f32.mxu0 %vm615_vm0, %v2784_v32 }
  0x7a   : > { %3137 = vmatmul.mubr.msk.f32.gmra.mxu0 %vm615_vm0, %v2785_v33 }
  0x7b   : > { %3139 = vmatprep.mubr.msk.f32.mxu0 %vm615_vm0, %v2786_v34 }
  0x7e   : > { %3140 = vmatmul.mubr.msk.f32.gmra.mxu0 %vm615_vm0, %v2787_v35 }
  0x7f   : > { %3142 = vmatprep.mubr.msk.f32.mxu0 %vm615_vm0, %v2788_v36 }
  0x82   : > { %3143 = vmatmul.mubr.msk.f32.gmra.mxu0 %vm615_vm0, %v2789_v37 }
  0x83   : > { %3145 = vmatprep.mubr.msk.f32.mxu0 %vm615_vm0, %v2790_v38 }
  0x86   : > { %3146 = vmatmul.mubr.msk.f32.gmra.mxu0 %vm615_vm0, %v2791_v39 }
  0x87   : > { %3148 = vmatprep.mubr.msk.f32.mxu0 %vm615_vm0, %v2792_v40 }
  0x8a   : > { %3149 = vmatmul.mubr.msk.f32.gmra.mxu0 %vm615_vm0, %v2793_v41 }
  0x8b   : > { %3151 = vmatprep.mubr.msk.f32.mxu0 %vm615_vm0, %v2794_v42 }
  0x8e   : > { %3152 = vmatmul.mubr.msk.f32.gmra.mxu0 %vm615_vm0, %v2795_v43 }
  0x8f   : > { %3154 = vmatprep.mubr.msk.f32.mxu0 %vm615_vm0, %v2796_v44 }
  0x92   : > { %3155 = vmatmul.mubr.msk.f32.gmra.mxu0 %vm615_vm0, %v2797_v45 }
  0x93   : > { %3157 = vmatprep.mubr.msk.f32.mxu0 %vm615_vm0, %v2798_v46 }
  0x96   : > { %3158 = vmatmul.mubr.msk.f32.gmra.mxu0 %vm615_vm0, %v2799_v48 }
  0x97   : > { %3160 = vmatprep.mubr.msk.f32.mxu0 %vm615_vm0, %v2800_v50 }
  0x9a   : > { %3161 = vmatmul.mubr.msk.f32.gmra.mxu0 %vm615_vm0, %v2801_v51 }
  0x9b   : > { %3163 = vmatprep.mubr.msk.f32.mxu0 %vm615_vm0, %v2802_v52 }
  0x9e   : > { %3164 = vmatmul.mubr.msk.f32.gmra.mxu0 %vm615_vm0, %v2803_v53 }
  0x9f   : > { %3166 = vmatprep.mubr.msk.f32.mxu0 %vm615_vm0, %v2804_v54 }
  0xa2   : > { %3167 = vmatmul.mubr.msk.f32.gmra.mxu0 %vm615_vm0, %v2805_v55 }
  0xa3   : > { %3169 = vmatprep.mubr.msk.f32.mxu0 %vm615_vm0, %v2806_v56 }
  0xa6   : > { %3170 = vmatmul.mubr.msk.f32.gmra.mxu0 %vm615_vm0, %v2807_v57 }
  0xa7   : > { %3172 = vmatprep.mubr.msk.f32.mxu0 %vm615_vm0, %v2808_v58 }
  0xaa   : > { %3173 = vmatmul.mubr.msk.f32.gmra.mxu0 %vm615_vm0, %v2809_v59 }
  0xab   : > { %3175 = vmatprep.mubr.msk.f32.mxu0 %vm615_vm0, %v2810_v60 }
  0xae   : > { %3176 = vmatmul.mubr.msk.f32.gmra.mxu0 %vm615_vm0, %v2811_v61 }
  0xaf   : > { %3178 = vmatprep.mubr.msk.f32.mxu0 %vm615_vm0, %v2812_v62 }
  0xb2   : > { %3179 = vmatmul.mubr.msk.f32.gmra.mxu0 %vm615_vm0, %v2813_v63 }
  0xb3   : > { %3181 = vmatprep.mubr.msk.f32.mxu0 %vm615_vm0, %v2814_v0 }
  0xb6   : > { %3182 = vmatmul.mubr.msk.f32.gmra.mxu0 %vm615_vm0, %v2815_v1 }
  0xb7   : > { %3184 = vmatprep.mubr.msk.f32.mxu0 %vm615_vm0, %v2816_v2 }
  0xba   : > { %3185 = vmatmul.mubr.msk.f32.gmra.mxu0 %vm615_vm0, %v2817_v3 }
  0xbb   : > { %3187 = vmatprep.mubr.msk.f32.mxu0 %vm615_vm0, %v2818_v4 }
  0xbe   : > { %3188 = vmatmul.mubr.msk.f32.gmra.mxu0 %vm615_vm0, %v2819_v5 }
 0x102   : > { %v3096_v7 = vpop.f32.mrf.mxu0 }
 0x103   : > { %v880_v8 = vadd.f32 %v3096_v7, %v4056_v6 }
 0x104   : > { %v874_v9 = vpop.f32.mrf.mxu0 }
 0x105   : > { %v875_v10 = vadd.f32 %v4056_v6, %v874_v9 }
 0x106   : > { %v3099_v11 = vpop.f32.mrf.mxu0 }
 0x107   : > { %3317 = vtanh.f32 %v875_v10  ;;  %v890_v12 = vadd.f32 %v3099_v11, %v4056_v6 }
 0x108   : > { %3319 = vtanh.f32 %v880_v8  ;;  %v884_v13 = vpop.f32.mrf.mxu0 }
 0x109   : > { %v885_v14 = vadd.f32 %v4056_v6, %v884_v13 }
 0x10a   : > { %v3102_v15 = vpop.f32.mrf.mxu0 }
 0x10b   : > { %3321 = vtanh.f32 %v885_v14  ;;  %v900_v16 = vadd.f32 %v3102_v15, %v4056_v6 }
 0x10c   : > { %3323 = vtanh.f32 %v890_v12  ;;  %v894_v17 = vpop.f32.mrf.mxu0 }
 0x10d   : > { %v895_v18 = vadd.f32 %v4056_v6, %v894_v17 }
 0x10e   : > { %v3105_v19 = vpop.f32.mrf.mxu0 }
 0x10f   : > { %3325 = vtanh.f32 %v895_v18  ;;  %v910_v20 = vadd.f32 %v3105_v19, %v4056_v6 }
 0x110   : > { %3327 = vtanh.f32 %v900_v16  ;;  %v904_v21 = vpop.f32.mrf.mxu0 }
 0x111   : > { %v905_v22 = vadd.f32 %v4056_v6, %v904_v21 }
 0x112   : > { %v3108_v23 = vpop.f32.mrf.mxu0 }
 0x113   : > { %3329 = vtanh.f32 %v905_v22  ;;  %v920_v25 = vadd.f32 %v3108_v23, %v4056_v6 }
 0x114   : > { %v3318_v24 = vpop.eup %3317  ;;  %3331 = vtanh.f32 %v910_v20  ;;  %v914_v26 = vpop.f32.mrf.mxu0 }
 0x115   : > { %v3320_v27 = vpop.eup %3319  ;;  %v915_v28 = vadd.f32 %v4056_v6, %v914_v26  ;;  %3194 = vmatprep.mubr.msk.f32.mxu1 %vm1259_vm1, %v3318_v24 }
 0x116   : > { %v3111_v29 = vpop.f32.mrf.mxu0  ;;  %3195 = vmatmul.mubr.msk.f32.vlgmr.msra.gmra.mxu1 %vm1259_vm1, %v3320_v27 }
 0x117   : > { %3333 = vtanh.f32 %v915_v28  ;;  %v930_v31 = vadd.f32 %v3111_v29, %v4056_v6 }
 0x118   : > { %v3322_v30 = vpop.eup %3321  ;;  %3335 = vtanh.f32 %v920_v25  ;;  %v924_v32 = vpop.f32.mrf.mxu0 }
 0x119   : > { %v3324_v33 = vpop.eup %3323  ;;  %v925_v34 = vadd.f32 %v4056_v6, %v924_v32  ;;  %3197 = vmatprep.mubr.msk.f32.mxu1 %vm1259_vm1, %v3322_v30 }
 0x11a   : > { %v3114_v35 = vpop.f32.mrf.mxu0  ;;  %3198 = vmatmul.mubr.msk.f32.gmra.mxu1 %vm1259_vm1, %v3324_v33 }
 0x11b   : > { %3337 = vtanh.f32 %v925_v34  ;;  %v940_v37 = vadd.f32 %v3114_v35, %v4056_v6 }
 0x11c   : > { %v3326_v36 = vpop.eup %3325  ;;  %3339 = vtanh.f32 %v930_v31  ;;  %v934_v38 = vpop.f32.mrf.mxu0 }
 0x11d   : > { %v3328_v39 = vpop.eup %3327  ;;  %v935_v40 = vadd.f32 %v4056_v6, %v934_v38  ;;  %3200 = vmatprep.mubr.msk.f32.mxu1 %vm1259_vm1, %v3326_v36 }
 0x11e   : > { %v3117_v41 = vpop.f32.mrf.mxu0  ;;  %3201 = vmatmul.mubr.msk.f32.gmra.mxu1 %vm1259_vm1, %v3328_v39 }
 0x11f   : > { %3341 = vtanh.f32 %v935_v40  ;;  %v950_v43 = vadd.f32 %v3117_v41, %v4056_v6 }
 0x120   : > { %v3330_v42 = vpop.eup %3329  ;;  %3343 = vtanh.f32 %v940_v37  ;;  %v944_v44 = vpop.f32.mrf.mxu0 }
 0x121   : > { %v3332_v45 = vpop.eup %3331  ;;  %v945_v46 = vadd.f32 %v4056_v6, %v944_v44  ;;  %3203 = vmatprep.mubr.msk.f32.mxu1 %vm1259_vm1, %v3330_v42 }
 0x122   : > { %v3120_v47 = vpop.f32.mrf.mxu0  ;;  %3204 = vmatmul.mubr.msk.f32.gmra.mxu1 %vm1259_vm1, %v3332_v45 }
 0x123   : > { %3345 = vtanh.f32 %v945_v46  ;;  %v960_v49 = vadd.f32 %v3120_v47, %v4056_v6 }
 0x124   : > { %v3334_v48 = vpop.eup %3333  ;;  %3347 = vtanh.f32 %v950_v43  ;;  %v954_v50 = vpop.f32.mrf.mxu0 }
 0x125   : > { %v3336_v51 = vpop.eup %3335  ;;  %v955_v52 = vadd.f32 %v4056_v6, %v954_v50  ;;  %3206 = vmatprep.mubr.msk.f32.mxu1 %vm1259_vm1, %v3334_v48 }
 0x126   : > { %v3123_v53 = vpop.f32.mrf.mxu0  ;;  %3207 = vmatmul.mubr.msk.f32.gmra.mxu1 %vm1259_vm1, %v3336_v51 }
 0x127   : > { %3349 = vtanh.f32 %v955_v52  ;;  %v970_v55 = vadd.f32 %v3123_v53, %v4056_v6 }
 0x128   : > { %v3338_v54 = vpop.eup %3337  ;;  %3351 = vtanh.f32 %v960_v49  ;;  %v964_v56 = vpop.f32.mrf.mxu0 }
 0x129   : > { %v3340_v57 = vpop.eup %3339  ;;  %v965_v58 = vadd.f32 %v4056_v6, %v964_v56  ;;  %3209 = vmatprep.mubr.msk.f32.mxu1 %vm1259_vm1, %v3338_v54 }
 0x12a   : > { %v3126_v59 = vpop.f32.mrf.mxu0  ;;  %3210 = vmatmul.mubr.msk.f32.gmra.mxu1 %vm1259_vm1, %v3340_v57 }
 0x12b   : > { %3353 = vtanh.f32 %v965_v58  ;;  %v980_v61 = vadd.f32 %v3126_v59, %v4056_v6 }
 0x12c   : > { %v3342_v60 = vpop.eup %3341  ;;  %3355 = vtanh.f32 %v970_v55  ;;  %v974_v62 = vpop.f32.mrf.mxu0 }
 0x12d   : > { %v3344_v63 = vpop.eup %3343  ;;  %v975_v0 = vadd.f32 %v4056_v6, %v974_v62  ;;  %3212 = vmatprep.mubr.msk.f32.mxu1 %vm1259_vm1, %v3342_v60 }
 0x12e   : > { %v3129_v1 = vpop.f32.mrf.mxu0  ;;  %3213 = vmatmul.mubr.msk.f32.gmra.mxu1 %vm1259_vm1, %v3344_v63 }
 0x12f   : > { %3357 = vtanh.f32 %v975_v0  ;;  %v990_v3 = vadd.f32 %v3129_v1, %v4056_v6 }
 0x130   : > { %v3346_v2 = vpop.eup %3345  ;;  %3359 = vtanh.f32 %v980_v61  ;;  %v984_v4 = vpop.f32.mrf.mxu0 }
 0x131   : > { %v3348_v5 = vpop.eup %3347  ;;  %v985_v7 = vadd.f32 %v4056_v6, %v984_v4  ;;  %3215 = vmatprep.mubr.msk.f32.mxu1 %vm1259_vm1, %v3346_v2 }
 0x132   : > { %v3132_v8 = vpop.f32.mrf.mxu0  ;;  %3216 = vmatmul.mubr.msk.f32.gmra.mxu1 %vm1259_vm1, %v3348_v5 }
 0x133   : > { %3361 = vtanh.f32 %v985_v7  ;;  %v1000_v10 = vadd.f32 %v3132_v8, %v4056_v6 }
 0x134   : > { %v3350_v9 = vpop.eup %3349  ;;  %3363 = vtanh.f32 %v990_v3  ;;  %v994_v11 = vpop.f32.mrf.mxu0 }
 0x135   : > { %v3352_v12 = vpop.eup %3351  ;;  %v995_v13 = vadd.f32 %v4056_v6, %v994_v11  ;;  %3218 = vmatprep.mubr.msk.f32.mxu1 %vm1259_vm1, %v3350_v9 }
 0x136   : > { %v3135_v14 = vpop.f32.mrf.mxu0  ;;  %3219 = vmatmul.mubr.msk.f32.gmra.mxu1 %vm1259_vm1, %v3352_v12 }
 0x137   : > { %3365 = vtanh.f32 %v995_v13  ;;  %v1010_v16 = vadd.f32 %v3135_v14, %v4056_v6 }
 0x138   : > { %v3354_v15 = vpop.eup %3353  ;;  %3367 = vtanh.f32 %v1000_v10  ;;  %v1004_v17 = vpop.f32.mrf.mxu0 }
 0x139   : > { %v3356_v18 = vpop.eup %3355  ;;  %v1005_v19 = vadd.f32 %v4056_v6, %v1004_v17  ;;  %3221 = vmatprep.mubr.msk.f32.mxu1 %vm1259_vm1, %v3354_v15 }
 0x13a   : > { %v3138_v20 = vpop.f32.mrf.mxu0  ;;  %3222 = vmatmul.mubr.msk.f32.gmra.mxu1 %vm1259_vm1, %v3356_v18 }
 0x13b   : > { %3369 = vtanh.f32 %v1005_v19  ;;  %v1020_v22 = vadd.f32 %v3138_v20, %v4056_v6 }
 0x13c   : > { %v3358_v21 = vpop.eup %3357  ;;  %3371 = vtanh.f32 %v1010_v16  ;;  %v1014_v23 = vpop.f32.mrf.mxu0 }
 0x13d   : > { %v3360_v24 = vpop.eup %3359  ;;  %v1015_v25 = vadd.f32 %v4056_v6, %v1014_v23  ;;  %3224 = vmatprep.mubr.msk.f32.mxu1 %vm1259_vm1, %v3358_v21 }
 0x13e   : > { %v3141_v26 = vpop.f32.mrf.mxu0  ;;  %3225 = vmatmul.mubr.msk.f32.gmra.mxu1 %vm1259_vm1, %v3360_v24 }
 0x13f   : > { %3373 = vtanh.f32 %v1015_v25  ;;  %v1030_v28 = vadd.f32 %v3141_v26, %v4056_v6 }
 0x140   : > { %v3362_v27 = vpop.eup %3361  ;;  %3375 = vtanh.f32 %v1020_v22  ;;  %v1024_v29 = vpop.f32.mrf.mxu0 }
 0x141   : > { %v3364_v30 = vpop.eup %3363  ;;  %v1025_v31 = vadd.f32 %v4056_v6, %v1024_v29  ;;  %3227 = vmatprep.mubr.msk.f32.mxu1 %vm1259_vm1, %v3362_v27 }
 0x142   : > { %v3144_v32 = vpop.f32.mrf.mxu0  ;;  %3228 = vmatmul.mubr.msk.f32.gmra.mxu1 %vm1259_vm1, %v3364_v30 }
 0x143   : > { %3377 = vtanh.f32 %v1025_v31  ;;  %v1040_v34 = vadd.f32 %v3144_v32, %v4056_v6 }
 0x144   : > { %v3366_v33 = vpop.eup %3365  ;;  %3379 = vtanh.f32 %v1030_v28  ;;  %v1034_v35 = vpop.f32.mrf.mxu0 }
 0x145   : > { %v3368_v36 = vpop.eup %3367  ;;  %v1035_v37 = vadd.f32 %v4056_v6, %v1034_v35  ;;  %3230 = vmatprep.mubr.msk.f32.mxu1 %vm1259_vm1, %v3366_v33 }
 0x146   : > { %v3147_v38 = vpop.f32.mrf.mxu0  ;;  %3231 = vmatmul.mubr.msk.f32.gmra.mxu1 %vm1259_vm1, %v3368_v36 }
 0x147   : > { %3381 = vtanh.f32 %v1035_v37  ;;  %v1050_v40 = vadd.f32 %v3147_v38, %v4056_v6 }
 0x148   : > { %v3370_v39 = vpop.eup %3369  ;;  %3383 = vtanh.f32 %v1040_v34  ;;  %v1044_v41 = vpop.f32.mrf.mxu0 }
 0x149   : > { %v3372_v42 = vpop.eup %3371  ;;  %v1045_v43 = vadd.f32 %v4056_v6, %v1044_v41  ;;  %3233 = vmatprep.mubr.msk.f32.mxu1 %vm1259_vm1, %v3370_v39 }
 0x14a   : > { %v3150_v44 = vpop.f32.mrf.mxu0  ;;  %3234 = vmatmul.mubr.msk.f32.gmra.mxu1 %vm1259_vm1, %v3372_v42 }
 0x14b   : > { %3385 = vtanh.f32 %v1045_v43  ;;  %v1060_v46 = vadd.f32 %v3150_v44, %v4056_v6 }
 0x14c   : > { %v3374_v45 = vpop.eup %3373  ;;  %3387 = vtanh.f32 %v1050_v40  ;;  %v1054_v47 = vpop.f32.mrf.mxu0 }
 0x14d   : > { %v3376_v48 = vpop.eup %3375  ;;  %v1055_v49 = vadd.f32 %v4056_v6, %v1054_v47  ;;  %3236 = vmatprep.mubr.msk.f32.mxu1 %vm1259_vm1, %v3374_v45 }
 0x14e   : > { %v3153_v50 = vpop.f32.mrf.mxu0  ;;  %3237 = vmatmul.mubr.msk.f32.gmra.mxu1 %vm1259_vm1, %v3376_v48 }
 0x14f   : > { %3389 = vtanh.f32 %v1055_v49  ;;  %v1070_v52 = vadd.f32 %v3153_v50, %v4056_v6 }
 0x150   : > { %v3378_v51 = vpop.eup %3377  ;;  %3391 = vtanh.f32 %v1060_v46  ;;  %v1064_v53 = vpop.f32.mrf.mxu0 }
 0x151   : > { %v3380_v54 = vpop.eup %3379  ;;  %v1065_v55 = vadd.f32 %v4056_v6, %v1064_v53  ;;  %3239 = vmatprep.mubr.msk.f32.mxu1 %vm1259_vm1, %v3378_v51 }
 0x152   : > { %v3156_v56 = vpop.f32.mrf.mxu0  ;;  %3240 = vmatmul.mubr.msk.f32.gmra.mxu1 %vm1259_vm1, %v3380_v54 }
 0x153   : > { %3393 = vtanh.f32 %v1065_v55  ;;  %v1080_v58 = vadd.f32 %v3156_v56, %v4056_v6 }
 0x154   : > { %v3382_v57 = vpop.eup %3381  ;;  %3395 = vtanh.f32 %v1070_v52  ;;  %v1074_v59 = vpop.f32.mrf.mxu0 }
 0x155   : > { %v3384_v60 = vpop.eup %3383  ;;  %v1075_v61 = vadd.f32 %v4056_v6, %v1074_v59  ;;  %3242 = vmatprep.mubr.msk.f32.mxu1 %vm1259_vm1, %v3382_v57 }
 0x156   : > { %v3159_v62 = vpop.f32.mrf.mxu0  ;;  %3243 = vmatmul.mubr.msk.f32.gmra.mxu1 %vm1259_vm1, %v3384_v60 }
 0x157   : > { %3397 = vtanh.f32 %v1075_v61  ;;  %v1090_v0 = vadd.f32 %v3159_v62, %v4056_v6 }
 0x158   : > { %v3386_v63 = vpop.eup %3385  ;;  %3399 = vtanh.f32 %v1080_v58  ;;  %v1084_v1 = vpop.f32.mrf.mxu0 }
 0x159   : > { %v3388_v2 = vpop.eup %3387  ;;  %v1085_v3 = vadd.f32 %v4056_v6, %v1084_v1  ;;  %3245 = vmatprep.mubr.msk.f32.mxu1 %vm1259_vm1, %v3386_v63 }
 0x15a   : > { %v3162_v4 = vpop.f32.mrf.mxu0  ;;  %3246 = vmatmul.mubr.msk.f32.gmra.mxu1 %vm1259_vm1, %v3388_v2 }
 0x15b   : > { %3401 = vtanh.f32 %v1085_v3  ;;  %v1100_v7 = vadd.f32 %v3162_v4, %v4056_v6 }
 0x15c   : > { %v3390_v5 = vpop.eup %3389  ;;  %3403 = vtanh.f32 %v1090_v0  ;;  %v1094_v8 = vpop.f32.mrf.mxu0 }
 0x15d   : > { %v3392_v9 = vpop.eup %3391  ;;  %v1095_v10 = vadd.f32 %v4056_v6, %v1094_v8  ;;  %3248 = vmatprep.mubr.msk.f32.mxu1 %vm1259_vm1, %v3390_v5 }
 0x15e   : > { %v3165_v11 = vpop.f32.mrf.mxu0  ;;  %3249 = vmatmul.mubr.msk.f32.gmra.mxu1 %vm1259_vm1, %v3392_v9 }
 0x15f   : > { %3405 = vtanh.f32 %v1095_v10  ;;  %v1110_v13 = vadd.f32 %v3165_v11, %v4056_v6 }
 0x160   : > { %v3394_v12 = vpop.eup %3393  ;;  %3407 = vtanh.f32 %v1100_v7  ;;  %v1104_v14 = vpop.f32.mrf.mxu0 }
 0x161   : > { %v3396_v15 = vpop.eup %3395  ;;  %v1105_v16 = vadd.f32 %v4056_v6, %v1104_v14  ;;  %3251 = vmatprep.mubr.msk.f32.mxu1 %vm1259_vm1, %v3394_v12 }
 0x162   : > { %v3168_v17 = vpop.f32.mrf.mxu0  ;;  %3252 = vmatmul.mubr.msk.f32.gmra.mxu1 %vm1259_vm1, %v3396_v15 }
 0x163   : > { %3409 = vtanh.f32 %v1105_v16  ;;  %v1120_v19 = vadd.f32 %v3168_v17, %v4056_v6 }
 0x164   : > { %v3398_v18 = vpop.eup %3397  ;;  %3411 = vtanh.f32 %v1110_v13  ;;  %v1114_v20 = vpop.f32.mrf.mxu0 }
 0x165   : > { %v3400_v21 = vpop.eup %3399  ;;  %v1115_v22 = vadd.f32 %v4056_v6, %v1114_v20  ;;  %3254 = vmatprep.mubr.msk.f32.mxu1 %vm1259_vm1, %v3398_v18  ;;  %v3693_v20 = vmov 0  }
 0x166   : > { %v3171_v23 = vpop.f32.mrf.mxu0  ;;  %3255 = vmatmul.mubr.msk.f32.gmra.mxu1 %vm1259_vm1, %v3400_v21  ;;  %3316 = vset.pattern.permute.xlu1 %v3693_v20 }
 0x167   : > { %3413 = vtanh.f32 %v1115_v22  ;;  %v1130_v24 = vadd.f32 %v3171_v23, %v4056_v6  ;;  %3315 = vset.pattern.permute.xlu0 %v3693_v20 }
 0x168   : > { %v3402_v25 = vpop.eup %3401  ;;  %3415 = vtanh.f32 %v1120_v19  ;;  %v1124_v26 = vpop.f32.mrf.mxu0 }
 0x169   : > { %v3404_v27 = vpop.eup %3403  ;;  %v1125_v28 = vadd.f32 %v4056_v6, %v1124_v26  ;;  %3257 = vmatprep.mubr.msk.f32.mxu1 %vm1259_vm1, %v3402_v25  ;;  %3417 = vtanh.f32 %v1130_v24 }
 0x16a   : > { %v3174_v29 = vpop.f32.mrf.mxu0  ;;  %3258 = vmatmul.mubr.msk.f32.gmra.mxu1 %vm1259_vm1, %v3404_v27 }
 0x16b   : > { %3419 = vtanh.f32 %v1125_v28  ;;  %v1140_v30 = vadd.f32 %v3174_v29, %v4056_v6 }
 0x16c   : > { %v3406_v31 = vpop.eup %3405  ;;  %v1134_v32 = vpop.f32.mrf.mxu0 }
 0x16d   : > { %v3408_v33 = vpop.eup %3407  ;;  %v1135_v34 = vadd.f32 %v4056_v6, %v1134_v32  ;;  %3260 = vmatprep.mubr.msk.f32.mxu1 %vm1259_vm1, %v3406_v31  ;;  %3421 = vtanh.f32 %v1140_v30 }
 0x16e   : > { %v3177_v35 = vpop.f32.mrf.mxu0  ;;  %3261 = vmatmul.mubr.msk.f32.gmra.mxu1 %vm1259_vm1, %v3408_v33 }
 0x16f   : > { %3423 = vtanh.f32 %v1135_v34  ;;  %v1150_v36 = vadd.f32 %v3177_v35, %v4056_v6 }
 0x170   : > { %v3410_v37 = vpop.eup %3409  ;;  %v1144_v38 = vpop.f32.mrf.mxu0 }
 0x171   : > { %v3412_v39 = vpop.eup %3411  ;;  %v1145_v40 = vadd.f32 %v4056_v6, %v1144_v38  ;;  %3263 = vmatprep.mubr.msk.f32.mxu1 %vm1259_vm1, %v3410_v37  ;;  %3425 = vtanh.f32 %v1150_v36 }
 0x172   : > { %v3180_v41 = vpop.f32.mrf.mxu0  ;;  %3264 = vmatmul.mubr.msk.f32.gmra.mxu1 %vm1259_vm1, %v3412_v39 }
 0x173   : > { %3427 = vtanh.f32 %v1145_v40  ;;  %v1160_v42 = vadd.f32 %v3180_v41, %v4056_v6 }
 0x174   : > { %v3414_v43 = vpop.eup %3413  ;;  %v1154_v44 = vpop.f32.mrf.mxu0 }
 0x175   : > { %v3416_v45 = vpop.eup %3415  ;;  %v1155_v46 = vadd.f32 %v4056_v6, %v1154_v44  ;;  %3266 = vmatprep.mubr.msk.f32.mxu1 %vm1259_vm1, %v3414_v43  ;;  %3429 = vtanh.f32 %v1160_v42 }
 0x176   : > { %v3183_v47 = vpop.f32.mrf.mxu0  ;;  %3267 = vmatmul.mubr.msk.f32.gmra.mxu1 %vm1259_vm1, %v3416_v45  ;;  %v3418_v48 = vpop.eup %3417 }
 0x177   : > { %3431 = vtanh.f32 %v1155_v46  ;;  %v1170_v49 = vadd.f32 %v3183_v47, %v4056_v6 }
 0x178   : > { %v3420_v50 = vpop.eup %3419  ;;  %v1164_v51 = vpop.f32.mrf.mxu0 }
 0x179   : > { %v1165_v52 = vadd.f32 %v4056_v6, %v1164_v51  ;;  %3269 = vmatprep.mubr.msk.f32.mxu1 %vm1259_vm1, %v3420_v50  ;;  %3433 = vtanh.f32 %v1170_v49 }
 0x17a   : > { %v3186_v53 = vpop.f32.mrf.mxu0  ;;  %3270 = vmatmul.mubr.msk.f32.gmra.mxu1 %vm1259_vm1, %v3418_v48  ;;  %v3422_v54 = vpop.eup %3421 }
 0x17b   : > { %3435 = vtanh.f32 %v1165_v52  ;;  %v1180_v55 = vadd.f32 %v3186_v53, %v4056_v6 }
 0x17c   : > { %v3424_v56 = vpop.eup %3423  ;;  %v1174_v57 = vpop.f32.mrf.mxu0 }
 0x17d   : > { %v1175_v58 = vadd.f32 %v4056_v6, %v1174_v57  ;;  %3272 = vmatprep.mubr.msk.f32.mxu1 %vm1259_vm1, %v3424_v56  ;;  %3437 = vtanh.f32 %v1180_v55 }
 0x17e   : > { %v3189_v59 = vpop.f32.mrf.mxu0  ;;  %3273 = vmatmul.mubr.msk.f32.gmra.mxu1 %vm1259_vm1, %v3422_v54  ;;  %v3426_v60 = vpop.eup %3425 }
 0x17f   : > { %3439 = vtanh.f32 %v1175_v58  ;;  %v1190_v61 = vadd.f32 %v3189_v59, %v4056_v6 }
 0x180   : > { %v3428_v62 = vpop.eup %3427  ;;  %v1184_v63 = vpop.f32.mrf.mxu0 }
 0x181   : > { %v1185_v0 = vadd.f32 %v4056_v6, %v1184_v63  ;;  %3275 = vmatprep.mubr.msk.f32.mxu1 %vm1259_vm1, %v3428_v62  ;;  %3441 = vtanh.f32 %v1190_v61 }
 0x182   : > { %3276 = vmatmul.mubr.msk.f32.gmra.mxu1 %vm1259_vm1, %v3426_v60  ;;  %v3430_v1 = vpop.eup %3429 }
 0x183   : > { %3443 = vtanh.f32 %v1185_v0 }
 0x184   : > { %v3432_v2 = vpop.eup %3431 }
 0x185   : > { %3278 = vmatprep.mubr.msk.f32.mxu1 %vm1259_vm1, %v3432_v2 }
 0x186   : > { %3279 = vmatmul.mubr.msk.f32.gmra.mxu1 %vm1259_vm1, %v3430_v1  ;;  %v3434_v3 = vpop.eup %3433 }
 0x188   : > { %v3436_v4 = vpop.eup %3435 }
 0x189   : > { %3281 = vmatprep.mubr.msk.f32.mxu1 %vm1259_vm1, %v3436_v4 }
 0x18a   : > { %3282 = vmatmul.mubr.msk.f32.gmra.mxu1 %vm1259_vm1, %v3434_v3  ;;  %v3438_v5 = vpop.eup %3437 }
 0x18c   : > { %v3440_v6 = vpop.eup %3439 }
 0x18d   : > { %3284 = vmatprep.mubr.msk.f32.mxu1 %vm1259_vm1, %v3440_v6 }
 0x18e   : > { %3285 = vmatmul.mubr.msk.f32.gmra.mxu1 %vm1259_vm1, %v3438_v5  ;;  %v3442_v7 = vpop.eup %3441 }
 0x190   : > { %v3444_v8 = vpop.eup %3443 }
 0x191   : > { %3287 = vmatprep.mubr.msk.f32.mxu1 %vm1259_vm1, %v3444_v8 }
 0x192   : > { %3288 = vmatmul.mubr.msk.f32.gmra.mxu1 %vm1259_vm1, %v3442_v7 }
 0x1d6   : > { %v4186_v9 = vpop.f32.mrf.mxu1 }
 0x1d8   : > { %v4188_v10 = vpop.f32.mrf.mxu1 }
 0x1da   : > { %v4190_v11 = vpop.f32.mrf.mxu1 }
 0x1dc   : > { %v4192_v12 = vpop.f32.mrf.mxu1 }
 0x1de   : > { %v4194_v13 = vpop.f32.mrf.mxu1 }
 0x1e0   : > { %v4196_v14 = vpop.f32.mrf.mxu1 }
 0x1e2   : > { %v4198_v15 = vpop.f32.mrf.mxu1 }
 0x1e4   : > { %v4200_v16 = vpop.f32.mrf.mxu1 }
 0x1e6   : > { %v4202_v17 = vpop.f32.mrf.mxu1 }
 0x1e8   : > { %v4204_v18 = vpop.f32.mrf.mxu1 }
 0x1ea   : > { %v4206_v19 = vpop.f32.mrf.mxu1 }
 0x1ec   : > { %v4208_v21 = vpop.f32.mrf.mxu1 }
 0x1ee   : > { %v4210_v22 = vpop.f32.mrf.mxu1 }
 0x1f0   : > { %v4212_v23 = vpop.f32.mrf.mxu1 }
 0x1f2   : > { %v4214_v24 = vpop.f32.mrf.mxu1 }
 0x1f3   : > { %4720 = vst [vmem:[#allocation3_spill] sm:$0xff] %v4214_v24 }
 0x1f4   : > { %v4216_v25 = vpop.f32.mrf.mxu1 }
 0x1f5   : > { %4721 = vst [vmem:[#allocation4_spill] sm:$0xff] %v4216_v25 }
 0x1f6   : > { %v3220_v26 = vpop.f32.mrf.mxu1 }
 0x1f7   : > { %v1838_v59 = vmax.f32 %v4186_v9, %v3220_v26 }
 0x1f8   : > { %v4218_v27 = vpop.f32.mrf.mxu1 }
 0x1f9   : > { %v1837_v0 = vmax.f32 %v4188_v10, %v4218_v27 }
 0x1fa   : > { %v4220_v28 = vpop.f32.mrf.mxu1 }
 0x1fb   : > { %v1840_v6 = vmax.f32 %v4190_v11, %v4220_v28 }
 0x1fc   : > { %v4222_v29 = vpop.f32.mrf.mxu1 }
 0x1fd   : > { %v1839_v7 = vmax.f32 %v4192_v12, %v4222_v29 }
 0x1fe   : > { %v4224_v30 = vpop.f32.mrf.mxu1 }
 0x200   : > { %v4226_v31 = vpop.f32.mrf.mxu1 }
 0x202   : > { %v4228_v32 = vpop.f32.mrf.mxu1 }
 0x204   : > { %v4230_v33 = vpop.f32.mrf.mxu1 }
 0x206   : > { %v4232_v34 = vpop.f32.mrf.mxu1 }
 0x208   : > { %v4234_v35 = vpop.f32.mrf.mxu1 }
 0x20a   : > { %v4236_v36 = vpop.f32.mrf.mxu1 }
 0x20c   : > { %v4238_v37 = vpop.f32.mrf.mxu1 }
 0x20e   : > { %v4240_v38 = vpop.f32.mrf.mxu1 }
 0x210   : > { %v4242_v39 = vpop.f32.mrf.mxu1 }
 0x212   : > { %v4244_v40 = vpop.f32.mrf.mxu1 }
 0x213   : > { %4722 = vst [vmem:[#allocation5_spill] sm:$0xff] %v4244_v40 }
 0x214   : > { %v4246_v41 = vpop.f32.mrf.mxu1 }
 0x215   : > { %4723 = vst [vmem:[#allocation6_spill] sm:$0xff] %v4246_v41 }
 0x216   : > { %v3244_v42 = vpop.f32.mrf.mxu1 }
 0x218   : > { %v1678_v43 = vpop.f32.mrf.mxu1 }
 0x21a   : > { %v4248_v44 = vpop.f32.mrf.mxu1 }
 0x21c   : > { %v4250_v45 = vpop.f32.mrf.mxu1 }
 0x21e   : > { %v4252_v46 = vpop.f32.mrf.mxu1 }
 0x220   : > { %v4254_v47 = vpop.f32.mrf.mxu1 }
 0x222   : > { %v4256_v48 = vpop.f32.mrf.mxu1 }
 0x224   : > { %v4258_v49 = vpop.f32.mrf.mxu1 }
 0x226   : > { %v4260_v50 = vpop.f32.mrf.mxu1 }
 0x228   : > { %v4262_v51 = vpop.f32.mrf.mxu1 }
 0x22a   : > { %v4264_v52 = vpop.f32.mrf.mxu1 }
 0x22c   : > { %v4266_v53 = vpop.f32.mrf.mxu1 }
 0x22e   : > { %v4268_v54 = vpop.f32.mrf.mxu1 }
 0x230   : > { %v4270_v55 = vpop.f32.mrf.mxu1 }
 0x232   : > { %v4272_v56 = vpop.f32.mrf.mxu1 }
 0x233   : > { %4724 = vst [vmem:[#allocation7_spill] sm:$0xff] %v4272_v56 }
 0x234   : > { %v4274_v57 = vpop.f32.mrf.mxu1 }
 0x235   : > { %4725 = vst [vmem:[#allocation8_spill] sm:$0xff] %v4274_v57 }
 0x236   : > { %v3268_v58 = vpop.f32.mrf.mxu1 }
 0x237   : > { %v1854_v60 = vmax.f32 %v3244_v42, %v3268_v58 }
 0x238   : > { %v1758_v61 = vpop.f32.mrf.mxu1 }
 0x239   : > { %v1870_v62 = vmax.f32 %v1838_v59, %v1854_v60  ;;  %v1853_v63 = vmax.f32 %v1678_v43, %v1758_v61 }
 0x23a   : > { %v3271_v1 = vpop.f32.mrf.mxu1 }
 0x23b   : > { %v1886_v2 = vsub.f32 %v4186_v9, %v1870_v62  ;;  %v1934_v3 = vsub.f32 %v3220_v26, %v1870_v62  ;;  %v1982_v4 = vsub.f32 %v3244_v42, %v1870_v62  ;;  %v2030_v5 = vsub.f32 %v3268_v58, %v1870_v62 }
 0x23c   : > { %v1869_v8 = vmax.f32 %v1837_v0, %v1853_v63  ;;  %v1856_v20 = vmax.f32 %v4248_v44, %v3271_v1  ;;  %v1768_v59 = vpop.f32.mrf.mxu1 }
 0x23d   : > { %v1903_v60 = vmul.f32 1.442695, %v1886_v2  ;;  %v1951_v24 = vmul.f32 1.442695, %v1934_v3  ;;  %v1999_v40 = vmul.f32 1.442695, %v1982_v4  ;;  %v1855_v25 = vmax.f32 %v4250_v45, %v1768_v59 }
 0x23e   : > { %v2047_v41 = vmul.f32 1.442695, %v2030_v5  ;;  %v1885_v9 = vsub.f32 %v4188_v10, %v1869_v8  ;;  %v1933_v26 = vsub.f32 %v4218_v27, %v1869_v8  ;;  %v1981_v42 = vsub.f32 %v1678_v43, %v1869_v8  ;;  %v4288_v58 = vpop.f32.mrf.mxu1 }
 0x23f   : > { %3445 = vpow2.f32 %v1903_v60  ;;  %v2029_v62 = vsub.f32 %v1758_v61, %v1869_v8  ;;  %v1872_v56 = vmax.f32 %v1840_v6, %v1856_v20  ;;  %v1871_v63 = vmax.f32 %v1839_v7, %v1855_v25 }
 0x240   : > { %3447 = vpow2.f32 %v1951_v24  ;;  %v1901_v0 = vmul.f32 1.442695, %v1885_v9  ;;  %v1949_v57 = vmul.f32 1.442695, %v1933_v26  ;;  %v1997_v2 = vmul.f32 1.442695, %v1981_v42  ;;  %v4293_v5 = vpop.f32.mrf.mxu1 }
 0x241   : > { %3449 = vpow2.f32 %v1999_v40  ;;  %v1888_v3 = vsub.f32 %v4190_v11, %v1872_v56  ;;  %v1936_v4 = vsub.f32 %v4220_v28, %v1872_v56  ;;  %v2045_v10 = vmul.f32 1.442695, %v2029_v62 }
 0x242   : > { %3451 = vpow2.f32 %v2047_v41  ;;  %v1984_v27 = vsub.f32 %v4248_v44, %v1872_v56  ;;  %v2032_v43 = vsub.f32 %v3271_v1, %v1872_v56  ;;  %v1842_v61 = vmax.f32 %v4194_v13, %v4224_v30  ;;  %v4306_v7 = vpop.f32.mrf.mxu1 }
 0x243   : > { %3453 = vpow2.f32 %v1901_v0  ;;  %v1907_v24 = vmul.f32 1.442695, %v1888_v3  ;;  %v1887_v25 = vsub.f32 %v4192_v12, %v1871_v63  ;;  %v1841_v40 = vmax.f32 %v4196_v14, %v4226_v31 }
 0x244   : > { %3455 = vpow2.f32 %v1949_v57  ;;  %v1955_v11 = vmul.f32 1.442695, %v1936_v4  ;;  %v1935_v28 = vsub.f32 %v4222_v29, %v1871_v63  ;;  %v2003_v41 = vmul.f32 1.442695, %v1984_v27  ;;  %v4313_v62 = vpop.f32.mrf.mxu1 }
 0x245   : > { %3457 = vpow2.f32 %v1997_v2  ;;  %v1983_v44 = vsub.f32 %v4250_v45, %v1871_v63  ;;  %v2031_v56 = vsub.f32 %v1768_v59, %v1871_v63  ;;  %v2051_v1 = vmul.f32 1.442695, %v2032_v43 }
 0x246   : > { %3459 = vpow2.f32 %v2045_v10  ;;  %v1858_v6 = vmax.f32 %v4252_v46, %v4288_v58  ;;  %v1857_v12 = vmax.f32 %v4254_v47, %v4293_v5  ;;  %v1905_v57 = vmul.f32 1.442695, %v1887_v25 }
 0x247   : > { %3461 = vpow2.f32 %v1907_v24  ;;  %v1953_v8 = vmul.f32 1.442695, %v1935_v28  ;;  %v2001_v60 = vmul.f32 1.442695, %v1983_v44  ;;  %v2049_v45 = vmul.f32 1.442695, %v2031_v56  ;;  %v4328_v44 = vpop.f32.mrf.mxu1 }
 0x248   : > { %3463 = vpow2.f32 %v1955_v11  ;;  %v1874_v29 = vmax.f32 %v1842_v61, %v1858_v6  ;;  %v1873_v20 = vmax.f32 %v1841_v40, %v1857_v12  ;;  %v1860_v59 = vmax.f32 %v4256_v48, %v4306_v7 }
 0x249   : > { %3465 = vpow2.f32 %v2003_v41  ;;  %v1844_v63 = vmax.f32 %v4198_v15, %v4228_v32  ;;  %v1843_v25 = vmax.f32 %v4200_v16, %v4230_v33 }
 0x24a   : > { %3467 = vpow2.f32 %v2051_v1  ;;  %v1890_v9 = vsub.f32 %v4194_v13, %v1874_v29  ;;  %v1938_v26 = vsub.f32 %v4224_v30, %v1874_v29  ;;  %v1986_v42 = vsub.f32 %v4252_v46, %v1874_v29 }
 0x24b   : > { %3469 = vpow2.f32 %v1905_v57  ;;  %v1889_v0 = vsub.f32 %v4196_v14, %v1873_v20  ;;  %v2034_v10 = vsub.f32 %v4288_v58, %v1874_v29  ;;  %v1937_v13 = vsub.f32 %v4226_v31, %v1873_v20 }
 0x24c   : > { %v3446_v2 = vpop.eup %3445  ;;  %3471 = vpow2.f32 %v1953_v8  ;;  %v1911_v3 = vmul.f32 1.442695, %v1890_v9  ;;  %v1959_v4 = vmul.f32 1.442695, %v1938_v26  ;;  %v4320_v30 = vmax.f32 %v1844_v63, %v1860_v59 }
 0x24d   : > { %v3448_v27 = vpop.eup %3447  ;;  %3473 = vpow2.f32 %v2001_v60  ;;  %v1859_v46 = vmax.f32 %v4258_v49, %v4313_v62  ;;  %2148 = vperm.xlu0 %3315, %v3446_v2   ;;  %v2007_v14 = vmul.f32 1.442695, %v1986_v42  ;;  %v1909_v58 = vmul.f32 1.442695, %v1889_v0  ;;  %v4346_v0 = vpop.f32.mrf.mxu1 }
 0x24e   : > { %v3450_v43 = vpop.eup %3449  ;;  %v2078_v61 = vadd.f32 %v3448_v27, %v3446_v2  ;;  %3475 = vpow2.f32 %v2049_v45  ;;  %2244 = vperm.xlu1 %3316, %v3448_v27   ;;  %v1985_v40 = vsub.f32 %v4254_v47, %v1873_v20  ;;  %v2055_v28 = vmul.f32 1.442695, %v2034_v10 }
 0x24f   : > { %v3452_v24 = vpop.eup %3451  ;;  %3477 = vpow2.f32 %v1911_v3  ;;  %v2033_v41 = vsub.f32 %v4293_v5, %v1873_v20  ;;  %v1957_v1 = vmul.f32 1.442695, %v1937_v13  ;;  %v1892_v6 = vsub.f32 %v4198_v15, %v4320_v30 }
 0x250   : > { %v3454_v31 = vpop.eup %3453  ;;  %v2094_v11 = vadd.f32 %v3450_v43, %v2078_v61  ;;  %3479 = vpow2.f32 %v1959_v4  ;;  %v4332_v12 = vmax.f32 %v1843_v25, %v1859_v46  ;;  %v1940_v29 = vsub.f32 %v4228_v32, %v4320_v30 }
 0x251   : > { %v3456_v56 = vpop.eup %3455  ;;  %2143 = vperm.xlu0 %3315, %v3454_v31   ;;  %3481 = vpow2.f32 %v2007_v14  ;;  %v2005_v20 = vmul.f32 1.442695, %v1985_v40  ;;  %v1862_v60 = vmax.f32 %v4260_v50, %v4328_v44  ;;  %v2053_v59 = vmul.f32 1.442695, %v2033_v41 }
 0x252   : > { %v3458_v57 = vpop.eup %3457  ;;  %v4334_v8 = vadd.f32 %v3452_v24, %v2094_v11  ;;  %v2077_v47 = vadd.f32 %v3456_v56, %v3454_v31  ;;  %2356 = vperm.xlu1 %3316, %v3450_v43   ;;  %3483 = vpow2.f32 %v1909_v58  ;;  %v1988_v9 = vsub.f32 %v4256_v48, %v4320_v30 }
 0x253   : > { %v3460_v5 = vpop.eup %3459  ;;  %3485 = vpow2.f32 %v2055_v28  ;;  %v1846_v42 = vmax.f32 %v4202_v17, %v4232_v34  ;;  %v1915_v32 = vmul.f32 1.442695, %v1892_v6  ;;  %v2036_v63 = vsub.f32 %v4306_v7, %v4320_v30 }
 0x254   : > { %v3462_v45 = vpop.eup %3461  ;;  %v2093_v15 = vadd.f32 %v3458_v57, %v2077_v47  ;;  %3487 = vpow2.f32 %v1957_v1  ;;  %v1963_v10 = vmul.f32 1.442695, %v1940_v29  ;;  %v1891_v48 = vsub.f32 %v4200_v16, %v4332_v12 }
 0x255   : > { %v3464_v26 = vpop.eup %3463  ;;  %2239 = vperm.xlu0 %3315, %v3456_v56   ;;  %v1845_v13 = vmax.f32 %v4204_v18, %v4234_v35  ;;  %3489 = vpow2.f32 %v2005_v20  ;;  %v1939_v7 = vsub.f32 %v4230_v33, %v4332_v12  ;;  %v1878_v30 = vmax.f32 %v1846_v42, %v1862_v60 }
 0x256   : > { %v3466_v2 = vpop.eup %3465  ;;  %v4348_v3 = vadd.f32 %v3460_v5, %v2093_v15  ;;  %v2080_v4 = vadd.f32 %v3464_v26, %v3462_v45  ;;  %2468 = vperm.xlu1 %3316, %v3452_v24   ;;  %3491 = vpow2.f32 %v2053_v59  ;;  %v2011_v61 = vmul.f32 1.442695, %v1988_v9 }
 0x257   : > { %v4352_v27 = vpop.eup %3467  ;;  %v1861_v14 = vmax.f32 %v4262_v51, %v4346_v0  ;;  %3493 = vpow2.f32 %v1915_v32  ;;  %v2059_v24 = vmul.f32 1.442695, %v2036_v63  ;;  %v1987_v25 = vsub.f32 %v4258_v49, %v4332_v12 }
 0x258   : > { %v4358_v46 = vpop.eup %3469  ;;  %v2096_v43 = vadd.f32 %v3466_v2, %v2080_v4  ;;  %v2035_v58 = vsub.f32 %v4313_v62, %v4332_v12  ;;  %3495 = vpow2.f32 %v1963_v10  ;;  %v1913_v11 = vmul.f32 1.442695, %v1891_v48 }
 0x259   : > { %v3472_v16 = vpop.eup %3471  ;;  %2351 = vperm.xlu0 %3315, %v3458_v57   ;;  %v1961_v41 = vmul.f32 1.442695, %v1939_v7  ;;  %v1894_v56 = vsub.f32 %v4202_v17, %v1878_v30  ;;  %3497 = vpow2.f32 %v2011_v61  ;;  %v1877_v6 = vmax.f32 %v1845_v13, %v1861_v14 }
 0x25a   : > { %v3474_v33 = vpop.eup %3473  ;;  %v4367_v40 = vadd.f32 %v4352_v27, %v2096_v43  ;;  %v2079_v31 = vadd.f32 %v3472_v16, %v4358_v46  ;;  %2158 = vperm.xlu1 %3316, %v3462_v45   ;;  %3499 = vpow2.f32 %v2059_v24  ;;  %v2009_v12 = vmul.f32 1.442695, %v1987_v25 }
 0x25b   : > { %v3476_v28 = vpop.eup %3475  ;;  %v1942_v57 = vsub.f32 %v4232_v34, %v1878_v30  ;;  %3501 = vpow2.f32 %v1913_v11  ;;  %v2057_v20 = vmul.f32 1.442695, %v2035_v58  ;;  %v1919_v60 = vmul.f32 1.442695, %v1894_v56 }
 0x25c   : > { %v4371_v1 = vpop.eup %3477  ;;  %v2095_v49 = vadd.f32 %v3474_v33, %v2079_v31  ;;  %3503 = vpow2.f32 %v1961_v41  ;;  %v1990_v45 = vsub.f32 %v4260_v50, %v1878_v30  ;;  %v1893_v34 = vsub.f32 %v4204_v18, %v1877_v6 }
 0x25d   : > { %v4373_v62 = vpop.eup %3479  ;;  %2463 = vperm.xlu0 %3315, %v3460_v5   ;;  %3505 = vpow2.f32 %v2009_v12  ;;  %v1967_v9 = vmul.f32 1.442695, %v1942_v57  ;;  %v2038_v42 = vsub.f32 %v4328_v44, %v1878_v30  ;;  %v1941_v63 = vsub.f32 %v4234_v35, %v1877_v6 }
 0x25e   : > { %v4376_v47 = vadd.f32 %v3476_v28, %v2095_v49  ;;  %v2082_v29 = vadd.f32 %v4373_v62, %v4371_v1  ;;  %2254 = vperm.xlu1 %3316, %v3464_v26   ;;  %v4380_v17 = vpop.eup %3481  ;;  %3507 = vpow2.f32 %v2057_v20  ;;  %v2015_v4 = vmul.f32 1.442695, %v1990_v45 }
 0x25f   : > { %v3484_v15 = vpop.eup %3483  ;;  %3509 = vpow2.f32 %v1919_v60  ;;  %v1917_v18 = vmul.f32 1.442695, %v1893_v34  ;;  %v1989_v48 = vsub.f32 %v4262_v51, %v1877_v6  ;;  %v2063_v44 = vmul.f32 1.442695, %v2038_v42 }
 0x260   : > { %v2098_v59 = vadd.f32 %v4380_v17, %v2082_v29  ;;  %v4385_v5 = vpop.eup %3485  ;;  %3511 = vpow2.f32 %v1967_v9  ;;  %v1965_v43 = vmul.f32 1.442695, %v1941_v63  ;;  %v2037_v61 = vsub.f32 %v4346_v0, %v1877_v6 }
 0x261   : > { %2249 = vperm.xlu0 %3315, %v3472_v16   ;;  %v3488_v32 = vpop.eup %3487  ;;  %3513 = vpow2.f32 %v2015_v4  ;;  %v2013_v16 = vmul.f32 1.442695, %v1989_v48  ;;  %v1847_v63 = vmax.f32 %v4208_v21, %v4238_v37 }
 0x262   : > { %v4389_v26 = vadd.f32 %v4385_v5, %v2098_v59  ;;  %2366 = vperm.xlu1 %3316, %v3466_v2   ;;  %v2081_v50 = vadd.f32 %v3488_v32, %v3484_v15  ;;  %v3490_v10 = vpop.eup %3489  ;;  %3515 = vpow2.f32 %v1917_v18  ;;  %v2061_v58 = vmul.f32 1.442695, %v2037_v61 }
 0x263   : > { %v3492_v13 = vpop.eup %3491  ;;  %3517 = vpow2.f32 %v2063_v44 }
 0x264   : > { %v2097_v7 = vadd.f32 %v3490_v10, %v2081_v50  ;;  %v3494_v30 = vpop.eup %3493  ;;  %3519 = vpow2.f32 %v1965_v43  ;;  %v1848_v50 = vmax.f32 %v4206_v19, %v4236_v36 }
 0x265   : > { %2361 = vperm.xlu0 %3315, %v3474_v33   ;;  %v3496_v35 = vpop.eup %3495  ;;  %3521 = vpow2.f32 %v2013_v16 }
 0x266   : > { %2478 = vperm.xlu1 %3316, %v4352_v27   ;;  %v4395_v2 = vadd.f32 %v3492_v13, %v2097_v7  ;;  %v2084_v14 = vadd.f32 %v3496_v35, %v3494_v30  ;;  %v3498_v24 = vpop.eup %3497  ;;  %3523 = vpow2.f32 %v2061_v58 }
 0x267   : > { %v3500_v51 = vpop.eup %3499 }
 0x268   : > { %v2100_v25 = vadd.f32 %v3498_v24, %v2084_v14  ;;  %v3502_v33 = vpop.eup %3501 }
 0x269   : > { %2473 = vperm.xlu0 %3315, %v3476_v28   ;;  %v3504_v0 = vpop.eup %3503 }
 0x26a   : > { %2153 = vperm.xlu1 %3316, %v4358_v46   ;;  %v4398_v31 = vadd.f32 %v3500_v51, %v2100_v25  ;;  %v2083_v27 = vadd.f32 %v3504_v0, %v3502_v33  ;;  %v3506_v11 = vpop.eup %3505 }
 0x26b   : > { %v3508_v41 = vpop.eup %3507 }
 0x26c   : > { %v2099_v56 = vadd.f32 %v3506_v11, %v2083_v27  ;;  %v3510_v28 = vpop.eup %3509 }
 0x26d   : > { %2163 = vperm.xlu0 %3315, %v3484_v15   ;;  %v3512_v6 = vpop.eup %3511  ;;  %v3283_v15 = vpop.f32.mrf.mxu1 }
 0x26e   : > { %2168 = vperm.xlu1 %3316, %v4371_v1   ;;  %v4401_v49 = vadd.f32 %v3508_v41, %v2099_v56  ;;  %v2086_v46 = vadd.f32 %v3512_v6, %v3510_v28  ;;  %v3514_v12 = vpop.eup %3513 }
 0x26f   : > { %v3516_v57 = vpop.eup %3515  ;;  %v1808_v42 = vpop.f32.mrf.mxu1 }
 0x270   : > { %v2102_v29 = vadd.f32 %v3514_v12, %v2086_v46  ;;  %v4404_v20 = vpop.eup %3517 }
 0x271   : > { %2259 = vperm.xlu0 %3315, %v3488_v32   ;;  %v3520_v60 = vpop.eup %3519  ;;  %v1863_v32 = vmax.f32 %v4266_v53, %v1808_v42 }
 0x272   : > { %2264 = vperm.xlu1 %3316, %v4373_v62   ;;  %v4408_v1 = vadd.f32 %v4404_v20, %v2102_v29  ;;  %v2085_v45 = vadd.f32 %v3520_v60, %v3516_v57  ;;  %v3522_v59 = vpop.eup %3521 }
 0x273   : > { %v3524_v62 = vpop.eup %3523  ;;  %v1879_v4 = vmax.f32 %v1847_v63, %v1863_v32  ;;  %v4728_v63 = vld [vmem:[#allocation6_spill] sm:$0xff] }
 0x274   : > { %v2101_v34 = vadd.f32 %v3522_v59, %v2085_v45 }
 0x275   : > { %2371 = vperm.xlu0 %3315, %v3490_v10   ;;  %v1895_v10 = vsub.f32 %v4208_v21, %v1879_v4  ;;  %v1991_v61 = vsub.f32 %v4266_v53, %v1879_v4  ;;  %v2039_v14 = vsub.f32 %v1808_v42, %v1879_v4  ;;  %v4727_v42 = vld [vmem:[#allocation7_spill] sm:$0xff] }
 0x276   : > { %2376 = vperm.xlu1 %3316, %v4380_v17   ;;  %v4411_v9 = vadd.f32 %v3524_v62, %v2101_v34  ;;  %v1864_v17 = vmax.f32 %v4264_v52, %v3283_v15 }
 0x277   : > { %v1921_v48 = vmul.f32 1.442695, %v1895_v10  ;;  %v2065_v25 = vmul.f32 1.442695, %v2039_v14  ;;  %v4731_v10 = vld [vmem:[#allocation3_spill] sm:$0xff] }
 0x279   : > { %2483 = vperm.xlu0 %3315, %v3492_v13   ;;  %v1943_v13 = vsub.f32 %v4238_v37, %v1879_v4  ;;  %3525 = vpow2.f32 %v1921_v48  ;;  %v2017_v37 = vmul.f32 1.442695, %v1991_v61 }
 0x27a   : > { %2488 = vperm.xlu1 %3316, %v4385_v5   ;;  %v1880_v5 = vmax.f32 %v1848_v50, %v1864_v17  ;;  %v4729_v50 = vld [vmem:[#allocation4_spill] sm:$0xff] }
 0x27b   : > { %v1969_v43 = vmul.f32 1.442695, %v1943_v13  ;;  %v1851_v4 = vmax.f32 %v4729_v50, %v4728_v63 }
 0x27c   : > { %v1896_v18 = vsub.f32 %v4206_v19, %v1880_v5  ;;  %v1944_v44 = vsub.f32 %v4236_v36, %v1880_v5  ;;  %v1992_v19 = vsub.f32 %v4264_v52, %v1880_v5  ;;  %v1850_v52 = vmax.f32 %v4210_v22, %v4240_v38 }
 0x27d   : > { %2173 = vperm.xlu0 %3315, %v3502_v33  }
 0x27e   : > { %2178 = vperm.xlu1 %3316, %v3494_v30   ;;  %v1923_v7 = vmul.f32 1.442695, %v1896_v18  ;;  %v4423_v30 = vpop.f32.mrf.mxu1  ;;  %v1971_v21 = vmul.f32 1.442695, %v1944_v44  ;;  %v2019_v16 = vmul.f32 1.442695, %v1992_v19 }
 0x27f   : > { %v1866_v53 = vmax.f32 %v4268_v54, %v4423_v30 }
 0x280   : > { %3527 = vpow2.f32 %v1923_v7 }
 0x281   : > { %2269 = vperm.xlu0 %3315, %v3504_v0   ;;  %3529 = vpow2.f32 %v1969_v43  ;;  %v1882_v0 = vmax.f32 %v1850_v52, %v1866_v53 }
 0x282   : > { %2274 = vperm.xlu1 %3316, %v3496_v35   ;;  %v4427_v35 = vpop.f32.mrf.mxu1  ;;  %3531 = vpow2.f32 %v1971_v21 }
 0x283   : > { %v1865_v36 = vmax.f32 %v4270_v55, %v4427_v35  ;;  %3533 = vpow2.f32 %v2017_v37 }
 0x284   : > { %3535 = vpow2.f32 %v2019_v16 }
 0x285   : > { %2381 = vperm.xlu0 %3315, %v3506_v11   ;;  %3537 = vpow2.f32 %v2065_v25 }
 0x286   : > { %2386 = vperm.xlu1 %3316, %v3498_v24   ;;  %v2040_v24 = vsub.f32 %v3283_v15, %v1880_v5  ;;  %v4439_v11 = vpop.eup %3525  ;;  %v4730_v5 = vld [vmem:[#allocation5_spill] sm:$0xff] }
 0x287   : > { %v1852_v18 = vmax.f32 %v4731_v10, %v4730_v5 }
 0x288   : > { %v2067_v33 = vmul.f32 1.442695, %v2040_v24 }
 0x289   : > { %2493 = vperm.xlu0 %3315, %v3508_v41   ;;  %v1898_v41 = vsub.f32 %v4210_v22, %v1882_v0 }
 0x28a   : > { %2498 = vperm.xlu1 %3316, %v3500_v51   ;;  %v1849_v51 = vmax.f32 %v4212_v23, %v4242_v39  ;;  %3539 = vpow2.f32 %v2067_v33 }
 0x28b   : > { %3541 = vrcp.f32 %v4348_v3 }
 0x28c   : > { %v1881_v58 = vmax.f32 %v1849_v51, %v1865_v36  ;;  %3543 = vrcp.f32 %v4334_v8  ;;  %v1994_v8 = vsub.f32 %v4268_v54, %v1882_v0  ;;  %v2042_v54 = vsub.f32 %v4423_v30, %v1882_v0 }
 0x28d   : > { %2183 = vperm.xlu0 %3315, %v3516_v57   ;;  %v4442_v56 = vpop.eup %3527  ;;  %v4452_v57 = vpop.f32.mrf.mxu1 }
 0x28e   : > { %2188 = vperm.xlu1 %3316, %v3510_v28   ;;  %v1897_v27 = vsub.f32 %v4212_v23, %v1881_v58  ;;  %v4448_v46 = vpop.eup %3529  ;;  %v1927_v23 = vmul.f32 1.442695, %v1898_v41  ;;  %v1993_v29 = vsub.f32 %v4270_v55, %v1881_v58  ;;  %v2041_v15 = vsub.f32 %v4427_v35, %v1881_v58  ;;  %v4726_v55 = vld [vmem:[#allocation8_spill] sm:$0xff] }
 0x28f   : > { %v4454_v22 = vpop.eup %3531  ;;  %v1868_v32 = vmax.f32 %v4727_v42, %v4452_v57  ;;  %v2071_v44 = vmul.f32 1.442695, %v2042_v54 }
 0x290   : > { %v1925_v28 = vmul.f32 1.442695, %v1897_v27  ;;  %v2021_v45 = vmul.f32 1.442695, %v1993_v29  ;;  %v2069_v48 = vmul.f32 1.442695, %v2041_v15 }
 0x291   : > { %2279 = vperm.xlu0 %3315, %v3520_v60   ;;  %v4462_v60 = vpop.f32.mrf.mxu1  ;;  %v1884_v30 = vmax.f32 %v1852_v18, %v1868_v32 }
 0x292   : > { %2284 = vperm.xlu1 %3316, %v3512_v6   ;;  %v1945_v6 = vsub.f32 %v4242_v39, %v1881_v58  ;;  %3545 = vpow2.f32 %v1925_v28  ;;  %v4459_v39 = vpop.eup %3533 }
 0x293   : > { %3547 = vpow2.f32 %v1927_v23  ;;  %v1900_v19 = vsub.f32 %v4731_v10, %v1884_v30  ;;  %v1948_v24 = vsub.f32 %v4730_v5, %v1884_v30  ;;  %v1996_v58 = vsub.f32 %v4727_v42, %v1884_v30  ;;  %v3606_v42 = vld [vmem:[%s3948_s27 + $0x88] sm:$0xff] }
 0x294   : > { %v1973_v3 = vmul.f32 1.442695, %v1945_v6  ;;  %v2044_v28 = vsub.f32 %v4452_v57, %v1884_v30  ;;  %v3608_v30 = vld [vmem:[%s3914_s23] sm:$0xff] }
 0x295   : > { %2391 = vperm.xlu0 %3315, %v3522_v59   ;;  %v1867_v59 = vmax.f32 %v4726_v55, %v4462_v60  ;;  %v1931_v16 = vmul.f32 1.442695, %v1900_v19  ;;  %v2027_v41 = vmul.f32 1.442695, %v1996_v58 }
 0x296   : > { %2396 = vperm.xlu1 %3316, %v3514_v12   ;;  %v1946_v12 = vsub.f32 %v4240_v38, %v1882_v0  ;;  %v4464_v38 = vpop.eup %3535  ;;  %3549 = vpow2.f32 %v1973_v3  ;;  %v2075_v3 = vmul.f32 1.442695, %v2044_v28  ;;  %v3612_v28 = vld [vmem:[%s3948_s27 + $0x180] sm:$0xff] }
 0x297   : > { %v4471_v34 = vpop.eup %3537  ;;  %v1883_v13 = vmax.f32 %v1851_v4, %v1867_v59 }
 0x298   : > { %v4476_v17 = vpop.eup %3539 }
 0x299   : > { %2503 = vperm.xlu0 %3315, %v3524_v62   ;;  %v2023_v62 = vmul.f32 1.442695, %v1994_v8  ;;  %v3542_v7 = vpop.eup %3541  ;;  %v1899_v61 = vsub.f32 %v4729_v50, %v1883_v13  ;;  %v1947_v14 = vsub.f32 %v4728_v63, %v1883_v13  ;;  %v1995_v52 = vsub.f32 %v4726_v55, %v1883_v13 }
 0x29a   : > { %2508 = vperm.xlu1 %3316, %v4404_v20   ;;  %v1975_v20 = vmul.f32 1.442695, %v1946_v12  ;;  %v3544_v43 = vpop.eup %3543  ;;  %v2043_v0 = vsub.f32 %v4462_v60, %v1883_v13  ;;  %v2087_v8 = vadd.f32 %v4448_v46, %v4439_v11 }
 0x29b   : > { %v1929_v37 = vmul.f32 1.442695, %v1899_v61  ;;  %v1977_v51 = vmul.f32 1.442695, %v1947_v14 }
 0x29c   : > { %3551 = vpow2.f32 %v1975_v20  ;;  %v2073_v23 = vmul.f32 1.442695, %v2043_v0 }
 0x29d   : > { %2193 = vperm.xlu0 %3315, %v4439_v11   ;;  %3553 = vpow2.f32 %v2021_v45  ;;  %v2088_v45 = vadd.f32 %v4454_v22, %v4442_v56 }
 0x29e   : > { %2198 = vperm.xlu1 %3316, %v4442_v56   ;;  %3555 = vpow2.f32 %v2023_v62  ;;  %v3605_v62 = vld [vmem:[%s3914_s23 + $0x8] sm:$0xff] }
 0x29f   : > { %3557 = vpow2.f32 %v2069_v48  ;;  %v4485_v21 = vpop.eup %3545  ;;  %v2104_v56 = vadd.f32 %v4464_v38, %v2088_v45 }
 0x2a0   : > { %3559 = vpow2.f32 %v2071_v44  ;;  %v4488_v35 = vpop.eup %3547 }
 0x2a1   : > { %2289 = vperm.xlu0 %3315, %v4448_v46   ;;  %3561 = vrcp.f32 %v4376_v47  ;;  %v1979_v47 = vmul.f32 1.442695, %v1948_v24  ;;  %v2120_v18 = vadd.f32 %v4476_v17, %v2104_v56 }
 0x2a2   : > { %2294 = vperm.xlu1 %3316, %v4454_v22   ;;  %3563 = vrcp.f32 %v4367_v40  ;;  %v2025_v40 = vmul.f32 1.442695, %v1995_v52  ;;  %v3611_v52 = vld [vmem:[%s3948_s27 + $0x100] sm:$0xff] }
 0x2a3   : > { %v3550_v36 = vpop.eup %3549  ;;  %3565 = vpow2.f32 %v1929_v37 }
 0x2a4   : > { %3567 = vpow2.f32 %v1931_v16  ;;  %v2089_v11 = vadd.f32 %v3550_v36, %v4485_v21 }
 0x2a5   : > { %2401 = vperm.xlu0 %3315, %v4459_v39   ;;  %3569 = vpow2.f32 %v1977_v51 }
 0x2a6   : > { %2406 = vperm.xlu1 %3316, %v4464_v38   ;;  %3571 = vpow2.f32 %v1979_v47 }
 0x2a7   : > { %3573 = vpow2.f32 %v2025_v40 }
 0x2a8   : > { %3575 = vpow2.f32 %v2027_v41 }
 0x2a9   : > { %2513 = vperm.xlu0 %3315, %v4471_v34   ;;  %v3552_v53 = vpop.eup %3551  ;;  %3577 = vpow2.f32 %v2073_v23 }
 0x2aa   : > { %2518 = vperm.xlu1 %3316, %v4476_v17   ;;  %v4497_v25 = vpop.eup %3553  ;;  %3579 = vpow2.f32 %v2075_v3  ;;  %v2090_v46 = vadd.f32 %v3552_v53, %v4488_v35 }
 0x2ab   : > { %v4500_v33 = vpop.eup %3555  ;;  %3581 = vrcp.f32 %v4395_v2  ;;  %v2103_v2 = vadd.f32 %v4459_v39, %v2087_v8  ;;  %v2105_v39 = vadd.f32 %v4497_v25, %v2089_v11 }
 0x2ac   : > { %v4505_v27 = vpop.eup %3557  ;;  %3583 = vrcp.f32 %v4389_v26  ;;  %v2106_v48 = vadd.f32 %v4500_v33, %v2090_v46 }
 0x2ad   : > { %2575 = vperm.xlu0 %3315, %v3542_v7   ;;  %v4508_v6 = vpop.eup %3559  ;;  %3585 = vrcp.f32 %v4401_v49  ;;  %v3607_v49 = vld [vmem:[%s3948_s27 + $0x108] sm:$0xff] }
 0x2ae   : > { %2580 = vperm.xlu1 %3316, %v3544_v43   ;;  %v3562_v12 = vpop.eup %3561  ;;  %3587 = vrcp.f32 %v4398_v31  ;;  %v2119_v31 = vadd.f32 %v4471_v34, %v2103_v2  ;;  %v3610_v34 = vld [vmem:[%s3948_s27 + $0x188] sm:$0xff] }
 0x2af   : > { %v3564_v29 = vpop.eup %3563  ;;  %3589 = vrcp.f32 %v4408_v1 }
 0x2b0   : > { %v3566_v20 = vpop.eup %3565  ;;  %3591 = vrcp.f32 %v4411_v9 }
 0x2b1   : > { %2203 = vperm.xlu0 %3315, %v4485_v21   ;;  %v3568_v57 = vpop.eup %3567  ;;  %v3609_v21 = vld [vmem:[%s3948_s27 + $0x80] sm:$0xff]  ;;  %3593 = vrcp.f32 %v2119_v31  ;;  %v3618_v31 = vld [vmem:[%s3914_s23 + $0x10] sm:$0xff] }
 0x2b2   : > { %2208 = vperm.xlu1 %3316, %v4488_v35   ;;  %v3570_v60 = vpop.eup %3569  ;;  %v2121_v35 = vadd.f32 %v4505_v27, %v2105_v39  ;;  %3595 = vrcp.f32 %v2120_v18 }
 0x2b3   : > { %v3572_v55 = vpop.eup %3571  ;;  %v2091_v38 = vadd.f32 %v3570_v60, %v3566_v20 }
 0x2b4   : > { %v3574_v26 = vpop.eup %3573  ;;  %v2092_v13 = vadd.f32 %v3572_v55, %v3568_v57  ;;  %3597 = vrcp.f32 %v2121_v35  ;;  %v3622_v35 = vld [vmem:[%s3948_s27 + $0xa0] sm:$0xff] }
 0x2b5   : > { %2299 = vperm.xlu0 %3315, %v3550_v36   ;;  %v3576_v50 = vpop.eup %3575  ;;  %v2107_v17 = vadd.f32 %v3574_v26, %v2091_v38  ;;  %v2122_v36 = vadd.f32 %v4508_v6, %v2106_v48 }
 0x2b6   : > { %2304 = vperm.xlu1 %3316, %v3552_v53   ;;  %v3578_v10 = vpop.eup %3577  ;;  %v2108_v16 = vadd.f32 %v3576_v50, %v2092_v13 }
 0x2b7   : > { %v3580_v44 = vpop.eup %3579  ;;  %v2123_v58 = vadd.f32 %v3578_v10, %v2107_v17  ;;  %3599 = vrcp.f32 %v2122_v36  ;;  %v3624_v36 = vld [vmem:[%s3948_s27 + $0xa8] sm:$0xff] }
 0x2b8   : > { %v3582_v14 = vpop.eup %3581  ;;  %v2124_v0 = vadd.f32 %v3580_v44, %v2108_v16 }
 0x2b9   : > { %2411 = vperm.xlu0 %3315, %v4497_v25   ;;  %v3584_v51 = vpop.eup %3583  ;;  %3601 = vrcp.f32 %v2123_v58 }
 0x2ba   : > { %2416 = vperm.xlu1 %3316, %v4500_v33   ;;  %v3586_v40 = vpop.eup %3585  ;;  %3603 = vrcp.f32 %v2124_v0 }
 0x2bb   : > { %v3588_v41 = vpop.eup %3587 }
 0x2bd   : > { %2523 = vperm.xlu0 %3315, %v4505_v27  }
 0x2be   : > { %2528 = vperm.xlu1 %3316, %v4508_v6  }
 0x2c1   : > { %2585 = vperm.xlu0 %3315, %v3562_v12   ;;  %v3613_v12 = vld [vmem:[%s3914_s23 + $0x18] sm:$0xff] }
 0x2c2   : > { %2590 = vperm.xlu1 %3316, %v3564_v29   ;;  %v3614_v29 = vld [vmem:[%s3948_s27 + $0x98] sm:$0xff] }
 0x2c5   : > { %2213 = vperm.xlu0 %3315, %v3566_v20  }
 0x2c6   : > { %2218 = vperm.xlu1 %3316, %v3568_v57   ;;  %v3590_v57 = vpop.eup %3589 }
 0x2c8   : > { %v2149_v15 = vpop.permute.xlu0 %2148 }
 0x2c9   : > { %v2245_v59 = vpop.permute.xlu1 %2244  ;;  %v2222_v54 = vmul.f32 %v3605_v62, %v2149_v15  ;;  %2309 = vperm.xlu0 %3315, %v3570_v60   ;;  %v3592_v60 = vpop.eup %3591 }
 0x2ca   : > { %v2318_v32 = vmul.f32 %v3606_v42, %v2245_v59  ;;  %2314 = vperm.xlu1 %3316, %v3572_v55   ;;  %v3615_v59 = vld [vmem:[%s3948_s27 + $0x118] sm:$0xff] }
 0x2cc   : > { %v2334_v22 = vadd.f32 %v2318_v32, %v2222_v54  ;;  %v2144_v63 = vpop.permute.xlu0 %2143  ;;  %v3594_v54 = vpop.eup %3593 }
 0x2cd   : > { %v2357_v4 = vpop.permute.xlu1 %2356  ;;  %2421 = vperm.xlu0 %3315, %v3574_v26   ;;  %v2221_v43 = vmul.f32 %v3608_v30, %v2144_v63  ;;  %v3596_v2 = vpop.eup %3595  ;;  %v3616_v26 = vld [vmem:[%s3948_s27 + $0x198] sm:$0xff] }
 0x2ce   : > { %v2430_v5 = vmul.f32 %v3607_v49, %v2357_v4  ;;  %2426 = vperm.xlu1 %3316, %v3576_v50   ;;  %v3598_v46 = vpop.eup %3597  ;;  %v3617_v49 = vld [vmem:[%s3948_s27 + $0x90] sm:$0xff] }
 0x2cf   : > { %v3600_v50 = vpop.eup %3599 }
 0x2d0   : > { %v2446_v7 = vadd.f32 %v2430_v5, %v2334_v22  ;;  %v2240_v1 = vpop.permute.xlu0 %2239  ;;  %v3602_v38 = vpop.eup %3601 }
 0x2d1   : > { %v2469_v61 = vpop.permute.xlu1 %2468  ;;  %v2317_v9 = vmul.f32 %v3609_v21, %v2240_v1  ;;  %2533 = vperm.xlu0 %3315, %v3578_v10   ;;  %v3619_v10 = vld [vmem:[%s3948_s27 + $0x110] sm:$0xff] }
 0x2d2   : > { %v2542_v19 = vmul.f32 %v3610_v34, %v2469_v61  ;;  %2538 = vperm.xlu1 %3316, %v3580_v44   ;;  %v3620_v44 = vld [vmem:[%s3948_s27 + $0x190] sm:$0xff] }
 0x2d3   : > { %v2333_v37 = vadd.f32 %v2317_v9, %v2221_v43  ;;  %v3621_v9 = vld [vmem:[%s3914_s23 + $0x20] sm:$0xff] }
 0x2d4   : > { %v2352_v24 = vpop.permute.xlu0 %2351  ;;  %v4538_v53 = vadd.f32 %v2542_v19, %v2446_v7  ;;  %v3604_v7 = vpop.eup %3603 }
 0x2d5   : > { %v2429_v25 = vmul.f32 %v3611_v52, %v2352_v24  ;;  %v2159_v47 = vpop.permute.xlu1 %2158  ;;  %2595 = vperm.xlu0 %3315, %v3582_v14  }
 0x2d6   : > { %2600 = vperm.xlu1 %3316, %v3584_v51   ;;  %v2224_v3 = vmul.f32 %v3613_v12, %v2159_v47  ;;  %v3625_v47 = vld [vmem:[%s3948_s27 + $0x120] sm:$0xff]  ;;  %v3628_v12 = vld [vmem:[%s3948_s27 + $0x1a8] sm:$0xff] }
 0x2d7   : > { %v2445_v33 = vadd.f32 %v2429_v25, %v2333_v37  ;;  %v3623_v37 = vld [vmem:[%s3914_s23 + $0x28] sm:$0xff] }
 0x2d8   : > { %v2464_v27 = vpop.permute.xlu0 %2463 }
 0x2d9   : > { %v2541_v6 = vmul.f32 %v3612_v28, %v2464_v27  ;;  %v2255_v23 = vpop.permute.xlu1 %2254  ;;  %2605 = vperm.xlu0 %3315, %v3586_v40  }
 0x2da   : > { %v2320_v20 = vmul.f32 %v3614_v29, %v2255_v23  ;;  %2610 = vperm.xlu1 %3316, %v3588_v41  }
 0x2db   : > { %v4544_v8 = vadd.f32 %v2541_v6, %v2445_v33  ;;  %v3626_v33 = vld [vmem:[%s3948_s27 + $0x128] sm:$0xff]  ;;  %v3627_v6 = vld [vmem:[%s3948_s27 + $0x1a0] sm:$0xff] }
 0x2dc   : > { %v2336_v45 = vadd.f32 %v2320_v20, %v2224_v3  ;;  %v2250_v15 = vpop.permute.xlu0 %2249 }
 0x2dd   : > { %v2367_v55 = vpop.permute.xlu1 %2366  ;;  %2615 = vperm.xlu0 %3315, %v3592_v60   ;;  %v2319_v5 = vmul.f32 %v3617_v49, %v2250_v15  ;;  %v3629_v15 = vld [vmem:[%s3914_s23 + $0x30] sm:$0xff]  ;;  %v3634_v49 = vld [vmem:[%s3948_s27 + $0x138] sm:$0xff] }
 0x2de   : > { %v2432_v62 = vmul.f32 %v3615_v59, %v2367_v55  ;;  %2620 = vperm.xlu1 %3316, %v3590_v57  }
 0x2e0   : > { %v2448_v42 = vadd.f32 %v2432_v62, %v2336_v45  ;;  %v2362_v32 = vpop.permute.xlu0 %2361  ;;  %v3630_v62 = vld [vmem:[%s3948_s27 + $0xb0] sm:$0xff] }
 0x2e1   : > { %v2479_v11 = vpop.permute.xlu1 %2478  ;;  %2625 = vperm.xlu0 %3315, %v3594_v54   ;;  %v2431_v18 = vmul.f32 %v3619_v10, %v2362_v32 }
 0x2e2   : > { %v2544_v56 = vmul.f32 %v3616_v26, %v2479_v11  ;;  %2630 = vperm.xlu1 %3316, %v3596_v2   ;;  %v3632_v2 = vld [vmem:[%s3948_s27 + $0xb8] sm:$0xff] }
 0x2e4   : > { %v2474_v22 = vpop.permute.xlu0 %2473  ;;  %v4548_v63 = vadd.f32 %v2544_v56, %v2448_v42  ;;  %v3631_v42 = vld [vmem:[%s3914_s23 + $0x38] sm:$0xff] }
 0x2e5   : > { %v2154_v4 = vpop.permute.xlu1 %2153  ;;  %2635 = vperm.xlu0 %3315, %v3598_v46   ;;  %v2543_v30 = vmul.f32 %v3620_v44, %v2474_v22 }
 0x2e6   : > { %v2223_v39 = vmul.f32 %v3618_v31, %v2154_v4  ;;  %2640 = vperm.xlu1 %3316, %v3600_v50   ;;  %v3633_v50 = vld [vmem:[%s3948_s27 + $0x130] sm:$0xff] }
 0x2e8   : > { %v2335_v48 = vadd.f32 %v2319_v5, %v2223_v39  ;;  %v2164_v13 = vpop.permute.xlu0 %2163 }
 0x2e9   : > { %v2169_v1 = vpop.permute.xlu1 %2168  ;;  %2645 = vperm.xlu0 %3315, %v3602_v38   ;;  %v2225_v34 = vmul.f32 %v3621_v9, %v2164_v13  ;;  %v3636_v13 = vld [vmem:[%s3948_s27 + $0x1b8] sm:$0xff]  ;;  %v3637_v9 = vld [vmem:[%s3914_s23 + $0x40] sm:$0xff] }
 0x2ea   : > { %2650 = vperm.xlu1 %3316, %v3604_v7   ;;  %v2447_v43 = vadd.f32 %v2431_v18, %v2335_v48  ;;  %v2226_v14 = vmul.f32 %v3623_v37, %v2169_v1  ;;  %v3635_v18 = vld [vmem:[%s3948_s27 + $0x1b0] sm:$0xff]  ;;  %v3639_v37 = vld [vmem:[%s3914_s23 + $0x48] sm:$0xff] }
 0x2ec   : > { %v2260_v61 = vpop.permute.xlu0 %2259  ;;  %v4554_v21 = vadd.f32 %v2543_v30, %v2447_v43 }
 0x2ed   : > { %v2265_v19 = vpop.permute.xlu1 %2264  ;;  %v2321_v17 = vmul.f32 %v3622_v35, %v2260_v61  ;;  %v3638_v35 = vld [vmem:[%s3948_s27 + $0xc0] sm:$0xff] }
 0x2ee   : > { %v2322_v16 = vmul.f32 %v3624_v36, %v2265_v19  ;;  %v3640_v36 = vld [vmem:[%s3948_s27 + $0xc8] sm:$0xff] }
 0x2ef   : > { %v2337_v24 = vadd.f32 %v2321_v17, %v2225_v34 }
 0x2f0   : > { %v2338_v51 = vadd.f32 %v2322_v16, %v2226_v14  ;;  %v2372_v52 = vpop.permute.xlu0 %2371 }
 0x2f1   : > { %v2377_v25 = vpop.permute.xlu1 %2376  ;;  %v2433_v58 = vmul.f32 %v3625_v47, %v2372_v52  ;;  %v3641_v47 = vld [vmem:[%s3948_s27 + $0x140] sm:$0xff] }
 0x2f2   : > { %v2434_v40 = vmul.f32 %v3626_v33, %v2377_v25  ;;  %v3642_v33 = vld [vmem:[%s3948_s27 + $0x148] sm:$0xff] }
 0x2f3   : > { %v2449_v0 = vadd.f32 %v2433_v58, %v2337_v24 }
 0x2f4   : > { %v2450_v27 = vadd.f32 %v2434_v40, %v2338_v51  ;;  %v2484_v41 = vpop.permute.xlu0 %2483 }
 0x2f5   : > { %v2489_v28 = vpop.permute.xlu1 %2488  ;;  %v2545_v23 = vmul.f32 %v3627_v6, %v2484_v41  ;;  %v3643_v6 = vld [vmem:[%s3948_s27 + $0x1c0] sm:$0xff] }
 0x2f6   : > { %v2546_v3 = vmul.f32 %v3628_v12, %v2489_v28  ;;  %v3644_v12 = vld [vmem:[%s3948_s27 + $0x1c8] sm:$0xff] }
 0x2f7   : > { %v4564_v29 = vadd.f32 %v2545_v23, %v2449_v0 }
 0x2f8   : > { %v2174_v20 = vpop.permute.xlu0 %2173  ;;  %v4566_v57 = vadd.f32 %v2546_v3, %v2450_v27 }
 0x2f9   : > { %v2179_v60 = vpop.permute.xlu1 %2178  ;;  %v2227_v55 = vmul.f32 %v3629_v15, %v2174_v20 }
 0x2fa   : > { %v2228_v32 = vmul.f32 %v3631_v42, %v2179_v60 }
 0x2fc   : > { %v2270_v45 = vpop.permute.xlu0 %2269 }
 0x2fd   : > { %v2275_v59 = vpop.permute.xlu1 %2274  ;;  %v2323_v54 = vmul.f32 %v3630_v62, %v2270_v45 }
 0x2fe   : > { %v2324_v11 = vmul.f32 %v3632_v2, %v2275_v59 }
 0x2ff   : > { %v2339_v26 = vadd.f32 %v2323_v54, %v2227_v55 }
 0x300   : > { %v2340_v56 = vadd.f32 %v2324_v11, %v2228_v32  ;;  %v2382_v46 = vpop.permute.xlu0 %2381 }
 0x301   : > { %v2387_v22 = vpop.permute.xlu1 %2386  ;;  %v2435_v4 = vmul.f32 %v3633_v50, %v2382_v46 }
 0x302   : > { %v2436_v5 = vmul.f32 %v3634_v49, %v2387_v22 }
 0x303   : > { %v2451_v31 = vadd.f32 %v2435_v4, %v2339_v26 }
 0x304   : > { %v2452_v39 = vadd.f32 %v2436_v5, %v2340_v56  ;;  %v2494_v38 = vpop.permute.xlu0 %2493 }
 0x305   : > { %v2499_v10 = vpop.permute.xlu1 %2498  ;;  %v2547_v48 = vmul.f32 %v3635_v18, %v2494_v38 }
 0x306   : > { %v2548_v7 = vmul.f32 %v3636_v13, %v2499_v10 }
 0x307   : > { %v4576_v1 = vadd.f32 %v2547_v48, %v2451_v31 }
 0x308   : > { %v2184_v44 = vpop.permute.xlu0 %2183  ;;  %v4578_v30 = vadd.f32 %v2548_v7, %v2452_v39 }
 0x309   : > { %v2189_v43 = vpop.permute.xlu1 %2188  ;;  %v2229_v34 = vmul.f32 %v3637_v9, %v2184_v44 }
 0x30a   : > { %v2230_v14 = vmul.f32 %v3639_v37, %v2189_v43  ;;  %v3646_v37 = vld [vmem:[%s3948_s27 + $0xd8] sm:$0xff] }
 0x30c   : > { %v2280_v61 = vpop.permute.xlu0 %2279 }
 0x30d   : > { %v2285_v19 = vpop.permute.xlu1 %2284  ;;  %v2325_v17 = vmul.f32 %v3638_v35, %v2280_v61  ;;  %v3645_v35 = vld [vmem:[%s3948_s27 + $0xd0] sm:$0xff] }
 0x30e   : > { %v2326_v16 = vmul.f32 %v3640_v36, %v2285_v19 }
 0x30f   : > { %v2341_v24 = vadd.f32 %v2325_v17, %v2229_v34 }
 0x310   : > { %v2342_v51 = vadd.f32 %v2326_v16, %v2230_v14  ;;  %v2392_v52 = vpop.permute.xlu0 %2391  ;;  %v3647_v16 = vld [vmem:[%s3914_s23 + $0x50] sm:$0xff] }
 0x311   : > { %v2397_v25 = vpop.permute.xlu1 %2396  ;;  %v2437_v58 = vmul.f32 %v3641_v47, %v2392_v52 }
 0x312   : > { %v2438_v40 = vmul.f32 %v3642_v33, %v2397_v25  ;;  %v3649_v25 = vld [vmem:[%s3914_s23 + $0x58] sm:$0xff] }
 0x313   : > { %v2453_v0 = vadd.f32 %v2437_v58, %v2341_v24  ;;  %v3650_v58 = vld [vmem:[%s3948_s27 + $0x158] sm:$0xff] }
 0x314   : > { %v2454_v27 = vadd.f32 %v2438_v40, %v2342_v51  ;;  %v2504_v41 = vpop.permute.xlu0 %2503  ;;  %v3648_v51 = vld [vmem:[%s3948_s27 + $0x150] sm:$0xff] }
 0x315   : > { %v2509_v28 = vpop.permute.xlu1 %2508  ;;  %v2549_v23 = vmul.f32 %v3643_v6, %v2504_v41 }
 0x316   : > { %v2550_v3 = vmul.f32 %v3644_v12, %v2509_v28  ;;  %v3652_v28 = vld [vmem:[%s3948_s27 + $0xe0] sm:$0xff]  ;;  %v3653_v12 = vld [vmem:[%s3948_s27 + $0x1d8] sm:$0xff] }
 0x317   : > { %v4588_v20 = vadd.f32 %v2549_v23, %v2453_v0 }
 0x318   : > { %v2194_v60 = vpop.permute.xlu0 %2193  ;;  %v4590_v45 = vadd.f32 %v2550_v3, %v2454_v27  ;;  %v3651_v27 = vld [vmem:[%s3948_s27 + $0x1d0] sm:$0xff]  ;;  %v3654_v3 = vld [vmem:[%s3948_s27 + $0xe8] sm:$0xff] }
 0x319   : > { %v2199_v15 = vpop.permute.xlu1 %2198  ;;  %v2231_v24 = vmul.f32 %v3647_v16, %v2194_v60  ;;  %v3666_v16 = vld [vmem:[%s3948_s27 + $0x178] sm:$0xff] }
 0x31a   : > { %v2232_v47 = vmul.f32 %v3649_v25, %v2199_v15  ;;  %v3668_v25 = vld [vmem:[%s3948_s27 + $0x1f8] sm:$0xff] }
 0x31c   : > { %v2290_v55 = vpop.permute.xlu0 %2289 }
 0x31d   : > { %v2295_v59 = vpop.permute.xlu1 %2294  ;;  %v2327_v17 = vmul.f32 %v3645_v35, %v2290_v55  ;;  %v3655_v55 = vld [vmem:[%s3914_s23 + $0x60] sm:$0xff]  ;;  %v3664_v35 = vld [vmem:[%s3948_s27 + $0x170] sm:$0xff] }
 0x31e   : > { %v2328_v14 = vmul.f32 %v3646_v37, %v2295_v59 }
 0x31f   : > { %v2343_v0 = vadd.f32 %v2327_v17, %v2231_v24 }
 0x320   : > { %v2402_v62 = vpop.permute.xlu0 %2401  ;;  %v2344_v23 = vadd.f32 %v2328_v14, %v2232_v47 }
 0x321   : > { %v2407_v54 = vpop.permute.xlu1 %2406 }
 0x322   : > { %v2440_v33 = vmul.f32 %v3650_v58, %v2407_v54 }
 0x324   : > { %v2514_v42 = vpop.permute.xlu0 %2513 }
 0x325   : > { %v2519_v32 = vpop.permute.xlu1 %2518  ;;  %v2551_v41 = vmul.f32 %v3651_v27, %v2514_v42 }
 0x328   : > { %v2576_v2 = vpop.permute.xlu0 %2575 }
 0x329   : > { %v2581_v11 = vpop.permute.xlu1 %2580  ;;  %v2653_v26 = vmul.f32 %v2576_v2, %v4544_v8 }
 0x32a   : > { %v2654_v56 = vmul.f32 %v2581_v11, %v4538_v53  ;;  %v2456_v11 = vadd.f32 %v2440_v33, %v2344_v23 }
 0x32b   : > { %2669 = vst.msk [vmem:[%s4597_s10] sm:$0xff] %vm615_vm0, %v2653_v26 }
 0x32c   : > { %2670 = vst.msk [vmem:[%s4597_s10 + $0x8] sm:$0xff] %vm615_vm0, %v2654_v56  ;;  %v2204_v46 = vpop.permute.xlu0 %2203  ;;  %v3658_v56 = vld [vmem:[%s3948_s27 + $0x168] sm:$0xff] }
 0x32d   : > { %v4605_v22 = vpop.permute.xlu1 %2208  ;;  %v2233_v59 = vmul.f32 %v3655_v55, %v2204_v46  ;;  %v3659_v46 = vld [vmem:[%s3948_s27 + $0x1e0] sm:$0xff] }
 0x330   : > { %v2300_v50 = vpop.permute.xlu0 %2299 }
 0x331   : > { %v2305_v4 = vpop.permute.xlu1 %2304  ;;  %v2329_v6 = vmul.f32 %v3652_v28, %v2300_v50 }
 0x332   : > { %v2330_v60 = vmul.f32 %v3654_v3, %v2305_v4 }
 0x334   : > { %v2412_v49 = vpop.permute.xlu0 %2411 }
 0x335   : > { %v4607_v5 = vpop.permute.xlu1 %2416 }
 0x336   : > { %v2442_v50 = vmul.f32 %v3658_v56, %v4607_v5  ;;  %v3662_v5 = vld [vmem:[%s3948_s27 + $0xf8] sm:$0xff] }
 0x338   : > { %v4609_v31 = vpop.permute.xlu0 %2523 }
 0x339   : > { %v4611_v39 = vpop.permute.xlu1 %2528 }
 0x33c   : > { %v2586_v8 = vpop.permute.xlu0 %2585 }
 0x33d   : > { %v2591_v38 = vpop.permute.xlu1 %2590  ;;  %v2655_v53 = vmul.f32 %v2586_v8, %v4554_v21  ;;  %v2345_v8 = vadd.f32 %v2329_v6, %v2233_v59 }
 0x33e   : > { %v2656_v10 = vmul.f32 %v2591_v38, %v4548_v63  ;;  %v3660_v38 = vld [vmem:[%s3948_s27 + $0xf0] sm:$0xff] }
 0x33f   : > { %2671 = vst.msk [vmem:[%s4597_s10 + $0x10] sm:$0xff] %vm615_vm0, %v2655_v53 }
 0x340   : > { %2672 = vst.msk [vmem:[%s4597_s10 + $0x18] sm:$0xff] %vm615_vm0, %v2656_v10  ;;  %v4619_v18 = vpop.permute.xlu0 %2213 }
 0x341   : > { %v4621_v48 = vpop.permute.xlu1 %2218 }
 0x344   : > { %v2310_v13 = vpop.permute.xlu0 %2309 }
 0x345   : > { %v4623_v7 = vpop.permute.xlu1 %2314  ;;  %v2331_v53 = vmul.f32 %v3660_v38, %v2310_v13  ;;  %v3663_v13 = vld [vmem:[%s3914_s23 + $0x70] sm:$0xff] }
 0x348   : > { %v4625_v44 = vpop.permute.xlu0 %2421 }
 0x349   : > { %v4627_v21 = vpop.permute.xlu1 %2426  ;;  %v2443_v17 = vmul.f32 %v3664_v35, %v4625_v44 }
 0x34a   : > { %v2444_v24 = vmul.f32 %v3666_v16, %v4627_v21 }
 0x34c   : > { %v4629_v63 = vpop.permute.xlu0 %2533 }
 0x34d   : > { %v4631_v43 = vpop.permute.xlu1 %2538 }
 0x34e   : > { %v2556_v47 = vmul.f32 %v3668_v25, %v4631_v43 }
 0x350   : > { %v2596_v61 = vpop.permute.xlu0 %2595 }
 0x351   : > { %v2601_v9 = vpop.permute.xlu1 %2600  ;;  %v2657_v34 = vmul.f32 %v2596_v61, %v4564_v29  ;;  %v2439_v29 = vmul.f32 %v3648_v51, %v2402_v62  ;;  %v3656_v62 = vld [vmem:[%s3948_s27 + $0x160] sm:$0xff] }
 0x352   : > { %v2658_v19 = vmul.f32 %v2601_v9, %v4566_v57  ;;  %v2441_v54 = vmul.f32 %v3656_v62, %v2412_v49  ;;  %v2553_v49 = vmul.f32 %v3659_v46, %v4609_v31 }
 0x353   : > { %2673 = vst.msk [vmem:[%s4597_s10 + $0x20] sm:$0xff] %vm615_vm0, %v2657_v34 }
 0x354   : > { %2674 = vst.msk [vmem:[%s4597_s10 + $0x28] sm:$0xff] %vm615_vm0, %v2658_v19  ;;  %v2606_v36 = vpop.permute.xlu0 %2605  ;;  %v2457_v34 = vadd.f32 %v2441_v54, %v2345_v8  ;;  %v2235_v19 = vmul.f32 %v3663_v13, %v4619_v18 }
 0x355   : > { %v2611_v52 = vpop.permute.xlu1 %2610  ;;  %v2659_v57 = vmul.f32 %v2606_v36, %v4576_v1  ;;  %v2552_v1 = vmul.f32 %v3653_v12, %v2519_v32  ;;  %v3657_v32 = vld [vmem:[%s3914_s23 + $0x68] sm:$0xff]  ;;  %v3665_v36 = vld [vmem:[%s3914_s23 + $0x78] sm:$0xff] }
 0x356   : > { %v2660_v40 = vmul.f32 %v2611_v52, %v4578_v30  ;;  %v2455_v30 = vadd.f32 %v2439_v29, %v2343_v0  ;;  %v2234_v26 = vmul.f32 %v3657_v32, %v4605_v22  ;;  %v3661_v22 = vld [vmem:[%s3948_s27 + $0x1e8] sm:$0xff]  ;;  %v2347_v29 = vadd.f32 %v2331_v53, %v2235_v19  ;;  %v3667_v52 = vld [vmem:[%s3948_s27 + $0x1f0] sm:$0xff] }
 0x357   : > { %2675 = vst.msk [vmem:[%s4597_s10 + $0x30] sm:$0xff] %vm615_vm0, %v2659_v57  ;;  %v2554_v61 = vmul.f32 %v3661_v22, %v4611_v39  ;;  %v2568_v9 = vadd.f32 %v2552_v1, %v2456_v11  ;;  %v2555_v18 = vmul.f32 %v3667_v52, %v4629_v63  ;;  %v2569_v44 = vadd.f32 %v2553_v49, %v2457_v34 }
 0x358   : > { %2676 = vst.msk [vmem:[%s4597_s10 + $0x38] sm:$0xff] %vm615_vm0, %v2660_v40  ;;  %v2616_v15 = vpop.permute.xlu0 %2615  ;;  %v2346_v10 = vadd.f32 %v2330_v60, %v2234_v26  ;;  %v2459_v58 = vadd.f32 %v2443_v17, %v2347_v29 }
 0x359   : > { %v2621_v42 = vpop.permute.xlu1 %2620  ;;  %v2661_v2 = vmul.f32 %v2616_v15, %v4588_v20  ;;  %v2567_v20 = vadd.f32 %v2551_v41, %v2455_v30 }
 0x35a   : > { %v2662_v4 = vmul.f32 %v2621_v42, %v4590_v45  ;;  %v2332_v45 = vmul.f32 %v3662_v5, %v4623_v7  ;;  %v2458_v14 = vadd.f32 %v2442_v50, %v2346_v10  ;;  %v2236_v7 = vmul.f32 %v3665_v36, %v4621_v48 }
 0x35b   : > { %2677 = vst.msk [vmem:[%s4597_s10 + $0x40] sm:$0xff] %vm615_vm0, %v2661_v2  ;;  %v2571_v63 = vadd.f32 %v2555_v18, %v2459_v58 }
 0x35c   : > { %2678 = vst.msk [vmem:[%s4597_s10 + $0x48] sm:$0xff] %vm615_vm0, %v2662_v4  ;;  %v2626_v31 = vpop.permute.xlu0 %2625  ;;  %v2348_v57 = vadd.f32 %v2332_v45, %v2236_v7  ;;  %v2570_v48 = vadd.f32 %v2554_v61, %v2458_v14 }
 0x35d   : > { %v2631_v37 = vpop.permute.xlu1 %2630  ;;  %v2663_v39 = vmul.f32 %v2626_v31, %v2567_v20 }
 0x35e   : > { %v2664_v51 = vmul.f32 %v2631_v37, %v2568_v9  ;;  %v2460_v0 = vadd.f32 %v2444_v24, %v2348_v57 }
 0x35f   : > { %2679 = vst.msk [vmem:[%s4597_s10 + $0x50] sm:$0xff] %vm615_vm0, %v2663_v39 }
 0x360   : > { %2680 = vst.msk [vmem:[%s4597_s10 + $0x58] sm:$0xff] %vm615_vm0, %v2664_v51  ;;  %v2636_v21 = vpop.permute.xlu0 %2635  ;;  %v2572_v41 = vadd.f32 %v2556_v47, %v2460_v0 }
 0x361   : > { %v2641_v33 = vpop.permute.xlu1 %2640  ;;  %v2665_v40 = vmul.f32 %v2636_v21, %v2569_v44 }
 0x362   : > { %v2666_v27 = vmul.f32 %v2641_v33, %v2570_v48 }
 0x363   : > { %2681 = vst.msk [vmem:[%s4597_s10 + $0x60] sm:$0xff] %vm615_vm0, %v2665_v40 }
 0x364   : > { %2682 = vst.msk [vmem:[%s4597_s10 + $0x68] sm:$0xff] %vm615_vm0, %v2666_v27  ;;  %v2646_v28 = vpop.permute.xlu0 %2645 }
 0x365   : > { %v2651_v6 = vpop.permute.xlu1 %2650  ;;  %v2667_v43 = vmul.f32 %v2646_v28, %v2571_v63 }
 0x366   : > { %v2668_v23 = vmul.f32 %v2651_v6, %v2572_v41 }
 0x367   : > { %2683 = vst.msk [vmem:[%s4597_s10 + $0x70] sm:$0xff] %vm615_vm0, %v2667_v43 }
 0x368   : > { %2684 = vst.msk [vmem:[%s4597_s10 + $0x78] sm:$0xff] %vm615_vm0, %v2668_v23 }
 0x369 PF: > { %p12_p9 = scmp.ge.s32.totalorder %s3741_s22, 4   ;;  %s4732_s18 = smov %s3687_s19 }
 0x36a   : > { %s4733_s19 = smov %s3750_s25  ;;  %s4734_s20 = smov %s3741_s22 }
 0x36b   :  { %14 = sbr.rel (!%p12_p9) target bundleno = 2 (0x2), region = 119 }

</bundles_post_ra>
